<compile_context>
chip_gen: v6e
topology: v6e:2x2x1
jax: 0.10.0
libtpu: 0.0.40
codegen_flags: <defaults>
</compile_context>

<pallas_src>
import numpy as np
import jax
import jax.numpy as jnp
from jax.experimental import pallas as pl
from jax.experimental.pallas import tpu as pltpu

H0, W0 = 25, 12          # input spatial size
H1, W1 = 5, 4            # after the 5x3 maxpool
SLAB_W = 256             # lane width of the packed scale/bias/mask slab
MASK_ROW0 = 23           # first mask row inside the slab


def _tree_max(parts):
    while len(parts) > 1:
        nxt = [jnp.maximum(parts[i], parts[i + 1])
               for i in range(0, len(parts) - 1, 2)]
        if len(parts) % 2:
            nxt.append(parts[-1])
        parts = nxt
    return parts[0]


# ----------------------------------------------------------------------------
# The single fused kernel (whole batch in one grid step)
# ----------------------------------------------------------------------------
def _fused_kernel(cols_ref, slab_ref,
                  w_e1, w_e2, w_e3, w_e4, w_e5,
                  w_d0, w_d1, w_d2, w_d3,
                  w_u3, w_d4, w_tf, c_tl,
                  o_ref):
    f32 = jnp.float32
    Nb = o_ref.shape[0] // 20          # batch folded along sublanes
    M40 = 20 * Nb                      # rows of a batch-folded 5x4 plane
    M8 = 4 * Nb                        # rows of a batch-folded 1x4 plane

    def sv(row, width):                # one packed (1, width) scale/bias row
        return slab_ref[row:row + 1, 0:width]

    def wf(ref):                       # bf16 weights -> f32 (lossless; see prep)
        return ref[...].astype(f32)

    # Boundary masks (per plane-row, broadcast along lanes), stored in the slab.
    mL = slab_ref[MASK_ROW0:MASK_ROW0 + M40, 0:1]   # zero where w == 0
    mR = slab_ref[MASK_ROW0:MASK_ROW0 + M40, 1:2]   # zero where w == 3
    mT = slab_ref[MASK_ROW0:MASK_ROW0 + M40, 2:3]   # zero where h == 0
    mB = slab_ref[MASK_ROW0:MASK_ROW0 + M40, 3:4]   # zero where h == 4
    mL4 = slab_ref[MASK_ROW0:MASK_ROW0 + M8, 0:1]
    mR4 = slab_ref[MASK_ROW0:MASK_ROW0 + M8, 1:2]

    def rot(x, s):
        # y[i] = x[(i + s) % M]; wrapped-in rows are zeroed by masks at call sites.
        M = x.shape[0]
        s = s % M
        if s == 0:
            return x
        return jnp.concatenate([x[s:], x[:s]], axis=0)

    def im2col9(x):
        # 3x3-conv im2col on a batch-folded 5x4 plane: (M40, C) -> (M40, 9C),
        # tap-major (dd = dh*3 + dw), so the whole conv is ONE matmul.
        rowm = (mT, None, mB)
        colm = (mL, None, mR)
        parts = []
        for dh in range(3):
            for dw in range(3):
                p = rot(x, (dh - 1) * 4 + (dw - 1))
                m = rowm[dh]
                if colm[dw] is not None:
                    m = colm[dw] if m is None else m * colm[dw]
                parts.append(p if m is None else p * m)
        return jnp.concatenate(parts, axis=1)

    def im2col3(x):
        # 3x3 conv on a batch-folded 1x4 plane (only dh == 1 taps hit data).
        return jnp.concatenate([rot(x, -1) * mL4, x, rot(x, 1) * mR4], axis=1)

    def bn_relu(y, srow, brow, c):
        return jnp.maximum(y * sv(srow, c) + sv(brow, c), 0.0)

    # --- encoder_conv1 + BN + ReLU fused with the 5x3 maxpool: ONE matmul ----
    y = jnp.dot(cols_ref[...], wf(w_e1), preferred_element_type=f32)  # (15*M40,16)
    y = bn_relu(y, 0, 1, 16)
    e1p = _tree_max([y[t * M40:(t + 1) * M40] for t in range(15)])    # (M40, 16)

    # --- encoder_conv2 (ONE matmul) + 5x1 maxpool -----------------------------
    X1 = im2col9(e1p)                                                 # (M40, 144)
    y2 = bn_relu(jnp.dot(X1, wf(w_e2), preferred_element_type=f32), 2, 3, 32)

    def pool_h(base):                                                 # max over h
        return _tree_max([y2[base + 4 * h:base + 4 * h + 4] for h in range(5)])
    e2 = jnp.concatenate([pool_h(20 * n) for n in range(Nb)], axis=0)  # (M8, 32)

    # --- 1x4 encoder/decoder stack: one matmul per layer; skip-concats fused
    #     into K; encoder im2col blocks reused for the decoder halves ---------
    X2 = im2col3(e2)
    e3 = bn_relu(jnp.dot(X2, wf(w_e3), preferred_element_type=f32), 4, 5, 64)
    X3 = im2col3(e3)
    e4 = bn_relu(jnp.dot(X3, wf(w_e4), preferred_element_type=f32), 6, 7, 128)
    X4 = im2col3(e4)
    e5 = bn_relu(jnp.dot(X4, wf(w_e5), preferred_element_type=f32), 8, 9, 256)
    d0 = bn_relu(jnp.dot(im2col3(e5), wf(w_d0),
                         preferred_element_type=f32), 10, 11, 128)
    d1 = bn_relu(jnp.dot(jnp.concatenate([im2col3(d0), X4], axis=1),
                         wf(w_d1), preferred_element_type=f32), 12, 13, 64)
    d2 = bn_relu(jnp.dot(jnp.concatenate([im2col3(d1), X3], axis=1),
                         wf(w_d2), preferred_element_type=f32), 14, 15, 32)
    d3 = bn_relu(jnp.dot(jnp.concatenate([im2col3(d2), X2], axis=1),
                         wf(w_d3), preferred_element_type=f32), 16, 17, 16)

    # --- decoder_conv3 ConvTranspose (5,1): ONE (M8,16)@(16,80) matmul -------
    yu = jnp.dot(d3, wf(w_u3), preferred_element_type=f32)            # (M8, 80)
    d3u = jnp.concatenate([yu[n * 4:(n + 1) * 4, r * 16:(r + 1) * 16]
                           for n in range(Nb) for r in range(5)], axis=0)
    d3u = d3u + sv(18, 16)                                            # (M40, 16)

    # --- decoder_conv4 3x3 conv (skip with pooled encoder_out1): ONE matmul --
    Xd4 = jnp.concatenate([im2col9(d3u), X1], axis=1)                 # (M40, 288)
    d4 = bn_relu(jnp.dot(Xd4, wf(w_d4), preferred_element_type=f32), 19, 20, 16)

    # --- decoder_conv4 ConvTranspose (5,3) + decoder_conv5 composite tail ----
    # U[h*4+w, (r*3+c)*16+co] (240 real cols, padded to 256) = upsampled pixel.
    U = jnp.dot(d4, wf(w_tf), preferred_element_type=f32) + sv(21, 256)  # (M40,256)
    Xt = im2col9(U)                                                   # (M40, 2304)
    out = jnp.dot(Xt, wf(c_tl), preferred_element_type=f32) + sv(22, 15)
    # out[n*20 + h*4 + w, r*3 + c] == final pixel (5h+r, 3w+c) of sample n.
    o_ref[...] = out


# ----------------------------------------------------------------------------
# Parameter construction (synthetic, deterministic) + BN folding
# ----------------------------------------------------------------------------
def _bf16_round(w):
    # Round weights to bf16-representable values so the bf16 shipping cast
    # inside prepare_kernel_params is lossless (kernel stays exact vs reference).
    return jnp.asarray(w, jnp.bfloat16).astype(jnp.float32)


def _make_conv_bn(key, cin, cout, with_bn=True):
    k1, k2, k3, k4, k5, k6 = jax.random.split(key, 6)
    w = _bf16_round(jax.random.normal(k1, (3, 3, cin, cout), jnp.float32)
                    / np.sqrt(9.0 * cin))
    b = 0.05 * jax.random.normal(k2, (cout,), jnp.float32)
    if with_bn:
        gamma = 1.0 + 0.1 * jax.random.normal(k3, (cout,), jnp.float32)
        beta = 0.05 * jax.random.normal(k4, (cout,), jnp.float32)
        mean = 0.05 * jax.random.normal(k5, (cout,), jnp.float32)
        var = 0.5 + jax.random.uniform(k6, (cout,), jnp.float32)
        s = gamma / jnp.sqrt(var + 1e-5)
        return w, s, (b - mean) * s + beta
    return w, jnp.ones((cout,), jnp.float32), b


def _make_convT(key, cin, cout, kh, kw):
    k1, k2 = jax.random.split(key)
    w = _bf16_round(jax.random.normal(k1, (cin, cout, kh, kw), jnp.float32)
                    / np.sqrt(cin * kh * kw))
    b = 0.05 * jax.random.normal(k2, (cout,), jnp.float32)
    return w, b


def init_raw_params(key):
    ks = jax.random.split(key, 13)
    return {
        "enc1": _make_conv_bn(ks[0], 1, 16),
        "enc2": _make_conv_bn(ks[1], 16, 32),
        "enc3": _make_conv_bn(ks[2], 32, 64),
        "enc4": _make_conv_bn(ks[3], 64, 128),
        "enc5": _make_conv_bn(ks[4], 128, 256),
        "dec0": _make_conv_bn(ks[5], 256, 128),
        "dec1": _make_conv_bn(ks[6], 256, 64),
        "dec2": _make_conv_bn(ks[7], 128, 32),
        "dec3_conv": _make_conv_bn(ks[8], 64, 16),
        "dec3_up": _make_convT(ks[9], 16, 16, 5, 1),
        "dec4_conv": _make_conv_bn(ks[10], 32, 16),
        "dec4_up": _make_convT(ks[11], 16, 16, 5, 3),
        "dec5": _make_conv_bn(ks[12], 16, 1, with_bn=False),
    }


# ----------------------------------------------------------------------------
# Weight preprocessing: matmul-ready (K-fused) bf16 layouts + one f32 slab
# ----------------------------------------------------------------------------
def prepare_kernel_params(raw, batch):
    rows = []

    def add_row(vec):
        v = np.zeros((SLAB_W,), np.float32)
        vec = np.asarray(vec, np.float32).reshape(-1)
        v[:vec.shape[0]] = vec
        rows.append(v)

    def np_w(name):
        w, s, b = raw[name]
        return (np.asarray(w, np.float32), np.asarray(s, np.float32),
                np.asarray(b, np.float32))

    weights = []

    # encoder_conv1: (3,3,1,16) -> (9,16); im2col comes from the wrapper.
    w, s, b = np_w("enc1")
    weights.append(w.reshape(9, 16)); add_row(s); add_row(b)          # rows 0,1

    # encoder_conv2: (3,3,16,32) -> (144,32), tap-major.
    w, s, b = np_w("enc2")
    weights.append(w.reshape(9 * 16, 32)); add_row(s); add_row(b)     # rows 2,3

    # 1x4-plane layers: only dh==1 taps can hit data -> (3*Cin, Co), dw-major.
    for name in ("enc3", "enc4", "enc5", "dec0"):                     # rows 4..11
        w, s, b = np_w(name)
        weights.append(w[1].reshape(-1, w.shape[-1])); add_row(s); add_row(b)

    # Skip decoder layers: K = [3*C decoder half | 3*C encoder half].
    for name, ch in (("dec1", 128), ("dec2", 64), ("dec3_conv", 32)):  # rows 12..17
        w, s, b = np_w(name)
        w1 = w[1]
        wd = w1[:, :ch, :].reshape(3 * ch, -1)
        we = w1[:, ch:, :].reshape(3 * ch, -1)
        weights.append(np.concatenate([wd, we], axis=0)); add_row(s); add_row(b)

    # decoder_conv3 ConvTranspose (5,1): (ci,co,5,1) -> (16,80), col = r*16+co.
    wT, bT = raw["dec3_up"]
    wT = np.asarray(wT, np.float32)
    weights.append(np.transpose(wT[:, :, :, 0], (0, 2, 1)).reshape(16, 80))
    add_row(np.asarray(bT, np.float32))                               # row 18

    # decoder_conv4 3x3 conv: (3,3,32,16), skip split, tap-major.
    w, s, b = np_w("dec4_conv")
    w9 = w.reshape(9, 32, 16)
    weights.append(np.concatenate([w9[:, :16, :].reshape(144, 16),
                                   w9[:, 16:, :].reshape(144, 16)], axis=0))
    add_row(s); add_row(b)                                            # rows 19,20

    # decoder_conv4 ConvTranspose (5,3): (ci,co,5,3) -> (16,256), 240 padded->256.
    wT4, bT4 = raw["dec4_up"]
    wT4 = np.asarray(wT4, np.float32)
    wtf = np.zeros((16, 256), np.float32)
    wtf[:, :240] = np.transpose(wT4, (0, 2, 3, 1)).reshape(16, 240)
    weights.append(wtf)
    btf = np.zeros((256,), np.float32)
    btf[:240] = np.tile(np.asarray(bT4, np.float32), 15)
    add_row(btf)                                                      # row 21

    # decoder_conv5 folded onto the upsampled block layout: c_flat (9*256, 15).
    w5, s5, b5 = np_w("dec5")
    w5n = w5[:, :, :, 0] * s5[0]                                      # (3,3,16)
    C = np.zeros((9, 256, 15), np.float32)
    for r in range(5):
        for c in range(3):
            for dh in range(3):
                for dw in range(3):
                    rr, cc = r + dh - 1, c + dw - 1
                    Dh = -1 if rr < 0 else (1 if rr > 4 else 0)
                    Dw = -1 if cc < 0 else (1 if cc > 2 else 0)
                    rs, cs = rr - 5 * Dh, cc - 3 * Dw
                    dd = (Dh + 1) * 3 + (Dw + 1)
                    base = (rs * 3 + cs) * 16
                    C[dd, base:base + 16, r * 3 + c] += w5n[dh, dw, :]
    weights.append(C.reshape(9 * 256, 15))
    add_row(np.full((15,), float(b5[0]), np.float32))                 # row 22

    # Boundary masks for the batch-folded 5x4 plane (rows 23 .. 23+20*batch-1).
    idx = np.arange(20 * batch)
    wcol = idx % 4
    hrow = (idx % 20) // 4
    masks = np.zeros((20 * batch, SLAB_W), np.float32)
    masks[:, 0] = (wcol != 0)
    masks[:, 1] = (wcol != 3)
    masks[:, 2] = (hrow != 0)
    masks[:, 3] = (hrow != 4)

    slab = np.concatenate([np.stack(rows, axis=0), masks], axis=0)
    assert slab.shape == (MASK_ROW0 + 20 * batch, SLAB_W)

    return ((jnp.asarray(slab, jnp.float32),)
            + tuple(jnp.asarray(w, jnp.bfloat16) for w in weights))   # lossless


# ----------------------------------------------------------------------------
# Forward pass wrapper (one pallas_call, grid=(1,), whole batch in the block)
# ----------------------------------------------------------------------------
def dae_forward(x_nchw, kparams):
    N = x_nchw.shape[0]
    x2 = x_nchw[:, 0, :, :]                                  # (N, 25, 12)
    xp = jnp.pad(x2, ((0, 0), (1, 1), (1, 1)))
    pat = jnp.stack([xp[:, dh:dh + H0, dw:dw + W0]
                     for dh in range(3) for dw in range(3)], axis=-1)  # (N,25,12,9)
    # row = (pool-window offset t)*20N + n*20 + (ho*4 + wo)
    cols = (pat.reshape(N, 5, 5, 4, 3, 9)
               .transpose(2, 4, 0, 1, 3, 5)
               .reshape(15 * N * 20, 9))

    in_arrays = (cols,) + tuple(kparams)
    in_specs = [pl.BlockSpec(a.shape, lambda i: (0, 0)) for a in in_arrays]

    out = pl.pallas_call(
        _fused_kernel,
        out_shape=jax.ShapeDtypeStruct((N * 20, 15), jnp.float32),
        grid=(1,),
        in_specs=in_specs,
        out_specs=pl.BlockSpec((N * 20, 15), lambda i: (0, 0)),
        compiler_params=pltpu.CompilerParams(
            dimension_semantics=("arbitrary",)),
    )(*in_arrays)

    # blocked layout (n*20 + h*4 + w, r*3 + c) -> spatial (25, 12); NCHW output.
    y = (out.reshape(N, 5, 4, 5, 3)
            .transpose(0, 1, 3, 2, 4)
            .reshape(N, H0, W0))
    return y[:, None, :, :]


# ----------------------------------------------------------------------------
# Pure-JAX reference (same folded parameters) for a correctness check
# ----------------------------------------------------------------------------
def ref_forward(raw, x_nhwc):
    P = jax.lax.Precision.HIGHEST

    def cbr(x, name, relu=True):
        w, s, b = raw[name]
        y = jax.lax.conv_general_dilated(
            x, w, (1, 1), ((1, 1), (1, 1)),
            dimension_numbers=("NHWC", "HWIO", "NHWC"), precision=P)
        y = y * s + b
        return jnp.maximum(y, 0.0) if relu else y

    def pool(x, ph, pw):
        n, h, w, c = x.shape
        return x.reshape(n, h // ph, ph, w // pw, pw, c).max(axis=(2, 4))

    def convT(x, name):
        w, b = raw[name]
        n, h, ww, _ = x.shape
        _, co, kh, kw = w.shape
        y = jnp.einsum("nhwc,coij->nhiwjo", x, w, precision=P)
        return y.reshape(n, h * kh, ww * kw, co) + b

    e1 = pool(cbr(x_nhwc, "enc1"), 5, 3)
    e2 = pool(cbr(e1, "enc2"), 5, 1)
    e3 = cbr(e2, "enc3")
    e4 = cbr(e3, "enc4")
    e5 = cbr(e4, "enc5")
    d = cbr(e5, "dec0")
    d = cbr(jnp.concatenate([d, e4], -1), "dec1")
    d = cbr(jnp.concatenate([d, e3], -1), "dec2")
    d = cbr(jnp.concatenate([d, e2], -1), "dec3_conv")
    d = convT(d, "dec3_up")
    d = cbr(jnp.concatenate([d, e1], -1), "dec4_conv")
    d = convT(d, "dec4_up")
    d = cbr(d, "dec5", relu=False)
    return d


if __name__ == "__main__":
    key = jax.random.PRNGKey(0)
    pkey, xkey = jax.random.split(key)
    raw = init_raw_params(pkey)

    N = 2
    kparams = prepare_kernel_params(raw, batch=N)

    # Input consistent with the module: NCHW, H divisible by 25, W by 3.
    x = jax.random.normal(xkey, (N, 1, 25, 12), jnp.float32)

    fwd = jax.jit(dae_forward)
    out = jax.block_until_ready(fwd(x, kparams))
    assert out.shape == (N, 1, 25, 12), out.shape
    assert bool(jnp.all(jnp.isfinite(out)))

    ref = jnp.transpose(ref_forward(raw, jnp.transpose(x, (0, 2, 3, 1))),
                        (0, 3, 1, 2))
    err = float(jnp.max(jnp.abs(out - ref)))
    assert err < 2e-2, f"mismatch vs reference: max abs err {err}"
    print("KERNEL_OK")
</pallas_src>

<mosaic_0001>
module attributes {stable_mosaic.version = 11 : i64} {
  func.func @_fused_kernel(%arg0: i32, %arg1: memref<600x9xf32, #tpu.memory_space<vmem>>, %arg2: memref<63x256xf32, #tpu.memory_space<vmem>>, %arg3: memref<9x16xbf16, #tpu.memory_space<vmem>>, %arg4: memref<144x32xbf16, #tpu.memory_space<vmem>>, %arg5: memref<96x64xbf16, #tpu.memory_space<vmem>>, %arg6: memref<192x128xbf16, #tpu.memory_space<vmem>>, %arg7: memref<384x256xbf16, #tpu.memory_space<vmem>>, %arg8: memref<768x128xbf16, #tpu.memory_space<vmem>>, %arg9: memref<768x64xbf16, #tpu.memory_space<vmem>>, %arg10: memref<384x32xbf16, #tpu.memory_space<vmem>>, %arg11: memref<192x16xbf16, #tpu.memory_space<vmem>>, %arg12: memref<16x80xbf16, #tpu.memory_space<vmem>>, %arg13: memref<288x16xbf16, #tpu.memory_space<vmem>>, %arg14: memref<16x256xbf16, #tpu.memory_space<vmem>>, %arg15: memref<2304x15xbf16, #tpu.memory_space<vmem>>, %arg16: memref<40x15xf32, #tpu.memory_space<vmem>>) attributes {dimension_semantics = [#tpu.dimension_semantics<arbitrary>], iteration_bounds = array<i64: 1>, scalar_prefetch = 0 : i64, scratch_operands = 0 : i64, tpu.core_type = #tpu.core_type<tc>, window_params = [{pipeline_mode = #tpu.pipeline_mode<synchronous>, transform_indices = @transform_0, window_bounds = array<i64: 600, 9>}, {pipeline_mode = #tpu.pipeline_mode<synchronous>, transform_indices = @transform_1, window_bounds = array<i64: 63, 256>}, {pipeline_mode = #tpu.pipeline_mode<synchronous>, transform_indices = @transform_2, window_bounds = array<i64: 9, 16>}, {pipeline_mode = #tpu.pipeline_mode<synchronous>, transform_indices = @transform_3, window_bounds = array<i64: 144, 32>}, {pipeline_mode = #tpu.pipeline_mode<synchronous>, transform_indices = @transform_4, window_bounds = array<i64: 96, 64>}, {pipeline_mode = #tpu.pipeline_mode<synchronous>, transform_indices = @transform_5, window_bounds = array<i64: 192, 128>}, {pipeline_mode = #tpu.pipeline_mode<synchronous>, transform_indices = @transform_6, window_bounds = array<i64: 384, 256>}, {pipeline_mode = #tpu.pipeline_mode<synchronous>, transform_indices = @transform_7, window_bounds = array<i64: 768, 128>}, {pipeline_mode = #tpu.pipeline_mode<synchronous>, transform_indices = @transform_8, window_bounds = array<i64: 768, 64>}, {pipeline_mode = #tpu.pipeline_mode<synchronous>, transform_indices = @transform_9, window_bounds = array<i64: 384, 32>}, {pipeline_mode = #tpu.pipeline_mode<synchronous>, transform_indices = @transform_10, window_bounds = array<i64: 192, 16>}, {pipeline_mode = #tpu.pipeline_mode<synchronous>, transform_indices = @transform_11, window_bounds = array<i64: 16, 80>}, {pipeline_mode = #tpu.pipeline_mode<synchronous>, transform_indices = @transform_12, window_bounds = array<i64: 288, 16>}, {pipeline_mode = #tpu.pipeline_mode<synchronous>, transform_indices = @transform_13, window_bounds = array<i64: 16, 256>}, {pipeline_mode = #tpu.pipeline_mode<synchronous>, transform_indices = @transform_14, window_bounds = array<i64: 2304, 15>}, {pipeline_mode = #tpu.pipeline_mode<synchronous>, transform_indices = @transform_15, window_bounds = array<i64: 40, 15>}]} {
    %c23 = arith.constant 23 : index
    %c0 = arith.constant 0 : index
    %0 = vector.load %arg2[%c23, %c0] : memref<63x256xf32, #tpu.memory_space<vmem>>, vector<40x1xf32>
    %c23_0 = arith.constant 23 : index
    %c1 = arith.constant 1 : index
    %1 = vector.load %arg2[%c23_0, %c1] : memref<63x256xf32, #tpu.memory_space<vmem>>, vector<40x1xf32>
    %c23_1 = arith.constant 23 : index
    %c2 = arith.constant 2 : index
    %2 = vector.load %arg2[%c23_1, %c2] : memref<63x256xf32, #tpu.memory_space<vmem>>, vector<40x1xf32>
    %c23_2 = arith.constant 23 : index
    %c3 = arith.constant 3 : index
    %3 = vector.load %arg2[%c23_2, %c3] : memref<63x256xf32, #tpu.memory_space<vmem>>, vector<40x1xf32>
    %c23_3 = arith.constant 23 : index
    %c0_4 = arith.constant 0 : index
    %4 = vector.load %arg2[%c23_3, %c0_4] : memref<63x256xf32, #tpu.memory_space<vmem>>, vector<8x1xf32>
    %c23_5 = arith.constant 23 : index
    %c1_6 = arith.constant 1 : index
    %5 = vector.load %arg2[%c23_5, %c1_6] : memref<63x256xf32, #tpu.memory_space<vmem>>, vector<8x1xf32>
    %c0_7 = arith.constant 0 : index
    %c0_8 = arith.constant 0 : index
    %6 = vector.load %arg1[%c0_7, %c0_8] : memref<600x9xf32, #tpu.memory_space<vmem>>, vector<600x9xf32>
    %c0_9 = arith.constant 0 : index
    %c0_10 = arith.constant 0 : index
    %7 = vector.load %arg3[%c0_9, %c0_10] : memref<9x16xbf16, #tpu.memory_space<vmem>>, vector<9x16xbf16>
    %8 = arith.extf %7 : vector<9x16xbf16> to vector<9x16xf32>
    %cst = arith.constant dense<0.000000e+00> : vector<600x16xf32>
    %9 = tpu.matmul %6, %8, %cst {dimension_numbers = #tpu.dot_dimension_numbers<[1], [0], [0], [1], [0, 0, 1, 1], [], []>} : vector<600x9xf32>, vector<9x16xf32>, vector<600x16xf32> -> vector<600x16xf32>
    %c0_11 = arith.constant 0 : index
    %c0_12 = arith.constant 0 : index
    %10 = vector.load %arg2[%c0_11, %c0_12] : memref<63x256xf32, #tpu.memory_space<vmem>>, vector<1x16xf32>
    %11 = vector.broadcast %10 : vector<1x16xf32> to vector<600x16xf32>
    %12 = arith.mulf %9, %11 : vector<600x16xf32>
    %c1_13 = arith.constant 1 : index
    %c0_14 = arith.constant 0 : index
    %13 = vector.load %arg2[%c1_13, %c0_14] : memref<63x256xf32, #tpu.memory_space<vmem>>, vector<1x16xf32>
    %14 = vector.broadcast %13 : vector<1x16xf32> to vector<600x16xf32>
    %15 = arith.addf %12, %14 : vector<600x16xf32>
    %cst_15 = arith.constant 0.000000e+00 : f32
    %16 = vector.broadcast %cst_15 : f32 to vector<600x16xf32>
    %17 = arith.maximumf %15, %16 : vector<600x16xf32>
    %18 = vector.extract_strided_slice %17 {offsets = [0, 0], sizes = [40, 16], strides = [1, 1]} : vector<600x16xf32> to vector<40x16xf32>
    %19 = vector.extract_strided_slice %17 {offsets = [40, 0], sizes = [40, 16], strides = [1, 1]} : vector<600x16xf32> to vector<40x16xf32>
    %20 = vector.extract_strided_slice %17 {offsets = [80, 0], sizes = [40, 16], strides = [1, 1]} : vector<600x16xf32> to vector<40x16xf32>
    %21 = vector.extract_strided_slice %17 {offsets = [120, 0], sizes = [40, 16], strides = [1, 1]} : vector<600x16xf32> to vector<40x16xf32>
    %22 = vector.extract_strided_slice %17 {offsets = [160, 0], sizes = [40, 16], strides = [1, 1]} : vector<600x16xf32> to vector<40x16xf32>
    %23 = vector.extract_strided_slice %17 {offsets = [200, 0], sizes = [40, 16], strides = [1, 1]} : vector<600x16xf32> to vector<40x16xf32>
    %24 = vector.extract_strided_slice %17 {offsets = [240, 0], sizes = [40, 16], strides = [1, 1]} : vector<600x16xf32> to vector<40x16xf32>
    %25 = vector.extract_strided_slice %17 {offsets = [280, 0], sizes = [40, 16], strides = [1, 1]} : vector<600x16xf32> to vector<40x16xf32>
    %26 = vector.extract_strided_slice %17 {offsets = [320, 0], sizes = [40, 16], strides = [1, 1]} : vector<600x16xf32> to vector<40x16xf32>
    %27 = vector.extract_strided_slice %17 {offsets = [360, 0], sizes = [40, 16], strides = [1, 1]} : vector<600x16xf32> to vector<40x16xf32>
    %28 = vector.extract_strided_slice %17 {offsets = [400, 0], sizes = [40, 16], strides = [1, 1]} : vector<600x16xf32> to vector<40x16xf32>
    %29 = vector.extract_strided_slice %17 {offsets = [440, 0], sizes = [40, 16], strides = [1, 1]} : vector<600x16xf32> to vector<40x16xf32>
    %30 = vector.extract_strided_slice %17 {offsets = [480, 0], sizes = [40, 16], strides = [1, 1]} : vector<600x16xf32> to vector<40x16xf32>
    %31 = vector.extract_strided_slice %17 {offsets = [520, 0], sizes = [40, 16], strides = [1, 1]} : vector<600x16xf32> to vector<40x16xf32>
    %32 = vector.extract_strided_slice %17 {offsets = [560, 0], sizes = [40, 16], strides = [1, 1]} : vector<600x16xf32> to vector<40x16xf32>
    %33 = arith.maximumf %18, %19 : vector<40x16xf32>
    %34 = arith.maximumf %20, %21 : vector<40x16xf32>
    %35 = arith.maximumf %22, %23 : vector<40x16xf32>
    %36 = arith.maximumf %24, %25 : vector<40x16xf32>
    %37 = arith.maximumf %26, %27 : vector<40x16xf32>
    %38 = arith.maximumf %28, %29 : vector<40x16xf32>
    %39 = arith.maximumf %30, %31 : vector<40x16xf32>
    %40 = arith.maximumf %33, %34 : vector<40x16xf32>
    %41 = arith.maximumf %35, %36 : vector<40x16xf32>
    %42 = arith.maximumf %37, %38 : vector<40x16xf32>
    %43 = arith.maximumf %39, %32 : vector<40x16xf32>
    %44 = arith.maximumf %40, %41 : vector<40x16xf32>
    %45 = arith.maximumf %42, %43 : vector<40x16xf32>
    %46 = arith.maximumf %44, %45 : vector<40x16xf32>
    %47 = vector.extract_strided_slice %46 {offsets = [35, 0], sizes = [5, 16], strides = [1, 1]} : vector<40x16xf32> to vector<5x16xf32>
    %48 = vector.extract_strided_slice %46 {offsets = [0, 0], sizes = [35, 16], strides = [1, 1]} : vector<40x16xf32> to vector<35x16xf32>
    %49 = tpu.concatenate %47, %48 in 0 : vector<5x16xf32>, vector<35x16xf32> -> vector<40x16xf32>
    %50 = arith.mulf %2, %0 : vector<40x1xf32>
    %51 = vector.broadcast %50 : vector<40x1xf32> to vector<40x16xf32>
    %52 = arith.mulf %49, %51 : vector<40x16xf32>
    %53 = vector.extract_strided_slice %46 {offsets = [36, 0], sizes = [4, 16], strides = [1, 1]} : vector<40x16xf32> to vector<4x16xf32>
    %54 = vector.extract_strided_slice %46 {offsets = [0, 0], sizes = [36, 16], strides = [1, 1]} : vector<40x16xf32> to vector<36x16xf32>
    %55 = tpu.concatenate %53, %54 in 0 : vector<4x16xf32>, vector<36x16xf32> -> vector<40x16xf32>
    %56 = vector.broadcast %2 : vector<40x1xf32> to vector<40x16xf32>
    %57 = arith.mulf %55, %56 : vector<40x16xf32>
    %58 = vector.extract_strided_slice %46 {offsets = [37, 0], sizes = [3, 16], strides = [1, 1]} : vector<40x16xf32> to vector<3x16xf32>
    %59 = vector.extract_strided_slice %46 {offsets = [0, 0], sizes = [37, 16], strides = [1, 1]} : vector<40x16xf32> to vector<37x16xf32>
    %60 = tpu.concatenate %58, %59 in 0 : vector<3x16xf32>, vector<37x16xf32> -> vector<40x16xf32>
    %61 = arith.mulf %2, %1 : vector<40x1xf32>
    %62 = vector.broadcast %61 : vector<40x1xf32> to vector<40x16xf32>
    %63 = arith.mulf %60, %62 : vector<40x16xf32>
    %64 = vector.extract_strided_slice %46 {offsets = [39, 0], sizes = [1, 16], strides = [1, 1]} : vector<40x16xf32> to vector<1x16xf32>
    %65 = vector.extract_strided_slice %46 {offsets = [0, 0], sizes = [39, 16], strides = [1, 1]} : vector<40x16xf32> to vector<39x16xf32>
    %66 = tpu.concatenate %64, %65 in 0 : vector<1x16xf32>, vector<39x16xf32> -> vector<40x16xf32>
    %67 = vector.broadcast %0 : vector<40x1xf32> to vector<40x16xf32>
    %68 = arith.mulf %66, %67 : vector<40x16xf32>
    %69 = vector.extract_strided_slice %46 {offsets = [1, 0], sizes = [39, 16], strides = [1, 1]} : vector<40x16xf32> to vector<39x16xf32>
    %70 = vector.extract_strided_slice %46 {offsets = [0, 0], sizes = [1, 16], strides = [1, 1]} : vector<40x16xf32> to vector<1x16xf32>
    %71 = tpu.concatenate %69, %70 in 0 : vector<39x16xf32>, vector<1x16xf32> -> vector<40x16xf32>
    %72 = vector.broadcast %1 : vector<40x1xf32> to vector<40x16xf32>
    %73 = arith.mulf %71, %72 : vector<40x16xf32>
    %74 = vector.extract_strided_slice %46 {offsets = [3, 0], sizes = [37, 16], strides = [1, 1]} : vector<40x16xf32> to vector<37x16xf32>
    %75 = vector.extract_strided_slice %46 {offsets = [0, 0], sizes = [3, 16], strides = [1, 1]} : vector<40x16xf32> to vector<3x16xf32>
    %76 = tpu.concatenate %74, %75 in 0 : vector<37x16xf32>, vector<3x16xf32> -> vector<40x16xf32>
    %77 = arith.mulf %3, %0 : vector<40x1xf32>
    %78 = vector.broadcast %77 : vector<40x1xf32> to vector<40x16xf32>
    %79 = arith.mulf %76, %78 : vector<40x16xf32>
    %80 = vector.extract_strided_slice %46 {offsets = [4, 0], sizes = [36, 16], strides = [1, 1]} : vector<40x16xf32> to vector<36x16xf32>
    %81 = vector.extract_strided_slice %46 {offsets = [0, 0], sizes = [4, 16], strides = [1, 1]} : vector<40x16xf32> to vector<4x16xf32>
    %82 = tpu.concatenate %80, %81 in 0 : vector<36x16xf32>, vector<4x16xf32> -> vector<40x16xf32>
    %83 = vector.broadcast %3 : vector<40x1xf32> to vector<40x16xf32>
    %84 = arith.mulf %82, %83 : vector<40x16xf32>
    %85 = vector.extract_strided_slice %46 {offsets = [5, 0], sizes = [35, 16], strides = [1, 1]} : vector<40x16xf32> to vector<35x16xf32>
    %86 = vector.extract_strided_slice %46 {offsets = [0, 0], sizes = [5, 16], strides = [1, 1]} : vector<40x16xf32> to vector<5x16xf32>
    %87 = tpu.concatenate %85, %86 in 0 : vector<35x16xf32>, vector<5x16xf32> -> vector<40x16xf32>
    %88 = arith.mulf %3, %1 : vector<40x1xf32>
    %89 = vector.broadcast %88 : vector<40x1xf32> to vector<40x16xf32>
    %90 = arith.mulf %87, %89 : vector<40x16xf32>
    %91 = tpu.concatenate %52, %57, %63, %68, %46, %73, %79, %84, %90 in 1 : vector<40x16xf32>, vector<40x16xf32>, vector<40x16xf32>, vector<40x16xf32>, vector<40x16xf32>, vector<40x16xf32>, vector<40x16xf32>, vector<40x16xf32>, vector<40x16xf32> -> vector<40x144xf32>
    %c0_16 = arith.constant 0 : index
    %c0_17 = arith.constant 0 : index
    %92 = vector.load %arg4[%c0_16, %c0_17] : memref<144x32xbf16, #tpu.memory_space<vmem>>, vector<144x32xbf16>
    %93 = arith.extf %92 : vector<144x32xbf16> to vector<144x32xf32>
    %cst_18 = arith.constant dense<0.000000e+00> : vector<40x32xf32>
    %94 = tpu.matmul %91, %93, %cst_18 {dimension_numbers = #tpu.dot_dimension_numbers<[1], [0], [0], [1], [0, 0, 1, 1], [], []>} : vector<40x144xf32>, vector<144x32xf32>, vector<40x32xf32> -> vector<40x32xf32>
    %c2_19 = arith.constant 2 : index
    %c0_20 = arith.constant 0 : index
    %95 = vector.load %arg2[%c2_19, %c0_20] : memref<63x256xf32, #tpu.memory_space<vmem>>, vector<1x32xf32>
    %96 = vector.broadcast %95 : vector<1x32xf32> to vector<40x32xf32>
    %97 = arith.mulf %94, %96 : vector<40x32xf32>
    %c3_21 = arith.constant 3 : index
    %c0_22 = arith.constant 0 : index
    %98 = vector.load %arg2[%c3_21, %c0_22] : memref<63x256xf32, #tpu.memory_space<vmem>>, vector<1x32xf32>
    %99 = vector.broadcast %98 : vector<1x32xf32> to vector<40x32xf32>
    %100 = arith.addf %97, %99 : vector<40x32xf32>
    %cst_23 = arith.constant 0.000000e+00 : f32
    %101 = vector.broadcast %cst_23 : f32 to vector<40x32xf32>
    %102 = arith.maximumf %100, %101 : vector<40x32xf32>
    %103 = vector.extract_strided_slice %102 {offsets = [0, 0], sizes = [4, 32], strides = [1, 1]} : vector<40x32xf32> to vector<4x32xf32>
    %104 = vector.extract_strided_slice %102 {offsets = [4, 0], sizes = [4, 32], strides = [1, 1]} : vector<40x32xf32> to vector<4x32xf32>
    %105 = vector.extract_strided_slice %102 {offsets = [8, 0], sizes = [4, 32], strides = [1, 1]} : vector<40x32xf32> to vector<4x32xf32>
    %106 = vector.extract_strided_slice %102 {offsets = [12, 0], sizes = [4, 32], strides = [1, 1]} : vector<40x32xf32> to vector<4x32xf32>
    %107 = vector.extract_strided_slice %102 {offsets = [16, 0], sizes = [4, 32], strides = [1, 1]} : vector<40x32xf32> to vector<4x32xf32>
    %108 = arith.maximumf %103, %104 : vector<4x32xf32>
    %109 = arith.maximumf %105, %106 : vector<4x32xf32>
    %110 = arith.maximumf %108, %109 : vector<4x32xf32>
    %111 = arith.maximumf %110, %107 : vector<4x32xf32>
    %112 = vector.extract_strided_slice %102 {offsets = [20, 0], sizes = [4, 32], strides = [1, 1]} : vector<40x32xf32> to vector<4x32xf32>
    %113 = vector.extract_strided_slice %102 {offsets = [24, 0], sizes = [4, 32], strides = [1, 1]} : vector<40x32xf32> to vector<4x32xf32>
    %114 = vector.extract_strided_slice %102 {offsets = [28, 0], sizes = [4, 32], strides = [1, 1]} : vector<40x32xf32> to vector<4x32xf32>
    %115 = vector.extract_strided_slice %102 {offsets = [32, 0], sizes = [4, 32], strides = [1, 1]} : vector<40x32xf32> to vector<4x32xf32>
    %116 = vector.extract_strided_slice %102 {offsets = [36, 0], sizes = [4, 32], strides = [1, 1]} : vector<40x32xf32> to vector<4x32xf32>
    %117 = arith.maximumf %112, %113 : vector<4x32xf32>
    %118 = arith.maximumf %114, %115 : vector<4x32xf32>
    %119 = arith.maximumf %117, %118 : vector<4x32xf32>
    %120 = arith.maximumf %119, %116 : vector<4x32xf32>
    %121 = tpu.concatenate %111, %120 in 0 : vector<4x32xf32>, vector<4x32xf32> -> vector<8x32xf32>
    %122 = vector.extract_strided_slice %121 {offsets = [7, 0], sizes = [1, 32], strides = [1, 1]} : vector<8x32xf32> to vector<1x32xf32>
    %123 = vector.extract_strided_slice %121 {offsets = [0, 0], sizes = [7, 32], strides = [1, 1]} : vector<8x32xf32> to vector<7x32xf32>
    %124 = tpu.concatenate %122, %123 in 0 : vector<1x32xf32>, vector<7x32xf32> -> vector<8x32xf32>
    %125 = vector.broadcast %4 : vector<8x1xf32> to vector<8x32xf32>
    %126 = arith.mulf %124, %125 : vector<8x32xf32>
    %127 = vector.extract_strided_slice %121 {offsets = [1, 0], sizes = [7, 32], strides = [1, 1]} : vector<8x32xf32> to vector<7x32xf32>
    %128 = vector.extract_strided_slice %121 {offsets = [0, 0], sizes = [1, 32], strides = [1, 1]} : vector<8x32xf32> to vector<1x32xf32>
    %129 = tpu.concatenate %127, %128 in 0 : vector<7x32xf32>, vector<1x32xf32> -> vector<8x32xf32>
    %130 = vector.broadcast %5 : vector<8x1xf32> to vector<8x32xf32>
    %131 = arith.mulf %129, %130 : vector<8x32xf32>
    %132 = tpu.concatenate %126, %121, %131 in 1 : vector<8x32xf32>, vector<8x32xf32>, vector<8x32xf32> -> vector<8x96xf32>
    %c0_24 = arith.constant 0 : index
    %c0_25 = arith.constant 0 : index
    %133 = vector.load %arg5[%c0_24, %c0_25] : memref<96x64xbf16, #tpu.memory_space<vmem>>, vector<96x64xbf16>
    %134 = arith.extf %133 : vector<96x64xbf16> to vector<96x64xf32>
    %cst_26 = arith.constant dense<0.000000e+00> : vector<8x64xf32>
    %135 = tpu.matmul %132, %134, %cst_26 {dimension_numbers = #tpu.dot_dimension_numbers<[1], [0], [0], [1], [0, 0, 1, 1], [], []>} : vector<8x96xf32>, vector<96x64xf32>, vector<8x64xf32> -> vector<8x64xf32>
    %c4 = arith.constant 4 : index
    %c0_27 = arith.constant 0 : index
    %136 = vector.load %arg2[%c4, %c0_27] : memref<63x256xf32, #tpu.memory_space<vmem>>, vector<1x64xf32>
    %137 = vector.broadcast %136 : vector<1x64xf32> to vector<8x64xf32>
    %138 = arith.mulf %135, %137 : vector<8x64xf32>
    %c5 = arith.constant 5 : index
    %c0_28 = arith.constant 0 : index
    %139 = vector.load %arg2[%c5, %c0_28] : memref<63x256xf32, #tpu.memory_space<vmem>>, vector<1x64xf32>
    %140 = vector.broadcast %139 : vector<1x64xf32> to vector<8x64xf32>
    %141 = arith.addf %138, %140 : vector<8x64xf32>
    %cst_29 = arith.constant 0.000000e+00 : f32
    %142 = vector.broadcast %cst_29 : f32 to vector<8x64xf32>
    %143 = arith.maximumf %141, %142 : vector<8x64xf32>
    %144 = vector.extract_strided_slice %143 {offsets = [7, 0], sizes = [1, 64], strides = [1, 1]} : vector<8x64xf32> to vector<1x64xf32>
    %145 = vector.extract_strided_slice %143 {offsets = [0, 0], sizes = [7, 64], strides = [1, 1]} : vector<8x64xf32> to vector<7x64xf32>
    %146 = tpu.concatenate %144, %145 in 0 : vector<1x64xf32>, vector<7x64xf32> -> vector<8x64xf32>
    %147 = vector.broadcast %4 : vector<8x1xf32> to vector<8x64xf32>
    %148 = arith.mulf %146, %147 : vector<8x64xf32>
    %149 = vector.extract_strided_slice %143 {offsets = [1, 0], sizes = [7, 64], strides = [1, 1]} : vector<8x64xf32> to vector<7x64xf32>
    %150 = vector.extract_strided_slice %143 {offsets = [0, 0], sizes = [1, 64], strides = [1, 1]} : vector<8x64xf32> to vector<1x64xf32>
    %151 = tpu.concatenate %149, %150 in 0 : vector<7x64xf32>, vector<1x64xf32> -> vector<8x64xf32>
    %152 = vector.broadcast %5 : vector<8x1xf32> to vector<8x64xf32>
    %153 = arith.mulf %151, %152 : vector<8x64xf32>
    %154 = tpu.concatenate %148, %143, %153 in 1 : vector<8x64xf32>, vector<8x64xf32>, vector<8x64xf32> -> vector<8x192xf32>
    %c0_30 = arith.constant 0 : index
    %c0_31 = arith.constant 0 : index
    %155 = vector.load %arg6[%c0_30, %c0_31] : memref<192x128xbf16, #tpu.memory_space<vmem>>, vector<192x128xbf16>
    %156 = arith.extf %155 : vector<192x128xbf16> to vector<192x128xf32>
    %cst_32 = arith.constant dense<0.000000e+00> : vector<8x128xf32>
    %157 = tpu.matmul %154, %156, %cst_32 {dimension_numbers = #tpu.dot_dimension_numbers<[1], [0], [0], [1], [0, 0, 1, 1], [], []>} : vector<8x192xf32>, vector<192x128xf32>, vector<8x128xf32> -> vector<8x128xf32>
    %c6 = arith.constant 6 : index
    %c0_33 = arith.constant 0 : index
    %158 = vector.load %arg2[%c6, %c0_33] : memref<63x256xf32, #tpu.memory_space<vmem>>, vector<1x128xf32>
    %159 = vector.broadcast %158 : vector<1x128xf32> to vector<8x128xf32>
    %160 = arith.mulf %157, %159 : vector<8x128xf32>
    %c7 = arith.constant 7 : index
    %c0_34 = arith.constant 0 : index
    %161 = vector.load %arg2[%c7, %c0_34] : memref<63x256xf32, #tpu.memory_space<vmem>>, vector<1x128xf32>
    %162 = vector.broadcast %161 : vector<1x128xf32> to vector<8x128xf32>
    %163 = arith.addf %160, %162 : vector<8x128xf32>
    %cst_35 = arith.constant 0.000000e+00 : f32
    %164 = vector.broadcast %cst_35 : f32 to vector<8x128xf32>
    %165 = arith.maximumf %163, %164 : vector<8x128xf32>
    %166 = vector.extract_strided_slice %165 {offsets = [7, 0], sizes = [1, 128], strides = [1, 1]} : vector<8x128xf32> to vector<1x128xf32>
    %167 = vector.extract_strided_slice %165 {offsets = [0, 0], sizes = [7, 128], strides = [1, 1]} : vector<8x128xf32> to vector<7x128xf32>
    %168 = tpu.concatenate %166, %167 in 0 : vector<1x128xf32>, vector<7x128xf32> -> vector<8x128xf32>
    %169 = vector.broadcast %4 : vector<8x1xf32> to vector<8x128xf32>
    %170 = arith.mulf %168, %169 : vector<8x128xf32>
    %171 = vector.extract_strided_slice %165 {offsets = [1, 0], sizes = [7, 128], strides = [1, 1]} : vector<8x128xf32> to vector<7x128xf32>
    %172 = vector.extract_strided_slice %165 {offsets = [0, 0], sizes = [1, 128], strides = [1, 1]} : vector<8x128xf32> to vector<1x128xf32>
    %173 = tpu.concatenate %171, %172 in 0 : vector<7x128xf32>, vector<1x128xf32> -> vector<8x128xf32>
    %174 = vector.broadcast %5 : vector<8x1xf32> to vector<8x128xf32>
    %175 = arith.mulf %173, %174 : vector<8x128xf32>
    %176 = tpu.concatenate %170, %165, %175 in 1 : vector<8x128xf32>, vector<8x128xf32>, vector<8x128xf32> -> vector<8x384xf32>
    %c0_36 = arith.constant 0 : index
    %c0_37 = arith.constant 0 : index
    %177 = vector.load %arg7[%c0_36, %c0_37] : memref<384x256xbf16, #tpu.memory_space<vmem>>, vector<384x256xbf16>
    %178 = arith.extf %177 : vector<384x256xbf16> to vector<384x256xf32>
    %cst_38 = arith.constant dense<0.000000e+00> : vector<8x256xf32>
    %179 = tpu.matmul %176, %178, %cst_38 {dimension_numbers = #tpu.dot_dimension_numbers<[1], [0], [0], [1], [0, 0, 1, 1], [], []>} : vector<8x384xf32>, vector<384x256xf32>, vector<8x256xf32> -> vector<8x256xf32>
    %c8 = arith.constant 8 : index
    %c0_39 = arith.constant 0 : index
    %180 = vector.load %arg2[%c8, %c0_39] : memref<63x256xf32, #tpu.memory_space<vmem>>, vector<1x256xf32>
    %181 = vector.broadcast %180 : vector<1x256xf32> to vector<8x256xf32>
    %182 = arith.mulf %179, %181 : vector<8x256xf32>
    %c9 = arith.constant 9 : index
    %c0_40 = arith.constant 0 : index
    %183 = vector.load %arg2[%c9, %c0_40] : memref<63x256xf32, #tpu.memory_space<vmem>>, vector<1x256xf32>
    %184 = vector.broadcast %183 : vector<1x256xf32> to vector<8x256xf32>
    %185 = arith.addf %182, %184 : vector<8x256xf32>
    %cst_41 = arith.constant 0.000000e+00 : f32
    %186 = vector.broadcast %cst_41 : f32 to vector<8x256xf32>
    %187 = arith.maximumf %185, %186 : vector<8x256xf32>
    %188 = vector.extract_strided_slice %187 {offsets = [7, 0], sizes = [1, 256], strides = [1, 1]} : vector<8x256xf32> to vector<1x256xf32>
    %189 = vector.extract_strided_slice %187 {offsets = [0, 0], sizes = [7, 256], strides = [1, 1]} : vector<8x256xf32> to vector<7x256xf32>
    %190 = tpu.concatenate %188, %189 in 0 : vector<1x256xf32>, vector<7x256xf32> -> vector<8x256xf32>
    %191 = vector.broadcast %4 : vector<8x1xf32> to vector<8x256xf32>
    %192 = arith.mulf %190, %191 : vector<8x256xf32>
    %193 = vector.extract_strided_slice %187 {offsets = [1, 0], sizes = [7, 256], strides = [1, 1]} : vector<8x256xf32> to vector<7x256xf32>
    %194 = vector.extract_strided_slice %187 {offsets = [0, 0], sizes = [1, 256], strides = [1, 1]} : vector<8x256xf32> to vector<1x256xf32>
    %195 = tpu.concatenate %193, %194 in 0 : vector<7x256xf32>, vector<1x256xf32> -> vector<8x256xf32>
    %196 = vector.broadcast %5 : vector<8x1xf32> to vector<8x256xf32>
    %197 = arith.mulf %195, %196 : vector<8x256xf32>
    %198 = tpu.concatenate %192, %187, %197 in 1 : vector<8x256xf32>, vector<8x256xf32>, vector<8x256xf32> -> vector<8x768xf32>
    %c0_42 = arith.constant 0 : index
    %c0_43 = arith.constant 0 : index
    %199 = vector.load %arg8[%c0_42, %c0_43] : memref<768x128xbf16, #tpu.memory_space<vmem>>, vector<768x128xbf16>
    %200 = arith.extf %199 : vector<768x128xbf16> to vector<768x128xf32>
    %cst_44 = arith.constant dense<0.000000e+00> : vector<8x128xf32>
    %201 = tpu.matmul %198, %200, %cst_44 {dimension_numbers = #tpu.dot_dimension_numbers<[1], [0], [0], [1], [0, 0, 1, 1], [], []>} : vector<8x768xf32>, vector<768x128xf32>, vector<8x128xf32> -> vector<8x128xf32>
    %c10 = arith.constant 10 : index
    %c0_45 = arith.constant 0 : index
    %202 = vector.load %arg2[%c10, %c0_45] : memref<63x256xf32, #tpu.memory_space<vmem>>, vector<1x128xf32>
    %203 = vector.broadcast %202 : vector<1x128xf32> to vector<8x128xf32>
    %204 = arith.mulf %201, %203 : vector<8x128xf32>
    %c11 = arith.constant 11 : index
    %c0_46 = arith.constant 0 : index
    %205 = vector.load %arg2[%c11, %c0_46] : memref<63x256xf32, #tpu.memory_space<vmem>>, vector<1x128xf32>
    %206 = vector.broadcast %205 : vector<1x128xf32> to vector<8x128xf32>
    %207 = arith.addf %204, %206 : vector<8x128xf32>
    %cst_47 = arith.constant 0.000000e+00 : f32
    %208 = vector.broadcast %cst_47 : f32 to vector<8x128xf32>
    %209 = arith.maximumf %207, %208 : vector<8x128xf32>
    %210 = vector.extract_strided_slice %209 {offsets = [7, 0], sizes = [1, 128], strides = [1, 1]} : vector<8x128xf32> to vector<1x128xf32>
    %211 = vector.extract_strided_slice %209 {offsets = [0, 0], sizes = [7, 128], strides = [1, 1]} : vector<8x128xf32> to vector<7x128xf32>
    %212 = tpu.concatenate %210, %211 in 0 : vector<1x128xf32>, vector<7x128xf32> -> vector<8x128xf32>
    %213 = vector.broadcast %4 : vector<8x1xf32> to vector<8x128xf32>
    %214 = arith.mulf %212, %213 : vector<8x128xf32>
    %215 = vector.extract_strided_slice %209 {offsets = [1, 0], sizes = [7, 128], strides = [1, 1]} : vector<8x128xf32> to vector<7x128xf32>
    %216 = vector.extract_strided_slice %209 {offsets = [0, 0], sizes = [1, 128], strides = [1, 1]} : vector<8x128xf32> to vector<1x128xf32>
    %217 = tpu.concatenate %215, %216 in 0 : vector<7x128xf32>, vector<1x128xf32> -> vector<8x128xf32>
    %218 = vector.broadcast %5 : vector<8x1xf32> to vector<8x128xf32>
    %219 = arith.mulf %217, %218 : vector<8x128xf32>
    %220 = tpu.concatenate %214, %209, %219 in 1 : vector<8x128xf32>, vector<8x128xf32>, vector<8x128xf32> -> vector<8x384xf32>
    %221 = tpu.concatenate %220, %176 in 1 : vector<8x384xf32>, vector<8x384xf32> -> vector<8x768xf32>
    %c0_48 = arith.constant 0 : index
    %c0_49 = arith.constant 0 : index
    %222 = vector.load %arg9[%c0_48, %c0_49] : memref<768x64xbf16, #tpu.memory_space<vmem>>, vector<768x64xbf16>
    %223 = arith.extf %222 : vector<768x64xbf16> to vector<768x64xf32>
    %cst_50 = arith.constant dense<0.000000e+00> : vector<8x64xf32>
    %224 = tpu.matmul %221, %223, %cst_50 {dimension_numbers = #tpu.dot_dimension_numbers<[1], [0], [0], [1], [0, 0, 1, 1], [], []>} : vector<8x768xf32>, vector<768x64xf32>, vector<8x64xf32> -> vector<8x64xf32>
    %c12 = arith.constant 12 : index
    %c0_51 = arith.constant 0 : index
    %225 = vector.load %arg2[%c12, %c0_51] : memref<63x256xf32, #tpu.memory_space<vmem>>, vector<1x64xf32>
    %226 = vector.broadcast %225 : vector<1x64xf32> to vector<8x64xf32>
    %227 = arith.mulf %224, %226 : vector<8x64xf32>
    %c13 = arith.constant 13 : index
    %c0_52 = arith.constant 0 : index
    %228 = vector.load %arg2[%c13, %c0_52] : memref<63x256xf32, #tpu.memory_space<vmem>>, vector<1x64xf32>
    %229 = vector.broadcast %228 : vector<1x64xf32> to vector<8x64xf32>
    %230 = arith.addf %227, %229 : vector<8x64xf32>
    %cst_53 = arith.constant 0.000000e+00 : f32
    %231 = vector.broadcast %cst_53 : f32 to vector<8x64xf32>
    %232 = arith.maximumf %230, %231 : vector<8x64xf32>
    %233 = vector.extract_strided_slice %232 {offsets = [7, 0], sizes = [1, 64], strides = [1, 1]} : vector<8x64xf32> to vector<1x64xf32>
    %234 = vector.extract_strided_slice %232 {offsets = [0, 0], sizes = [7, 64], strides = [1, 1]} : vector<8x64xf32> to vector<7x64xf32>
    %235 = tpu.concatenate %233, %234 in 0 : vector<1x64xf32>, vector<7x64xf32> -> vector<8x64xf32>
    %236 = vector.broadcast %4 : vector<8x1xf32> to vector<8x64xf32>
    %237 = arith.mulf %235, %236 : vector<8x64xf32>
    %238 = vector.extract_strided_slice %232 {offsets = [1, 0], sizes = [7, 64], strides = [1, 1]} : vector<8x64xf32> to vector<7x64xf32>
    %239 = vector.extract_strided_slice %232 {offsets = [0, 0], sizes = [1, 64], strides = [1, 1]} : vector<8x64xf32> to vector<1x64xf32>
    %240 = tpu.concatenate %238, %239 in 0 : vector<7x64xf32>, vector<1x64xf32> -> vector<8x64xf32>
    %241 = vector.broadcast %5 : vector<8x1xf32> to vector<8x64xf32>
    %242 = arith.mulf %240, %241 : vector<8x64xf32>
    %243 = tpu.concatenate %237, %232, %242 in 1 : vector<8x64xf32>, vector<8x64xf32>, vector<8x64xf32> -> vector<8x192xf32>
    %244 = tpu.concatenate %243, %154 in 1 : vector<8x192xf32>, vector<8x192xf32> -> vector<8x384xf32>
    %c0_54 = arith.constant 0 : index
    %c0_55 = arith.constant 0 : index
    %245 = vector.load %arg10[%c0_54, %c0_55] : memref<384x32xbf16, #tpu.memory_space<vmem>>, vector<384x32xbf16>
    %246 = arith.extf %245 : vector<384x32xbf16> to vector<384x32xf32>
    %cst_56 = arith.constant dense<0.000000e+00> : vector<8x32xf32>
    %247 = tpu.matmul %244, %246, %cst_56 {dimension_numbers = #tpu.dot_dimension_numbers<[1], [0], [0], [1], [0, 0, 1, 1], [], []>} : vector<8x384xf32>, vector<384x32xf32>, vector<8x32xf32> -> vector<8x32xf32>
    %c14 = arith.constant 14 : index
    %c0_57 = arith.constant 0 : index
    %248 = vector.load %arg2[%c14, %c0_57] : memref<63x256xf32, #tpu.memory_space<vmem>>, vector<1x32xf32>
    %249 = vector.broadcast %248 : vector<1x32xf32> to vector<8x32xf32>
    %250 = arith.mulf %247, %249 : vector<8x32xf32>
    %c15 = arith.constant 15 : index
    %c0_58 = arith.constant 0 : index
    %251 = vector.load %arg2[%c15, %c0_58] : memref<63x256xf32, #tpu.memory_space<vmem>>, vector<1x32xf32>
    %252 = vector.broadcast %251 : vector<1x32xf32> to vector<8x32xf32>
    %253 = arith.addf %250, %252 : vector<8x32xf32>
    %cst_59 = arith.constant 0.000000e+00 : f32
    %254 = vector.broadcast %cst_59 : f32 to vector<8x32xf32>
    %255 = arith.maximumf %253, %254 : vector<8x32xf32>
    %256 = vector.extract_strided_slice %255 {offsets = [7, 0], sizes = [1, 32], strides = [1, 1]} : vector<8x32xf32> to vector<1x32xf32>
    %257 = vector.extract_strided_slice %255 {offsets = [0, 0], sizes = [7, 32], strides = [1, 1]} : vector<8x32xf32> to vector<7x32xf32>
    %258 = tpu.concatenate %256, %257 in 0 : vector<1x32xf32>, vector<7x32xf32> -> vector<8x32xf32>
    %259 = vector.broadcast %4 : vector<8x1xf32> to vector<8x32xf32>
    %260 = arith.mulf %258, %259 : vector<8x32xf32>
    %261 = vector.extract_strided_slice %255 {offsets = [1, 0], sizes = [7, 32], strides = [1, 1]} : vector<8x32xf32> to vector<7x32xf32>
    %262 = vector.extract_strided_slice %255 {offsets = [0, 0], sizes = [1, 32], strides = [1, 1]} : vector<8x32xf32> to vector<1x32xf32>
    %263 = tpu.concatenate %261, %262 in 0 : vector<7x32xf32>, vector<1x32xf32> -> vector<8x32xf32>
    %264 = vector.broadcast %5 : vector<8x1xf32> to vector<8x32xf32>
    %265 = arith.mulf %263, %264 : vector<8x32xf32>
    %266 = tpu.concatenate %260, %255, %265 in 1 : vector<8x32xf32>, vector<8x32xf32>, vector<8x32xf32> -> vector<8x96xf32>
    %267 = tpu.concatenate %266, %132 in 1 : vector<8x96xf32>, vector<8x96xf32> -> vector<8x192xf32>
    %c0_60 = arith.constant 0 : index
    %c0_61 = arith.constant 0 : index
    %268 = vector.load %arg11[%c0_60, %c0_61] : memref<192x16xbf16, #tpu.memory_space<vmem>>, vector<192x16xbf16>
    %269 = arith.extf %268 : vector<192x16xbf16> to vector<192x16xf32>
    %cst_62 = arith.constant dense<0.000000e+00> : vector<8x16xf32>
    %270 = tpu.matmul %267, %269, %cst_62 {dimension_numbers = #tpu.dot_dimension_numbers<[1], [0], [0], [1], [0, 0, 1, 1], [], []>} : vector<8x192xf32>, vector<192x16xf32>, vector<8x16xf32> -> vector<8x16xf32>
    %c16 = arith.constant 16 : index
    %c0_63 = arith.constant 0 : index
    %271 = vector.load %arg2[%c16, %c0_63] : memref<63x256xf32, #tpu.memory_space<vmem>>, vector<1x16xf32>
    %272 = vector.broadcast %271 : vector<1x16xf32> to vector<8x16xf32>
    %273 = arith.mulf %270, %272 : vector<8x16xf32>
    %c17 = arith.constant 17 : index
    %c0_64 = arith.constant 0 : index
    %274 = vector.load %arg2[%c17, %c0_64] : memref<63x256xf32, #tpu.memory_space<vmem>>, vector<1x16xf32>
    %275 = vector.broadcast %274 : vector<1x16xf32> to vector<8x16xf32>
    %276 = arith.addf %273, %275 : vector<8x16xf32>
    %cst_65 = arith.constant 0.000000e+00 : f32
    %277 = vector.broadcast %cst_65 : f32 to vector<8x16xf32>
    %278 = arith.maximumf %276, %277 : vector<8x16xf32>
    %c0_66 = arith.constant 0 : index
    %c0_67 = arith.constant 0 : index
    %279 = vector.load %arg12[%c0_66, %c0_67] : memref<16x80xbf16, #tpu.memory_space<vmem>>, vector<16x80xbf16>
    %280 = arith.extf %279 : vector<16x80xbf16> to vector<16x80xf32>
    %cst_68 = arith.constant dense<0.000000e+00> : vector<8x80xf32>
    %281 = tpu.matmul %278, %280, %cst_68 {dimension_numbers = #tpu.dot_dimension_numbers<[1], [0], [0], [1], [0, 0, 1, 1], [], []>} : vector<8x16xf32>, vector<16x80xf32>, vector<8x80xf32> -> vector<8x80xf32>
    %282 = vector.extract_strided_slice %281 {offsets = [0, 0], sizes = [4, 16], strides = [1, 1]} : vector<8x80xf32> to vector<4x16xf32>
    %283 = vector.extract_strided_slice %281 {offsets = [0, 16], sizes = [4, 16], strides = [1, 1]} : vector<8x80xf32> to vector<4x16xf32>
    %284 = vector.extract_strided_slice %281 {offsets = [0, 32], sizes = [4, 16], strides = [1, 1]} : vector<8x80xf32> to vector<4x16xf32>
    %285 = vector.extract_strided_slice %281 {offsets = [0, 48], sizes = [4, 16], strides = [1, 1]} : vector<8x80xf32> to vector<4x16xf32>
    %286 = vector.extract_strided_slice %281 {offsets = [0, 64], sizes = [4, 16], strides = [1, 1]} : vector<8x80xf32> to vector<4x16xf32>
    %287 = vector.extract_strided_slice %281 {offsets = [4, 0], sizes = [4, 16], strides = [1, 1]} : vector<8x80xf32> to vector<4x16xf32>
    %288 = vector.extract_strided_slice %281 {offsets = [4, 16], sizes = [4, 16], strides = [1, 1]} : vector<8x80xf32> to vector<4x16xf32>
    %289 = vector.extract_strided_slice %281 {offsets = [4, 32], sizes = [4, 16], strides = [1, 1]} : vector<8x80xf32> to vector<4x16xf32>
    %290 = vector.extract_strided_slice %281 {offsets = [4, 48], sizes = [4, 16], strides = [1, 1]} : vector<8x80xf32> to vector<4x16xf32>
    %291 = vector.extract_strided_slice %281 {offsets = [4, 64], sizes = [4, 16], strides = [1, 1]} : vector<8x80xf32> to vector<4x16xf32>
    %292 = tpu.concatenate %282, %283, %284, %285, %286, %287, %288, %289, %290, %291 in 0 : vector<4x16xf32>, vector<4x16xf32>, vector<4x16xf32>, vector<4x16xf32>, vector<4x16xf32>, vector<4x16xf32>, vector<4x16xf32>, vector<4x16xf32>, vector<4x16xf32>, vector<4x16xf32> -> vector<40x16xf32>
    %c18 = arith.constant 18 : index
    %c0_69 = arith.constant 0 : index
    %293 = vector.load %arg2[%c18, %c0_69] : memref<63x256xf32, #tpu.memory_space<vmem>>, vector<1x16xf32>
    %294 = vector.broadcast %293 : vector<1x16xf32> to vector<40x16xf32>
    %295 = arith.addf %292, %294 : vector<40x16xf32>
    %296 = vector.extract_strided_slice %295 {offsets = [35, 0], sizes = [5, 16], strides = [1, 1]} : vector<40x16xf32> to vector<5x16xf32>
    %297 = vector.extract_strided_slice %295 {offsets = [0, 0], sizes = [35, 16], strides = [1, 1]} : vector<40x16xf32> to vector<35x16xf32>
    %298 = tpu.concatenate %296, %297 in 0 : vector<5x16xf32>, vector<35x16xf32> -> vector<40x16xf32>
    %299 = arith.mulf %2, %0 : vector<40x1xf32>
    %300 = vector.broadcast %299 : vector<40x1xf32> to vector<40x16xf32>
    %301 = arith.mulf %298, %300 : vector<40x16xf32>
    %302 = vector.extract_strided_slice %295 {offsets = [36, 0], sizes = [4, 16], strides = [1, 1]} : vector<40x16xf32> to vector<4x16xf32>
    %303 = vector.extract_strided_slice %295 {offsets = [0, 0], sizes = [36, 16], strides = [1, 1]} : vector<40x16xf32> to vector<36x16xf32>
    %304 = tpu.concatenate %302, %303 in 0 : vector<4x16xf32>, vector<36x16xf32> -> vector<40x16xf32>
    %305 = vector.broadcast %2 : vector<40x1xf32> to vector<40x16xf32>
    %306 = arith.mulf %304, %305 : vector<40x16xf32>
    %307 = vector.extract_strided_slice %295 {offsets = [37, 0], sizes = [3, 16], strides = [1, 1]} : vector<40x16xf32> to vector<3x16xf32>
    %308 = vector.extract_strided_slice %295 {offsets = [0, 0], sizes = [37, 16], strides = [1, 1]} : vector<40x16xf32> to vector<37x16xf32>
    %309 = tpu.concatenate %307, %308 in 0 : vector<3x16xf32>, vector<37x16xf32> -> vector<40x16xf32>
    %310 = arith.mulf %2, %1 : vector<40x1xf32>
    %311 = vector.broadcast %310 : vector<40x1xf32> to vector<40x16xf32>
    %312 = arith.mulf %309, %311 : vector<40x16xf32>
    %313 = vector.extract_strided_slice %295 {offsets = [39, 0], sizes = [1, 16], strides = [1, 1]} : vector<40x16xf32> to vector<1x16xf32>
    %314 = vector.extract_strided_slice %295 {offsets = [0, 0], sizes = [39, 16], strides = [1, 1]} : vector<40x16xf32> to vector<39x16xf32>
    %315 = tpu.concatenate %313, %314 in 0 : vector<1x16xf32>, vector<39x16xf32> -> vector<40x16xf32>
    %316 = vector.broadcast %0 : vector<40x1xf32> to vector<40x16xf32>
    %317 = arith.mulf %315, %316 : vector<40x16xf32>
    %318 = vector.extract_strided_slice %295 {offsets = [1, 0], sizes = [39, 16], strides = [1, 1]} : vector<40x16xf32> to vector<39x16xf32>
    %319 = vector.extract_strided_slice %295 {offsets = [0, 0], sizes = [1, 16], strides = [1, 1]} : vector<40x16xf32> to vector<1x16xf32>
    %320 = tpu.concatenate %318, %319 in 0 : vector<39x16xf32>, vector<1x16xf32> -> vector<40x16xf32>
    %321 = vector.broadcast %1 : vector<40x1xf32> to vector<40x16xf32>
    %322 = arith.mulf %320, %321 : vector<40x16xf32>
    %323 = vector.extract_strided_slice %295 {offsets = [3, 0], sizes = [37, 16], strides = [1, 1]} : vector<40x16xf32> to vector<37x16xf32>
    %324 = vector.extract_strided_slice %295 {offsets = [0, 0], sizes = [3, 16], strides = [1, 1]} : vector<40x16xf32> to vector<3x16xf32>
    %325 = tpu.concatenate %323, %324 in 0 : vector<37x16xf32>, vector<3x16xf32> -> vector<40x16xf32>
    %326 = arith.mulf %3, %0 : vector<40x1xf32>
    %327 = vector.broadcast %326 : vector<40x1xf32> to vector<40x16xf32>
    %328 = arith.mulf %325, %327 : vector<40x16xf32>
    %329 = vector.extract_strided_slice %295 {offsets = [4, 0], sizes = [36, 16], strides = [1, 1]} : vector<40x16xf32> to vector<36x16xf32>
    %330 = vector.extract_strided_slice %295 {offsets = [0, 0], sizes = [4, 16], strides = [1, 1]} : vector<40x16xf32> to vector<4x16xf32>
    %331 = tpu.concatenate %329, %330 in 0 : vector<36x16xf32>, vector<4x16xf32> -> vector<40x16xf32>
    %332 = vector.broadcast %3 : vector<40x1xf32> to vector<40x16xf32>
    %333 = arith.mulf %331, %332 : vector<40x16xf32>
    %334 = vector.extract_strided_slice %295 {offsets = [5, 0], sizes = [35, 16], strides = [1, 1]} : vector<40x16xf32> to vector<35x16xf32>
    %335 = vector.extract_strided_slice %295 {offsets = [0, 0], sizes = [5, 16], strides = [1, 1]} : vector<40x16xf32> to vector<5x16xf32>
    %336 = tpu.concatenate %334, %335 in 0 : vector<35x16xf32>, vector<5x16xf32> -> vector<40x16xf32>
    %337 = arith.mulf %3, %1 : vector<40x1xf32>
    %338 = vector.broadcast %337 : vector<40x1xf32> to vector<40x16xf32>
    %339 = arith.mulf %336, %338 : vector<40x16xf32>
    %340 = tpu.concatenate %301, %306, %312, %317, %295, %322, %328, %333, %339 in 1 : vector<40x16xf32>, vector<40x16xf32>, vector<40x16xf32>, vector<40x16xf32>, vector<40x16xf32>, vector<40x16xf32>, vector<40x16xf32>, vector<40x16xf32>, vector<40x16xf32> -> vector<40x144xf32>
    %341 = tpu.concatenate %340, %91 in 1 : vector<40x144xf32>, vector<40x144xf32> -> vector<40x288xf32>
    %c0_70 = arith.constant 0 : index
    %c0_71 = arith.constant 0 : index
    %342 = vector.load %arg13[%c0_70, %c0_71] : memref<288x16xbf16, #tpu.memory_space<vmem>>, vector<288x16xbf16>
    %343 = arith.extf %342 : vector<288x16xbf16> to vector<288x16xf32>
    %cst_72 = arith.constant dense<0.000000e+00> : vector<40x16xf32>
    %344 = tpu.matmul %341, %343, %cst_72 {dimension_numbers = #tpu.dot_dimension_numbers<[1], [0], [0], [1], [0, 0, 1, 1], [], []>} : vector<40x288xf32>, vector<288x16xf32>, vector<40x16xf32> -> vector<40x16xf32>
    %c19 = arith.constant 19 : index
    %c0_73 = arith.constant 0 : index
    %345 = vector.load %arg2[%c19, %c0_73] : memref<63x256xf32, #tpu.memory_space<vmem>>, vector<1x16xf32>
    %346 = vector.broadcast %345 : vector<1x16xf32> to vector<40x16xf32>
    %347 = arith.mulf %344, %346 : vector<40x16xf32>
    %c20 = arith.constant 20 : index
    %c0_74 = arith.constant 0 : index
    %348 = vector.load %arg2[%c20, %c0_74] : memref<63x256xf32, #tpu.memory_space<vmem>>, vector<1x16xf32>
    %349 = vector.broadcast %348 : vector<1x16xf32> to vector<40x16xf32>
    %350 = arith.addf %347, %349 : vector<40x16xf32>
    %cst_75 = arith.constant 0.000000e+00 : f32
    %351 = vector.broadcast %cst_75 : f32 to vector<40x16xf32>
    %352 = arith.maximumf %350, %351 : vector<40x16xf32>
    %c0_76 = arith.constant 0 : index
    %c0_77 = arith.constant 0 : index
    %353 = vector.load %arg14[%c0_76, %c0_77] : memref<16x256xbf16, #tpu.memory_space<vmem>>, vector<16x256xbf16>
    %354 = arith.extf %353 : vector<16x256xbf16> to vector<16x256xf32>
    %cst_78 = arith.constant dense<0.000000e+00> : vector<40x256xf32>
    %355 = tpu.matmul %352, %354, %cst_78 {dimension_numbers = #tpu.dot_dimension_numbers<[1], [0], [0], [1], [0, 0, 1, 1], [], []>} : vector<40x16xf32>, vector<16x256xf32>, vector<40x256xf32> -> vector<40x256xf32>
    %c21 = arith.constant 21 : index
    %c0_79 = arith.constant 0 : index
    %356 = vector.load %arg2[%c21, %c0_79] : memref<63x256xf32, #tpu.memory_space<vmem>>, vector<1x256xf32>
    %357 = vector.broadcast %356 : vector<1x256xf32> to vector<40x256xf32>
    %358 = arith.addf %355, %357 : vector<40x256xf32>
    %359 = vector.extract_strided_slice %358 {offsets = [35, 0], sizes = [5, 256], strides = [1, 1]} : vector<40x256xf32> to vector<5x256xf32>
    %360 = vector.extract_strided_slice %358 {offsets = [0, 0], sizes = [35, 256], strides = [1, 1]} : vector<40x256xf32> to vector<35x256xf32>
    %361 = tpu.concatenate %359, %360 in 0 : vector<5x256xf32>, vector<35x256xf32> -> vector<40x256xf32>
    %362 = arith.mulf %2, %0 : vector<40x1xf32>
    %363 = vector.broadcast %362 : vector<40x1xf32> to vector<40x256xf32>
    %364 = arith.mulf %361, %363 : vector<40x256xf32>
    %365 = vector.extract_strided_slice %358 {offsets = [36, 0], sizes = [4, 256], strides = [1, 1]} : vector<40x256xf32> to vector<4x256xf32>
    %366 = vector.extract_strided_slice %358 {offsets = [0, 0], sizes = [36, 256], strides = [1, 1]} : vector<40x256xf32> to vector<36x256xf32>
    %367 = tpu.concatenate %365, %366 in 0 : vector<4x256xf32>, vector<36x256xf32> -> vector<40x256xf32>
    %368 = vector.broadcast %2 : vector<40x1xf32> to vector<40x256xf32>
    %369 = arith.mulf %367, %368 : vector<40x256xf32>
    %370 = vector.extract_strided_slice %358 {offsets = [37, 0], sizes = [3, 256], strides = [1, 1]} : vector<40x256xf32> to vector<3x256xf32>
    %371 = vector.extract_strided_slice %358 {offsets = [0, 0], sizes = [37, 256], strides = [1, 1]} : vector<40x256xf32> to vector<37x256xf32>
    %372 = tpu.concatenate %370, %371 in 0 : vector<3x256xf32>, vector<37x256xf32> -> vector<40x256xf32>
    %373 = arith.mulf %2, %1 : vector<40x1xf32>
    %374 = vector.broadcast %373 : vector<40x1xf32> to vector<40x256xf32>
    %375 = arith.mulf %372, %374 : vector<40x256xf32>
    %376 = vector.extract_strided_slice %358 {offsets = [39, 0], sizes = [1, 256], strides = [1, 1]} : vector<40x256xf32> to vector<1x256xf32>
    %377 = vector.extract_strided_slice %358 {offsets = [0, 0], sizes = [39, 256], strides = [1, 1]} : vector<40x256xf32> to vector<39x256xf32>
    %378 = tpu.concatenate %376, %377 in 0 : vector<1x256xf32>, vector<39x256xf32> -> vector<40x256xf32>
    %379 = vector.broadcast %0 : vector<40x1xf32> to vector<40x256xf32>
    %380 = arith.mulf %378, %379 : vector<40x256xf32>
    %381 = vector.extract_strided_slice %358 {offsets = [1, 0], sizes = [39, 256], strides = [1, 1]} : vector<40x256xf32> to vector<39x256xf32>
    %382 = vector.extract_strided_slice %358 {offsets = [0, 0], sizes = [1, 256], strides = [1, 1]} : vector<40x256xf32> to vector<1x256xf32>
    %383 = tpu.concatenate %381, %382 in 0 : vector<39x256xf32>, vector<1x256xf32> -> vector<40x256xf32>
    %384 = vector.broadcast %1 : vector<40x1xf32> to vector<40x256xf32>
    %385 = arith.mulf %383, %384 : vector<40x256xf32>
    %386 = vector.extract_strided_slice %358 {offsets = [3, 0], sizes = [37, 256], strides = [1, 1]} : vector<40x256xf32> to vector<37x256xf32>
    %387 = vector.extract_strided_slice %358 {offsets = [0, 0], sizes = [3, 256], strides = [1, 1]} : vector<40x256xf32> to vector<3x256xf32>
    %388 = tpu.concatenate %386, %387 in 0 : vector<37x256xf32>, vector<3x256xf32> -> vector<40x256xf32>
    %389 = arith.mulf %3, %0 : vector<40x1xf32>
    %390 = vector.broadcast %389 : vector<40x1xf32> to vector<40x256xf32>
    %391 = arith.mulf %388, %390 : vector<40x256xf32>
    %392 = vector.extract_strided_slice %358 {offsets = [4, 0], sizes = [36, 256], strides = [1, 1]} : vector<40x256xf32> to vector<36x256xf32>
    %393 = vector.extract_strided_slice %358 {offsets = [0, 0], sizes = [4, 256], strides = [1, 1]} : vector<40x256xf32> to vector<4x256xf32>
    %394 = tpu.concatenate %392, %393 in 0 : vector<36x256xf32>, vector<4x256xf32> -> vector<40x256xf32>
    %395 = vector.broadcast %3 : vector<40x1xf32> to vector<40x256xf32>
    %396 = arith.mulf %394, %395 : vector<40x256xf32>
    %397 = vector.extract_strided_slice %358 {offsets = [5, 0], sizes = [35, 256], strides = [1, 1]} : vector<40x256xf32> to vector<35x256xf32>
    %398 = vector.extract_strided_slice %358 {offsets = [0, 0], sizes = [5, 256], strides = [1, 1]} : vector<40x256xf32> to vector<5x256xf32>
    %399 = tpu.concatenate %397, %398 in 0 : vector<35x256xf32>, vector<5x256xf32> -> vector<40x256xf32>
    %400 = arith.mulf %3, %1 : vector<40x1xf32>
    %401 = vector.broadcast %400 : vector<40x1xf32> to vector<40x256xf32>
    %402 = arith.mulf %399, %401 : vector<40x256xf32>
    %403 = tpu.concatenate %364, %369, %375, %380, %358, %385, %391, %396, %402 in 1 : vector<40x256xf32>, vector<40x256xf32>, vector<40x256xf32>, vector<40x256xf32>, vector<40x256xf32>, vector<40x256xf32>, vector<40x256xf32>, vector<40x256xf32>, vector<40x256xf32> -> vector<40x2304xf32>
    %c0_80 = arith.constant 0 : index
    %c0_81 = arith.constant 0 : index
    %404 = vector.load %arg15[%c0_80, %c0_81] : memref<2304x15xbf16, #tpu.memory_space<vmem>>, vector<2304x15xbf16>
    %405 = arith.extf %404 : vector<2304x15xbf16> to vector<2304x15xf32>
    %cst_82 = arith.constant dense<0.000000e+00> : vector<40x15xf32>
    %406 = tpu.matmul %403, %405, %cst_82 {dimension_numbers = #tpu.dot_dimension_numbers<[1], [0], [0], [1], [0, 0, 1, 1], [], []>} : vector<40x2304xf32>, vector<2304x15xf32>, vector<40x15xf32> -> vector<40x15xf32>
    %c22 = arith.constant 22 : index
    %c0_83 = arith.constant 0 : index
    %407 = vector.load %arg2[%c22, %c0_83] : memref<63x256xf32, #tpu.memory_space<vmem>>, vector<1x15xf32>
    %408 = vector.broadcast %407 : vector<1x15xf32> to vector<40x15xf32>
    %409 = arith.addf %406, %408 : vector<40x15xf32>
    %c0_84 = arith.constant 0 : index
    %c0_85 = arith.constant 0 : index
    %410 = vector.load %arg16[%c0_84, %c0_85] : memref<40x15xf32, #tpu.memory_space<vmem>>, vector<40x15xf32>
    tpu.vector_store %arg16[%c0_84, %c0_85], %409 {strides = array<i32>} : memref<40x15xf32, #tpu.memory_space<vmem>>, vector<40x15xf32>,
    return
  }
  func.func @transform_0(%arg0: i32) -> (i32, i32) {
    %c0_i32 = arith.constant 0 : i32
    %c0_i32_0 = arith.constant 0 : i32
    %c0_i32_1 = arith.constant 0 : i32
    return %c0_i32, %c0_i32_0 : i32, i32
  }
  func.func @transform_1(%arg0: i32) -> (i32, i32) {
    %c0_i32 = arith.constant 0 : i32
    %c0_i32_0 = arith.constant 0 : i32
    %c0_i32_1 = arith.constant 0 : i32
    return %c0_i32, %c0_i32_0 : i32, i32
  }
  func.func @transform_2(%arg0: i32) -> (i32, i32) {
    %c0_i32 = arith.constant 0 : i32
    %c0_i32_0 = arith.constant 0 : i32
    %c0_i32_1 = arith.constant 0 : i32
    return %c0_i32, %c0_i32_0 : i32, i32
  }
  func.func @transform_3(%arg0: i32) -> (i32, i32) {
    %c0_i32 = arith.constant 0 : i32
    %c0_i32_0 = arith.constant 0 : i32
    %c0_i32_1 = arith.constant 0 : i32
    return %c0_i32, %c0_i32_0 : i32, i32
  }
  func.func @transform_4(%arg0: i32) -> (i32, i32) {
    %c0_i32 = arith.constant 0 : i32
    %c0_i32_0 = arith.constant 0 : i32
    %c0_i32_1 = arith.constant 0 : i32
    return %c0_i32, %c0_i32_0 : i32, i32
  }
  func.func @transform_5(%arg0: i32) -> (i32, i32) {
    %c0_i32 = arith.constant 0 : i32
    %c0_i32_0 = arith.constant 0 : i32
    %c0_i32_1 = arith.constant 0 : i32
    return %c0_i32, %c0_i32_0 : i32, i32
  }
  func.func @transform_6(%arg0: i32) -> (i32, i32) {
    %c0_i32 = arith.constant 0 : i32
    %c0_i32_0 = arith.constant 0 : i32
    %c0_i32_1 = arith.constant 0 : i32
    return %c0_i32, %c0_i32_0 : i32, i32
  }
  func.func @transform_7(%arg0: i32) -> (i32, i32) {
    %c0_i32 = arith.constant 0 : i32
    %c0_i32_0 = arith.constant 0 : i32
    %c0_i32_1 = arith.constant 0 : i32
    return %c0_i32, %c0_i32_0 : i32, i32
  }
  func.func @transform_8(%arg0: i32) -> (i32, i32) {
    %c0_i32 = arith.constant 0 : i32
    %c0_i32_0 = arith.constant 0 : i32
    %c0_i32_1 = arith.constant 0 : i32
    return %c0_i32, %c0_i32_0 : i32, i32
  }
  func.func @transform_9(%arg0: i32) -> (i32, i32) {
    %c0_i32 = arith.constant 0 : i32
    %c0_i32_0 = arith.constant 0 : i32
    %c0_i32_1 = arith.constant 0 : i32
    return %c0_i32, %c0_i32_0 : i32, i32
  }
  func.func @transform_10(%arg0: i32) -> (i32, i32) {
    %c0_i32 = arith.constant 0 : i32
    %c0_i32_0 = arith.constant 0 : i32
    %c0_i32_1 = arith.constant 0 : i32
    return %c0_i32, %c0_i32_0 : i32, i32
  }
  func.func @transform_11(%arg0: i32) -> (i32, i32) {
    %c0_i32 = arith.constant 0 : i32
    %c0_i32_0 = arith.constant 0 : i32
    %c0_i32_1 = arith.constant 0 : i32
    return %c0_i32, %c0_i32_0 : i32, i32
  }
  func.func @transform_12(%arg0: i32) -> (i32, i32) {
    %c0_i32 = arith.constant 0 : i32
    %c0_i32_0 = arith.constant 0 : i32
    %c0_i32_1 = arith.constant 0 : i32
    return %c0_i32, %c0_i32_0 : i32, i32
  }
  func.func @transform_13(%arg0: i32) -> (i32, i32) {
    %c0_i32 = arith.constant 0 : i32
    %c0_i32_0 = arith.constant 0 : i32
    %c0_i32_1 = arith.constant 0 : i32
    return %c0_i32, %c0_i32_0 : i32, i32
  }
  func.func @transform_14(%arg0: i32) -> (i32, i32) {
    %c0_i32 = arith.constant 0 : i32
    %c0_i32_0 = arith.constant 0 : i32
    %c0_i32_1 = arith.constant 0 : i32
    return %c0_i32, %c0_i32_0 : i32, i32
  }
  func.func @transform_15(%arg0: i32) -> (i32, i32) {
    %c0_i32 = arith.constant 0 : i32
    %c0_i32_0 = arith.constant 0 : i32
    %c0_i32_1 = arith.constant 0 : i32
    return %c0_i32, %c0_i32_0 : i32, i32
  }
}

</mosaic_0001>

<bundles_post_ra>
// kernel: dae_forward.1
= control target key start
LH: loop header
LB: loop body
LE: loop exit
PB: predicated region body
PF: predicated region fallthrough
CT: control target
= control target key end

     0   :  { %v13224_v0 = vmov 0.0   ;;  %vm362_vm0 = vcmask 1040384   ;;  %vm9285_vm1 = vmmov 0   ;;  %v9286_v5 = vmov 2   ;;  %s9288_s27 = smov 1   ;;  %s9289_s17 = smov 3   ;;  %s13207_s2 = inlined_call_operand.vmem [shape: bf16[9,16], index: 2, kind: input, shape index: {}]   ;;  %s13208_s0 = inlined_call_operand.vmem [shape: f32[600,9], index: 0, kind: input, shape index: {}]   ;;  %s13209_s1 = inlined_call_operand.vmem [shape: f32[63,256], index: 1, kind: input, shape index: {}]   ;;  %s13210_s3 = inlined_call_operand.vmem [shape: bf16[144,32], index: 3, kind: input, shape index: {}]   ;;  %s13211_s4 = inlined_call_operand.vmem [shape: bf16[96,64], index: 4, kind: input, shape index: {}]   ;;  %s13212_s5 = inlined_call_operand.vmem [shape: bf16[192,128], index: 5, kind: input, shape index: {}]   ;;  %s13213_s6 = inlined_call_operand.vmem [shape: bf16[384,256], index: 6, kind: input, shape index: {}]   ;;  %s13214_s7 = inlined_call_operand.vmem [shape: bf16[768,128], index: 7, kind: input, shape index: {}]   ;;  %s13215_s8 = inlined_call_operand.vmem [shape: bf16[768,64], index: 8, kind: input, shape index: {}]   ;;  %s13216_s9 = inlined_call_operand.vmem [shape: bf16[384,32], index: 9, kind: input, shape index: {}]   ;;  %s13217_s10 = inlined_call_operand.vmem [shape: bf16[192,16], index: 10, kind: input, shape index: {}]   ;;  %s13218_s11 = inlined_call_operand.vmem [shape: bf16[16,80], index: 11, kind: input, shape index: {}]   ;;  %s13219_s12 = inlined_call_operand.vmem [shape: bf16[288,16], index: 12, kind: input, shape index: {}]   ;;  %s13220_s13 = inlined_call_operand.vmem [shape: bf16[16,256], index: 13, kind: input, shape index: {}]   ;;  %s13221_s14 = inlined_call_operand.vmem [shape: bf16[2304,15], index: 14, kind: input, shape index: {}]   ;;  %s13222_s15 = inlined_call_operand.vmem [shape: f32[40,15], index: 15, kind: output, shape index: {}]  }
   0x1   :  { %8838 = vmatprep.subr.mxu0 %v13224_v0  ;;  %v133_v1 = vld [vmem:[%s13207_s2 + $0x4] sm:$0x1]  ;;  %v132_v2 = vld [vmem:[%s13207_s2] sm:$0xf]  ;;  %8842 = vmatprep.mubr.msk.f32.mxu0 %vm9285_vm1, %v13224_v0  ;;  %v13223_v6 = vmov 0   ;;  %vm136_vm2 = vcmask 72704  }
   0x2   :  { %v135_v3 = vunpack.c.l.bf16 %v133_v1  ;;  %v134_v4 = vunpack.c.l.bf16 %v132_v2  ;;  %1828 = vmatprep.subr.mxu1 %v13224_v0  ;;  %9175 = vset.pattern.permute.xlu1 %v9286_v5  ;;  %v57_v7 = vld [vmem:[%s13208_s0] sm:$0xff]  ;;  %v58_v9 = vld [vmem:[%s13208_s0 + $0x8] sm:$0xff]  ;;  %v59_v11 = vld [vmem:[%s13208_s0 + $0x10] sm:$0xff]  ;;  %s9290_s21 = smov 2   ;;  %v9291_v24 = vmov 1   ;;  %v9292_v33 = vmov 3  }
   0x3   :  { %9176 = vset.pattern.permute.xlu0 %v13223_v6  ;;  %v9401_v8 = vld [vmem:[%s13209_s1 + $0x40] sm:$0xff]  ;;  %v9425_v12 = vld [vmem:[%s13209_s1 + $0x30] sm:$0xff]  ;;  %v60_v14 = vld [vmem:[%s13208_s0 + $0x18] sm:$0xff]  ;;  %vm1258_vm3 = vcmask 1042432   ;;  %vm1202_vm4 = vcmask 1043456   ;;  %vm1397_vm5 = vcmask 1046528  }
   0x4   :  { %8839 = vmatpush3.msk.msra.mxu0 %vm362_vm0, %v135_v3  ;;  %1277 = vrot.lane.b32.xlu1 %v9401_v8, %s9288_s27  ;;  %v9412_v10 = vld [vmem:[%s13209_s1 + $0x20] sm:$0x80]  ;;  %v9430_v13 = vld [vmem:[%s13209_s1 + $0x50] sm:$0xff]  ;;  %v62_v18 = vld [vmem:[%s13208_s0 + $0x28] sm:$0xff]  ;;  %s9293_s20 = smov 64   ;;  %vm1735_vm6 = vcmask 130048  }
   0x5   :  { %8840 = vmatprep.subr.mxu0 %v13224_v0  ;;  %1273 = vrot.lane.b32.xlu0 %v9412_v10, %s9288_s27  ;;  %v9443_v15 = vld [vmem:[%s13209_s1 + $0x60] sm:$0xff]  ;;  %v9456_v17 = vld [vmem:[%s13209_s1 + $0x70] sm:$0x7f]  ;;  %v64_v20 = vld [vmem:[%s13208_s0 + $0x38] sm:$0xff]  ;;  %vm1110_vm7 = vcmask 1044480   ;;  %s9296_s22 = smov 80  }
   0x6   :  { %8841 = vmatpush3.msra.mxu0 %v134_v4  ;;  %v61_v16 = vld [vmem:[%s13208_s0 + $0x20] sm:$0xff]  ;;  %v63_v19 = vld [vmem:[%s13208_s0 + $0x30] sm:$0xff]  ;;  %v66_v22 = vld [vmem:[%s13208_s0 + $0x48] sm:$0xff]  ;;  %s9297_s23 = smov 96   ;;  %s9298_s2 = smov 48   ;;  %vm1741_vm8 = vcmask 261120  }
   0x7   :  { %8843 = vmatmul.mubr.msk.f32.vlgmr.msra.gmra.mxu0 %vm136_vm2, %v57_v7  ;;  %v65_v21 = vld [vmem:[%s13208_s0 + $0x40] sm:$0xff]  ;;  %v67_v23 = vld [vmem:[%s13208_s0 + $0x50] sm:$0xff]  ;;  %v68_v25 = vld [vmem:[%s13208_s0 + $0x58] sm:$0xff]  ;;  %s9299_s26 = smov 112   ;;  %vm1747_vm9 = vcmask 392192   ;;  %vm1753_vm10 = vcmask 523264  }
   0x8   :  { %8845 = vmatprep.mubr.msk.f32.mxu0 %vm9285_vm1, %v13224_v0  ;;  %1453 = vrot.lane.b32.xlu1 %v9412_v10, %s9289_s17  ;;  %v69_v26 = vld [vmem:[%s13208_s0 + $0x60] sm:$0xff]  ;;  %v70_v27 = vld [vmem:[%s13208_s0 + $0x68] sm:$0xff]  ;;  %v71_v28 = vld [vmem:[%s13208_s0 + $0x70] sm:$0xff]  ;;  %vm1759_vm11 = vcmask 654336   ;;  %vm1765_vm12 = vcmask 785408   ;;  %vm1771_vm13 = vcmask 916480  }
   0x9   :  { %1275 = vrot.lane.b32.xlu0 %v9425_v12, %s9288_s27  ;;  %v72_v29 = vld [vmem:[%s13208_s0 + $0x78] sm:$0xff]  ;;  %v73_v30 = vld [vmem:[%s13208_s0 + $0x80] sm:$0xff]  ;;  %v74_v31 = vld [vmem:[%s13208_s0 + $0x88] sm:$0xff]  ;;  %vm6296_vm14 = vcmask 121856  }
   0xa   :  { %v75_v32 = vld [vmem:[%s13208_s0 + $0x90] sm:$0xff]  ;;  %v76_v34 = vld [vmem:[%s13208_s0 + $0x98] sm:$0xff]  ;;  %v77_v35 = vld [vmem:[%s13208_s0 + $0xa0] sm:$0xff] }
   0xb   :  { %8846 = vmatmul.mubr.msk.f32.gmra.mxu0 %vm136_vm2, %v58_v9  ;;  %v78_v36 = vld [vmem:[%s13208_s0 + $0xa8] sm:$0xff]  ;;  %v79_v37 = vld [vmem:[%s13208_s0 + $0xb0] sm:$0xff]  ;;  %v80_v38 = vld [vmem:[%s13208_s0 + $0xb8] sm:$0xff] }
   0xc   :  { %8848 = vmatprep.mubr.msk.f32.mxu0 %vm9285_vm1, %v13224_v0  ;;  %1279 = vrot.lane.b32.xlu1 %v9430_v13, %s9288_s27  ;;  %v81_v39 = vld [vmem:[%s13208_s0 + $0xc0] sm:$0xff]  ;;  %v82_v40 = vld [vmem:[%s13208_s0 + $0xc8] sm:$0xff]  ;;  %v83_v41 = vld [vmem:[%s13208_s0 + $0xd0] sm:$0xff] }
   0xd   :  { %1455 = vrot.lane.b32.xlu0 %v9425_v12, %s9289_s17  ;;  %v84_v42 = vld [vmem:[%s13208_s0 + $0xd8] sm:$0xff]  ;;  %v85_v43 = vld [vmem:[%s13208_s0 + $0xe0] sm:$0xff]  ;;  %v86_v44 = vld [vmem:[%s13208_s0 + $0xe8] sm:$0xff] }
   0xe   :  { %v87_v47 = vld [vmem:[%s13208_s0 + $0xf0] sm:$0xff]  ;;  %v88_v52 = vld [vmem:[%s13208_s0 + $0xf8] sm:$0xff]  ;;  %v89_v57 = vld [vmem:[%s13208_s0 + $0x100] sm:$0xff] }
   0xf   :  { %8849 = vmatmul.mubr.msk.f32.gmra.mxu0 %vm136_vm2, %v59_v11  ;;  %v90_v61 = vld [vmem:[%s13208_s0 + $0x108] sm:$0xff]  ;;  %v91_v2 = vld [vmem:[%s13208_s0 + $0x110] sm:$0xff]  ;;  %v92_v7 = vld [vmem:[%s13208_s0 + $0x118] sm:$0xff] }
  0x10   :  { %8851 = vmatprep.mubr.msk.f32.mxu0 %vm9285_vm1, %v13224_v0  ;;  %1281 = vrot.lane.b32.xlu1 %v9443_v15, %s9288_s27 }
  0x11   :  { %1457 = vrot.lane.b32.xlu0 %v9401_v8, %s9289_s17 }
  0x13   :  { %8852 = vmatmul.mubr.msk.f32.gmra.mxu0 %vm136_vm2, %v60_v14  ;;  %v93_v14 = vld [vmem:[%s13208_s0 + $0x120] sm:$0xff] }
  0x14   :  { %8854 = vmatprep.mubr.msk.f32.mxu0 %vm9285_vm1, %v13224_v0  ;;  %1283 = vrot.lane.b32.xlu1 %v9456_v17, %s9288_s27 }
  0x15   :  { %1459 = vrot.lane.b32.xlu0 %v9430_v13, %s9289_s17 }
  0x17   :  { %8855 = vmatmul.mubr.msk.f32.gmra.mxu0 %vm136_vm2, %v61_v16  ;;  %v94_v16 = vld [vmem:[%s13208_s0 + $0x128] sm:$0xff] }
  0x18   :  { %8857 = vmatprep.mubr.msk.f32.mxu0 %vm9285_vm1, %v13224_v0  ;;  %1463 = vrot.lane.b32.xlu1 %v9456_v17, %s9289_s17 }
  0x19   :  { %1461 = vrot.lane.b32.xlu0 %v9443_v15, %s9289_s17  ;;  %s9294_s17 = smov 16  }
  0x1b   :  { %8858 = vmatmul.mubr.msk.f32.gmra.mxu0 %vm136_vm2, %v62_v18 }
  0x1c   :  { %8860 = vmatprep.mubr.msk.f32.mxu0 %vm9285_vm1, %v13224_v0  ;;  %1133 = vrot.lane.b32.xlu1 %v9425_v12, %s9290_s21 }
  0x1d   :  { %1131 = vrot.lane.b32.xlu0 %v9412_v10, %s9290_s21 }
  0x1f   :  { %8861 = vmatmul.mubr.msk.f32.gmra.mxu0 %vm136_vm2, %v63_v19  ;;  %v96_v19 = vld [vmem:[%s13208_s0 + $0x138] sm:$0xff] }
  0x20   :  { %8863 = vmatprep.mubr.msk.f32.mxu0 %vm9285_vm1, %v13224_v0  ;;  %1221 = vperm.xlu1 %9175, %v9425_v12  }
  0x21   :  { %1359 = vperm.xlu0 %9176, %v9412_v10  }
  0x23   :  { %8864 = vmatmul.mubr.msk.f32.gmra.mxu0 %vm136_vm2, %v64_v20 }
  0x24   :  { %8866 = vmatprep.mubr.msk.f32.mxu0 %vm9285_vm1, %v13224_v0  ;;  %1135 = vrot.lane.b32.xlu1 %v9401_v8, %s9290_s21 }
  0x25   :  { %9177 = vset.pattern.permute.xlu1 %v13223_v6  ;;  %1365 = vperm.xlu0 %9176, %v9401_v8  }
  0x27   :  { %8867 = vmatmul.mubr.msk.f32.gmra.mxu0 %vm136_vm2, %v65_v21  ;;  %v97_v21 = vld [vmem:[%s13208_s0 + $0x140] sm:$0xff] }
  0x28   :  { %8869 = vmatprep.mubr.msk.f32.mxu0 %vm9285_vm1, %v13224_v0  ;;  %1362 = vperm.xlu1 %9177, %v9425_v12  }
  0x29   :  { %9180 = vset.pattern.permute.xlu0 %v9291_v24 }
  0x2a   :  { %1415 = vperm.xlu0 %9180, %v9412_v10  }
  0x2b   :  { %8870 = vmatmul.mubr.msk.f32.gmra.mxu0 %vm136_vm2, %v66_v22 }
  0x2c   :  { %8872 = vmatprep.mubr.msk.f32.mxu0 %vm9285_vm1, %v13224_v0  ;;  %9178 = vset.pattern.permute.xlu1 %v9286_v5 }
  0x2d   :  { %1224 = vperm.xlu1 %9178, %v9401_v8  }
  0x2e   :  { %1424 = vperm.xlu0 %9180, %v9430_v13  }
  0x2f   :  { %8873 = vmatmul.mubr.msk.f32.gmra.mxu0 %vm136_vm2, %v67_v23  ;;  %v98_v23 = vld [vmem:[%s13208_s0 + $0x148] sm:$0xff] }
  0x30   :  { %8875 = vmatprep.mubr.msk.f32.mxu0 %vm9285_vm1, %v13224_v0 }
  0x31   :  { %9179 = vset.pattern.permute.xlu1 %v9291_v24 }
  0x32   :  { %1418 = vperm.xlu1 %9179, %v9425_v12   ;;  %9185 = vset.pattern.permute.xlu0 %v9292_v33 }
  0x33   :  { %8876 = vmatmul.mubr.msk.f32.gmra.mxu0 %vm136_vm2, %v68_v25  ;;  %1529 = vperm.xlu0 %9185, %v9401_v8   ;;  %v99_v25 = vld [vmem:[%s13208_s0 + $0x150] sm:$0xff] }
  0x34   :  { %8878 = vmatprep.mubr.msk.f32.mxu0 %vm9285_vm1, %v13224_v0 }
  0x36   :  { %1137 = vrot.lane.b32.xlu1 %v9430_v13, %s9290_s21 }
  0x37   :  { %8879 = vmatmul.mubr.msk.f32.gmra.mxu0 %vm136_vm2, %v69_v26  ;;  %9181 = vset.pattern.permute.xlu1 %v9292_v33 }
  0x38   :  { %8881 = vmatprep.mubr.msk.f32.mxu0 %vm9285_vm1, %v13224_v0  ;;  %1141 = vrot.lane.b32.xlu0 %v9456_v17, %s9290_s21 }
  0x3a   :  { %1523 = vperm.xlu1 %9181, %v9412_v10  }
  0x3b   :  { %8882 = vmatmul.mubr.msk.f32.gmra.mxu0 %vm136_vm2, %v70_v27  ;;  %v100_v27 = vld [vmem:[%s13208_s0 + $0x158] sm:$0xff] }
  0x3c   :  { %8884 = vmatprep.mubr.msk.f32.mxu0 %vm9285_vm1, %v13224_v0  ;;  %1532 = vperm.xlu0 %9185, %v9430_v13  }
  0x3e   :  { %1526 = vperm.xlu1 %9181, %v9425_v12  }
  0x3f   :  { %8885 = vmatmul.mubr.msk.f32.gmra.mxu0 %vm136_vm2, %v71_v28 }
  0x40   :  { %8887 = vmatprep.mubr.msk.f32.mxu0 %vm9285_vm1, %v13224_v0  ;;  %1535 = vperm.xlu0 %9185, %v9443_v15  }
  0x42   :  { %9182 = vset.pattern.permute.xlu1 %v9291_v24 }
  0x43   :  { %8888 = vmatmul.mubr.msk.f32.gmra.mxu0 %vm136_vm2, %v72_v29  ;;  %1421 = vperm.xlu1 %9182, %v9401_v8  }
  0x44   :  { %8890 = vmatprep.mubr.msk.f32.mxu0 %vm9285_vm1, %v13224_v0  ;;  %9190 = vset.pattern.permute.xlu0 %v9286_v5 }
  0x45   :  { %1218 = vperm.xlu0 %9190, %v9412_v10  }
  0x47   :  { %8891 = vmatmul.mubr.msk.f32.gmra.mxu0 %vm136_vm2, %v73_v30  ;;  %1139 = vrot.lane.b32.xlu1 %v9443_v15, %s9290_s21  ;;  %v101_v30 = vld [vmem:[%s13208_s0 + $0x160] sm:$0xff]  ;;  %s9295_s21 = smov 32  }
  0x48   :  { %8893 = vmatprep.mubr.msk.f32.mxu0 %vm9285_vm1, %v13224_v0  ;;  %9183 = vset.pattern.permute.xlu1 %v13223_v6 }
  0x4b   :  { %8894 = vmatmul.mubr.msk.f32.gmra.mxu0 %vm136_vm2, %v74_v31  ;;  %1368 = vperm.xlu1 %9183, %v9430_v13  }
  0x4c   :  { %8896 = vmatprep.mubr.msk.f32.mxu0 %vm9285_vm1, %v13224_v0 }
  0x4f   :  { %8897 = vmatmul.mubr.msk.f32.gmra.mxu0 %vm136_vm2, %v75_v32  ;;  %9184 = vset.pattern.permute.xlu1 %v9286_v5 }
  0x50   :  { %8899 = vmatprep.mubr.msk.f32.mxu0 %vm9285_vm1, %v13224_v0  ;;  %1230 = vperm.xlu1 %9184, %v9443_v15  }
  0x53   :  { %8900 = vmatmul.mubr.msk.f32.gmra.mxu0 %vm136_vm2, %v76_v34 }
  0x54   :  { %8902 = vmatprep.mubr.msk.f32.mxu0 %vm9285_vm1, %v13224_v0  ;;  %9186 = vset.pattern.permute.xlu1 %v13223_v6 }
  0x55   :  { %1371 = vperm.xlu1 %9186, %v9443_v15  }
  0x57   :  { %8903 = vmatmul.mubr.msk.f32.gmra.mxu0 %vm136_vm2, %v77_v35  ;;  %v102_v35 = vld [vmem:[%s13208_s0 + $0x168] sm:$0xff] }
  0x58   :  { %8905 = vmatprep.mubr.msk.f32.mxu0 %vm9285_vm1, %v13224_v0 }
  0x59   :  { %9187 = vset.pattern.permute.xlu1 %v9286_v5 }
  0x5a   :  { %1233 = vperm.xlu1 %9187, %v9456_v17  }
  0x5b   :  { %8906 = vmatmul.mubr.msk.f32.gmra.mxu0 %vm136_vm2, %v78_v36 }
  0x5c   :  { %8908 = vmatprep.mubr.msk.f32.mxu0 %vm9285_vm1, %v13224_v0 }
  0x5e   :  { %9188 = vset.pattern.permute.xlu1 %v9291_v24 }
  0x5f   :  { %8909 = vmatmul.mubr.msk.f32.gmra.mxu0 %vm136_vm2, %v79_v37  ;;  %1427 = vperm.xlu1 %9188, %v9443_v15  }
  0x60   :  { %8911 = vmatprep.mubr.msk.f32.mxu0 %vm9285_vm1, %v13224_v0 }
  0x63   :  { %8912 = vmatmul.mubr.msk.f32.gmra.mxu0 %vm136_vm2, %v80_v38  ;;  %9189 = vset.pattern.permute.xlu1 %v13223_v6  ;;  %v103_v38 = vld [vmem:[%s13208_s0 + $0x170] sm:$0xff] }
  0x64   :  { %8914 = vmatprep.mubr.msk.f32.mxu0 %vm9285_vm1, %v13224_v0  ;;  %1374 = vperm.xlu1 %9189, %v9456_v17  }
  0x67   :  { %8915 = vmatmul.mubr.msk.f32.gmra.mxu0 %vm136_vm2, %v81_v39 }
  0x68   :  { %8917 = vmatprep.mubr.msk.f32.mxu0 %vm9285_vm1, %v13224_v0  ;;  %9191 = vset.pattern.permute.xlu1 %v9286_v5 }
  0x6b   :  { %8918 = vmatmul.mubr.msk.f32.gmra.mxu0 %vm136_vm2, %v82_v40  ;;  %v104_v40 = vld [vmem:[%s13208_s0 + $0x178] sm:$0xff] }
  0x6c   :  { %8920 = vmatprep.mubr.msk.f32.mxu0 %vm9285_vm1, %v13224_v0 }
  0x6f   :  { %8921 = vmatmul.mubr.msk.f32.gmra.mxu0 %vm136_vm2, %v83_v41  ;;  %v105_v41 = vld [vmem:[%s13208_s0 + $0x180] sm:$0xff] }
  0x70   :  { %8923 = vmatprep.mubr.msk.f32.mxu0 %vm9285_vm1, %v13224_v0 }
  0x73   :  { %8924 = vmatmul.mubr.msk.f32.gmra.mxu0 %vm136_vm2, %v84_v42 }
  0x74   :  { %8926 = vmatprep.mubr.msk.f32.mxu0 %vm9285_vm1, %v13224_v0 }
  0x76   :  { %v1278_v45 = vpop.permute.xlu1 %1277 }
  0x77   :  { %8927 = vmatmul.mubr.msk.f32.gmra.mxu0 %vm136_vm2, %v85_v43  ;;  %v1274_v46 = vpop.permute.xlu0 %1273  ;;  %v1293_v49 = vmul.f32 %v1278_v45, %v9401_v8 }
  0x78   :  { %8929 = vmatprep.mubr.msk.f32.mxu0 %vm9285_vm1, %v13224_v0  ;;  %v1291_v48 = vmul.f32 %v1274_v46, %v9412_v10 }
  0x7a   :  { %v1454_v50 = vpop.permute.xlu1 %1453  ;;  %1299 = vperm.xlu1 %9191, %v1291_v48   ;;  %v107_v48 = vld [vmem:[%s13208_s0 + $0x190] sm:$0xff] }
  0x7b   :  { %8930 = vmatmul.mubr.msk.f32.gmra.mxu0 %vm136_vm2, %v86_v44  ;;  %v1276_v51 = vpop.permute.xlu0 %1275  ;;  %v1471_v55 = vmul.f32 %v1454_v50, %v9412_v10  ;;  %v106_v44 = vld [vmem:[%s13208_s0 + $0x188] sm:$0xff] }
  0x7c   :  { %8932 = vmatprep.mubr.msk.f32.mxu0 %vm9285_vm1, %v13224_v0  ;;  %v1292_v53 = vmul.f32 %v1276_v51, %v9425_v12 }
  0x7e   :  { %v1280_v54 = vpop.permute.xlu1 %1279  ;;  %1303 = vperm.xlu0 %9190, %v1292_v53   ;;  %1307 = vperm.xlu1 %9191, %v1293_v49  }
  0x7f   :  { %8933 = vmatmul.mubr.msk.f32.gmra.mxu0 %vm136_vm2, %v87_v47  ;;  %v1456_v56 = vpop.permute.xlu0 %1455  ;;  %v1294_v63 = vmul.f32 %v1280_v54, %v9430_v13 }
  0x80   :  { %8935 = vmatprep.mubr.msk.f32.mxu0 %vm9285_vm1, %v13224_v0  ;;  %v1472_v58 = vmul.f32 %v1456_v56, %v9425_v12 }
  0x82   :  { %v1282_v59 = vpop.permute.xlu1 %1281  ;;  %9192 = vset.pattern.permute.xlu0 %v9292_v33  ;;  %9193 = vset.pattern.permute.xlu1 %v9292_v33 }
  0x83   :  { %8936 = vmatmul.mubr.msk.f32.gmra.mxu0 %vm136_vm2, %v88_v52  ;;  %1479 = vperm.xlu0 %9192, %v1471_v55   ;;  %v1458_v60 = vpop.permute.xlu0 %1457  ;;  %v1295_v3 = vmul.f32 %v1282_v59, %v9443_v15  ;;  %v9849_v55 = vld [vmem:[%s13209_s1] ss:$0 sm:$0xff]  ;;  %v110_v59 = vld [vmem:[%s13208_s0 + $0x1a8] sm:$0xff] }
  0x84   :  { %8938 = vmatprep.mubr.msk.f32.mxu0 %vm9285_vm1, %v13224_v0  ;;  %v1473_v62 = vmul.f32 %v1458_v60, %v9401_v8  ;;  %1483 = vperm.xlu1 %9193, %v1472_v58   ;;  %v9861_v60 = vld [vmem:[%s13209_s1 + $0x1] ss:$0 sm:$0xff] }
  0x86   :  { %v9694_v1 = vpop.permute.xlu1 %1283 }
  0x87   :  { %8939 = vmatmul.mubr.msk.f32.gmra.mxu0 %vm136_vm2, %v89_v57  ;;  %1487 = vperm.xlu0 %9192, %v1473_v62   ;;  %v1460_v29 = vpop.permute.xlu0 %1459  ;;  %v1296_v39 = vmul.f32 %v9694_v1, %v9456_v17 }
  0x88   :  { %8941 = vmatprep.mubr.msk.f32.mxu0 %vm9285_vm1, %v13224_v0  ;;  %9194 = vset.pattern.permute.xlu1 %v9286_v5  ;;  %v1474_v34 = vmul.f32 %v1460_v29, %v9430_v13 }
  0x89   :  { %1311 = vperm.xlu1 %9194, %v1294_v63  }
  0x8a   :  { %v9704_v4 = vpop.permute.xlu1 %1463 }
  0x8b   :  { %8942 = vmatmul.mubr.msk.f32.gmra.mxu0 %vm136_vm2, %v90_v61  ;;  %1538 = vperm.xlu0 %9192, %v9456_v17   ;;  %v1462_v36 = vpop.permute.xlu0 %1461 }
  0x8c   :  { %8944 = vmatprep.mubr.msk.f32.mxu0 %vm9285_vm1, %v13224_v0  ;;  %v1475_v37 = vmul.f32 %v1462_v36, %v9443_v15 }
  0x8d   :  { %1315 = vperm.xlu1 %9194, %v1295_v3  }
  0x8e   :  { %v1134_v9 = vpop.permute.xlu1 %1133 }
  0x8f   :  { %8945 = vmatmul.mubr.msk.f32.gmra.mxu0 %vm136_vm2, %v91_v2  ;;  %v1150_v11 = vmul.f32 %v1134_v9, %v9425_v12  ;;  %v95_v12 = vld [vmem:[%s13208_s0 + $0x130] sm:$0xff]  ;;  %v1132_v43 = vpop.permute.xlu0 %1131 }
  0x90   :  { %8947 = vmatprep.mubr.msk.f32.mxu0 %vm9285_vm1, %v13224_v0  ;;  %v1149_v45 = vmul.f32 %v1132_v43, %v9412_v10  ;;  %v108_v10 = vld [vmem:[%s13208_s0 + $0x198] sm:$0xff] }
  0x91   :  { %1565 = vperm.xlu0 %9192, %v1150_v11   ;;  %9195 = vset.pattern.permute.xlu1 %v9292_v33 }
  0x92   :  { %1491 = vperm.xlu1 %9195, %v1474_v34  }
  0x93   :  { %8948 = vmatmul.mubr.msk.f32.gmra.mxu0 %vm136_vm2, %v92_v7 }
  0x94   :  { %8950 = vmatprep.mubr.msk.f32.mxu0 %vm9285_vm1, %v13224_v0 }
  0x96   :  { %1495 = vperm.xlu1 %9195, %v1475_v37  }
  0x97   :  { %8951 = vmatmul.mubr.msk.f32.gmra.mxu0 %vm136_vm2, %v93_v14 }
  0x98   :  { %8953 = vmatprep.mubr.msk.f32.mxu0 %vm9285_vm1, %v13224_v0 }
  0x9a   :  { %9196 = vset.pattern.permute.xlu1 %v9291_v24 }
  0x9b   :  { %8954 = vmatmul.mubr.msk.f32.gmra.mxu0 %vm136_vm2, %v94_v16  ;;  %v9734_v18 = vpop.permute.xlu1 %1221  ;;  %1430 = vperm.xlu1 %9196, %v9456_v17  }
  0x9c   :  { %8956 = vmatprep.mubr.msk.f32.mxu0 %vm9285_vm1, %v13224_v0  ;;  %13333 = vst [vmem:[#allocation2_spill] sm:$0xff] %v9734_v18  ;;  %v9843_v54 = vpop.permute.xlu0 %1359 }
  0x9d   :  { %13334 = vst [vmem:[#allocation3_spill] sm:$0xff] %v9843_v54 }
  0x9f   :  { %8957 = vmatmul.mubr.msk.f32.gmra.mxu0 %vm136_vm2, %v95_v12  ;;  %v1136_v20 = vpop.permute.xlu1 %1135  ;;  %9197 = vset.pattern.permute.xlu1 %v9292_v33 }
  0xa0   :  { %8959 = vmatprep.mubr.msk.f32.mxu0 %vm9285_vm1, %v13224_v0  ;;  %v1151_v49 = vmul.f32 %v1136_v20, %v9401_v8  ;;  %v109_v8 = vld [vmem:[%s13208_s0 + $0x1a0] sm:$0xff]  ;;  %v9864_v62 = vpop.permute.xlu0 %1365  ;;  %v112_v20 = vld [vmem:[%s13208_s0 + $0x1b8] sm:$0xff] }
  0xa3   :  { %8960 = vmatmul.mubr.msk.f32.gmra.mxu0 %vm136_vm2, %v96_v19  ;;  %v9748_v22 = vpop.permute.xlu1 %1362 }
  0xa4   :  { %8962 = vmatprep.mubr.msk.f32.mxu0 %vm9285_vm1, %v13224_v0 }
  0xa7   :  { %8963 = vmatmul.mubr.msk.f32.gmra.mxu0 %vm136_vm2, %v97_v21 }
  0xa8   :  { %8965 = vmatprep.mubr.msk.f32.mxu0 %vm9285_vm1, %v13224_v0  ;;  %v9761_v26 = vpop.permute.xlu1 %1224 }
  0xab   :  { %8966 = vmatmul.mubr.msk.f32.gmra.mxu0 %vm136_vm2, %v98_v23 }
  0xac   :  { %8968 = vmatprep.mubr.msk.f32.mxu0 %vm9285_vm1, %v13224_v0 }
  0xad   :  { %v9769_v28 = vpop.permute.xlu1 %1418 }
  0xaf   :  { %8969 = vmatmul.mubr.msk.f32.gmra.mxu0 %vm136_vm2, %v99_v25 }
  0xb0   :  { %8971 = vmatprep.mubr.msk.f32.mxu0 %vm9285_vm1, %v13224_v0 }
  0xb1   :  { %v1138_v31 = vpop.permute.xlu1 %1137 }
  0xb2   :  { %v9778_v32 = vmul.f32 %v1138_v31, %v9430_v13 }
  0xb3   :  { %8972 = vmatmul.mubr.msk.f32.gmra.mxu0 %vm136_vm2, %v100_v27 }
  0xb4   :  { %8974 = vmatprep.mubr.msk.f32.mxu0 %vm9285_vm1, %v13224_v0  ;;  %1571 = vperm.xlu0 %9192, %v9778_v32  }
  0xb5   :  { %v9901_v37 = vpop.permute.xlu1 %1523 }
  0xb7   :  { %8975 = vmatmul.mubr.msk.f32.gmra.mxu0 %vm136_vm2, %v101_v30 }
  0xb8   :  { %8977 = vmatprep.mubr.msk.f32.mxu0 %vm9285_vm1, %v13224_v0  ;;  %9202 = vset.pattern.permute.xlu0 %v9286_v5 }
  0xb9   :  { %1227 = vperm.xlu0 %9202, %v9430_v13   ;;  %v1476_v13 = vmul.f32 %v9704_v4, %v9456_v17 }
  0xbb   :  { %8978 = vmatmul.mubr.msk.f32.gmra.mxu0 %vm136_vm2, %v102_v35  ;;  %1499 = vperm.xlu1 %9197, %v1476_v13   ;;  %v113_v35 = vld [vmem:[%s13208_s0 + $0x1c0] sm:$0xff] }
  0xbc   :  { %8980 = vmatprep.mubr.msk.f32.mxu0 %vm9285_vm1, %v13224_v0 }
  0xbd   :  { %1319 = vperm.xlu0 %9202, %v1296_v39  }
  0xbf   :  { %8981 = vmatmul.mubr.msk.f32.gmra.mxu0 %vm136_vm2, %v103_v38  ;;  %9198 = vset.pattern.permute.xlu1 %v9286_v5 }
  0xc0   :  { %8983 = vmatprep.mubr.msk.f32.mxu0 %vm9285_vm1, %v13224_v0  ;;  %1157 = vperm.xlu1 %9198, %v1149_v45  }
  0xc1   :  { %1161 = vperm.xlu0 %9202, %v1150_v11  }
  0xc3   :  { %8984 = vmatmul.mubr.msk.f32.gmra.mxu0 %vm136_vm2, %v104_v40 }
  0xc4   :  { %8986 = vmatprep.mubr.msk.f32.mxu0 %vm9285_vm1, %v13224_v0  ;;  %1165 = vperm.xlu1 %9198, %v1151_v49  }
  0xc7   :  { %v432_v42 = vpop.f32.mrf.mxu0  ;;  %8987 = vmatmul.mubr.msk.f32.gmra.mxu0 %vm136_vm2, %v105_v41 }
  0xc8   :  { %8989 = vmatprep.mubr.msk.f32.mxu0 %vm9285_vm1, %v13224_v0  ;;  %9199 = vset.pattern.permute.xlu1 %v9292_v33  ;;  %v807_v58 = vmul.f32 %v9849_v55, %v432_v42 }
  0xc9   :  { %v8844_v46 = vpop.f32.mrf.mxu0  ;;  %1562 = vperm.xlu1 %9199, %v1149_v45  }
  0xca   :  { %v883_v1 = vadd.f32 %v9861_v60, %v807_v58  ;;  %v114_v46 = vld [vmem:[%s13208_s0 + $0x1c8] sm:$0xff] }
  0xcb   :  { %v437_v47 = vpop.f32.mrf.mxu0  ;;  %8990 = vmatmul.mubr.msk.f32.gmra.mxu0 %vm136_vm2, %v106_v44 }
  0xcc   :  { %8992 = vmatprep.mubr.msk.f32.mxu0 %vm9285_vm1, %v13224_v0  ;;  %v808_v2 = vmul.f32 %v9849_v55, %v437_v47  ;;  %v958_v14 = vmax.f32 %v883_v1, 0.0 }
  0xcd   :  { %v8847_v50 = vpop.f32.mrf.mxu0  ;;  %9200 = vset.pattern.permute.xlu1 %v9286_v5  ;;  %v111_v5 = vld [vmem:[%s13208_s0 + $0x1b0] sm:$0xff] }
  0xce   :  { %1169 = vperm.xlu1 %9200, %v9778_v32   ;;  %v884_v16 = vadd.f32 %v9861_v60, %v808_v2 }
  0xcf   :  { %v442_v51 = vpop.f32.mrf.mxu0  ;;  %8993 = vmatmul.mubr.msk.f32.gmra.mxu0 %vm136_vm2, %v107_v48  ;;  %v9917_v48 = vpop.permute.xlu1 %1526 }
  0xd0   :  { %8995 = vmatprep.mubr.msk.f32.mxu0 %vm9285_vm1, %v13224_v0  ;;  %v809_v9 = vmul.f32 %v9849_v55, %v442_v51  ;;  %v959_v30 = vmax.f32 %v884_v16, 0.0 }
  0xd1   :  { %v8850_v52 = vpop.f32.mrf.mxu0 }
  0xd2   :  { %9201 = vset.pattern.permute.xlu1 %v9292_v33  ;;  %v9887_v33 = vpop.permute.xlu0 %1415  ;;  %v885_v27 = vadd.f32 %v9861_v60, %v809_v9 }
  0xd3   :  { %v447_v53 = vpop.f32.mrf.mxu0  ;;  %8996 = vmatmul.mubr.msk.f32.gmra.mxu0 %vm136_vm2, %v108_v10  ;;  %1568 = vperm.xlu1 %9201, %v1151_v49  }
  0xd4   :  { %8998 = vmatprep.mubr.msk.f32.mxu0 %vm9285_vm1, %v13224_v0  ;;  %v810_v31 = vmul.f32 %v9849_v55, %v447_v53  ;;  %v960_v13 = vmax.f32 %v885_v27, 0.0 }
  0xd5   :  { %v8853_v56 = vpop.f32.mrf.mxu0 }
  0xd6   :  { %v9906_v40 = vpop.permute.xlu0 %1424  ;;  %v886_v42 = vadd.f32 %v9861_v60, %v810_v31  ;;  %v115_v56 = vld [vmem:[%s13208_s0 + $0x1d0] sm:$0xff] }
  0xd7   :  { %v452_v57 = vpop.f32.mrf.mxu0  ;;  %8999 = vmatmul.mubr.msk.f32.gmra.mxu0 %vm136_vm2, %v109_v8  ;;  %13335 = vst [vmem:[#allocation4_spill] sm:$0xff] %v9906_v40 }
  0xd8   :  { %9001 = vmatprep.mubr.msk.f32.mxu0 %vm9285_vm1, %v13224_v0  ;;  %v811_v43 = vmul.f32 %v9849_v55, %v452_v57  ;;  %v961_v10 = vmax.f32 %v886_v42, 0.0 }
  0xd9   :  { %v8856_v61 = vpop.f32.mrf.mxu0 }
  0xda   :  { %v887_v52 = vadd.f32 %v9861_v60, %v811_v43  ;;  %v9930_v57 = vpop.permute.xlu0 %1529 }
  0xdb   :  { %v457_v63 = vpop.f32.mrf.mxu0  ;;  %9002 = vmatmul.mubr.msk.f32.gmra.mxu0 %vm136_vm2, %v110_v59  ;;  %v9932_v59 = vpop.permute.xlu1 %1421 }
  0xdc   :  { %v812_v3 = vmul.f32 %v9849_v55, %v457_v63  ;;  %9004 = vmatprep.mubr.msk.f32.mxu0 %vm9285_vm1, %v13224_v0  ;;  %v962_v2 = vmax.f32 %v887_v52, 0.0 }
  0xdd   :  { %v8859_v4 = vpop.f32.mrf.mxu0 }
  0xde   :  { %v888_v7 = vadd.f32 %v9861_v60, %v812_v3  ;;  %v1142_v16 = vpop.permute.xlu0 %1141 }
  0xdf   :  { %v462_v11 = vpop.f32.mrf.mxu0  ;;  %9005 = vmatmul.mubr.msk.f32.gmra.mxu0 %vm136_vm2, %v111_v5  ;;  %v116_v5 = vld [vmem:[%s13208_s0 + $0x1d8] sm:$0xff] }
  0xe0   :  { %v963_v12 = vmax.f32 %v888_v7, 0.0  ;;  %v813_v19 = vmul.f32 %v9849_v55, %v462_v11  ;;  %9007 = vmatprep.mubr.msk.f32.mxu0 %vm9285_vm1, %v13224_v0  ;;  %v1140_v7 = vpop.permute.xlu1 %1139 }
  0xe1   :  { %v8862_v21 = vpop.f32.mrf.mxu0  ;;  %v1153_v11 = vmul.f32 %v1140_v7, %v9443_v15  ;;  %v118_v15 = vld [vmem:[%s13208_s0 + $0x1e8] sm:$0xff] }
  0xe2   :  { %v9889_v23 = vmax.f32 %v958_v14, %v963_v12  ;;  %v889_v25 = vadd.f32 %v9861_v60, %v813_v19  ;;  %v117_v12 = vld [vmem:[%s13208_s0 + $0x1e0] sm:$0xff]  ;;  %v1154_v19 = vmul.f32 %v1142_v16, %v9456_v17  ;;  %v119_v17 = vld [vmem:[%s13208_s0 + $0x1f0] sm:$0xff] }
  0xe3   :  { %v467_v29 = vpop.f32.mrf.mxu0  ;;  %9008 = vmatmul.mubr.msk.f32.gmra.mxu0 %vm136_vm2, %v112_v20  ;;  %1574 = vperm.xlu1 %9201, %v1153_v11  }
  0xe4   :  { %v964_v32 = vmax.f32 %v889_v25, 0.0  ;;  %v814_v34 = vmul.f32 %v9849_v55, %v467_v29  ;;  %9010 = vmatprep.mubr.msk.f32.mxu0 %vm9285_vm1, %v13224_v0  ;;  %1173 = vperm.xlu0 %9202, %v1153_v11  }
  0xe5   :  { %v8865_v36 = vpop.f32.mrf.mxu0 }
  0xe6   :  { %v9903_v38 = vmax.f32 %v959_v30, %v964_v32  ;;  %v890_v39 = vadd.f32 %v9861_v60, %v814_v34  ;;  %v120_v32 = vld [vmem:[%s13208_s0 + $0x1f8] sm:$0xff] }
  0xe7   :  { %v472_v41 = vpop.f32.mrf.mxu0  ;;  %9011 = vmatmul.mubr.msk.f32.gmra.mxu0 %vm136_vm2, %v113_v35  ;;  %1577 = vperm.xlu1 %9201, %v1154_v19  }
  0xe8   :  { %v965_v44 = vmax.f32 %v890_v39, 0.0  ;;  %v815_v45 = vmul.f32 %v9849_v55, %v472_v41  ;;  %9013 = vmatprep.mubr.msk.f32.mxu0 %vm9285_vm1, %v13224_v0  ;;  %1177 = vperm.xlu0 %9202, %v1154_v19  }
  0xe9   :  { %v8868_v47 = vpop.f32.mrf.mxu0 }
  0xea   :  { %v9919_v49 = vmax.f32 %v960_v13, %v965_v44  ;;  %v891_v50 = vadd.f32 %v9861_v60, %v815_v45  ;;  %v121_v13 = vld [vmem:[%s13208_s0 + $0x200] sm:$0xff] }
  0xeb   :  { %v477_v51 = vpop.f32.mrf.mxu0  ;;  %9014 = vmatmul.mubr.msk.f32.gmra.mxu0 %vm136_vm2, %v114_v46  ;;  %9203 = vset.pattern.permute.xlu1 %v9291_v24 }
  0xec   :  { %v966_v53 = vmax.f32 %v891_v50, 0.0  ;;  %v816_v8 = vmul.f32 %v9849_v55, %v477_v51  ;;  %9016 = vmatprep.mubr.msk.f32.mxu0 %vm9285_vm1, %v13224_v0  ;;  %9204 = vset.pattern.permute.xlu0 %v9291_v24  ;;  %v122_v51 = vld [vmem:[%s13208_s0 + $0x208] sm:$0xff] }
  0xed   :  { %v8871_v58 = vpop.f32.mrf.mxu0 }
  0xee   :  { %v9934_v61 = vmax.f32 %v961_v10, %v966_v53  ;;  %v892_v63 = vadd.f32 %v9861_v60, %v816_v8 }
  0xef   :  { %v482_v1 = vpop.f32.mrf.mxu0  ;;  %9017 = vmatmul.mubr.msk.f32.gmra.mxu0 %vm136_vm2, %v115_v56 }
  0xf0   :  { %v967_v3 = vmax.f32 %v892_v63, 0.0  ;;  %9019 = vmatprep.mubr.msk.f32.mxu0 %vm9285_vm1, %v13224_v0  ;;  %v817_v31 = vmul.f32 %v9849_v55, %v482_v1 }
  0xf1   :  { %v8874_v4 = vpop.f32.mrf.mxu0 }
  0xf2   :  { %v9943_v9 = vmax.f32 %v962_v2, %v967_v3  ;;  %v893_v36 = vadd.f32 %v9861_v60, %v817_v31 }
  0xf3   :  { %v487_v14 = vpop.f32.mrf.mxu0  ;;  %9020 = vmatmul.mubr.msk.f32.gmra.mxu0 %vm136_vm2, %v116_v5  ;;  %v123_v5 = vld [vmem:[%s13208_s0 + $0x210] sm:$0xff] }
  0xf4   :  { %9022 = vmatprep.mubr.msk.f32.mxu0 %vm9285_vm1, %v13224_v0  ;;  %v818_v24 = vmul.f32 %v9849_v55, %v487_v14  ;;  %v968_v45 = vmax.f32 %v893_v36, 0.0 }
  0xf5   :  { %v8877_v20 = vpop.f32.mrf.mxu0 }
  0xf6   :  { %v894_v46 = vadd.f32 %v9861_v60, %v818_v24 }
  0xf7   :  { %v492_v21 = vpop.f32.mrf.mxu0  ;;  %9023 = vmatmul.mubr.msk.f32.gmra.mxu0 %vm136_vm2, %v117_v12 }
  0xf8   :  { %9025 = vmatprep.mubr.msk.f32.mxu0 %vm9285_vm1, %v13224_v0  ;;  %v819_v43 = vmul.f32 %v9849_v55, %v492_v21  ;;  %v969_v63 = vmax.f32 %v894_v46, 0.0 }
  0xf9   :  { %v8880_v25 = vpop.f32.mrf.mxu0 }
  0xfa   :  { %v895_v8 = vadd.f32 %v9861_v60, %v819_v43  ;;  %v124_v25 = vld [vmem:[%s13208_s0 + $0x218] sm:$0xff] }
  0xfb   :  { %v497_v27 = vpop.f32.mrf.mxu0  ;;  %9026 = vmatmul.mubr.msk.f32.gmra.mxu0 %vm136_vm2, %v118_v15 }
  0xfc   :  { %9028 = vmatprep.mubr.msk.f32.mxu0 %vm9285_vm1, %v13224_v0  ;;  %v820_v56 = vmul.f32 %v9849_v55, %v497_v27  ;;  %v970_v14 = vmax.f32 %v895_v8, 0.0  ;;  %v10021_v27 = vpop.permute.xlu1 %1368 }
  0xfd   :  { %v8883_v29 = vpop.f32.mrf.mxu0 }
  0xfe   :  { %v896_v16 = vadd.f32 %v9861_v60, %v820_v56 }
  0xff   :  { %v502_v30 = vpop.f32.mrf.mxu0  ;;  %9029 = vmatmul.mubr.msk.f32.gmra.mxu0 %vm136_vm2, %v119_v17 }
 0x100   :  { %9031 = vmatprep.mubr.msk.f32.mxu0 %vm9285_vm1, %v13224_v0  ;;  %v821_v19 = vmul.f32 %v9849_v55, %v502_v30  ;;  %v971_v31 = vmax.f32 %v896_v16, 0.0  ;;  %v129_v16 = vld [vmem:[%s13208_s0 + $0x240] sm:$0xff] }
 0x101   :  { %v8886_v34 = vpop.f32.mrf.mxu0 }
 0x102   :  { %v897_v34 = vadd.f32 %v9861_v60, %v821_v19 }
 0x103   :  { %v507_v35 = vpop.f32.mrf.mxu0  ;;  %9032 = vmatmul.mubr.msk.f32.gmra.mxu0 %vm136_vm2, %v120_v32 }
 0x104   :  { %v822_v39 = vmul.f32 %v9849_v55, %v507_v35  ;;  %9034 = vmatprep.mubr.msk.f32.mxu0 %vm9285_vm1, %v13224_v0 }
 0x105   :  { %v8889_v41 = vpop.f32.mrf.mxu0 }
 0x106   :  { %v898_v42 = vadd.f32 %v9861_v60, %v822_v39  ;;  %v125_v39 = vld [vmem:[%s13208_s0 + $0x220] sm:$0xff] }
 0x107   :  { %v512_v44 = vpop.f32.mrf.mxu0  ;;  %9035 = vmatmul.mubr.msk.f32.gmra.mxu0 %vm136_vm2, %v121_v13  ;;  %v10036_v13 = vpop.permute.xlu1 %1230 }
 0x108   :  { %v973_v47 = vmax.f32 %v898_v42, 0.0  ;;  %v823_v50 = vmul.f32 %v9849_v55, %v512_v44  ;;  %9037 = vmatprep.mubr.msk.f32.mxu0 %vm9285_vm1, %v13224_v0 }
 0x109   :  { %v8892_v10 = vpop.f32.mrf.mxu0 }
 0x10a   :  { %v9993_v52 = vmax.f32 %v968_v45, %v973_v47  ;;  %v899_v53 = vadd.f32 %v9861_v60, %v823_v50  ;;  %v972_v45 = vmax.f32 %v897_v34, 0.0  ;;  %v126_v50 = vld [vmem:[%s13208_s0 + $0x228] sm:$0xff] }
 0x10b   :  { %v517_v58 = vpop.f32.mrf.mxu0  ;;  %9038 = vmatmul.mubr.msk.f32.gmra.mxu0 %vm136_vm2, %v122_v51  ;;  %v10049_v51 = vpop.permute.xlu1 %1371 }
 0x10c   :  { %v974_v2 = vmax.f32 %v899_v53, 0.0  ;;  %v824_v3 = vmul.f32 %v9849_v55, %v517_v58  ;;  %9040 = vmatprep.mubr.msk.f32.mxu0 %vm9285_vm1, %v13224_v0  ;;  %v127_v58 = vld [vmem:[%s13208_s0 + $0x230] sm:$0xff] }
 0x10d   :  { %v8895_v4 = vpop.f32.mrf.mxu0 }
 0x10e   :  { %v10007_v7 = vmax.f32 %v969_v63, %v974_v2  ;;  %v900_v11 = vadd.f32 %v9861_v60, %v824_v3 }
 0x10f   :  { %v522_v12 = vpop.f32.mrf.mxu0  ;;  %9041 = vmatmul.mubr.msk.f32.gmra.mxu0 %vm136_vm2, %v123_v5  ;;  %v10061_v63 = vpop.permute.xlu1 %1233  ;;  %v128_v5 = vld [vmem:[%s13208_s0 + $0x238] sm:$0xff] }
 0x110   :  { %v975_v21 = vmax.f32 %v900_v11, 0.0  ;;  %v825_v15 = vmul.f32 %v9849_v55, %v522_v12  ;;  %9043 = vmatprep.mubr.msk.f32.mxu0 %vm9285_vm1, %v13224_v0  ;;  %13336 = vst [vmem:[#allocation5_spill] sm:$0xff] %v10061_v63 }
 0x111   :  { %v8898_v17 = vpop.f32.mrf.mxu0 }
 0x112   :  { %v10023_v29 = vmax.f32 %v970_v14, %v975_v21  ;;  %v901_v30 = vadd.f32 %v9861_v60, %v825_v15 }
 0x113   :  { %v527_v32 = vpop.f32.mrf.mxu0  ;;  %9044 = vmatmul.mubr.msk.f32.gmra.mxu0 %vm136_vm2, %v124_v25  ;;  %v10069_v4 = vpop.permute.xlu1 %1427  ;;  %v130_v25 = vld [vmem:[%s13208_s0 + $0x248] sm:$0xff] }
 0x114   :  { %v976_v36 = vmax.f32 %v901_v30, 0.0  ;;  %v826_v24 = vmul.f32 %v9849_v55, %v527_v32  ;;  %9046 = vmatprep.mubr.msk.f32.mxu0 %vm9285_vm1, %v13224_v0  ;;  %13337 = vst [vmem:[#allocation6_spill] sm:$0xff] %v10069_v4 }
 0x115   :  { %v8901_v41 = vpop.f32.mrf.mxu0 }
 0x116   :  { %v10038_v42 = vmax.f32 %v971_v31, %v976_v36  ;;  %v902_v43 = vadd.f32 %v9861_v60, %v826_v24  ;;  %v131_v24 = vld [vmem:[%s13208_s0 + $0x250] sm:$0xff] }
 0x117   :  { %v532_v44 = vpop.f32.mrf.mxu0  ;;  %9047 = vmatmul.mubr.msk.f32.gmra.mxu0 %vm136_vm2, %v125_v39  ;;  %v10077_v12 = vpop.permute.xlu1 %1374 }
 0x118   :  { %v977_v47 = vmax.f32 %v902_v43, 0.0  ;;  %9049 = vmatprep.mubr.msk.f32.mxu0 %vm9285_vm1, %v13224_v0  ;;  %13338 = vst [vmem:[#allocation7_spill] sm:$0xff] %v10077_v12  ;;  %v827_v15 = vmul.f32 %v9849_v55, %v532_v44  ;;  %v10097_v39 = vpop.permute.xlu0 %1532 }
 0x119   :  { %v8904_v10 = vpop.f32.mrf.mxu0  ;;  %13340 = vst [vmem:[#allocation9_spill] sm:$0xff] %v10097_v39 }
 0x11a   :  { %v10051_v53 = vmax.f32 %v972_v45, %v977_v47  ;;  %v903_v32 = vadd.f32 %v9861_v60, %v827_v15 }
 0x11b   :  { %v537_v8 = vpop.f32.mrf.mxu0  ;;  %9050 = vmatmul.mubr.msk.f32.gmra.mxu0 %vm136_vm2, %v126_v50  ;;  %v10086_v17 = vpop.permute.xlu1 %1299 }
 0x11c   :  { %9052 = vmatprep.mubr.msk.f32.mxu0 %vm9285_vm1, %v13224_v0  ;;  %13339 = vst [vmem:[#allocation8_spill] sm:$0xff] %v10086_v17  ;;  %v828_v34 = vmul.f32 %v9849_v55, %v537_v8  ;;  %v978_v50 = vmax.f32 %v903_v32, 0.0 }
 0x11d   :  { %v8907_v2 = vpop.f32.mrf.mxu0 }
 0x11e   :  { %v904_v10 = vadd.f32 %v9861_v60, %v828_v34 }
 0x11f   :  { %v542_v3 = vpop.f32.mrf.mxu0  ;;  %9053 = vmatmul.mubr.msk.f32.gmra.mxu0 %vm136_vm2, %v127_v58  ;;  %v10099_v41 = vpop.permute.xlu1 %1307 }
 0x120   :  { %9055 = vmatprep.mubr.msk.f32.mxu0 %vm9285_vm1, %v13224_v0  ;;  %v829_v45 = vmul.f32 %v9849_v55, %v542_v3 }
 0x121   :  { %v8910_v11 = vpop.f32.mrf.mxu0 }
 0x122   :  { %v905_v3 = vadd.f32 %v9861_v60, %v829_v45 }
 0x123   :  { %v547_v14 = vpop.f32.mrf.mxu0  ;;  %9056 = vmatmul.mubr.msk.f32.gmra.mxu0 %vm136_vm2, %v128_v5  ;;  %v10106_v2 = vpop.permute.xlu1 %1483 }
 0x124   :  { %9058 = vmatprep.mubr.msk.f32.mxu0 %vm9285_vm1, %v13224_v0 }
 0x125   :  { %v8913_v19 = vpop.f32.mrf.mxu0 }
 0x126   :  { %v10111_v19 = vpop.permute.xlu0 %1535 }
 0x127   :  { %v552_v21 = vpop.f32.mrf.mxu0  ;;  %9059 = vmatmul.mubr.msk.f32.gmra.mxu0 %vm136_vm2, %v129_v16  ;;  %13341 = vst [vmem:[#allocation10_spill] sm:$0xff] %v10111_v19  ;;  %v10116_v34 = vpop.permute.xlu1 %1311 }
 0x128   :  { %9061 = vmatprep.mubr.msk.f32.mxu0 %vm9285_vm1, %v13224_v0  ;;  %v831_v45 = vmul.f32 %v9849_v55, %v552_v21 }
 0x129   :  { %v8916_v30 = vpop.f32.mrf.mxu0 }
 0x12a   :  { %v830_v30 = vmul.f32 %v9849_v55, %v547_v14  ;;  %v10124_v14 = vpop.permute.xlu0 %1218 }
 0x12b   :  { %v557_v31 = vpop.f32.mrf.mxu0  ;;  %9062 = vmatmul.mubr.msk.f32.gmra.mxu0 %vm136_vm2, %v130_v25  ;;  %v979_v25 = vmax.f32 %v904_v10, 0.0 }
 0x12c   :  { %v832_v36 = vmul.f32 %v9849_v55, %v557_v31  ;;  %9064 = vmatprep.mubr.msk.f32.mxu0 %vm9285_vm1, %v13224_v0 }
 0x12d   :  { %v8919_v43 = vpop.f32.mrf.mxu0 }
 0x12e   :  { %v908_v44 = vadd.f32 %v9861_v60, %v832_v36  ;;  %v10138_v6 = vpop.permute.xlu0 %1303 }
 0x12f   :  { %v562_v47 = vpop.f32.mrf.mxu0  ;;  %9065 = vmatmul.mubr.msk.f32.gmra.mxu0 %vm136_vm2, %v131_v24  ;;  %13343 = vst [vmem:[#allocation12_spill] sm:$0xff] %v10138_v6 }
 0x130   :  { %v983_v8 = vmax.f32 %v908_v44, 0.0  ;;  %v833_v58 = vmul.f32 %v9849_v55, %v562_v47  ;;  %v980_v44 = vmax.f32 %v905_v3, 0.0  ;;  %v907_v3 = vadd.f32 %v9861_v60, %v831_v45 }
 0x131   :  { %v8922_v5 = vpop.f32.mrf.mxu0 }
 0x132   :  { %v10108_v11 = vmax.f32 %v978_v50, %v983_v8  ;;  %v909_v16 = vadd.f32 %v9861_v60, %v833_v58  ;;  %v906_v50 = vadd.f32 %v9861_v60, %v830_v30  ;;  %v10126_v58 = vpop.permute.xlu1 %1315 }
 0x133   :  { %v567_v15 = vpop.f32.mrf.mxu0 }
 0x134   :  { %v984_v31 = vmax.f32 %v909_v16, 0.0  ;;  %v834_v32 = vmul.f32 %v9849_v55, %v567_v15 }
 0x135   :  { %v8925_v36 = vpop.f32.mrf.mxu0 }
 0x136   :  { %v10118_v24 = vmax.f32 %v979_v25, %v984_v31  ;;  %v910_v43 = vadd.f32 %v9861_v60, %v834_v32  ;;  %v981_v31 = vmax.f32 %v906_v50, 0.0  ;;  %v10133_v21 = vpop.permute.xlu1 %1491 }
 0x137   :  { %v572_v47 = vpop.f32.mrf.mxu0  ;;  %13342 = vst [vmem:[#allocation11_spill] sm:$0xff] %v10133_v21 }
 0x138   :  { %v985_v8 = vmax.f32 %v910_v43, 0.0  ;;  %v835_v10 = vmul.f32 %v9849_v55, %v572_v47 }
 0x139   :  { %v8928_v5 = vpop.f32.mrf.mxu0 }
 0x13a   :  { %v10128_v16 = vmax.f32 %v980_v44, %v985_v8  ;;  %v911_v15 = vadd.f32 %v9861_v60, %v835_v10  ;;  %v982_v8 = vmax.f32 %v907_v3, 0.0  ;;  %v10140_v10 = vpop.permute.xlu1 %1495 }
 0x13b   :  { %v577_v25 = vpop.f32.mrf.mxu0  ;;  %13344 = vst [vmem:[#allocation13_spill] sm:$0xff] %v10140_v10 }
 0x13c   :  { %v986_v32 = vmax.f32 %v911_v15, 0.0  ;;  %v836_v30 = vmul.f32 %v9849_v55, %v577_v25  ;;  %v10144_v15 = vpop.permute.xlu0 %1479 }
 0x13d   :  { %v8931_v36 = vpop.f32.mrf.mxu0 }
 0x13e   :  { %v10135_v43 = vmax.f32 %v981_v31, %v986_v32  ;;  %v912_v47 = vadd.f32 %v9861_v60, %v836_v30  ;;  %v10146_v25 = vpop.permute.xlu1 %1430 }
 0x13f   :  { %v582_v44 = vpop.f32.mrf.mxu0  ;;  %13345 = vst [vmem:[#allocation14_spill] sm:$0xff] %v10146_v25 }
 0x140   :  { %v987_v5 = vmax.f32 %v912_v47, 0.0  ;;  %v10150_v56 = vpop.permute.xlu0 %1487 }
 0x141   :  { %v8934_v50 = vpop.f32.mrf.mxu0 }
 0x142   :  { %v10142_v0 = vmax.f32 %v982_v8, %v987_v5  ;;  %v10148_v32 = vpop.permute.xlu1 %1499  ;;  %v837_v8 = vmul.f32 %v9849_v55, %v582_v44 }
 0x143   :  { %v587_v45 = vpop.f32.mrf.mxu0  ;;  %13346 = vst [vmem:[#allocation15_spill] sm:$0xff] %v10148_v32 }
 0x144   :  { %v10155_v5 = vpop.permute.xlu0 %1538  ;;  %v838_v32 = vmul.f32 %v9849_v55, %v587_v45 }
 0x145   :  { %v8937_v36 = vpop.f32.mrf.mxu0  ;;  %13348 = vst [vmem:[#allocation17_spill] sm:$0xff] %v10155_v5 }
 0x146   :  { %v10152_v3 = vpop.permute.xlu1 %1157  ;;  %v913_v36 = vadd.f32 %v9861_v60, %v837_v8 }
 0x147   :  { %v592_v31 = vpop.f32.mrf.mxu0  ;;  %13347 = vst [vmem:[#allocation16_spill] sm:$0xff] %v10152_v3 }
 0x148   :  { %v10165_v3 = vpop.permute.xlu0 %1565  ;;  %v839_v44 = vmul.f32 %v9849_v55, %v592_v31  ;;  %v988_v25 = vmax.f32 %v913_v36, 0.0 }
 0x149   :  { %v8940_v30 = vpop.f32.mrf.mxu0  ;;  %v13230_v31 = vrot.slane %v10165_v3, 7 }
 0x14a   :  { %v10157_v50 = vpop.permute.xlu1 %1165 }
 0x14b   :  { %v597_v46 = vpop.f32.mrf.mxu0  ;;  %13349 = vst [vmem:[#allocation18_spill] sm:$0xff] %v10157_v50 }
 0x14d   :  { %v8943_v47 = vpop.f32.mrf.mxu0 }
 0x14e   :  { %v10162_v12 = vpop.permute.xlu1 %1562 }
 0x14f   :  { %v602_v35 = vpop.f32.mrf.mxu0 }
 0x151   :  { %v8946_v20 = vpop.f32.mrf.mxu0 }
 0x152   :  { %v914_v20 = vadd.f32 %v9861_v60, %v838_v32  ;;  %v10170_v19 = vpop.permute.xlu1 %1169 }
 0x153   :  { %v607_v1 = vpop.f32.mrf.mxu0  ;;  %13350 = vst [vmem:[#allocation19_spill] sm:$0xff] %v10170_v19 }
 0x154   :  { %v842_v30 = vmul.f32 %v9849_v55, %v607_v1  ;;  %v989_v39 = vmax.f32 %v914_v20, 0.0 }
 0x155   :  { %v8949_v63 = vpop.f32.mrf.mxu0 }
 0x156   :  { %v918_v47 = vadd.f32 %v9861_v60, %v842_v30  ;;  %v915_v63 = vadd.f32 %v9861_v60, %v839_v44  ;;  %v840_v30 = vmul.f32 %v9849_v55, %v597_v46  ;;  %v1569_v4 = vpop.permute.xlu1 %1568  ;;  %v13351_v44 = vmax.f32 %v9889_v23, %v9993_v52 }
 0x157   :  { %v612_v5 = vpop.f32.mrf.mxu0 }
 0x158   :  { %v993_v54 = vmax.f32 %v918_v47, 0.0  ;;  %v843_v8 = vmul.f32 %v9849_v55, %v612_v5  ;;  %v1572_v5 = vpop.permute.xlu0 %1571 }
 0x159   :  { %v8952_v45 = vpop.f32.mrf.mxu0 }
 0x15a   :  { %v1048_v1 = vmax.f32 %v988_v25, %v993_v54  ;;  %v919_v17 = vadd.f32 %v9861_v60, %v843_v8  ;;  %v1584_v45 = vrot.slane %v1572_v5, 7  ;;  %v13229_v54 = vrot.slane %v10157_v50, 7 }
 0x15b   :  { %v617_v10 = vpop.f32.mrf.mxu0  ;;  %v1582_v25 = vrot.slane %v1569_v4, 7  ;;  %v1579_v50 = vrot.slane %v10162_v12, 7 }
 0x15c   :  { %v1073_v36 = vmax.f32 %v10108_v11, %v1048_v1  ;;  %v994_v32 = vmax.f32 %v919_v17, 0.0  ;;  %v844_v47 = vmul.f32 %v9849_v55, %v617_v10  ;;  %v13227_v11 = vrot.slane %v10170_v19, 7  ;;  %v10345_v40 = vpop.permute.xlu0 %1227 }
 0x15d   :  { %v8955_v21 = vpop.f32.mrf.mxu0  ;;  %v990_v17 = vmax.f32 %v915_v63, 0.0  ;;  %v916_v10 = vadd.f32 %v9861_v60, %v840_v30  ;;  %v841_v1 = vmul.f32 %v9849_v55, %v602_v35  ;;  %v10191_v4 = vsel %vm362_vm0, %v13230_v31, %v1582_v25 }
 0x15e   :  { %v10182_v46 = vmax.f32 %v13351_v44, %v1073_v36  ;;  %v1049_v8 = vmax.f32 %v989_v39, %v994_v32  ;;  %v920_v20 = vadd.f32 %v9861_v60, %v844_v47  ;;  %13352 = vst [vmem:[#allocation20_spill] sm:$0xff] %v10191_v4  ;;  %v10200_v63 = vsel %vm362_vm0, %v13229_v54, %v13227_v11 }
 0x15f   :  { %v622_v21 = vpop.f32.mrf.mxu0  ;;  %13353 = vst [vmem:[#allocation21_spill] sm:$0xff] %v10200_v63  ;;  %v13354_v35 = vmax.f32 %v9903_v38, %v10007_v7  ;;  %v991_v5 = vmax.f32 %v916_v10, 0.0  ;;  %v13356_v38 = vmax.f32 %v9919_v49, %v10023_v29  ;;  %v10335_v63 = vld [vmem:[%s13209_s1] ss:$0 sm:$0xff] }
 0x160   :  { %v1074_v23 = vmax.f32 %v10118_v24, %v1049_v8  ;;  %v995_v52 = vmax.f32 %v920_v20, 0.0  ;;  %v845_v39 = vmul.f32 %v9849_v55, %v622_v21  ;;  %v10209_v24 = vsel %vm362_vm0, %v1582_v25, %v1584_v45 }
 0x161   :  { %v8958_v30 = vpop.f32.mrf.mxu0  ;;  %13355 = vst [vmem:[#allocation22_spill] sm:$0xff] %v10209_v24  ;;  %v917_v8 = vadd.f32 %v9861_v60, %v841_v1 }
 0x162   :  { %v10205_v36 = vmax.f32 %v13354_v35, %v1074_v23  ;;  %v1050_v32 = vmax.f32 %v990_v17, %v995_v52  ;;  %v921_v47 = vadd.f32 %v9861_v60, %v845_v39 }
 0x163   :  { %v627_v44 = vpop.f32.mrf.mxu0  ;;  %v992_v52 = vmax.f32 %v917_v8, 0.0  ;;  %v10232_v8 = vpop.permute.xlu1 %1574 }
 0x164   :  { %v1075_v20 = vmax.f32 %v10128_v16, %v1050_v32  ;;  %v996_v21 = vmax.f32 %v921_v47, 0.0  ;;  %v846_v30 = vmul.f32 %v9849_v55, %v627_v44  ;;  %v13357_v16 = vmax.f32 %v9934_v61, %v10038_v42  ;;  %13359 = vst [vmem:[#allocation23_spill] sm:$0xff] %v10232_v8 }
 0x165   :  { %v8961_v11 = vpop.f32.mrf.mxu0  ;;  %v13358_v47 = vmax.f32 %v9943_v9, %v10051_v53 }
 0x166   :  { %v10217_v7 = vmax.f32 %v13356_v38, %v1075_v20  ;;  %v1051_v17 = vmax.f32 %v991_v5, %v996_v21  ;;  %v922_v23 = vadd.f32 %v9861_v60, %v846_v30 }
 0x167   :  { %v632_v25 = vpop.f32.mrf.mxu0 }
 0x168   :  { %v1076_v10 = vmax.f32 %v10135_v43, %v1051_v17  ;;  %v997_v39 = vmax.f32 %v922_v23, 0.0  ;;  %v13228_v43 = vrot.slane %v10232_v8, 7  ;;  %v847_v30 = vmul.f32 %v9849_v55, %v632_v25 }
 0x169   :  { %v8964_v1 = vpop.f32.mrf.mxu0 }
 0x16a   :  { %v10224_v35 = vmax.f32 %v13357_v16, %v1076_v10  ;;  %v1052_v11 = vmax.f32 %v992_v52, %v997_v39  ;;  %v10238_v61 = vsel %vm362_vm0, %v1584_v45, %v13228_v43  ;;  %v923_v53 = vadd.f32 %v9861_v60, %v847_v30 }
 0x16b   :  { %v637_v32 = vpop.f32.mrf.mxu0  ;;  %13360 = vst [vmem:[#allocation24_spill] sm:$0xff] %v10238_v61 }
 0x16c   :  { %v1077_v49 = vmax.f32 %v10142_v0, %v1052_v11  ;;  %v848_v17 = vmul.f32 %v9849_v55, %v637_v32  ;;  %v998_v1 = vmax.f32 %v923_v53, 0.0 }
 0x16d   :  { %v8967_v29 = vpop.f32.mrf.mxu0 }
 0x16e   :  { %v10230_v5 = vmax.f32 %v13358_v47, %v1077_v49  ;;  %v924_v16 = vadd.f32 %v9861_v60, %v848_v17 }
 0x16f   :  { %v642_v44 = vpop.f32.mrf.mxu0 }
 0x170   :  { %v849_v39 = vmul.f32 %v9849_v55, %v642_v44 }
 0x171   :  { %v8970_v20 = vpop.f32.mrf.mxu0 }
 0x172   :  { %v925_v32 = vadd.f32 %v9861_v60, %v849_v39 }
 0x173   :  { %v647_v42 = vpop.f32.mrf.mxu0 }
 0x174   :  { %v850_v30 = vmul.f32 %v9849_v55, %v647_v42 }
 0x175   :  { %v8973_v21 = vpop.f32.mrf.mxu0 }
 0x176   :  { %v999_v21 = vmax.f32 %v924_v16, 0.0 }
 0x177   :  { %v652_v0 = vpop.f32.mrf.mxu0 }
 0x179   :  { %v8976_v38 = vpop.f32.mrf.mxu0 }
 0x17b   :  { %v657_v9 = vpop.f32.mrf.mxu0 }
 0x17c   :  { %v852_v23 = vmul.f32 %v9849_v55, %v657_v9 }
 0x17d   :  { %v8979_v52 = vpop.f32.mrf.mxu0 }
 0x17e   :  { %v928_v10 = vadd.f32 %v9861_v60, %v852_v23  ;;  %v1000_v23 = vmax.f32 %v925_v32, 0.0 }
 0x17f   :  { %v662_v45 = vpop.f32.mrf.mxu0 }
 0x180   :  { %v1003_v11 = vmax.f32 %v928_v10, 0.0  ;;  %v853_v25 = vmul.f32 %v9849_v55, %v662_v45  ;;  %v926_v10 = vadd.f32 %v9861_v60, %v850_v30  ;;  %v851_v45 = vmul.f32 %v9849_v55, %v652_v0 }
 0x181   :  { %v8982_v49 = vpop.f32.mrf.mxu0 }
 0x182   :  { %v10248_v29 = vmax.f32 %v998_v1, %v1003_v11  ;;  %v929_v47 = vadd.f32 %v9861_v60, %v853_v25  ;;  %v1001_v49 = vmax.f32 %v926_v10, 0.0 }
 0x183   :  { %v667_v20 = vpop.f32.mrf.mxu0 }
 0x184   :  { %v1004_v38 = vmax.f32 %v929_v47, 0.0  ;;  %v854_v44 = vmul.f32 %v9849_v55, %v667_v20  ;;  %v927_v47 = vadd.f32 %v9861_v60, %v851_v45 }
 0x185   :  { %v8985_v9 = vpop.f32.mrf.mxu0 }
 0x186   :  { %v10254_v53 = vmax.f32 %v999_v21, %v1004_v38  ;;  %v930_v17 = vadd.f32 %v9861_v60, %v854_v44  ;;  %v1002_v44 = vmax.f32 %v927_v47, 0.0 }
 0x187   :  { %v672_v52 = vpop.f32.mrf.mxu0 }
 0x188   :  { %v1005_v1 = vmax.f32 %v930_v17, 0.0  ;;  %v855_v39 = vmul.f32 %v9849_v55, %v672_v52 }
 0x189   :  { %v8988_v16 = vpop.f32.mrf.mxu0 }
 0x18a   :  { %v10260_v11 = vmax.f32 %v1000_v23, %v1005_v1  ;;  %v931_v42 = vadd.f32 %v9861_v60, %v855_v39 }
 0x18b   :  { %v677_v25 = vpop.f32.mrf.mxu0 }
 0x18c   :  { %v1006_v20 = vmax.f32 %v931_v42, 0.0  ;;  %v856_v32 = vmul.f32 %v9849_v55, %v677_v25 }
 0x18d   :  { %v8991_v21 = vpop.f32.mrf.mxu0 }
 0x18e   :  { %v10265_v38 = vmax.f32 %v1001_v49, %v1006_v20  ;;  %v932_v0 = vadd.f32 %v9861_v60, %v856_v32 }
 0x18f   :  { %v682_v30 = vpop.f32.mrf.mxu0 }
 0x190   :  { %v1007_v9 = vmax.f32 %v932_v0, 0.0  ;;  %v857_v25 = vmul.f32 %v9849_v55, %v682_v30 }
 0x191   :  { %v8994_v17 = vpop.f32.mrf.mxu0 }
 0x192   :  { %v10268_v23 = vmax.f32 %v1002_v44, %v1007_v9  ;;  %v933_v20 = vadd.f32 %v9861_v60, %v857_v25 }
 0x193   :  { %v687_v52 = vpop.f32.mrf.mxu0 }
 0x194   :  { %v858_v32 = vmul.f32 %v9849_v55, %v687_v52 }
 0x195   :  { %v8997_v1 = vpop.f32.mrf.mxu0 }
 0x196   :  { %v1008_v1 = vmax.f32 %v933_v20, 0.0 }
 0x197   :  { %v692_v39 = vpop.f32.mrf.mxu0 }
 0x198   :  { %v859_v9 = vmul.f32 %v9849_v55, %v692_v39 }
 0x199   :  { %v9000_v10 = vpop.f32.mrf.mxu0 }
 0x19a   :  { %v934_v10 = vadd.f32 %v9861_v60, %v858_v32  ;;  %v935_v52 = vadd.f32 %v9861_v60, %v859_v9 }
 0x19b   :  { %v697_v16 = vpop.f32.mrf.mxu0 }
 0x19d   :  { %v9003_v45 = vpop.f32.mrf.mxu0 }
 0x19f   :  { %v702_v42 = vpop.f32.mrf.mxu0 }
 0x1a0   :  { %v861_v9 = vmul.f32 %v9849_v55, %v702_v42 }
 0x1a1   :  { %v9006_v21 = vpop.f32.mrf.mxu0 }
 0x1a3   :  { %v707_v49 = vpop.f32.mrf.mxu0 }
 0x1a4   :  { %v862_v47 = vmul.f32 %v9849_v55, %v707_v49  ;;  %v860_v49 = vmul.f32 %v9849_v55, %v697_v16 }
 0x1a5   :  { %v9009_v0 = vpop.f32.mrf.mxu0 }
 0x1a6   :  { %v938_v44 = vadd.f32 %v9861_v60, %v862_v47  ;;  %v1009_v47 = vmax.f32 %v934_v10, 0.0 }
 0x1a7   :  { %v712_v17 = vpop.f32.mrf.mxu0 }
 0x1a8   :  { %v1013_v45 = vmax.f32 %v938_v44, 0.0  ;;  %v863_v30 = vmul.f32 %v9849_v55, %v712_v17 }
 0x1a9   :  { %v9012_v21 = vpop.f32.mrf.mxu0 }
 0x1aa   :  { %v10278_v43 = vmax.f32 %v1008_v1, %v1013_v45  ;;  %v939_v25 = vadd.f32 %v9861_v60, %v863_v30  ;;  %v1010_v1 = vmax.f32 %v935_v52, 0.0  ;;  %v936_v45 = vadd.f32 %v9861_v60, %v860_v49 }
 0x1ab   :  { %v717_v0 = vpop.f32.mrf.mxu0  ;;  %v937_v52 = vadd.f32 %v9861_v60, %v861_v9 }
 0x1ac   :  { %v1014_v20 = vmax.f32 %v939_v25, 0.0  ;;  %v864_v32 = vmul.f32 %v9849_v55, %v717_v0 }
 0x1ad   :  { %v9015_v44 = vpop.f32.mrf.mxu0 }
 0x1ae   :  { %v10286_v54 = vmax.f32 %v1009_v47, %v1014_v20  ;;  %v940_v17 = vadd.f32 %v9861_v60, %v864_v32  ;;  %v1011_v47 = vmax.f32 %v936_v45, 0.0 }
 0x1af   :  { %v722_v30 = vpop.f32.mrf.mxu0 }
 0x1b0   :  { %v1015_v10 = vmax.f32 %v940_v17, 0.0  ;;  %v865_v21 = vmul.f32 %v9849_v55, %v722_v30 }
 0x1b1   :  { %v9018_v25 = vpop.f32.mrf.mxu0 }
 0x1b2   :  { %v10294_v31 = vmax.f32 %v1010_v1, %v1015_v10  ;;  %v941_v0 = vadd.f32 %v9861_v60, %v865_v21  ;;  %v1012_v1 = vmax.f32 %v937_v52, 0.0 }
 0x1b3   :  { %v727_v20 = vpop.f32.mrf.mxu0 }
 0x1b4   :  { %v1016_v32 = vmax.f32 %v941_v0, 0.0  ;;  %v866_v42 = vmul.f32 %v9849_v55, %v727_v20 }
 0x1b5   :  { %v9021_v44 = vpop.f32.mrf.mxu0 }
 0x1b6   :  { %v10301_v16 = vmax.f32 %v1011_v47, %v1016_v32  ;;  %v942_v17 = vadd.f32 %v9861_v60, %v866_v42 }
 0x1b7   :  { %v732_v30 = vpop.f32.mrf.mxu0 }
 0x1b8   :  { %v1017_v45 = vmax.f32 %v942_v17, 0.0  ;;  %v867_v19 = vmul.f32 %v9849_v55, %v732_v30 }
 0x1b9   :  { %v9024_v21 = vpop.f32.mrf.mxu0 }
 0x1ba   :  { %v10306_v25 = vmax.f32 %v1012_v1, %v1017_v45 }
 0x1bb   :  { %v737_v9 = vpop.f32.mrf.mxu0 }
 0x1bd   :  { %v9027_v49 = vpop.f32.mrf.mxu0 }
 0x1be   :  { %v13237_v49 = vrot.slane %v9734_v18, 7 }
 0x1bf   :  { %v742_v20 = vpop.f32.mrf.mxu0 }
 0x1c1   :  { %v9030_v44 = vpop.f32.mrf.mxu0 }
 0x1c2   :  { %v13238_v44 = vrot.slane %v9761_v26, 7 }
 0x1c3   :  { %v747_v47 = vpop.f32.mrf.mxu0 }
 0x1c5   :  { %v9033_v32 = vpop.f32.mrf.mxu0 }
 0x1c7   :  { %v752_v39 = vpop.f32.mrf.mxu0 }
 0x1c9   :  { %v9036_v42 = vpop.f32.mrf.mxu0 }
 0x1cb   :  { %v757_v8 = vpop.f32.mrf.mxu0 }
 0x1cc   :  { %v872_v1 = vmul.f32 %v9849_v55, %v757_v8  ;;  %v10324_v8 = vsel %vm362_vm0, %v13237_v49, %v13238_v44  ;;  %v869_v49 = vmul.f32 %v10335_v63, %v742_v20 }
 0x1cd   :  { %v9039_v52 = vpop.f32.mrf.mxu0 }
 0x1ce   :  { %v948_v42 = vadd.f32 %v9861_v60, %v872_v1  ;;  %v868_v52 = vmul.f32 %v9849_v55, %v737_v9 }
 0x1cf   :  { %v762_v61 = vpop.f32.mrf.mxu0 }
 0x1d0   :  { %v873_v32 = vmul.f32 %v9849_v55, %v762_v61  ;;  %v1023_v1 = vmax.f32 %v948_v42, 0.0  ;;  %v944_v4 = vadd.f32 %v9861_v60, %v868_v52  ;;  %v1432_v42 = vrot.slane %v9887_v33, 7  ;;  %v10350_v33 = vld [vmem:[%s13209_s1 + $0x1] ss:$0 sm:$0xff] }
 0x1d1   :  { %v9042_v24 = vpop.f32.mrf.mxu0  ;;  %v870_v52 = vmul.f32 %v10335_v63, %v747_v47  ;;  %v945_v47 = vadd.f32 %v10350_v33, %v869_v49  ;;  %v13364_v49 = vrot.slane %v10138_v6, 7  ;;  %v13367_v6 = vrot.slane %v10165_v3, 7 }
 0x1d2   :  { %v949_v30 = vadd.f32 %v9861_v60, %v873_v32 }
 0x1d3   :  { %v767_v10 = vpop.f32.mrf.mxu0 }
 0x1d4   :  { %v874_v9 = vmul.f32 %v9849_v55, %v767_v10 }
 0x1d5   :  { %v9045_v17 = vpop.f32.mrf.mxu0 }
 0x1d6   :  { %v943_v17 = vadd.f32 %v9861_v60, %v867_v19  ;;  %v1024_v19 = vmax.f32 %v949_v30, 0.0  ;;  %v871_v30 = vmul.f32 %v10335_v63, %v752_v39 }
 0x1d7   :  { %v772_v21 = vpop.f32.mrf.mxu0 }
 0x1d8   :  { %v875_v32 = vmul.f32 %v10335_v63, %v772_v21  ;;  %v950_v21 = vadd.f32 %v10350_v33, %v874_v9 }
 0x1d9   :  { %v9048_v45 = vpop.f32.mrf.mxu0 }
 0x1da   :  { %v1018_v45 = vmax.f32 %v943_v17, 0.0  ;;  %v1019_v17 = vmax.f32 %v944_v4, 0.0  ;;  %v951_v12 = vadd.f32 %v10350_v33, %v875_v32  ;;  %v13363_v4 = vrot.slane %v10099_v41, 7 }
 0x1db   :  { %v777_v0 = vpop.f32.mrf.mxu0  ;;  %v946_v32 = vadd.f32 %v10350_v33, %v870_v52 }
 0x1dc   :  { %v1063_v20 = vmax.f32 %v1018_v45, %v1023_v1  ;;  %v13361_v45 = vrot.slane %v9769_v28, 7  ;;  %v876_v10 = vmul.f32 %v10335_v63, %v777_v0  ;;  %v10370_v39 = vsel %vm362_vm0, %v13364_v49, %v13363_v4 }
 0x1dd   :  { %v9051_v24 = vpop.f32.mrf.mxu0  ;;  %13365 = vst [vmem:[#allocation26_spill] sm:$0xff] %v10370_v39  ;;  %v13366_v0 = vmax.f32 %v10248_v29, %v10278_v43  ;;  %v10381_v4 = vsel %vm362_vm0, %v1579_v50, %v13367_v6  ;;  %v1026_v49 = vmax.f32 %v951_v12, 0.0  ;;  %v13369_v6 = vmax.f32 %v10254_v53, %v10286_v54 }
 0x1de   :  { %v10360_v1 = vsel %vm362_vm0, %v1432_v42, %v13361_v45  ;;  %v1025_v42 = vmax.f32 %v950_v21, 0.0  ;;  %v1020_v45 = vmax.f32 %v945_v47, 0.0  ;;  %13368 = vst [vmem:[#allocation27_spill] sm:$0xff] %v10381_v4 }
 0x1df   :  { %v782_v61 = vpop.f32.mrf.mxu0  ;;  %13362 = vst [vmem:[#allocation25_spill] sm:$0xff] %v10360_v1 }
 0x1e0   :  { %v877_v24 = vmul.f32 %v9849_v55, %v782_v61  ;;  %v1065_v47 = vmax.f32 %v1020_v45, %v1025_v42 }
 0x1e1   :  { %v9054_v44 = vpop.f32.mrf.mxu0 }
 0x1e2   :  { %v953_v55 = vadd.f32 %v9861_v60, %v877_v24 }
 0x1e3   :  { %v787_v18 = vpop.f32.mrf.mxu0 }
 0x1e4   :  { %v1028_v44 = vmax.f32 %v953_v55, 0.0  ;;  %v878_v60 = vmul.f32 %v10335_v63, %v787_v18  ;;  %v1064_v55 = vmax.f32 %v1019_v17, %v1024_v19  ;;  %v947_v18 = vadd.f32 %v10350_v33, %v871_v30 }
 0x1e5   :  { %v9057_v24 = vpop.f32.mrf.mxu0  ;;  %v952_v19 = vadd.f32 %v10350_v33, %v876_v10 }
 0x1e6   :  { %v1083_v61 = vmax.f32 %v1063_v20, %v1028_v44  ;;  %v954_v9 = vadd.f32 %v10350_v33, %v878_v60 }
 0x1e7   :  { %v792_v24 = vpop.f32.mrf.mxu0 }
 0x1e8   :  { %v1093_v20 = vmax.f32 %v13366_v0, %v1083_v61  ;;  %v1029_v44 = vmax.f32 %v954_v9, 0.0  ;;  %v879_v60 = vmul.f32 %v10335_v63, %v792_v24  ;;  %v1021_v61 = vmax.f32 %v946_v32, 0.0 }
 0x1e9   :  { %v9060_v52 = vpop.f32.mrf.mxu0  ;;  %v1027_v9 = vmax.f32 %v952_v19, 0.0 }
 0x1ea   :  { %v10385_v21 = vmax.f32 %v10182_v46, %v1093_v20  ;;  %v1084_v43 = vmax.f32 %v1064_v55, %v1029_v44  ;;  %v955_v29 = vadd.f32 %v10350_v33, %v879_v60  ;;  %v1022_v46 = vmax.f32 %v947_v18, 0.0 }
 0x1eb   :  { %v797_v17 = vpop.f32.mrf.mxu0  ;;  %v1066_v10 = vmax.f32 %v1021_v61, %v1026_v49  ;;  %v13370_v20 = vmax.f32 %v10260_v11, %v10294_v31 }
 0x1ec   :  { %v1094_v3 = vmax.f32 %v13369_v6, %v1084_v43  ;;  %v1030_v50 = vmax.f32 %v955_v29, 0.0  ;;  %v880_v30 = vmul.f32 %v10335_v63, %v797_v17  ;;  %1660 = vrot.lane.b32.xlu1 %v10385_v21, %s9293_s20  ;;  %v1259_v24 = vrot.slane %v10385_v21, 5 }
 0x1ed   :  { %v9063_v12 = vpop.f32.mrf.mxu0  ;;  %v1203_v42 = vrot.slane %v10385_v21, 4  ;;  %v1398_v0 = vrot.slane %v10385_v21, 1  ;;  %v1111_v18 = vrot.slane %v10385_v21, 3  ;;  %v1344_v6 = vrot.slane %v10385_v21, 7 }
 0x1ee   :  { %v10395_v32 = vmax.f32 %v10205_v36, %v1094_v3  ;;  %v1085_v55 = vmax.f32 %v1065_v47, %v1030_v50  ;;  %v956_v54 = vadd.f32 %v10350_v33, %v880_v30  ;;  %v1067_v3 = vmax.f32 %v1022_v46, %v1027_v9 }
 0x1ef   :  { %v802_v53 = vpop.f32.mrf.mxu0  ;;  %v1501_v9 = vrot.slane %v10144_v15, 7  ;;  %v13373_v15 = vrot.slane %v10345_v40, 7 }
 0x1f0   :  { %v1095_v44 = vmax.f32 %v13370_v20, %v1085_v55  ;;  %v1031_v60 = vmax.f32 %v956_v54, 0.0  ;;  %v881_v36 = vmul.f32 %v10335_v63, %v802_v53  ;;  %1662 = vrot.lane.b32.xlu0 %v10395_v32, %s9293_s20  ;;  %v1260_v45 = vrot.slane %v10395_v32, 5 }
 0x1f1   :  { %v1204_v49 = vrot.slane %v10395_v32, 4  ;;  %v1399_v52 = vrot.slane %v10395_v32, 1  ;;  %v1112_v19 = vrot.slane %v10395_v32, 3  ;;  %v1345_v43 = vrot.slane %v10395_v32, 7  ;;  %v9066_v29 = vpop.f32.mrf.mxu0 }
 0x1f2   :  { %v10414_v31 = vmax.f32 %v10217_v7, %v1095_v44  ;;  %v1086_v11 = vmax.f32 %v1066_v10, %v1031_v60  ;;  %v957_v63 = vadd.f32 %v10350_v33, %v881_v36  ;;  %v1261_v61 = vsel %vm1258_vm3, %v1259_v24, %v1260_v45 }
 0x1f3   :  { %v10421_v17 = vmul.f32 %v10381_v4, %v1261_v61  ;;  %v10426_v47 = vsel %vm1202_vm4, %v1203_v42, %v1204_v49  ;;  %v1400_v7 = vsel %vm1397_vm5, %v1398_v0, %v1399_v52  ;;  %v13372_v33 = vmax.f32 %v10265_v38, %v10301_v16 }
 0x1f4   :  { %v1032_v30 = vmax.f32 %v957_v63, 0.0  ;;  %1664 = vrot.lane.b32.xlu0 %v10414_v31, %s9293_s20  ;;  %v1252_v10 = vmul.f32 %v10324_v8, %v10426_v47  ;;  %v1206_v12 = vrot.slane %v10414_v31, 4  ;;  %v10445_v46 = vsel %vm1110_vm7, %v1111_v18, %v1112_v19 }
 0x1f5   :  { %13371 = vst [vmem:[#allocation28_spill] sm:$0xff] %v10421_v17  ;;  %v1096_v50 = vmax.f32 %v13372_v33, %v1086_v11  ;;  %6382 = vmatprep.mubr.msk.f32.mxu1 %vm1735_vm6, %v10421_v17  ;;  %v1262_v38 = vrot.slane %v10414_v31, 5  ;;  %v1346_v16 = vsel %vm362_vm0, %v1344_v6, %v1345_v43  ;;  %v1338_v54 = vmul.f32 %v10370_v39, %v1261_v61 }
 0x1f6   :  { %v1087_v55 = vmax.f32 %v1067_v3, %v1032_v30  ;;  %1607 = vrot.lane.b32.xlu1 %v1252_v10, %s9294_s17  ;;  %v13243_v53 = vrot.slane %v10106_v2, 7  ;;  %v10459_v20 = vsel %vm1202_vm4, %v1204_v49, %v1206_v12  ;;  %v1347_v60 = vrot.slane %v10414_v31, 7 }
 0x1f7   :  { %v10453_v32 = vmax.f32 %v10224_v35, %v1096_v50  ;;  %v10462_v44 = vsel %vm1258_vm3, %v1260_v45, %v1262_v38  ;;  %v13374_v35 = vrot.slane %v9761_v26, 7  ;;  %v13242_v29 = vrot.slane %v10021_v27, 7 }
 0x1f8   :  { %v13375_v11 = vmax.f32 %v10268_v23, %v10306_v25  ;;  %1627 = vrot.lane.b32.xlu0 %v1338_v54, %s9295_s21  ;;  %v1448_v45 = vmul.f32 %v10360_v1, %v1400_v7  ;;  %v1326_v49 = vrot.slane %v10116_v34, 7  ;;  %v1348_v61 = vsel %vm362_vm0, %v1345_v43, %v1347_v60 }
 0x1f9   :  { %v10470_v36 = vsel %vm362_vm0, %v13374_v35, %v13373_v15  ;;  %v1208_v26 = vrot.slane %v10453_v32, 4  ;;  %v1401_v3 = vrot.slane %v10414_v31, 1  ;;  %v1264_v25 = vrot.slane %v10453_v32, 5 }
 0x1fa   :  { %v1097_v63 = vmax.f32 %v13375_v11, %v1087_v55  ;;  %1680 = vrot.lane.b32.xlu1 %v1448_v45, %s9296_s22  ;;  %v1253_v23 = vmul.f32 %v10470_v36, %v10459_v20  ;;  %v1114_v7 = vrot.slane %v10414_v31, 3  ;;  %v10493_v43 = vsel %vm362_vm0, %v1501_v9, %v13243_v53 }
 0x1fb   :  { %13376 = vst [vmem:[#allocation29_spill] sm:$0xff] %v10493_v43  ;;  %v10496_v50 = vsel %vm1202_vm4, %v1206_v12, %v1208_v26  ;;  %v1349_v30 = vrot.slane %v10453_v32, 7  ;;  %v13377_v10 = vrot.slane %v9864_v62, 7  ;;  %v13378_v55 = vrot.slane %v9748_v22, 7 }
 0x1fc   :  { %v10483_v33 = vmax.f32 %v10230_v5, %v1097_v63  ;;  %v1402_v5 = vsel %vm1397_vm5, %v1399_v52, %v1401_v3  ;;  %v1540_v31 = vrot.slane %v9901_v37, 7  ;;  %1609 = vrot.lane.b32.xlu0 %v1253_v23, %s9294_s17  ;;  %v1517_v9 = vmul.f32 %v10493_v43, %v10445_v46 }
 0x1fd   :  { %v10505_v54 = vsel %vm362_vm0, %v13378_v55, %v13377_v10  ;;  %v10512_v12 = vsel %vm1258_vm3, %v1262_v38, %v1264_v25  ;;  %v1541_v52 = vrot.slane %v9917_v48, 7  ;;  %v13380_v15 = vrot.slane %v10099_v41, 7 }
 0x1fe   :  { %13379 = vst [vmem:[#allocation30_spill] sm:$0xff] %v10505_v54  ;;  %v10523_v11 = vsel %vm1110_vm7, %v1112_v19, %v1114_v7  ;;  %v10526_v37 = vsel %vm362_vm0, %v1347_v60, %v1349_v30  ;;  %v13382_v38 = vmov %v13377_v10  ;;  %1700 = vrot.lane.b32.xlu1 %v1517_v9, %s9297_s23  ;;  %v1393_v45 = vmul.f32 %v10505_v54, %v1346_v16 }
 0x1ff   :  { %v10520_v35 = vsel %vm362_vm0, %v13380_v15, %v1326_v49  ;;  %v10533_v63 = vsel %vm362_vm0, %v13382_v38, %v13242_v29  ;;  %v1200_v19 = vrot.slane %v10483_v33, 4  ;;  %v1403_v60 = vrot.slane %v10453_v32, 1 }
 0x200   :  { %13381 = vst [vmem:[#allocation31_spill] sm:$0xff] %v10520_v35  ;;  %13383 = vst [vmem:[#allocation32_spill] sm:$0xff] %v10533_v63  ;;  %v1339_v41 = vmul.f32 %v10520_v35, %v10462_v44  ;;  %v1116_v23 = vrot.slane %v10453_v32, 3  ;;  %v1405_v10 = vrot.slane %v10483_v33, 1  ;;  %v1104_v62 = vrot.slane %v10483_v33, 3 }
 0x201   :  { %v10548_v55 = vsel %vm1202_vm4, %v1200_v19, %v1203_v42  ;;  %v1256_v9 = vrot.slane %v10483_v33, 5  ;;  %v10552_v16 = vsel %vm1202_vm4, %v1208_v26, %v1200_v19  ;;  %v1342_v15 = vrot.slane %v10483_v33, 7 }
 0x202   :  { %1629 = vrot.lane.b32.xlu0 %v1339_v41, %s9295_s21  ;;  %v1242_v38 = vrot.slane %v10036_v13, 7  ;;  %v10557_v29 = vsel %vm1397_vm5, %v1401_v3, %v1403_v60  ;;  %v10560_v53 = vsel %vm1110_vm7, %v1114_v7, %v1116_v23  ;;  %v10563_v41 = vsel %vm1397_vm5, %v1403_v60, %v1405_v10  ;;  %1647 = vrot.lane.b32.xlu1 %v1393_v45, %s9298_s2 }
 0x203   :  { %v1394_v42 = vmul.f32 %v10533_v63, %v1348_v61  ;;  %v10568_v26 = vsel %vm1110_vm7, %v1116_v23, %v1104_v62  ;;  %v10573_v19 = vsel %vm362_vm0, %v1540_v31, %v1541_v52  ;;  %v1435_v3 = vrot.slane %v9932_v59, 7  ;;  %v7698_v59 = vld [vmem:[%s13210_s3 + $0x38] sm:$0xff]   ;;  %v13430_v63 = vld [vmem:[#allocation18_spill] sm:$0xff] }
 0x204   :  { %13384 = vst [vmem:[#allocation33_spill] sm:$0xff] %v10573_v19  ;;  %v10579_v7 = vsel %vm1258_vm3, %v1256_v9, %v1259_v24  ;;  %v1556_v61 = vmul.f32 %v10573_v19, %v10426_v47  ;;  %v10587_v45 = vsel %vm362_vm0, %v1342_v15, %v1344_v6  ;;  %v10592_v31 = vsel %vm1397_vm5, %v1405_v10, %v1398_v0  ;;  %v7697_v10 = vld [vmem:[%s13210_s3 + $0x30] sm:$0xff]  }
 0x205   :  { %v13385_v24 = vrot.slane %v10345_v40, 7  ;;  %v13246_v60 = vrot.slane %v10126_v58, 7  ;;  %v10606_v6 = vsel %vm1258_vm3, %v1264_v25, %v1256_v9  ;;  %v10612_v23 = vsel %vm362_vm0, %v1349_v30, %v1342_v15 }
 0x206   :  { %1649 = vrot.lane.b32.xlu0 %v1394_v42, %s9298_s2  ;;  %1720 = vrot.lane.b32.xlu1 %v1556_v61, %s9299_s26  ;;  %v10617_v40 = vsel %vm1110_vm7, %v1104_v62, %v1111_v18  ;;  %v1504_v25 = vrot.slane %v10150_v56, 7  ;;  %v13386_v9 = vrot.slane %v9769_v28, 7  ;;  %v6434_v61 = vunpack.c.l.bf16 %v7698_v59 }
 0x207   :  { %v10602_v47 = vsel %vm362_vm0, %v13385_v24, %v1242_v38  ;;  %v6435_v24 = vunpack.c.h.bf16 %v7698_v59  ;;  %v13245_v18 = vrot.slane %v10049_v51, 7  ;;  %v10636_v30 = vsel %vm362_vm0, %v1326_v49, %v13246_v60 }
 0x208   :  { %v1254_v0 = vmul.f32 %v10602_v47, %v10496_v50  ;;  %v10626_v42 = vsel %vm362_vm0, %v13386_v9, %v1435_v3  ;;  %13388 = vst [vmem:[#allocation35_spill] sm:$0xff] %v10636_v30  ;;  %v6431_v28 = vunpack.c.h.bf16 %v7697_v10  ;;  %v1340_v56 = vmul.f32 %v10636_v30, %v10512_v12 }
 0x209   :  { %13387 = vst [vmem:[#allocation34_spill] sm:$0xff] %v10626_v42  ;;  %v1449_v21 = vmul.f32 %v10626_v42, %v1402_v5  ;;  %1829 = vmatpush1.msra.mxu1 %v6435_v24  ;;  %v13389_v62 = vmov 0.0   ;;  %v7696_v5 = vld [vmem:[%s13210_s3 + $0x28] sm:$0xff]   ;;  %v1543_v15 = vrot.slane %v9930_v57, 7  ;;  %v13390_v34 = vrot.slane %v10106_v2, 7 }
 0x20a   :  { %1611 = vrot.lane.b32.xlu0 %v1254_v0, %s9294_s17  ;;  %1830 = vmatprep.subr.mxu1 %v13389_v62  ;;  %v6430_v59 = vunpack.c.l.bf16 %v7697_v10  ;;  %v1235_v9 = vrot.slane %v10124_v14, 7  ;;  %v13392_v57 = vrot.slane %v10021_v27, 7  ;;  %v6427_v24 = vunpack.c.h.bf16 %v7696_v5  ;;  %v7695_v14 = vld [vmem:[%s13210_s3 + $0x20] sm:$0xff]  }
 0x20b   :  { %1682 = vrot.lane.b32.xlu1 %v1449_v21, %s9296_s22  ;;  %v10649_v49 = vsel %vm362_vm0, %v13390_v34, %v1504_v25  ;;  %1831 = vmatpush1.msra.mxu1 %v6434_v61  ;;  %v13394_v61 = vld [vmem:[#allocation4_spill] sm:$0xff]  ;;  %v10674_v27 = vsel %vm362_vm0, %v1541_v52, %v1543_v15 }
 0x20c   :  { %13391 = vst [vmem:[#allocation36_spill] sm:$0xff] %v10649_v49  ;;  %v1518_v0 = vmul.f32 %v10649_v49, %v10523_v11  ;;  %1832 = vmatprep.subr.mxu1 %v13389_v62  ;;  %v10661_v2 = vsel %vm362_vm0, %v13392_v57, %v13245_v18  ;;  %v1437_v21 = vrot.slane %v13394_v61, 7  ;;  %13395 = vst [vmem:[#allocation4_spill] sm:$0xff] %v10674_v27  ;;  %v6423_v57 = vunpack.c.h.bf16 %v7695_v14  ;;  %v13413_v18 = vld [vmem:[#allocation14_spill] sm:$0xff] }
 0x20d   :  { %13393 = vst [vmem:[#allocation37_spill] sm:$0xff] %v10661_v2  ;;  %1833 = vmatpush1.msra.mxu1 %v6431_v28  ;;  %v1395_v10 = vmul.f32 %v10661_v2, %v10526_v37  ;;  %v6426_v28 = vunpack.c.l.bf16 %v7696_v5  ;;  %v1557_v37 = vmul.f32 %v10674_v27, %v10459_v20  ;;  %v7694_v20 = vld [vmem:[%s13210_s3 + $0x18] sm:$0xff]   ;;  %v13399_v5 = vld [vmem:[#allocation11_spill] sm:$0xff]  ;;  %v1441_v60 = vrot.slane %v13413_v18, 7 }
 0x20e   :  { %1631 = vrot.lane.b32.xlu0 %v1340_v56, %s9295_s21  ;;  %1834 = vmatprep.subr.mxu1 %v13389_v62  ;;  %v13396_v56 = vld [vmem:[#allocation2_spill] sm:$0xff]  ;;  %v10693_v52 = vsel %vm362_vm0, %v1435_v3, %v1437_v21  ;;  %v7693_v3 = vld [vmem:[%s13210_s3 + $0x10] sm:$0xff]  }
 0x20f   :  { %1702 = vrot.lane.b32.xlu1 %v1518_v0, %s9297_s23  ;;  %1835 = vmatpush1.msra.mxu1 %v6430_v59  ;;  %v13397_v34 = vrot.slane %v13396_v56, 7  ;;  %13398 = vst [vmem:[#allocation2_spill] sm:$0xff] %v10693_v52  ;;  %v1506_v59 = vrot.slane %v13399_v5, 7 }
 0x210   :  { %1836 = vmatprep.subr.mxu1 %v13389_v62 }
 0x211   :  { %v10683_v0 = vsel %vm362_vm0, %v1235_v9, %v13397_v34  ;;  %1837 = vmatpush1.msra.mxu1 %v6427_v24  ;;  %v6422_v9 = vunpack.c.l.bf16 %v7695_v14  ;;  %v1450_v24 = vmul.f32 %v10693_v52, %v10557_v29  ;;  %v13401_v14 = vld [vmem:[#allocation9_spill] sm:$0xff]  ;;  %v10708_v56 = vsel %vm362_vm0, %v1504_v25, %v1506_v59 }
 0x212   :  { %1651 = vrot.lane.b32.xlu0 %v1395_v10, %s9298_s2  ;;  %v1251_v48 = vmul.f32 %v10683_v0, %v10548_v55  ;;  %1838 = vmatprep.subr.mxu1 %v13389_v62  ;;  %v13400_v10 = vld [vmem:[#allocation6_spill] sm:$0xff]  ;;  %13402 = vst [vmem:[#allocation11_spill] sm:$0xff] %v10708_v56  ;;  %v6418_v29 = vunpack.c.l.bf16 %v7694_v20  ;;  %v1519_v34 = vmul.f32 %v10708_v56, %v10560_v53 }
 0x213   :  { %1722 = vrot.lane.b32.xlu1 %v1557_v37, %s9299_s26  ;;  %1839 = vmatpush1.msra.mxu1 %v6426_v28  ;;  %v1439_v61 = vrot.slane %v13400_v10, 7  ;;  %v6419_v37 = vunpack.c.h.bf16 %v7694_v20  ;;  %v1545_v28 = vrot.slane %v13401_v14, 7  ;;  %v13408_v14 = vld [vmem:[#allocation10_spill] sm:$0xff] }
 0x214   :  { %1840 = vmatprep.subr.mxu1 %v13389_v62 }
 0x215   :  { %1841 = vmatpush1.msra.mxu1 %v6423_v57  ;;  %v10716_v57 = vsel %vm362_vm0, %v1437_v21, %v1439_v61  ;;  %v10727_v20 = vsel %vm362_vm0, %v1543_v15, %v1545_v28  ;;  %v13406_v21 = vld [vmem:[#allocation8_spill] sm:$0xff] }
 0x216   :  { %1605 = vrot.lane.b32.xlu0 %v1251_v48, %s9294_s17  ;;  %1842 = vmatprep.subr.mxu1 %v13389_v62  ;;  %13403 = vst [vmem:[#allocation6_spill] sm:$0xff] %v10716_v57  ;;  %v13404_v48 = vld [vmem:[#allocation13_spill] sm:$0xff]  ;;  %v1451_v25 = vmul.f32 %v10716_v57, %v10563_v41  ;;  %13405 = vst [vmem:[#allocation9_spill] sm:$0xff] %v10727_v20  ;;  %v1558_v41 = vmul.f32 %v10727_v20, %v10496_v50  ;;  %v13409_v50 = vld [vmem:[#allocation3_spill] sm:$0xff] }
 0x217   :  { %1684 = vrot.lane.b32.xlu1 %v1450_v24, %s9296_s22  ;;  %1843 = vmatpush1.msra.mxu1 %v6422_v9  ;;  %v13244_v5 = vrot.slane %v13404_v48, 7  ;;  %v6415_v24 = vunpack.c.h.bf16 %v7693_v3  ;;  %v1321_v9 = vrot.slane %v13406_v21, 7 }
 0x218   :  { %1844 = vmatprep.subr.mxu1 %v13389_v62 }
 0x219   :  { %1845 = vmatpush1.msra.mxu1 %v6419_v37  ;;  %v10733_v10 = vsel %vm362_vm0, %v1506_v59, %v13244_v5  ;;  %v6414_v37 = vunpack.c.l.bf16 %v7693_v3  ;;  %v6405_v59 = vld [vmem:[%s13210_s3] sm:$0xff]   ;;  %v1376_v3 = vrot.slane %v13409_v50, 7 }
 0x21a   :  { %1666 = vrot.lane.b32.xlu0 %v10453_v32, %s9293_s20  ;;  %1846 = vmatprep.subr.mxu1 %v13389_v62  ;;  %v7692_v32 = vld [vmem:[%s13210_s3 + $0x8] sm:$0xff]   ;;  %13407 = vst [vmem:[#allocation13_spill] sm:$0xff] %v10733_v10  ;;  %v1520_v21 = vmul.f32 %v10733_v10, %v10568_v26  ;;  %v6407_v50 = vunpack.c.h.bf16 %v6405_v59  ;;  %v6406_v18 = vunpack.c.l.bf16 %v6405_v59  ;;  %v13417_v59 = vld [vmem:[#allocation5_spill] sm:$0xff]  ;;  %v13431_v10 = vrot.slane %v13430_v63, 7 }
 0x21b   :  { %1704 = vrot.lane.b32.xlu1 %v1519_v34, %s9297_s23  ;;  %1847 = vmatpush1.msra.mxu1 %v6418_v29  ;;  %v1547_v34 = vrot.slane %v13408_v14, 7  ;;  %v6411_v15 = vunpack.c.h.bf16 %v7692_v32  ;;  %v13410_v29 = vld [vmem:[#allocation12_spill] sm:$0xff] }
 0x21c   :  { %1848 = vmatprep.subr.mxu1 %v13389_v62 }
 0x21d   :  { %1849 = vmatpush1.msra.mxu1 %v6415_v24  ;;  %v6410_v24 = vunpack.c.l.bf16 %v7692_v32  ;;  %v10758_v14 = vsel %vm362_vm0, %v1545_v28, %v1547_v34  ;;  %v7699_v32 = vld [vmem:[%s13210_s3 + $0x40] sm:$0xff]  }
 0x21e   :  { %1686 = vrot.lane.b32.xlu0 %v1451_v25, %s9296_s22  ;;  %1850 = vmatprep.subr.mxu1 %v13389_v62  ;;  %v13411_v25 = vrot.slane %v13410_v29, 7  ;;  %13412 = vst [vmem:[#allocation8_spill] sm:$0xff] %v10758_v14 }
 0x21f   :  { %1724 = vrot.lane.b32.xlu1 %v1558_v41, %s9299_s26  ;;  %1851 = vmatpush1.msra.mxu1 %v6414_v37  ;;  %v13414_v37 = vrot.slane %v9748_v22, 7 }
 0x220   :  { %v10751_v5 = vsel %vm362_vm0, %v1321_v9, %v13411_v25  ;;  %1852 = vmatprep.subr.mxu1 %v13389_v62  ;;  %v1559_v9 = vmul.f32 %v10758_v14, %v10552_v16  ;;  %v10779_v25 = vsel %vm362_vm0, %v1439_v61, %v1441_v60 }
 0x221   :  { %v1337_v41 = vmul.f32 %v10751_v5, %v10579_v7  ;;  %1853 = vmatpush1.msra.mxu1 %v6411_v15  ;;  %v10771_v28 = vsel %vm362_vm0, %v1376_v3, %v13414_v37  ;;  %13416 = vst [vmem:[#allocation10_spill] sm:$0xff] %v10779_v25  ;;  %v1452_v22 = vmul.f32 %v10779_v25, %v10592_v31  ;;  %v1244_v3 = vrot.slane %v13417_v59, 7 }
 0x222   :  { %1706 = vrot.lane.b32.xlu0 %v1520_v21, %s9297_s23  ;;  %1854 = vmatprep.subr.mxu1 %v13389_v62  ;;  %v1392_v15 = vmul.f32 %v10771_v28, %v10587_v45  ;;  %v13415_v21 = vld [vmem:[#allocation17_spill] sm:$0xff]  ;;  %v6438_v45 = vunpack.c.l.bf16 %v7699_v32 }
 0x223   :  { %1625 = vrot.lane.b32.xlu1 %v1337_v41, %s9295_s21  ;;  %1855 = vmatpush1.msra.mxu1 %v6410_v24  ;;  %v1549_v29 = vrot.slane %v13415_v21, 7  ;;  %v6439_v41 = vunpack.c.h.bf16 %v7699_v32  ;;  %v1320_v24 = vpop.permute.xlu0 %1319  ;;  %v10799_v61 = vsel %vm362_vm0, %v1242_v38, %v1244_v3  ;;  %v56_v38 = vld [vmem:[%s13209_s1 + $0x30] sm:$0x7f]  ;;  %v13423_v32 = vrot.slane %v10049_v51, 7  ;;  %v9283_v51 = vld [vmem:[%s13209_s1 + $0x20] sm:$0x80]  ;;  %v10843_v3 = vpop.permute.xlu1 %1577 }
 0x224   :  { %1856 = vmatprep.subr.mxu1 %v13389_v62  ;;  %13419 = vst [vmem:[#allocation12_spill] sm:$0xff] %v10799_v61  ;;  %v13426_v21 = vrot.slane %v13404_v48, 7 }
 0x225   :  { %1857 = vmatpush1.msra.mxu1 %v6407_v50  ;;  %v10789_v60 = vsel %vm362_vm0, %v1547_v34, %v1549_v29  ;;  %v1330_v50 = vrot.slane %v1320_v24, 7  ;;  %v1255_v34 = vmul.f32 %v10799_v61, %v10552_v16 }
 0x226   :  { %1726 = vrot.lane.b32.xlu0 %v1559_v9, %s9299_s26  ;;  %1858 = vmatprep.subr.mxu1 %v13389_v62  ;;  %13418 = vst [vmem:[#allocation3_spill] sm:$0xff] %v10789_v60  ;;  %v1560_v31 = vmul.f32 %v10789_v60, %v10548_v55  ;;  %v13421_v9 = vrot.slane %v10126_v58, 7 }
 0x227   :  { %1645 = vrot.lane.b32.xlu1 %v1392_v15, %s9298_s2  ;;  %1859 = vmatpush1.msra.mxu1 %v6406_v18  ;;  %v13425_v18 = vld [vmem:[#allocation15_spill] sm:$0xff] }
 0x228   :  { %1888 = vmatprep.subr.mxu1 %v13389_v62  ;;  %v10810_v13 = vsel %vm362_vm0, %v13421_v9, %v1330_v50  ;;  %v1510_v58 = vrot.slane %v13425_v18, 7 }
 0x229   :  { %1889 = vmatpush2.msra.mxu1 %v6439_v41  ;;  %13422 = vst [vmem:[#allocation14_spill] sm:$0xff] %v10810_v13  ;;  %v1341_v16 = vmul.f32 %v10810_v13, %v10606_v6 }
 0x22a   :  { %1688 = vrot.lane.b32.xlu0 %v1452_v22, %s9296_s22  ;;  %1890 = vmatprep.subr.mxu1 %v13389_v62  ;;  %v10830_v29 = vsel %vm362_vm0, %v13426_v21, %v1510_v58  ;;  %v13428_v22 = vmov 0  }
 0x22b   :  { %1668 = vrot.lane.b32.xlu1 %v10483_v33, %s9293_s20  ;;  %1891 = vmatpush2.msra.mxu1 %v6438_v45  ;;  %v13420_v33 = vld [vmem:[#allocation7_spill] sm:$0xff]  ;;  %13427 = vst [vmem:[#allocation5_spill] sm:$0xff] %v10830_v29  ;;  %v1521_v41 = vmul.f32 %v10830_v29, %v10617_v40 }
 0x22c   :  { %9067 = vmatprep.subr.mxu1 %v13389_v62  ;;  %v1385_v55 = vrot.slane %v13420_v33, 7 }
 0x22e   :  { %1728 = vrot.lane.b32.xlu0 %v1560_v31, %s9299_s26  ;;  %v10821_v37 = vsel %vm362_vm0, %v13423_v32, %v1385_v55 }
 0x22f   :  { %1613 = vrot.lane.b32.xlu1 %v1255_v34, %s9294_s17  ;;  %13424 = vst [vmem:[#allocation17_spill] sm:$0xff] %v10821_v37  ;;  %v1396_v15 = vmul.f32 %v10821_v37, %v10612_v23  ;;  %v1162_v23 = vpop.permute.xlu0 %1161  ;;  %v13429_v37 = vld [vmem:[#allocation16_spill] sm:$0xff] }
 0x230   :  { %v1179_v61 = vrot.slane %v13429_v37, 7  ;;  %v1180_v13 = vrot.slane %v1162_v23, 7 }
 0x232   :  { %1979 = vperm.xlu0 %9204, %v56_v38   ;;  %v10853_v52 = vsel %vm362_vm0, %v1179_v61, %v1180_v13  ;;  %v10860_v56 = vsel %vm362_vm0, %v1180_v13, %v13431_v10 }
 0x233   :  { %1633 = vrot.lane.b32.xlu1 %v1341_v16, %s9295_s21  ;;  %v10839_v59 = vpop.permute.xlu0 %1173  ;;  %v1195_v20 = vmul.f32 %v10853_v52, %v10617_v40  ;;  %13432 = vst [vmem:[#allocation7_spill] sm:$0xff] %v10860_v56  ;;  %v1196_v30 = vmul.f32 %v10860_v56, %v10445_v46  ;;  %v13433_v46 = vld [vmem:[#allocation21_spill] sm:$0xff] }
 0x234   :  { %v1186_v63 = vrot.slane %v10839_v59, 7  ;;  %v1197_v56 = vmul.f32 %v13433_v46, %v10523_v11  ;;  %v13434_v59 = vld [vmem:[#allocation20_spill] sm:$0xff]  ;;  %v13435_v11 = vld [vmem:[#allocation19_spill] sm:$0xff] }
 0x237   :  { %1653 = vrot.lane.b32.xlu1 %v1396_v15, %s9298_s2  ;;  %v10841_v48 = vpop.permute.xlu0 %1177 }
 0x23b   :  { %1708 = vrot.lane.b32.xlu1 %v1521_v41, %s9297_s23 }
 0x23f   :  { %1976 = vperm.xlu1 %9203, %v9283_v51  }
 0x243   :  { %9205 = vset.pattern.permute.xlu1 %v13428_v22 }
 0x244   :  { %1961 = vperm.xlu1 %9205, %v9283_v51  }
 0x248   :  { %1965 = vperm.xlu1 %9205, %v56_v38  }
 0x25e   :  { %v1661_v24 = vpop.permute.xlu1 %1660 }
 0x262   :  { %v1663_v45 = vpop.permute.xlu0 %1662 }
 0x266   :  { %v10845_v31 = vpop.permute.xlu0 %1664 }
 0x268   :  { %v1608_v50 = vpop.permute.xlu1 %1607 }
 0x269   :  { %v1737_v35 = vsel %vm1735_vm6, %v1196_v30, %v1608_v50 }
 0x26a   :  { %v1628_v34 = vpop.permute.xlu0 %1627 }
 0x26b   :  { %v1743_v10 = vsel %vm1741_vm8, %v1737_v35, %v1628_v34  ;;  %v13436_v34 = vrot.slane %v13435_v11, 7 }
 0x26c   :  { %v1681_v33 = vpop.permute.xlu1 %1680 }
 0x26e   :  { %v1610_v55 = vpop.permute.xlu0 %1609 }
 0x26f   :  { %v1738_v35 = vsel %vm1735_vm6, %v1197_v56, %v1610_v55 }
 0x270   :  { %v1701_v9 = vpop.permute.xlu1 %1700 }
 0x274   :  { %v1630_v16 = vpop.permute.xlu0 %1629  ;;  %v1648_v32 = vpop.permute.xlu1 %1647 }
 0x278   :  { %v1650_v18 = vpop.permute.xlu0 %1649  ;;  %v1721_v38 = vpop.permute.xlu1 %1720 }
 0x27c   :  { %v1612_v58 = vpop.permute.xlu0 %1611 }
 0x27d   :  { %v1683_v15 = vpop.permute.xlu1 %1682 }
 0x280   :  { %v1632_v21 = vpop.permute.xlu0 %1631 }
 0x281   :  { %v1703_v41 = vpop.permute.xlu1 %1702 }
 0x284   :  { %v10847_v51 = vpop.permute.xlu0 %1651 }
 0x285   :  { %v1723_v22 = vpop.permute.xlu1 %1722 }
 0x288   :  { %v1606_v60 = vpop.permute.xlu0 %1605 }
 0x289   :  { %v1685_v17 = vpop.permute.xlu1 %1684  ;;  %v1736_v37 = vsel %vm1735_vm6, %v1195_v20, %v1606_v60  ;;  %v1749_v20 = vsel %vm1747_vm9, %v1743_v10, %v1648_v32  ;;  %v10887_v32 = vsel %vm362_vm0, %v13436_v34, %v1186_v63 }
 0x28c   :  { %v10849_v29 = vpop.permute.xlu0 %1666 }
 0x28d   :  { %v1705_v25 = vpop.permute.xlu1 %1704 }
 0x290   :  { %v1687_v2 = vpop.permute.xlu0 %1686 }
 0x291   :  { %v1725_v57 = vpop.permute.xlu1 %1724 }
 0x295   :  { %v1626_v14 = vpop.permute.xlu1 %1625 }
 0x296   :  { %v1742_v61 = vsel %vm1741_vm8, %v1736_v37, %v1626_v14  ;;  %v1707_v14 = vpop.permute.xlu0 %1706  ;;  %v10878_v37 = vmul.f32 %v13434_v59, %v10462_v44 }
 0x299   :  { %v1646_v23 = vpop.permute.xlu1 %1645 }
 0x29a   :  { %v1748_v40 = vsel %vm1747_vm9, %v1742_v61, %v1646_v23  ;;  %v1744_v61 = vsel %vm1741_vm8, %v1738_v35, %v1630_v16  ;;  %v13437_v23 = vld [vmem:[#allocation22_spill] sm:$0xff] }
 0x29b   :  { %v1754_v13 = vsel %vm1753_vm10, %v1748_v40, %v1661_v24  ;;  %v1750_v44 = vsel %vm1747_vm9, %v1744_v61, %v1650_v18  ;;  %v10900_v40 = vmul.f32 %v13437_v23, %v10512_v12  ;;  %v1588_v18 = vrot.slane %v10843_v3, 7 }
 0x29c   :  { %v1760_v60 = vsel %vm1759_vm11, %v1754_v13, %v1681_v33  ;;  %v1188_v33 = vrot.slane %v10841_v48, 7  ;;  %v1198_v48 = vmul.f32 %v10887_v32, %v10560_v53 }
 0x29d   :  { %v1669_v30 = vpop.permute.xlu1 %1668  ;;  %v1766_v50 = vsel %vm1765_vm12, %v1760_v60, %v1701_v9  ;;  %v1755_v9 = vsel %vm1753_vm10, %v1749_v20, %v1663_v45  ;;  %v1727_v45 = vpop.permute.xlu0 %1726  ;;  %v13439_v20 = vld [vmem:[#allocation23_spill] sm:$0xff] }
 0x29e   :  { %v10882_v24 = vsel %vm1771_vm13, %v1766_v50, %v1721_v38  ;;  %v1761_v56 = vsel %vm1759_vm11, %v1755_v9, %v1683_v15  ;;  %v10909_v15 = vsel %vm362_vm0, %v1186_v63, %v1188_v33  ;;  %v1739_v12 = vsel %vm1735_vm6, %v1198_v48, %v1612_v58  ;;  %v13438_v58 = vld [vmem:[#allocation24_spill] sm:$0xff]  ;;  %v7702_v48 = vld [vmem:[%s13211_s4 + $0x18] sm:$0xff]  }
 0x29f   :  { %1893 = vmatmul.mubr.f32.vlgmr.msra.gmra.mxu1 %v10882_v24  ;;  %v1767_v55 = vsel %vm1765_vm12, %v1761_v56, %v1703_v41  ;;  %v1756_v41 = vsel %vm1753_vm10, %v1750_v44, %v10845_v31  ;;  %v1745_v53 = vsel %vm1741_vm8, %v1739_v12, %v1632_v21  ;;  %v1199_v63 = vmul.f32 %v10909_v15, %v10568_v26 }
 0x2a0   :  { %6383 = vmatprep.mubr.msk.f32.mxu1 %vm1735_vm6, %v10878_v37  ;;  %v10905_v16 = vsel %vm1771_vm13, %v1767_v55, %v1723_v22  ;;  %v1762_v10 = vsel %vm1759_vm11, %v1756_v41, %v1685_v17  ;;  %v1751_v31 = vsel %vm1747_vm9, %v1745_v53, %v10847_v51  ;;  %v10929_v17 = vmul.f32 %v13438_v58, %v10606_v6  ;;  %v7701_v41 = vld [vmem:[%s13211_s4 + $0x10] sm:$0xff]   ;;  %v7700_v53 = vld [vmem:[%s13211_s4 + $0x8] sm:$0xff]  }
 0x2a1   :  { %v1614_v38 = vpop.permute.xlu1 %1613  ;;  %v1768_v22 = vsel %vm1765_vm12, %v1762_v10, %v1705_v25  ;;  %v13440_v60 = vrot.slane %v13439_v20, 7  ;;  %v1757_v25 = vsel %vm1753_vm10, %v1751_v31, %v10849_v29  ;;  %v1689_v51 = vpop.permute.xlu0 %1688  ;;  %v6454_v12 = vunpack.c.l.bf16 %v7702_v48 }
 0x2a2   :  { %v10925_v13 = vsel %vm1771_vm13, %v1768_v22, %v1725_v57  ;;  %v1763_v26 = vsel %vm1759_vm11, %v1757_v25, %v1687_v2  ;;  %v1740_v57 = vsel %vm1735_vm6, %v1199_v63, %v1614_v38  ;;  %v6451_v10 = vunpack.c.h.bf16 %v7701_v41 }
 0x2a3   :  { %1898 = vmatmul.mubr.f32.gmra.mxu1 %v10905_v16  ;;  %v10934_v21 = vsel %vm362_vm0, %v13440_v60, %v1588_v18  ;;  %v1769_v6 = vsel %vm1765_vm12, %v1763_v26, %v1707_v14  ;;  %v6455_v18 = vunpack.c.h.bf16 %v7702_v48  ;;  %v6450_v22 = vunpack.c.l.bf16 %v7701_v41  ;;  %v1918_v60 = vld [vmem:[%s13209_s1 + $0x2] ss:$0 sm:$0xff] }
 0x2a4   :  { %6384 = vmatprep.mubr.msk.f32.mxu1 %vm1735_vm6, %v10900_v40  ;;  %13441 = vst [vmem:[#allocation15_spill] sm:$0xff] %v10934_v21  ;;  %v10947_v34 = vsel %vm1771_vm13, %v1769_v6, %v1727_v45  ;;  %v10951_v29 = vmul.f32 %v10934_v21, %v10579_v7  ;;  %v7704_v7 = vld [vmem:[%s13211_s4 + $0x28] sm:$0xff]   ;;  %v1924_v6 = vld [vmem:[%s13209_s1 + $0x3] ss:$0 sm:$0xff] }
 0x2a5   :  { %v1634_v3 = vpop.permute.xlu1 %1633  ;;  %v1729_v61 = vpop.permute.xlu0 %1728  ;;  %v6463_v56 = vunpack.c.h.bf16 %v7704_v7  ;;  %v6462_v55 = vunpack.c.l.bf16 %v7704_v7 }
 0x2a6   :  { %v1746_v50 = vsel %vm1741_vm8, %v1740_v57, %v1634_v3  ;;  %v6447_v3 = vunpack.c.h.bf16 %v7700_v53 }
 0x2a7   :  { %1903 = vmatmul.mubr.f32.gmra.mxu1 %v10925_v13 }
 0x2a8   :  { %6385 = vmatprep.mubr.msk.f32.mxu1 %vm1735_vm6, %v10929_v17  ;;  %9068 = vmatpush3.msra.mxu1 %v6463_v56 }
 0x2a9   :  { %v1654_v35 = vpop.permute.xlu1 %1653  ;;  %9069 = vmatprep.subr.mxu1 %v13389_v62 }
 0x2aa   :  { %v1752_v11 = vsel %vm1747_vm9, %v1746_v50, %v1654_v35  ;;  %9070 = vmatpush3.msra.mxu1 %v6462_v55 }
 0x2ab   :  { %v1758_v2 = vsel %vm1753_vm10, %v1752_v11, %v1669_v30  ;;  %1908 = vmatmul.mubr.f32.gmra.mxu1 %v10947_v34  ;;  %v7703_v30 = vld [vmem:[%s13211_s4 + $0x20] sm:$0xff]   ;;  %9071 = vmatprep.subr.mxu1 %v13389_v62 }
 0x2ac   :  { %6386 = vmatprep.mubr.msk.f32.mxu1 %vm1735_vm6, %v10951_v29  ;;  %v1764_v14 = vsel %vm1759_vm11, %v1758_v2, %v1689_v51  ;;  %v6459_v38 = vunpack.c.h.bf16 %v7703_v30  ;;  %v6458_v45 = vunpack.c.l.bf16 %v7703_v30 }
 0x2ad   :  { %v1709_v33 = vpop.permute.xlu1 %1708 }
 0x2ae   :  { %v1770_v9 = vsel %vm1765_vm12, %v1764_v14, %v1709_v33  ;;  %9072 = vmatpush3.msra.mxu1 %v6459_v38 }
 0x2af   :  { %v10960_v44 = vsel %vm1771_vm13, %v1770_v9, %v1729_v61  ;;  %9073 = vmatprep.subr.mxu1 %v13389_v62 }
 0x2b0   :  { %1913 = vmatmul.mubr.f32.gmra.mxu1 %v10960_v44 }
 0x2b1   :  { %9091 = vmatprep.mubr.msk.f32.mxu1 %vm9285_vm1, %v13389_v62  ;;  %9074 = vmatpush3.msra.mxu1 %v6458_v45 }
 0x2b2   :  { %9075 = vmatprep.subr.mxu1 %v13389_v62 }
 0x2b3   :  { %9076 = vmatpush3.msra.mxu1 %v6455_v18 }
 0x2b4   :  { %9077 = vmatprep.subr.mxu1 %v13389_v62 }
 0x2b5   :  { %9078 = vmatpush3.msra.mxu1 %v6454_v12 }
 0x2b6   :  { %9079 = vmatprep.subr.mxu1 %v13389_v62 }
 0x2b7   :  { %9080 = vmatpush3.msra.mxu1 %v6451_v10  ;;  %v6446_v10 = vunpack.c.l.bf16 %v7700_v53 }
 0x2b8   :  { %9081 = vmatprep.subr.mxu1 %v13389_v62 }
 0x2b9   :  { %9082 = vmatpush3.msra.mxu1 %v6450_v22  ;;  %v6441_v22 = vld [vmem:[%s13211_s4] sm:$0xff]  }
 0x2ba   :  { %9083 = vmatprep.subr.mxu1 %v13389_v62 }
 0x2bb   :  { %9084 = vmatpush3.msra.mxu1 %v6447_v3  ;;  %v6443_v3 = vunpack.c.h.bf16 %v6441_v22 }
 0x2bc   :  { %9085 = vmatprep.subr.mxu1 %v13389_v62 }
 0x2bd   :  { %9086 = vmatpush3.msra.mxu1 %v6446_v10 }
 0x2be   :  { %9087 = vmatprep.subr.mxu1 %v13389_v62 }
 0x2bf   :  { %9088 = vmatpush3.msra.mxu1 %v6443_v3 }
 0x2c0   :  { %9089 = vmatprep.subr.mxu1 %v13389_v62 }
 0x35f   :  { %v1894_v63 = vpop.f32.mrf.mxu1 }
 0x360   :  { %v1919_v51 = vmul.f32 %v1918_v60, %v1894_v63 }
 0x361   :  { %v1896_v31 = vpop.f32.mrf.mxu1 }
 0x362   :  { %v1925_v11 = vadd.f32 %v1924_v6, %v1919_v51 }
 0x363   :  { %v1899_v20 = vpop.f32.mrf.mxu1 }
 0x364   :  { %v1920_v25 = vmul.f32 %v1918_v60, %v1899_v20  ;;  %v1930_v7 = vmax.f32 %v1925_v11, 0.0 }
 0x365   :  { %v1901_v26 = vpop.f32.mrf.mxu1 }
 0x366   :  { %v1926_v50 = vadd.f32 %v1924_v6, %v1920_v25  ;;  %v1936_v18 = vrot.slane %v1930_v7, 4 }
 0x367   :  { %v1904_v57 = vpop.f32.mrf.mxu1 }
 0x368   :  { %v1931_v33 = vmax.f32 %v1926_v50, 0.0  ;;  %v1921_v30 = vmul.f32 %v1918_v60, %v1904_v57  ;;  %v1938_v25 = vmax.f32 %v1930_v7, %v1936_v18  ;;  %v1980_v57 = vpop.permute.xlu0 %1979 }
 0x369   :  { %v1906_v35 = vpop.f32.mrf.mxu1 }
 0x36a   :  { %v1940_v55 = vrot.slane %v1931_v33, 4  ;;  %v1927_v41 = vadd.f32 %v1924_v6, %v1921_v30  ;;  %v1977_v35 = vpop.permute.xlu1 %1976 }
 0x36b   :  { %v1909_v2 = vpop.f32.mrf.mxu1 }
 0x36c   :  { %v1922_v14 = vmul.f32 %v1918_v60, %v1909_v2  ;;  %v1942_v63 = vmax.f32 %v1931_v33, %v1940_v55  ;;  %v1932_v26 = vmax.f32 %v1927_v41, 0.0  ;;  %v1981_v2 = vrot.slane %v1977_v35, 7 }
 0x36d   :  { %v1911_v61 = vpop.f32.mrf.mxu1 }
 0x36e   :  { %v1928_v9 = vadd.f32 %v1924_v6, %v1922_v14  ;;  %v1943_v53 = vmax.f32 %v1938_v25, %v1942_v63  ;;  %v1982_v14 = vrot.slane %v1980_v57, 7  ;;  %v1962_v55 = vpop.permute.xlu1 %1961 }
 0x370   :  { %v1914_v56 = vpop.f32.mrf.mxu1  ;;  %v1933_v38 = vmax.f32 %v1928_v9, 0.0  ;;  %v1944_v33 = vmax.f32 %v1943_v53, %v1932_v26  ;;  %v11002_v9 = vsel %vm362_vm0, %v1981_v2, %v1982_v14 }
 0x371   :  { %v1923_v48 = vmul.f32 %v1918_v60, %v1914_v56  ;;  %v6442_v60 = vunpack.c.l.bf16 %v6441_v22 }
 0x372   :  { %v1916_v45 = vpop.f32.mrf.mxu1  ;;  %v1946_v31 = vrot.slane %v1933_v38, 4 }
 0x373   :  { %v1929_v12 = vadd.f32 %v1924_v6, %v1923_v48  ;;  %9090 = vmatpush3.msra.mxu1 %v6442_v60  ;;  %v1967_v48 = vrot.slane %v1962_v55, 7  ;;  %v7709_v60 = vld [vmem:[%s13212_s5 + $0x28] sm:$0xff]  }
 0x374   :  { %v1948_v6 = vmax.f32 %v1932_v26, %v1946_v31  ;;  %2161 = vmatprep.subr.mxu1 %v13389_v62  ;;  %v7711_v31 = vld [vmem:[%s13212_s5 + $0x38] sm:$0xff]   ;;  %v6487_v53 = vunpack.c.h.bf16 %v7709_v60 }
 0x375   :  { %v1934_v20 = vmax.f32 %v1929_v12, 0.0  ;;  %v6495_v25 = vunpack.c.h.bf16 %v7711_v31  ;;  %v6494_v26 = vunpack.c.l.bf16 %v7711_v31 }
 0x377   :  { %v1950_v51 = vrot.slane %v1934_v20, 4 }
 0x379   :  { %v1952_v50 = vmax.f32 %v1933_v38, %v1950_v51  ;;  %v1966_v38 = vpop.permute.xlu1 %1965 }
 0x37a   :  { %v1968_v45 = vrot.slane %v1966_v38, 7  ;;  %v6465_v38 = vld [vmem:[%s13212_s5] sm:$0xff]  }
 0x37b   :  { %v1953_v11 = vmax.f32 %v1948_v6, %v1952_v50  ;;  %v7708_v6 = vld [vmem:[%s13212_s5 + $0x20] sm:$0xff]   ;;  %v6486_v50 = vunpack.c.l.bf16 %v7709_v60 }
 0x37c   :  { %v11009_v41 = vsel %vm362_vm0, %v1967_v48, %v1968_v45  ;;  %v6483_v35 = vunpack.c.h.bf16 %v7708_v6  ;;  %v6482_v2 = vunpack.c.l.bf16 %v7708_v6  ;;  %v6467_v45 = vunpack.c.h.bf16 %v6465_v38  ;;  %v2092_v6 = vld [vmem:[%s13209_s1 + $0x4] ss:$0 sm:$0xff] }
 0x37d   :  { %v1954_v61 = vmax.f32 %v1953_v11, %v1934_v20  ;;  %v7710_v20 = vld [vmem:[%s13212_s5 + $0x30] sm:$0xff]   ;;  %v7707_v11 = vld [vmem:[%s13212_s5 + $0x18] sm:$0xff]  }
 0x37e   :  { %v6491_v51 = vunpack.c.h.bf16 %v7710_v20  ;;  %v6490_v57 = vunpack.c.l.bf16 %v7710_v20  ;;  %v6479_v14 = vunpack.c.h.bf16 %v7707_v11  ;;  %v7713_v20 = vld [vmem:[%s13212_s5 + $0x48] sm:$0xff]  }
 0x37f   :  { %v1955_v7 = vsel %vm1202_vm4, %v1944_v33, %v1954_v61  ;;  %v7706_v33 = vld [vmem:[%s13212_s5 + $0x10] sm:$0xff]   ;;  %v6478_v61 = vunpack.c.l.bf16 %v7707_v11  ;;  %v6502_v60 = vunpack.c.l.bf16 %v7713_v20 }
 0x380   :  { %1986 = vrot.lane.b32.xlu0 %v1955_v7, %s9295_s21  ;;  %v1972_v30 = vrot.slane %v1955_v7, 1  ;;  %v1957_v18 = vrot.slane %v1955_v7, 7  ;;  %v6475_v7 = vunpack.c.h.bf16 %v7706_v33 }
 0x382   :  { %v1985_v56 = vmul.f32 %v11002_v9, %v1972_v30  ;;  %v1971_v10 = vmul.f32 %v11009_v41, %v1957_v18  ;;  %v7705_v30 = vld [vmem:[%s13212_s5 + $0x8] sm:$0xff]   ;;  %v7715_v18 = vld [vmem:[%s13212_s5 + $0x58] sm:$0xff]  }
 0x383   :  { %v6471_v55 = vunpack.c.h.bf16 %v7705_v30  ;;  %v6470_v48 = vunpack.c.l.bf16 %v7705_v30 }
 0x384   :  { %1990 = vrot.lane.b32.xlu1 %v1985_v56, %s9293_s20  ;;  %v6474_v56 = vunpack.c.l.bf16 %v7706_v33 }
 0x3f2   :  { %v1987_v12 = vpop.permute.xlu0 %1986 }
 0x3f3   :  { %v1993_v22 = vsel %vm1741_vm8, %v1971_v10, %v1987_v12  ;;  %v6466_v12 = vunpack.c.l.bf16 %v6465_v38  ;;  %v6511_v10 = vunpack.c.h.bf16 %v7715_v18  ;;  %v2259_v38 = vld [vmem:[%s13213_s6 + $0x70] sm:$0xff] }
 0x3f6   :  { %v1991_v3 = vpop.permute.xlu1 %1990 }
 0x3f7   :  { %v11014_v63 = vsel %vm1753_vm10, %v1993_v22, %v1991_v3  ;;  %v7714_v22 = vld [vmem:[%s13212_s5 + $0x50] sm:$0xff]   ;;  %v6510_v3 = vunpack.c.l.bf16 %v7715_v18  ;;  %v2258_v18 = vld [vmem:[%s13213_s6 + $0x68] sm:$0xff] }
 0x3f8   :  { %9092 = vmatmul.mubr.msk.f32.vlgmr.msra.gmra.mxu1 %vm1765_vm12, %v11014_v63  ;;  %v6507_v31 = vunpack.c.h.bf16 %v7714_v22 }
 0x3f9   :  { %2162 = vmatpush1.msra.mxu1 %v6495_v25  ;;  %v6506_v25 = vunpack.c.l.bf16 %v7714_v22 }
 0x3fa   :  { %2163 = vmatprep.subr.mxu1 %v13389_v62 }
 0x3fb   :  { %2164 = vmatpush1.msra.mxu1 %v6494_v26  ;;  %v6503_v26 = vunpack.c.h.bf16 %v7713_v20  ;;  %v2320_v20 = vunpack.c.h.bf16 %v2258_v18 }
 0x3fc   :  { %2165 = vmatprep.subr.mxu1 %v13389_v62 }
 0x3fd   :  { %2166 = vmatpush1.msra.mxu1 %v6491_v51  ;;  %v7712_v51 = vld [vmem:[%s13212_s5 + $0x40] sm:$0xff]  }
 0x3fe   :  { %2167 = vmatprep.subr.mxu1 %v13389_v62 }
 0x3ff   :  { %2168 = vmatpush1.msra.mxu1 %v6490_v57  ;;  %v6499_v57 = vunpack.c.h.bf16 %v7712_v51 }
 0x400   :  { %2169 = vmatprep.subr.mxu1 %v13389_v62 }
 0x401   :  { %2170 = vmatpush1.msra.mxu1 %v6487_v53  ;;  %v6498_v53 = vunpack.c.l.bf16 %v7712_v51 }
 0x402   :  { %2171 = vmatprep.subr.mxu1 %v13389_v62 }
 0x403   :  { %2172 = vmatpush1.msra.mxu1 %v6486_v50  ;;  %v2260_v50 = vld [vmem:[%s13213_s6 + $0x78] sm:$0xff] }
 0x404   :  { %2173 = vmatprep.subr.mxu1 %v13389_v62 }
 0x405   :  { %2174 = vmatpush1.msra.mxu1 %v6483_v35  ;;  %v2324_v35 = vunpack.c.h.bf16 %v2260_v50 }
 0x406   :  { %2175 = vmatprep.subr.mxu1 %v13389_v62 }
 0x407   :  { %2176 = vmatpush1.msra.mxu1 %v6482_v2  ;;  %v2094_v2 = vld [vmem:[%s13209_s1 + $0x5] ss:$0 sm:$0xff] }
 0x408   :  { %2177 = vmatprep.subr.mxu1 %v13389_v62 }
 0x409   :  { %2178 = vmatpush1.msra.mxu1 %v6479_v14 }
 0x40a   :  { %2179 = vmatprep.subr.mxu1 %v13389_v62 }
 0x40b   :  { %2180 = vmatpush1.msra.mxu1 %v6478_v61 }
 0x40c   :  { %2181 = vmatprep.subr.mxu1 %v13389_v62 }
 0x40d   :  { %2182 = vmatpush1.msra.mxu1 %v6475_v7 }
 0x40e   :  { %2183 = vmatprep.subr.mxu1 %v13389_v62 }
 0x40f   :  { %2184 = vmatpush1.msra.mxu1 %v6474_v56 }
 0x410   :  { %2185 = vmatprep.subr.mxu1 %v13389_v62 }
 0x411   :  { %2186 = vmatpush1.msra.mxu1 %v6471_v55 }
 0x412   :  { %2187 = vmatprep.subr.mxu1 %v13389_v62 }
 0x413   :  { %2188 = vmatpush1.msra.mxu1 %v6470_v48 }
 0x414   :  { %2189 = vmatprep.subr.mxu1 %v13389_v62 }
 0x415   :  { %2190 = vmatpush1.msra.mxu1 %v6467_v45  ;;  %v2323_v45 = vunpack.c.l.bf16 %v2260_v50  ;;  %v2254_v50 = vld [vmem:[%s13213_s6 + $0x48] sm:$0xff] }
 0x416   :  { %2191 = vmatprep.subr.mxu1 %v13389_v62 }
 0x417   :  { %2192 = vmatpush1.msra.mxu1 %v6466_v12 }
 0x418   :  { %2209 = vmatprep.subr.mxu1 %v13389_v62 }
 0x419   :  { %2210 = vmatpush2.msra.mxu1 %v6511_v10  ;;  %v2322_v10 = vunpack.c.h.bf16 %v2259_v38 }
 0x41a   :  { %2211 = vmatprep.subr.mxu1 %v13389_v62 }
 0x41b   :  { %2212 = vmatpush2.msra.mxu1 %v6510_v3  ;;  %v2321_v3 = vunpack.c.l.bf16 %v2259_v38 }
 0x41c   :  { %2213 = vmatprep.subr.mxu1 %v13389_v62 }
 0x41d   :  { %2214 = vmatpush2.msra.mxu1 %v6507_v31  ;;  %v2257_v31 = vld [vmem:[%s13213_s6 + $0x60] sm:$0xff] }
 0x41e   :  { %2215 = vmatprep.subr.mxu1 %v13389_v62  ;;  %v2318_v51 = vunpack.c.h.bf16 %v2257_v31 }
 0x41f   :  { %2216 = vmatpush2.msra.mxu1 %v6506_v25  ;;  %v2319_v25 = vunpack.c.l.bf16 %v2258_v18 }
 0x420   :  { %2217 = vmatprep.subr.mxu1 %v13389_v62 }
 0x421   :  { %2218 = vmatpush2.msra.mxu1 %v6503_v26  ;;  %v2256_v26 = vld [vmem:[%s13213_s6 + $0x58] sm:$0xff] }
 0x422   :  { %2219 = vmatprep.subr.mxu1 %v13389_v62 }
 0x423   :  { %2220 = vmatpush2.msra.mxu1 %v6502_v60  ;;  %v2317_v60 = vunpack.c.l.bf16 %v2257_v31  ;;  %v2248_v31 = vld [vmem:[%s13213_s6 + $0x18] sm:$0xff] }
 0x424   :  { %2221 = vmatprep.subr.mxu1 %v13389_v62 }
 0x425   :  { %2222 = vmatpush2.msra.mxu1 %v6499_v57  ;;  %v2255_v57 = vld [vmem:[%s13213_s6 + $0x50] sm:$0xff] }
 0x426   :  { %2223 = vmatprep.subr.mxu1 %v13389_v62 }
 0x427   :  { %2224 = vmatpush2.msra.mxu1 %v6498_v53  ;;  %v2316_v53 = vunpack.c.h.bf16 %v2256_v26 }
 0x428   :  { %2389 = vmatprep.subr.mxu1 %v2324_v35  ;;  %v2314_v35 = vunpack.c.h.bf16 %v2255_v57 }
 0x4b8   :  { %v2088_v11 = vpop.f32.mrf.mxu1 }
 0x4b9   :  { %v2093_v14 = vmul.f32 %v2092_v6, %v2088_v11  ;;  %v2315_v6 = vunpack.c.l.bf16 %v2256_v26  ;;  %v2313_v11 = vunpack.c.l.bf16 %v2255_v57  ;;  %v2247_v26 = vld [vmem:[%s13213_s6 + $0x10] sm:$0xff]  ;;  %v2246_v57 = vld [vmem:[%s13213_s6 + $0x8] sm:$0xff] }
 0x4ba   :  { %v9093_v33 = vpop.f32.mrf.mxu1 }
 0x4bb   :  { %v2095_v61 = vadd.f32 %v2094_v2, %v2093_v14  ;;  %v2253_v2 = vld [vmem:[%s13213_s6 + $0x40] sm:$0xff]  ;;  %v2312_v14 = vunpack.c.h.bf16 %v2254_v50  ;;  %v2311_v33 = vunpack.c.l.bf16 %v2254_v50 }
 0x4bc   :  { %v2245_v50 = vld [vmem:[%s13213_s6] sm:$0xff] }
 0x4bd   :  { %v2096_v7 = vmax.f32 %v2095_v61, 0.0  ;;  %v2252_v61 = vld [vmem:[%s13213_s6 + $0x38] sm:$0xff] }
 0x4be   :  { %v2307_v38 = vunpack.c.l.bf16 %v2252_v61 }
 0x4bf   :  { %2106 = vrot.lane.b32.xlu0 %v2096_v7, %s9293_s20  ;;  %v2102_v30 = vrot.slane %v2096_v7, 1  ;;  %v2098_v55 = vrot.slane %v2096_v7, 7  ;;  %v2310_v7 = vunpack.c.h.bf16 %v2253_v2 }
 0x4c1   :  { %v2105_v56 = vmul.f32 %v2102_v30, %v11002_v9  ;;  %v2101_v48 = vmul.f32 %v2098_v55, %v11009_v41  ;;  %v2309_v30 = vunpack.c.l.bf16 %v2253_v2  ;;  %v2308_v55 = vunpack.c.h.bf16 %v2252_v61  ;;  %v2276_v2 = vld [vmem:[%s13213_s6 + $0xf8] sm:$0xff]  ;;  %v2275_v61 = vld [vmem:[%s13213_s6 + $0xf0] sm:$0xff] }
 0x4c3   :  { %3420 = vrot.lane.b32.xlu0 %v2105_v56, %s9293_s20  ;;  %6388 = vmatprep.mubr.msk.f32.mxu1 %vm1753_vm10, %v2105_v56  ;;  %v2251_v56 = vld [vmem:[%s13213_s6 + $0x30] sm:$0xff] }
 0x4c4   :  { %v2305_v18 = vunpack.c.l.bf16 %v2251_v56 }
 0x531   :  { %v2107_v12 = vpop.permute.xlu0 %2106 }
 0x532   :  { %v11098_v22 = vsel %vm1753_vm10, %v2101_v48, %v2107_v12  ;;  %v2250_v48 = vld [vmem:[%s13213_s6 + $0x28] sm:$0xff]  ;;  %v2249_v12 = vld [vmem:[%s13213_s6 + $0x20] sm:$0xff] }
 0x533   :  { %2226 = vmatmul.mubr.f32.vlgmr.msra.gmra.mxu1 %v11098_v22 }
 0x534   :  { %2390 = vmatpush1.msra.mxu1 %v2323_v45  ;;  %v2306_v45 = vunpack.c.h.bf16 %v2251_v56  ;;  %v2274_v56 = vld [vmem:[%s13213_s6 + $0xe8] sm:$0xff] }
 0x535   :  { %2391 = vmatprep.subr.mxu1 %v2322_v10  ;;  %v2304_v10 = vunpack.c.h.bf16 %v2250_v48 }
 0x536   :  { %2392 = vmatpush1.msra.mxu1 %v2321_v3  ;;  %v2303_v3 = vunpack.c.l.bf16 %v2250_v48  ;;  %v2273_v48 = vld [vmem:[%s13213_s6 + $0xe0] sm:$0xff] }
 0x537   :  { %2393 = vmatprep.subr.mxu1 %v2320_v20  ;;  %v2302_v20 = vunpack.c.h.bf16 %v2249_v12 }
 0x538   :  { %2394 = vmatpush1.msra.mxu1 %v2319_v25  ;;  %v2301_v25 = vunpack.c.l.bf16 %v2249_v12  ;;  %v2272_v12 = vld [vmem:[%s13213_s6 + $0xd8] sm:$0xff] }
 0x539   :  { %2395 = vmatprep.subr.mxu1 %v2318_v51  ;;  %v2300_v51 = vunpack.c.h.bf16 %v2248_v31 }
 0x53a   :  { %2396 = vmatpush1.msra.mxu1 %v2317_v60  ;;  %v2299_v60 = vunpack.c.l.bf16 %v2248_v31  ;;  %v2271_v31 = vld [vmem:[%s13213_s6 + $0xd0] sm:$0xff] }
 0x53b   :  { %2397 = vmatprep.subr.mxu1 %v2316_v53  ;;  %v2298_v53 = vunpack.c.h.bf16 %v2247_v26 }
 0x53c   :  { %2398 = vmatpush1.msra.mxu1 %v2315_v6  ;;  %v2297_v6 = vunpack.c.l.bf16 %v2247_v26  ;;  %v2270_v26 = vld [vmem:[%s13213_s6 + $0xc8] sm:$0xff] }
 0x53d   :  { %2399 = vmatprep.subr.mxu1 %v2314_v35  ;;  %v2296_v35 = vunpack.c.h.bf16 %v2246_v57 }
 0x53e   :  { %2400 = vmatpush1.msra.mxu1 %v2313_v11  ;;  %v2295_v11 = vunpack.c.l.bf16 %v2246_v57  ;;  %v2269_v57 = vld [vmem:[%s13213_s6 + $0xc0] sm:$0xff] }
 0x53f   :  { %2401 = vmatprep.subr.mxu1 %v2312_v14  ;;  %v2294_v14 = vunpack.c.h.bf16 %v2245_v50 }
 0x540   :  { %2402 = vmatpush1.msra.mxu1 %v2311_v33  ;;  %v2293_v33 = vunpack.c.l.bf16 %v2245_v50  ;;  %v2268_v50 = vld [vmem:[%s13213_s6 + $0xb8] sm:$0xff] }
 0x541   :  { %2403 = vmatprep.subr.mxu1 %v2310_v7  ;;  %v2356_v7 = vunpack.c.h.bf16 %v2276_v2 }
 0x542   :  { %2404 = vmatpush1.msra.mxu1 %v2309_v30  ;;  %v2355_v30 = vunpack.c.l.bf16 %v2276_v2  ;;  %v2267_v2 = vld [vmem:[%s13213_s6 + $0xb0] sm:$0xff] }
 0x543   :  { %2405 = vmatprep.subr.mxu1 %v2308_v55  ;;  %v2354_v55 = vunpack.c.h.bf16 %v2275_v61 }
 0x544   :  { %2406 = vmatpush1.msra.mxu1 %v2307_v38  ;;  %v2353_v38 = vunpack.c.l.bf16 %v2275_v61  ;;  %v2266_v61 = vld [vmem:[%s13213_s6 + $0xa8] sm:$0xff] }
 0x545   :  { %2407 = vmatprep.subr.mxu1 %v2306_v45  ;;  %v2352_v45 = vunpack.c.h.bf16 %v2274_v56 }
 0x546   :  { %2408 = vmatpush1.msra.mxu1 %v2305_v18  ;;  %v2351_v18 = vunpack.c.l.bf16 %v2274_v56  ;;  %v2336_v56 = vunpack.c.h.bf16 %v2266_v61 }
 0x547   :  { %2409 = vmatprep.subr.mxu1 %v2304_v10  ;;  %v2350_v10 = vunpack.c.h.bf16 %v2273_v48 }
 0x548   :  { %2410 = vmatpush1.msra.mxu1 %v2303_v3  ;;  %v2349_v3 = vunpack.c.l.bf16 %v2273_v48  ;;  %v2264_v48 = vld [vmem:[%s13213_s6 + $0x98] sm:$0xff] }
 0x549   :  { %2411 = vmatprep.subr.mxu1 %v2302_v20  ;;  %v2348_v20 = vunpack.c.h.bf16 %v2272_v12 }
 0x54a   :  { %2412 = vmatpush1.msra.mxu1 %v2301_v25  ;;  %v2347_v25 = vunpack.c.l.bf16 %v2272_v12 }
 0x54b   :  { %2413 = vmatprep.subr.mxu1 %v2300_v51  ;;  %v2346_v51 = vunpack.c.h.bf16 %v2271_v31 }
 0x54c   :  { %2414 = vmatpush1.msra.mxu1 %v2299_v60  ;;  %v2345_v60 = vunpack.c.l.bf16 %v2271_v31  ;;  %v2262_v31 = vld [vmem:[%s13213_s6 + $0x88] sm:$0xff] }
 0x54d   :  { %2415 = vmatprep.subr.mxu1 %v2298_v53  ;;  %v2344_v53 = vunpack.c.h.bf16 %v2270_v26 }
 0x54e   :  { %2416 = vmatpush1.msra.mxu1 %v2297_v6  ;;  %v2343_v6 = vunpack.c.l.bf16 %v2270_v26  ;;  %v2261_v26 = vld [vmem:[%s13213_s6 + $0x80] sm:$0xff] }
 0x54f   :  { %2417 = vmatprep.subr.mxu1 %v2296_v35  ;;  %v2342_v35 = vunpack.c.h.bf16 %v2269_v57 }
 0x550   :  { %2418 = vmatpush1.msra.mxu1 %v2295_v11  ;;  %v2341_v11 = vunpack.c.l.bf16 %v2269_v57  ;;  %v2292_v57 = vld [vmem:[%s13213_s6 + $0x178] sm:$0xff] }
 0x551   :  { %2419 = vmatprep.subr.mxu1 %v2294_v14  ;;  %v2340_v14 = vunpack.c.h.bf16 %v2268_v50 }
 0x552   :  { %2420 = vmatpush1.msra.mxu1 %v2293_v33  ;;  %v2339_v33 = vunpack.c.l.bf16 %v2268_v50  ;;  %v2388_v50 = vunpack.c.h.bf16 %v2292_v57 }
 0x553   :  { %2421 = vmatprep.subr.mxu1 %v2356_v7  ;;  %v2338_v7 = vunpack.c.h.bf16 %v2267_v2 }
 0x554   :  { %2422 = vmatpush2.msra.mxu1 %v2355_v30  ;;  %v2337_v30 = vunpack.c.l.bf16 %v2267_v2  ;;  %v2233_v2 = vld [vmem:[%s13209_s1 + $0x7] ss:$0 sm:$0xff] }
 0x555   :  { %2423 = vmatprep.subr.mxu1 %v2354_v55  ;;  %v2335_v55 = vunpack.c.l.bf16 %v2266_v61 }
 0x556   :  { %2424 = vmatpush2.msra.mxu1 %v2353_v38  ;;  %v2265_v38 = vld [vmem:[%s13213_s6 + $0xa0] sm:$0xff] }
 0x557   :  { %2425 = vmatprep.subr.mxu1 %v2352_v45  ;;  %v2263_v45 = vld [vmem:[%s13213_s6 + $0x90] sm:$0xff]  ;;  %v2334_v12 = vunpack.c.h.bf16 %v2265_v38 }
 0x558   :  { %2426 = vmatpush2.msra.mxu1 %v2351_v18  ;;  %v2333_v18 = vunpack.c.l.bf16 %v2265_v38  ;;  %v2290_v38 = vld [vmem:[%s13213_s6 + $0x168] sm:$0xff] }
 0x559   :  { %2427 = vmatprep.subr.mxu1 %v2350_v10  ;;  %v2332_v10 = vunpack.c.h.bf16 %v2264_v48 }
 0x55a   :  { %2428 = vmatpush2.msra.mxu1 %v2349_v3  ;;  %v2331_v3 = vunpack.c.l.bf16 %v2264_v48 }
 0x55b   :  { %2429 = vmatprep.subr.mxu1 %v2348_v20  ;;  %v2330_v20 = vunpack.c.h.bf16 %v2263_v45 }
 0x55c   :  { %2430 = vmatpush2.msra.mxu1 %v2347_v25  ;;  %v2329_v25 = vunpack.c.l.bf16 %v2263_v45 }
 0x55d   :  { %2431 = vmatprep.subr.mxu1 %v2346_v51  ;;  %v2328_v51 = vunpack.c.h.bf16 %v2262_v31 }
 0x55e   :  { %2432 = vmatpush2.msra.mxu1 %v2345_v60  ;;  %v2327_v60 = vunpack.c.l.bf16 %v2262_v31  ;;  %v2288_v31 = vld [vmem:[%s13213_s6 + $0x158] sm:$0xff] }
 0x55f   :  { %2433 = vmatprep.subr.mxu1 %v2344_v53  ;;  %v2326_v53 = vunpack.c.h.bf16 %v2261_v26 }
 0x560   :  { %2434 = vmatpush2.msra.mxu1 %v2343_v6  ;;  %v2325_v6 = vunpack.c.l.bf16 %v2261_v26  ;;  %v2287_v26 = vld [vmem:[%s13213_s6 + $0x150] sm:$0xff] }
 0x561   :  { %2435 = vmatprep.subr.mxu1 %v2342_v35  ;;  %v2231_v35 = vld [vmem:[%s13209_s1 + $0x6] ss:$0 sm:$0xff] }
 0x562   :  { %2436 = vmatpush2.msra.mxu1 %v2341_v11 }
 0x563   :  { %2437 = vmatprep.subr.mxu1 %v2340_v14 }
 0x564   :  { %2438 = vmatpush2.msra.mxu1 %v2339_v33 }
 0x565   :  { %2439 = vmatprep.subr.mxu1 %v2338_v7 }
 0x566   :  { %2440 = vmatpush2.msra.mxu1 %v2337_v30  ;;  %v2291_v30 = vld [vmem:[%s13213_s6 + $0x170] sm:$0xff] }
 0x567   :  { %2441 = vmatprep.subr.mxu1 %v2336_v56  ;;  %v2386_v45 = vunpack.c.h.bf16 %v2291_v30 }
 0x568   :  { %2442 = vmatpush2.msra.mxu1 %v2335_v55  ;;  %v2387_v55 = vunpack.c.l.bf16 %v2292_v57  ;;  %v2286_v57 = vld [vmem:[%s13213_s6 + $0x148] sm:$0xff] }
 0x569   :  { %2443 = vmatprep.subr.mxu1 %v2334_v12  ;;  %v2289_v12 = vld [vmem:[%s13213_s6 + $0x160] sm:$0xff] }
 0x56a   :  { %2444 = vmatpush2.msra.mxu1 %v2333_v18  ;;  %v2385_v18 = vunpack.c.l.bf16 %v2291_v30 }
 0x56b   :  { %2445 = vmatprep.subr.mxu1 %v2332_v10  ;;  %v2384_v10 = vunpack.c.h.bf16 %v2290_v38 }
 0x56c   :  { %2446 = vmatpush2.msra.mxu1 %v2331_v3  ;;  %v2383_v3 = vunpack.c.l.bf16 %v2290_v38 }
 0x56d   :  { %2447 = vmatprep.subr.mxu1 %v2330_v20  ;;  %v2382_v20 = vunpack.c.h.bf16 %v2289_v12 }
 0x56e   :  { %2448 = vmatpush2.msra.mxu1 %v2329_v25  ;;  %v2381_v25 = vunpack.c.l.bf16 %v2289_v12 }
 0x56f   :  { %2449 = vmatprep.subr.mxu1 %v2328_v51  ;;  %v2380_v51 = vunpack.c.h.bf16 %v2288_v31 }
 0x570   :  { %2450 = vmatpush2.msra.mxu1 %v2327_v60  ;;  %v2379_v60 = vunpack.c.l.bf16 %v2288_v31 }
 0x571   :  { %2451 = vmatprep.subr.mxu1 %v2326_v53  ;;  %v2378_v53 = vunpack.c.h.bf16 %v2287_v26 }
 0x572   :  { %2452 = vmatpush2.msra.mxu1 %v2325_v6  ;;  %v2377_v6 = vunpack.c.l.bf16 %v2287_v26 }
 0x573   :  { %2460 = vmatprep.subr.mxu1 %v2388_v50  ;;  %v2285_v50 = vld [vmem:[%s13213_s6 + $0x140] sm:$0xff] }
 0x5f3   :  { %v2227_v11 = vpop.f32.mrf.mxu1 }
 0x5f4   :  { %v2232_v14 = vmul.f32 %v2231_v35, %v2227_v11  ;;  %v2376_v35 = vunpack.c.h.bf16 %v2286_v57  ;;  %v2375_v11 = vunpack.c.l.bf16 %v2286_v57 }
 0x5f5   :  { %v2229_v33 = vpop.f32.mrf.mxu1 }
 0x5f6   :  { %v2234_v61 = vadd.f32 %v2233_v2, %v2232_v14  ;;  %v2284_v2 = vld [vmem:[%s13213_s6 + $0x138] sm:$0xff]  ;;  %v2374_v14 = vunpack.c.h.bf16 %v2285_v50  ;;  %v2373_v33 = vunpack.c.l.bf16 %v2285_v50 }
 0x5f7   :  { %v2372_v30 = vunpack.c.h.bf16 %v2284_v2 }
 0x5f8   :  { %v11197_v7 = vmax.f32 %v2234_v61, 0.0  ;;  %v2283_v61 = vld [vmem:[%s13213_s6 + $0x130] sm:$0xff] }
 0x5f9   :  { %v2370_v38 = vunpack.c.h.bf16 %v2283_v61 }
 0x5fa   :  { %2453 = vmatprep.mubr.f32.mxu1 %v11197_v7  ;;  %v2237_v56 = vrot.slane %v11197_v7, 7 }
 0x5fc   :  { %v11208_v48 = vmul.f32 %v2237_v56, %v11009_v41  ;;  %v2371_v56 = vunpack.c.l.bf16 %v2284_v2  ;;  %v2241_v2 = vrot.slane %v11197_v7, 1 }
 0x5fe   :  { %2454 = vmatmul.mubr.f32.vlgmr.msra.gmra.mxu1 %v11208_v48 }
 0x5ff   :  { %2461 = vmatpush1.msra.mxu1 %v2387_v55  ;;  %2524 = vmatprep.mubr.f32.mxu1 %v13389_v62  ;;  %v2282_v55 = vld [vmem:[%s13213_s6 + $0x128] sm:$0xff] }
 0x600   :  { %2462 = vmatprep.subr.mxu1 %v2386_v45  ;;  %v2369_v45 = vunpack.c.l.bf16 %v2283_v61  ;;  %v2368_v12 = vunpack.c.h.bf16 %v2282_v55  ;;  %v7730_v61 = vld [vmem:[%s13214_s7 + $0x78] sm:$0xff]  }
 0x601   :  { %2463 = vmatpush1.msra.mxu1 %v2385_v18  ;;  %v2281_v18 = vld [vmem:[%s13213_s6 + $0x120] sm:$0xff] }
 0x602   :  { %2464 = vmatprep.subr.mxu1 %v2384_v10  ;;  %v2367_v10 = vunpack.c.l.bf16 %v2282_v55  ;;  %v2366_v31 = vunpack.c.h.bf16 %v2281_v18  ;;  %v6575_v55 = vunpack.c.h.bf16 %v7730_v61 }
 0x603   :  { %2465 = vmatpush1.msra.mxu1 %v2383_v3  ;;  %v2280_v3 = vld [vmem:[%s13213_s6 + $0x118] sm:$0xff] }
 0x604   :  { %2466 = vmatprep.subr.mxu1 %v2382_v20  ;;  %v2365_v20 = vunpack.c.l.bf16 %v2281_v18  ;;  %v2364_v26 = vunpack.c.h.bf16 %v2280_v3  ;;  %v7777_v18 = vld [vmem:[%s13215_s8 + $0x78] sm:$0xff]  }
 0x605   :  { %2467 = vmatpush1.msra.mxu1 %v2381_v25  ;;  %v2279_v25 = vld [vmem:[%s13213_s6 + $0x110] sm:$0xff] }
 0x606   :  { %2468 = vmatprep.subr.mxu1 %v2380_v51  ;;  %v2363_v51 = vunpack.c.l.bf16 %v2280_v3  ;;  %v2362_v57 = vunpack.c.h.bf16 %v2279_v25 }
 0x607   :  { %2469 = vmatpush1.msra.mxu1 %v2379_v60  ;;  %v2278_v60 = vld [vmem:[%s13213_s6 + $0x108] sm:$0xff] }
 0x608   :  { %2470 = vmatprep.subr.mxu1 %v2378_v53  ;;  %v2361_v53 = vunpack.c.l.bf16 %v2279_v25  ;;  %v2360_v50 = vunpack.c.h.bf16 %v2278_v60 }
 0x609   :  { %2471 = vmatpush1.msra.mxu1 %v2377_v6  ;;  %v2277_v6 = vld [vmem:[%s13213_s6 + $0x100] sm:$0xff] }
 0x60a   :  { %2472 = vmatprep.subr.mxu1 %v2376_v35  ;;  %v2359_v35 = vunpack.c.l.bf16 %v2278_v60 }
 0x60b   :  { %2473 = vmatpush1.msra.mxu1 %v2375_v11  ;;  %v2358_v11 = vunpack.c.h.bf16 %v2277_v6 }
 0x60c   :  { %2474 = vmatprep.subr.mxu1 %v2374_v14  ;;  %v2357_v14 = vunpack.c.l.bf16 %v2277_v6 }
 0x60d   :  { %2475 = vmatpush1.msra.mxu1 %v2373_v33  ;;  %v11253_v33 = vmul.f32 %v2241_v2, %v11002_v9  ;;  %v7719_v2 = vld [vmem:[%s13214_s7 + $0x20] sm:$0xff]  }
 0x60e   :  { %2476 = vmatprep.subr.mxu1 %v2372_v30  ;;  %v7722_v30 = vld [vmem:[%s13214_s7 + $0x38] sm:$0xff]  }
 0x60f   :  { %2477 = vmatpush1.msra.mxu1 %v2371_v56  ;;  %v7729_v56 = vld [vmem:[%s13214_s7 + $0x70] sm:$0xff]   ;;  %v6542_v3 = vunpack.c.l.bf16 %v7722_v30 }
 0x610   :  { %2478 = vmatprep.subr.mxu1 %v2370_v38  ;;  %v6543_v38 = vunpack.c.h.bf16 %v7722_v30  ;;  %v6571_v25 = vunpack.c.h.bf16 %v7729_v56  ;;  %v6570_v60 = vunpack.c.l.bf16 %v7729_v56  ;;  %v6531_v30 = vunpack.c.h.bf16 %v7719_v2  ;;  %v7726_v56 = vld [vmem:[%s13214_s7 + $0x58] sm:$0xff]  }
 0x611   :  { %2479 = vmatpush1.msra.mxu1 %v2369_v45  ;;  %v6574_v45 = vunpack.c.l.bf16 %v7730_v61 }
 0x612   :  { %2480 = vmatprep.subr.mxu1 %v2368_v12  ;;  %v7721_v12 = vld [vmem:[%s13214_s7 + $0x30] sm:$0xff]  }
 0x613   :  { %2481 = vmatpush1.msra.mxu1 %v2367_v10  ;;  %v7769_v10 = vld [vmem:[%s13215_s8 + $0x38] sm:$0xff]  }
 0x614   :  { %2482 = vmatprep.subr.mxu1 %v2366_v31  ;;  %v6767_v31 = vunpack.c.h.bf16 %v7777_v18 }
 0x615   :  { %2483 = vmatpush1.msra.mxu1 %v2365_v20  ;;  %v6735_v20 = vunpack.c.h.bf16 %v7769_v10 }
 0x616   :  { %2484 = vmatprep.subr.mxu1 %v2364_v26  ;;  %8199 = vmatprep.subr.mxu0 %v6767_v31  ;;  %v6539_v26 = vunpack.c.h.bf16 %v7721_v12 }
 0x617   :  { %2485 = vmatpush1.msra.mxu1 %v2363_v51  ;;  %v7728_v51 = vld [vmem:[%s13214_s7 + $0x68] sm:$0xff]   ;;  %8200 = vmatpush3.msra.mxu0 %v6735_v20 }
 0x618   :  { %2486 = vmatprep.subr.mxu1 %v2362_v57  ;;  %v7720_v57 = vld [vmem:[%s13214_s7 + $0x28] sm:$0xff]   ;;  %v6567_v6 = vunpack.c.h.bf16 %v7728_v51 }
 0x619   :  { %2487 = vmatpush1.msra.mxu1 %v2361_v53  ;;  %v6538_v53 = vunpack.c.l.bf16 %v7721_v12  ;;  %v7718_v12 = vld [vmem:[%s13214_s7 + $0x18] sm:$0xff]  }
 0x61a   :  { %2488 = vmatprep.subr.mxu1 %v2360_v50  ;;  %v6535_v50 = vunpack.c.h.bf16 %v7720_v57  ;;  %v6527_v31 = vunpack.c.h.bf16 %v7718_v12  ;;  %v6526_v20 = vunpack.c.l.bf16 %v7718_v12 }
 0x61b   :  { %2489 = vmatpush1.msra.mxu1 %v2359_v35  ;;  %v7727_v35 = vld [vmem:[%s13214_s7 + $0x60] sm:$0xff]  }
 0x61c   :  { %2490 = vmatprep.subr.mxu1 %v2358_v11  ;;  %v6566_v11 = vunpack.c.l.bf16 %v7728_v51  ;;  %v6563_v61 = vunpack.c.h.bf16 %v7727_v35  ;;  %v6766_v51 = vunpack.c.l.bf16 %v7777_v18 }
 0x61d   :  { %2491 = vmatpush1.msra.mxu1 %v2357_v14  ;;  %v6534_v14 = vunpack.c.l.bf16 %v7720_v57 }
 0x61e   :  { %2525 = vmatmul.mubr.f32.vlgmr.msra.gmra.mxu1 %v11253_v33  ;;  %8094 = vmatprep.subr.mxu1 %v6575_v55  ;;  %v6562_v55 = vunpack.c.l.bf16 %v7727_v35  ;;  %v7716_v35 = vld [vmem:[%s13214_s7 + $0x8] sm:$0xff]  }
 0x61f   :  { %8095 = vmatpush3.msra.mxu1 %v6543_v38  ;;  %v6530_v38 = vunpack.c.l.bf16 %v7719_v2  ;;  %8201 = vmatprep.subr.mxu0 %v6766_v51  ;;  %v6519_v18 = vunpack.c.h.bf16 %v7716_v35 }
 0x620   :  { %8096 = vmatprep.subr.mxu1 %v6574_v45  ;;  %v6559_v45 = vunpack.c.h.bf16 %v7726_v56 }
 0x621   :  { %8097 = vmatpush3.msra.mxu1 %v6542_v3  ;;  %v6558_v3 = vunpack.c.l.bf16 %v7726_v56 }
 0x622   :  { %8098 = vmatprep.subr.mxu1 %v6571_v25  ;;  %v7725_v25 = vld [vmem:[%s13214_s7 + $0x50] sm:$0xff]  }
 0x623   :  { %8099 = vmatpush3.msra.mxu1 %v6539_v26  ;;  %v7717_v26 = vld [vmem:[%s13214_s7 + $0x10] sm:$0xff]  }
 0x624   :  { %8100 = vmatprep.subr.mxu1 %v6570_v60  ;;  %v6555_v60 = vunpack.c.h.bf16 %v7725_v25  ;;  %v6523_v57 = vunpack.c.h.bf16 %v7717_v26 }
 0x625   :  { %8101 = vmatpush3.msra.mxu1 %v6538_v53  ;;  %v7724_v53 = vld [vmem:[%s13214_s7 + $0x48] sm:$0xff]  }
 0x626   :  { %8102 = vmatprep.subr.mxu1 %v6567_v6  ;;  %v6554_v6 = vunpack.c.l.bf16 %v7725_v25  ;;  %v6551_v2 = vunpack.c.h.bf16 %v7724_v53  ;;  %v7768_v25 = vld [vmem:[%s13215_s8 + $0x30] sm:$0xff]  }
 0x627   :  { %8103 = vmatpush3.msra.mxu1 %v6535_v50  ;;  %v6734_v50 = vunpack.c.l.bf16 %v7769_v10  ;;  %v6513_v10 = vld [vmem:[%s13214_s7] sm:$0xff]  }
 0x628   :  { %8104 = vmatprep.subr.mxu1 %v6566_v11  ;;  %v6522_v11 = vunpack.c.l.bf16 %v7717_v26  ;;  %v6514_v12 = vunpack.c.l.bf16 %v6513_v10  ;;  %v6731_v26 = vunpack.c.h.bf16 %v7768_v25 }
 0x629   :  { %8105 = vmatpush3.msra.mxu1 %v6534_v14  ;;  %8202 = vmatpush3.msra.mxu0 %v6734_v50  ;;  %v7723_v14 = vld [vmem:[%s13214_s7 + $0x40] sm:$0xff]  }
 0x62a   :  { %8106 = vmatprep.subr.mxu1 %v6563_v61  ;;  %v6550_v61 = vunpack.c.l.bf16 %v7724_v53  ;;  %v6547_v56 = vunpack.c.h.bf16 %v7723_v14 }
 0x62b   :  { %8107 = vmatpush3.msra.mxu1 %v6531_v30  ;;  %v6518_v30 = vunpack.c.l.bf16 %v7716_v35 }
 0x62c   :  { %8108 = vmatprep.subr.mxu1 %v6562_v55  ;;  %v6515_v55 = vunpack.c.h.bf16 %v6513_v10  ;;  %v7773_v10 = vld [vmem:[%s13215_s8 + $0x58] sm:$0xff]  }
 0x62d   :  { %8109 = vmatpush3.msra.mxu1 %v6530_v38  ;;  %v11313_v38 = vld [vmem:[%s13214_s7 + $0xf8] sm:$0xff]  }
 0x62e   :  { %8110 = vmatprep.subr.mxu1 %v6559_v45  ;;  %v6546_v45 = vunpack.c.l.bf16 %v7723_v14 }
 0x62f   :  { %8111 = vmatpush3.msra.mxu1 %v6527_v31  ;;  %v7776_v31 = vld [vmem:[%s13215_s8 + $0x70] sm:$0xff]  }
 0x630   :  { %8112 = vmatprep.subr.mxu1 %v6558_v3  ;;  %v6639_v3 = vunpack.c.h.bf16 %v11313_v38  ;;  %v6762_v51 = vunpack.c.l.bf16 %v7776_v31 }
 0x631   :  { %8113 = vmatpush3.msra.mxu1 %v6526_v20  ;;  %v6763_v20 = vunpack.c.h.bf16 %v7776_v31  ;;  %v6750_v31 = vunpack.c.l.bf16 %v7773_v10 }
 0x632   :  { %8114 = vmatprep.subr.mxu1 %v6555_v60  ;;  %v6730_v60 = vunpack.c.l.bf16 %v7768_v25 }
 0x633   :  { %8115 = vmatpush3.msra.mxu1 %v6523_v57  ;;  %8203 = vmatprep.subr.mxu0 %v6763_v20  ;;  %v7775_v57 = vld [vmem:[%s13215_s8 + $0x68] sm:$0xff]   ;;  %v7764_v20 = vld [vmem:[%s13215_s8 + $0x10] sm:$0xff]  }
 0x634   :  { %8116 = vmatprep.subr.mxu1 %v6554_v6  ;;  %8204 = vmatpush3.msra.mxu0 %v6731_v26  ;;  %v6759_v53 = vunpack.c.h.bf16 %v7775_v57  ;;  %v7767_v6 = vld [vmem:[%s13215_s8 + $0x28] sm:$0xff]   ;;  %v6758_v35 = vunpack.c.l.bf16 %v7775_v57  ;;  %v6714_v57 = vunpack.c.l.bf16 %v7764_v20 }
 0x635   :  { %8117 = vmatpush3.msra.mxu1 %v6522_v11  ;;  %8205 = vmatprep.subr.mxu0 %v6762_v51  ;;  %v6727_v50 = vunpack.c.h.bf16 %v7767_v6  ;;  %v6726_v11 = vunpack.c.l.bf16 %v7767_v6  ;;  %v6715_v51 = vunpack.c.h.bf16 %v7764_v20 }
 0x636   :  { %8118 = vmatprep.subr.mxu1 %v6551_v2  ;;  %8206 = vmatpush3.msra.mxu0 %v6730_v60  ;;  %v7774_v2 = vld [vmem:[%s13215_s8 + $0x60] sm:$0xff]  }
 0x637   :  { %8119 = vmatpush3.msra.mxu1 %v6519_v18  ;;  %8207 = vmatprep.subr.mxu0 %v6759_v53  ;;  %v7766_v18 = vld [vmem:[%s13215_s8 + $0x20] sm:$0xff]   ;;  %v6755_v14 = vunpack.c.h.bf16 %v7774_v2  ;;  %v2534_v53 = vlaneseq }
 0x638   :  { %8120 = vmatprep.subr.mxu1 %v6550_v61  ;;  %8208 = vmatpush3.msra.mxu0 %v6727_v50  ;;  %v6723_v61 = vunpack.c.h.bf16 %v7766_v18 }
 0x639   :  { %8121 = vmatpush3.msra.mxu1 %v6518_v30  ;;  %8209 = vmatprep.subr.mxu0 %v6758_v35  ;;  %v6754_v30 = vunpack.c.l.bf16 %v7774_v2  ;;  %v2535_v6 = vshrl.u32 %v2534_v53, 7  ;;  %v7738_v53 = vld [vmem:[%s13214_s7 + $0xb8] sm:$0xff]  }
 0x63a   :  { %8122 = vmatprep.subr.mxu1 %v6547_v56  ;;  %v7765_v56 = vld [vmem:[%s13215_s8 + $0x18] sm:$0xff]   ;;  %8210 = vmatpush3.msra.mxu0 %v6726_v11 }
 0x63b   :  { %8123 = vmatpush3.msra.mxu1 %v6515_v55  ;;  %v6722_v55 = vunpack.c.l.bf16 %v7766_v18  ;;  %8211 = vmatprep.subr.mxu0 %v6755_v14  ;;  %v6718_v25 = vunpack.c.l.bf16 %v7765_v56  ;;  %v11346_v35 = vsub.s32 0, %v2535_v6  ;;  %v6389_v11 = vld [vmem:[%s13209_s1 + $0x10] ss:$8 sm:$0x3]  ;;  %v11351_v2 = vsub.s32 1, %v2535_v6 }
 0x63c   :  { %8124 = vmatprep.subr.mxu1 %v6546_v45  ;;  %v6751_v45 = vunpack.c.h.bf16 %v7773_v10  ;;  %8212 = vmatpush3.msra.mxu0 %v6723_v61  ;;  %v6390_v14 = vld [vmem:[%s13209_s1 + $0x11] ss:$8 sm:$0x3] }
 0x63d   :  { %8125 = vmatpush3.msra.mxu1 %v6514_v12  ;;  %v6719_v12 = vunpack.c.h.bf16 %v7765_v56  ;;  %8213 = vmatprep.subr.mxu0 %v6754_v30  ;;  %v2537_v61 = vrot.slane %v6389_v11, %v11346_v35  ;;  %v2552_v56 = vrot.slane %v6390_v14, %v11346_v35 }
 0x63e   :  { %8129 = vmatprep.subr.mxu1 %v6639_v3  ;;  %v7772_v3 = vld [vmem:[%s13215_s8 + $0x50] sm:$0xff]   ;;  %8214 = vmatpush3.msra.mxu0 %v6722_v55  ;;  %v2541_v55 = vrot.slane %v6389_v11, %v11351_v2  ;;  %v6607_v11 = vunpack.c.h.bf16 %v7738_v53 }
 0x63f   :  { %8215 = vmatprep.subr.mxu0 %v6751_v45  ;;  %v6747_v26 = vunpack.c.h.bf16 %v7772_v3  ;;  %v6746_v60 = vunpack.c.l.bf16 %v7772_v3 }
 0x640   :  { %8216 = vmatpush3.msra.mxu0 %v6719_v12 }
 0x641   :  { %8217 = vmatprep.subr.mxu0 %v6750_v31  ;;  %v2556_v31 = vrot.slane %v6390_v14, %v11351_v2 }
 0x642   :  { %8218 = vmatpush3.msra.mxu0 %v6718_v25 }
 0x643   :  { %8219 = vmatprep.subr.mxu0 %v6747_v26 }
 0x644   :  { %8220 = vmatpush3.msra.mxu0 %v6715_v51 }
 0x645   :  { %8221 = vmatprep.subr.mxu0 %v6746_v60 }
 0x646   :  { %8222 = vmatpush3.msra.mxu0 %v6714_v57 }
 0x6be   :  { %v2455_v50 = vpop.f32.mrf.mxu1 }
 0x6c0   :  { %v2457_v18 = vpop.f32.mrf.mxu1 }
 0x6de   :  { %v2526_v10 = vpop.f32.mrf.mxu1 }
 0x6df   :  { %v2527_v30 = vadd.f32 %v2526_v10, %v2455_v50  ;;  %v7737_v10 = vld [vmem:[%s13214_s7 + $0xb0] sm:$0xff]  }
 0x6e0   :  { %v2528_v45 = vpop.f32.mrf.mxu1 }
 0x6e1   :  { %v2544_v12 = vmul.f32 %v2537_v61, %v2527_v30  ;;  %v2529_v3 = vadd.f32 %v2528_v45, %v2457_v18  ;;  %v7745_v18 = vld [vmem:[%s13214_s7 + $0xf0] sm:$0xff]   ;;  %v6638_v61 = vunpack.c.l.bf16 %v11313_v38  ;;  %v6606_v30 = vunpack.c.l.bf16 %v7738_v53  ;;  %v7744_v45 = vld [vmem:[%s13214_s7 + $0xe8] sm:$0xff]  }
 0x6e2   :  { %v7736_v38 = vld [vmem:[%s13214_s7 + $0xa8] sm:$0xff]  }
 0x6e3   :  { %v2559_v20 = vadd.f32 %v2552_v56, %v2544_v12  ;;  %v2545_v25 = vmul.f32 %v2541_v55, %v2529_v3  ;;  %v6635_v56 = vunpack.c.h.bf16 %v7745_v18  ;;  %v6603_v55 = vunpack.c.h.bf16 %v7737_v10 }
 0x6e4   :  { %v6634_v12 = vunpack.c.l.bf16 %v7745_v18  ;;  %v6602_v3 = vunpack.c.l.bf16 %v7737_v10  ;;  %v6598_v53 = vunpack.c.l.bf16 %v7736_v38 }
 0x6e5   :  { %v11360_v26 = vmax.f32 %v2559_v20, 0.0  ;;  %v2560_v51 = vadd.f32 %v2556_v31, %v2545_v25  ;;  %v6631_v31 = vunpack.c.h.bf16 %v7744_v45  ;;  %v6599_v20 = vunpack.c.h.bf16 %v7736_v38  ;;  %v7743_v25 = vld [vmem:[%s13214_s7 + $0xe0] sm:$0xff]  }
 0x6e6   :  { %v6626_v18 = vunpack.c.l.bf16 %v7743_v25 }
 0x6e7   :  { %v11362_v60 = vmax.f32 %v2560_v51, 0.0  ;;  %v2565_v57 = vrot.slane %v11360_v26, 7  ;;  %v6630_v51 = vunpack.c.l.bf16 %v7744_v45  ;;  %v7733_v45 = vld [vmem:[%s13214_s7 + $0x90] sm:$0xff]  }
 0x6e9   :  { %v2566_v6 = vrot.slane %v11362_v60, 7  ;;  %v2571_v14 = vmul.f32 %v2565_v57, %v11009_v41  ;;  %v7735_v57 = vld [vmem:[%s13214_s7 + $0xa0] sm:$0xff]  }
 0x6eb   :  { %v2572_v50 = vmul.f32 %v2566_v6, %v11009_v41  ;;  %v6627_v6 = vunpack.c.h.bf16 %v7743_v25  ;;  %v7732_v25 = vld [vmem:[%s13214_s7 + $0x88] sm:$0xff]  }
 0x6ed   :  { %2837 = vmatprep.mubr.f32.mxu1 %v2572_v50  ;;  %v6595_v50 = vunpack.c.h.bf16 %v7735_v57 }
 0x6ee   :  { %2838 = vmatmul.mubr.f32.vlgmr.msra.gmra.mxu1 %v2571_v14  ;;  %v7734_v14 = vld [vmem:[%s13214_s7 + $0x98] sm:$0xff]  }
 0x6ef   :  { %8130 = vmatpush3.msra.mxu1 %v6607_v11  ;;  %2907 = vmatprep.mubr.f32.mxu1 %v11362_v60  ;;  %v7742_v11 = vld [vmem:[%s13214_s7 + $0xd8] sm:$0xff]  }
 0x6f0   :  { %8131 = vmatprep.subr.mxu1 %v6638_v61  ;;  %v6594_v61 = vunpack.c.l.bf16 %v7735_v57  ;;  %v6623_v10 = vunpack.c.h.bf16 %v7742_v11 }
 0x6f1   :  { %8132 = vmatpush3.msra.mxu1 %v6606_v30  ;;  %v6591_v30 = vunpack.c.h.bf16 %v7734_v14 }
 0x6f2   :  { %8133 = vmatprep.subr.mxu1 %v6635_v56  ;;  %v7741_v56 = vld [vmem:[%s13214_s7 + $0xd0] sm:$0xff]  }
 0x6f3   :  { %8134 = vmatpush3.msra.mxu1 %v6603_v55  ;;  %v6622_v55 = vunpack.c.l.bf16 %v7742_v11  ;;  %v6619_v38 = vunpack.c.h.bf16 %v7741_v56  ;;  %v7731_v11 = vld [vmem:[%s13214_s7 + $0x80] sm:$0xff]  }
 0x6f4   :  { %8135 = vmatprep.subr.mxu1 %v6634_v12  ;;  %v6590_v12 = vunpack.c.l.bf16 %v7734_v14 }
 0x6f5   :  { %8136 = vmatpush3.msra.mxu1 %v6602_v3  ;;  %v6587_v3 = vunpack.c.h.bf16 %v7733_v45 }
 0x6f6   :  { %8137 = vmatprep.subr.mxu1 %v6631_v31  ;;  %v7740_v31 = vld [vmem:[%s13214_s7 + $0xc8] sm:$0xff]  }
 0x6f7   :  { %8138 = vmatpush3.msra.mxu1 %v6599_v20  ;;  %v6618_v20 = vunpack.c.l.bf16 %v7741_v56  ;;  %v6615_v57 = vunpack.c.h.bf16 %v7740_v31  ;;  %v7754_v56 = vld [vmem:[%s13214_s7 + $0x138] sm:$0xff]  }
 0x6f8   :  { %8139 = vmatprep.subr.mxu1 %v6630_v51  ;;  %v6586_v51 = vunpack.c.l.bf16 %v7733_v45  ;;  %v2574_v45 = vrot.slane %v11362_v60, 1 }
 0x6f9   :  { %8140 = vmatpush3.msra.mxu1 %v6598_v53  ;;  %v6583_v53 = vunpack.c.h.bf16 %v7732_v25 }
 0x6fa   :  { %8141 = vmatprep.subr.mxu1 %v6627_v6  ;;  %v7739_v6 = vld [vmem:[%s13214_s7 + $0xc0] sm:$0xff]  }
 0x6fb   :  { %8142 = vmatpush3.msra.mxu1 %v6595_v50  ;;  %v6614_v50 = vunpack.c.l.bf16 %v7740_v31  ;;  %v6611_v14 = vunpack.c.h.bf16 %v7739_v6 }
 0x6fc   :  { %8143 = vmatprep.subr.mxu1 %v6626_v18  ;;  %v6582_v18 = vunpack.c.l.bf16 %v7732_v25  ;;  %v2580_v25 = vmul.f32 %v2574_v45, %v11002_v9 }
 0x6fd   :  { %8144 = vmatpush3.msra.mxu1 %v6594_v61  ;;  %v6579_v61 = vunpack.c.h.bf16 %v7731_v11 }
 0x6fe   :  { %8145 = vmatprep.subr.mxu1 %v6623_v10  ;;  %v7762_v10 = vld [vmem:[%s13214_s7 + $0x178] sm:$0xff]  }
 0x6ff   :  { %8146 = vmatpush3.msra.mxu1 %v6591_v30  ;;  %v6610_v30 = vunpack.c.l.bf16 %v7739_v6  ;;  %v6702_v31 = vunpack.c.l.bf16 %v7762_v10 }
 0x700   :  { %8147 = vmatprep.subr.mxu1 %v6622_v55  ;;  %v6578_v55 = vunpack.c.l.bf16 %v7731_v11 }
 0x701   :  { %8148 = vmatpush3.msra.mxu1 %v6590_v12  ;;  %v6703_v12 = vunpack.c.h.bf16 %v7762_v10 }
 0x702   :  { %8149 = vmatprep.subr.mxu1 %v6619_v38  ;;  %v6671_v38 = vunpack.c.h.bf16 %v7754_v56 }
 0x703   :  { %8150 = vmatpush3.msra.mxu1 %v6587_v3  ;;  %v7761_v3 = vld [vmem:[%s13214_s7 + $0x170] sm:$0xff]  }
 0x704   :  { %8151 = vmatprep.subr.mxu1 %v6618_v20  ;;  %v7753_v20 = vld [vmem:[%s13214_s7 + $0x130] sm:$0xff]   ;;  %v6699_v60 = vunpack.c.h.bf16 %v7761_v3  ;;  %v6698_v6 = vunpack.c.l.bf16 %v7761_v3  ;;  %v7750_v3 = vld [vmem:[%s13214_s7 + $0x118] sm:$0xff]  }
 0x705   :  { %8152 = vmatpush3.msra.mxu1 %v6586_v51  ;;  %v6670_v51 = vunpack.c.l.bf16 %v7754_v56  ;;  %v6666_v11 = vunpack.c.l.bf16 %v7753_v20 }
 0x706   :  { %8153 = vmatprep.subr.mxu1 %v6615_v57  ;;  %v6667_v57 = vunpack.c.h.bf16 %v7753_v20 }
 0x707   :  { %8154 = vmatpush3.msra.mxu1 %v6583_v53  ;;  %v7760_v53 = vld [vmem:[%s13214_s7 + $0x168] sm:$0xff]  }
 0x708   :  { %8155 = vmatprep.subr.mxu1 %v6614_v50  ;;  %v7752_v50 = vld [vmem:[%s13214_s7 + $0x128] sm:$0xff]   ;;  %v6694_v10 = vunpack.c.l.bf16 %v7760_v53 }
 0x709   :  { %8156 = vmatpush3.msra.mxu1 %v6582_v18  ;;  %v6695_v18 = vunpack.c.h.bf16 %v7760_v53  ;;  %v6662_v56 = vunpack.c.l.bf16 %v7752_v50  ;;  %v6654_v53 = vunpack.c.l.bf16 %v7750_v3 }
 0x70a   :  { %8157 = vmatprep.subr.mxu1 %v6611_v14  ;;  %v6663_v14 = vunpack.c.h.bf16 %v7752_v50 }
 0x70b   :  { %8158 = vmatpush3.msra.mxu1 %v6579_v61  ;;  %v7759_v61 = vld [vmem:[%s13214_s7 + $0x160] sm:$0xff]  }
 0x70c   :  { %8159 = vmatprep.subr.mxu1 %v6610_v30  ;;  %v7751_v30 = vld [vmem:[%s13214_s7 + $0x120] sm:$0xff]  }
 0x70d   :  { %8160 = vmatpush3.msra.mxu1 %v6578_v55  ;;  %v6691_v55 = vunpack.c.h.bf16 %v7759_v61  ;;  %v6659_v45 = vunpack.c.h.bf16 %v7751_v30 }
 0x70e   :  { %2908 = vmatmul.mubr.f32.vlgmr.msra.gmra.mxu1 %v11360_v26  ;;  %8164 = vmatprep.subr.mxu1 %v6703_v12  ;;  %v7758_v12 = vld [vmem:[%s13214_s7 + $0x158] sm:$0xff]  }
 0x70f   :  { %8165 = vmatpush3.msra.mxu1 %v6671_v38  ;;  %2977 = vmatprep.mubr.f32.mxu1 %v2580_v25  ;;  %v6690_v38 = vunpack.c.l.bf16 %v7759_v61  ;;  %v6687_v20 = vunpack.c.h.bf16 %v7758_v12  ;;  %v6655_v25 = vunpack.c.h.bf16 %v7750_v3 }
 0x710   :  { %8166 = vmatprep.subr.mxu1 %v6702_v31  ;;  %v6658_v31 = vunpack.c.l.bf16 %v7751_v30 }
 0x711   :  { %8167 = vmatpush3.msra.mxu1 %v6670_v51  ;;  %v7757_v51 = vld [vmem:[%s13214_s7 + $0x150] sm:$0xff]  }
 0x712   :  { %8168 = vmatprep.subr.mxu1 %v6699_v60  ;;  %v6686_v60 = vunpack.c.l.bf16 %v7758_v12 }
 0x713   :  { %8169 = vmatpush3.msra.mxu1 %v6667_v57  ;;  %v7749_v57 = vld [vmem:[%s13214_s7 + $0x110] sm:$0xff]  }
 0x714   :  { %8170 = vmatprep.subr.mxu1 %v6698_v6  ;;  %v6683_v6 = vunpack.c.h.bf16 %v7757_v51  ;;  %v6651_v50 = vunpack.c.h.bf16 %v7749_v57  ;;  %v6650_v61 = vunpack.c.l.bf16 %v7749_v57  ;;  %v7763_v57 = vld [vmem:[%s13215_s8 + $0x8] sm:$0xff]  }
 0x715   :  { %8171 = vmatpush3.msra.mxu1 %v6666_v11  ;;  %v7756_v11 = vld [vmem:[%s13214_s7 + $0x148] sm:$0xff]  }
 0x716   :  { %8172 = vmatprep.subr.mxu1 %v6695_v18  ;;  %v6682_v18 = vunpack.c.l.bf16 %v7757_v51 }
 0x717   :  { %8173 = vmatpush3.msra.mxu1 %v6663_v14  ;;  %v7748_v14 = vld [vmem:[%s13214_s7 + $0x108] sm:$0xff]  }
 0x718   :  { %8174 = vmatprep.subr.mxu1 %v6694_v10  ;;  %v6679_v10 = vunpack.c.h.bf16 %v7756_v11  ;;  %v6647_v30 = vunpack.c.h.bf16 %v7748_v14  ;;  %v6646_v12 = vunpack.c.l.bf16 %v7748_v14 }
 0x719   :  { %8175 = vmatpush3.msra.mxu1 %v6662_v56  ;;  %v7755_v56 = vld [vmem:[%s13214_s7 + $0x140] sm:$0xff]  }
 0x71a   :  { %8176 = vmatprep.subr.mxu1 %v6691_v55  ;;  %v6678_v55 = vunpack.c.l.bf16 %v7756_v11  ;;  %v6705_v11 = vld [vmem:[%s13215_s8] sm:$0xff]  }
 0x71b   :  { %8177 = vmatpush3.msra.mxu1 %v6659_v45  ;;  %v7747_v45 = vld [vmem:[%s13214_s7 + $0x100] sm:$0xff]  }
 0x71c   :  { %8178 = vmatprep.subr.mxu1 %v6690_v38  ;;  %v6675_v38 = vunpack.c.h.bf16 %v7755_v56  ;;  %v6643_v3 = vunpack.c.h.bf16 %v7747_v45 }
 0x71d   :  { %8179 = vmatpush3.msra.mxu1 %v6658_v31  ;;  %v6674_v31 = vunpack.c.l.bf16 %v7755_v56 }
 0x71e   :  { %8180 = vmatprep.subr.mxu1 %v6687_v20  ;;  %v2573_v20 = vrot.slane %v11360_v26, 1 }
 0x71f   :  { %8181 = vmatpush3.msra.mxu1 %v6655_v25  ;;  %v6642_v25 = vunpack.c.l.bf16 %v7747_v45  ;;  %v7784_v45 = vld [vmem:[%s13215_s8 + $0xb0] sm:$0xff]  }
 0x720   :  { %8182 = vmatprep.subr.mxu1 %v6686_v60  ;;  %v2579_v51 = vmul.f32 %v2573_v20, %v11002_v9  ;;  %v7771_v60 = vld [vmem:[%s13215_s8 + $0x48] sm:$0xff]  }
 0x721   :  { %8183 = vmatpush3.msra.mxu1 %v6654_v53  ;;  %v6743_v26 = vunpack.c.h.bf16 %v7771_v60  ;;  %v6711_v53 = vunpack.c.h.bf16 %v7763_v57  ;;  %v7791_v20 = vld [vmem:[%s13215_s8 + $0xe8] sm:$0xff]  }
 0x722   :  { %8184 = vmatprep.subr.mxu1 %v6683_v6  ;;  %v6742_v6 = vunpack.c.l.bf16 %v7771_v60  ;;  %v7783_v60 = vld [vmem:[%s13215_s8 + $0xa8] sm:$0xff]  }
 0x723   :  { %8185 = vmatpush3.msra.mxu1 %v6651_v50  ;;  %v6710_v50 = vunpack.c.l.bf16 %v7763_v57  ;;  %8223 = vmatprep.subr.mxu0 %v6743_v26  ;;  %v6706_v57 = vunpack.c.l.bf16 %v6705_v11  ;;  %v6794_v26 = vunpack.c.l.bf16 %v7784_v45 }
 0x724   :  { %8186 = vmatprep.subr.mxu1 %v6682_v18  ;;  %8224 = vmatpush3.msra.mxu0 %v6711_v53  ;;  %v7793_v18 = vld [vmem:[%s13215_s8 + $0xf8] sm:$0xff]   ;;  %v6823_v53 = vunpack.c.h.bf16 %v7791_v20 }
 0x725   :  { %8187 = vmatpush3.msra.mxu1 %v6650_v61  ;;  %8225 = vmatprep.subr.mxu0 %v6742_v6  ;;  %v6707_v61 = vunpack.c.h.bf16 %v6705_v11  ;;  %v6830_v56 = vunpack.c.l.bf16 %v7793_v18  ;;  %v6791_v6 = vunpack.c.h.bf16 %v7783_v60  ;;  %v6790_v11 = vunpack.c.l.bf16 %v7783_v60  ;;  %v7787_v60 = vld [vmem:[%s13215_s8 + $0xc8] sm:$0xff]  }
 0x726   :  { %8188 = vmatprep.subr.mxu1 %v6679_v10  ;;  %8226 = vmatpush3.msra.mxu0 %v6710_v50  ;;  %v6831_v10 = vunpack.c.h.bf16 %v7793_v18  ;;  %v7790_v50 = vld [vmem:[%s13215_s8 + $0xe0] sm:$0xff]  }
 0x727   :  { %8189 = vmatpush3.msra.mxu1 %v6647_v30  ;;  %v7785_v30 = vld [vmem:[%s13215_s8 + $0xb8] sm:$0xff]   ;;  %v7782_v18 = vld [vmem:[%s13215_s8 + $0xa0] sm:$0xff]  }
 0x728   :  { %8190 = vmatprep.subr.mxu1 %v6678_v55  ;;  %v7792_v55 = vld [vmem:[%s13215_s8 + $0xf0] sm:$0xff]  }
 0x729   :  { %8191 = vmatpush3.msra.mxu1 %v6646_v12  ;;  %v6799_v12 = vunpack.c.h.bf16 %v7785_v30 }
 0x72a   :  { %8192 = vmatprep.subr.mxu1 %v6675_v38  ;;  %v6798_v38 = vunpack.c.l.bf16 %v7785_v30  ;;  %v6786_v30 = vunpack.c.l.bf16 %v7782_v18 }
 0x72b   :  { %8193 = vmatpush3.msra.mxu1 %v6643_v3  ;;  %v6827_v3 = vunpack.c.h.bf16 %v7792_v55 }
 0x72c   :  { %8194 = vmatprep.subr.mxu1 %v6674_v31  ;;  %v6795_v31 = vunpack.c.h.bf16 %v7784_v45  ;;  %v7781_v45 = vld [vmem:[%s13215_s8 + $0x98] sm:$0xff]  }
 0x72d   :  { %8195 = vmatpush3.msra.mxu1 %v6642_v25 }
 0x72e   :  { %2978 = vmatmul.mubr.f32.vlgmr.msra.gmra.mxu1 %v2579_v51  ;;  %8234 = vmatprep.subr.mxu1 %v6831_v10  ;;  %v6826_v51 = vunpack.c.l.bf16 %v7792_v55  ;;  %v6818_v10 = vunpack.c.l.bf16 %v7790_v50 }
 0x72f   :  { %3323 = vmatprep.mubr.f32.mxu1 %v11208_v48  ;;  %v7770_v48 = vld [vmem:[%s13215_s8 + $0x40] sm:$0xff]   ;;  %8235 = vmatpush3.msra.mxu1 %v6799_v12 }
 0x730   :  { %v6739_v14 = vunpack.c.h.bf16 %v7770_v48  ;;  %v6738_v25 = vunpack.c.l.bf16 %v7770_v48  ;;  %8236 = vmatprep.subr.mxu1 %v6830_v56  ;;  %v6822_v48 = vunpack.c.l.bf16 %v7791_v20  ;;  %v7789_v56 = vld [vmem:[%s13215_s8 + $0xd8] sm:$0xff]   ;;  %v6782_v20 = vunpack.c.l.bf16 %v7781_v45 }
 0x731   :  { %8237 = vmatpush3.msra.mxu1 %v6798_v38  ;;  %v6815_v55 = vunpack.c.h.bf16 %v7789_v56  ;;  %v6814_v12 = vunpack.c.l.bf16 %v7789_v56  ;;  %v7788_v38 = vld [vmem:[%s13215_s8 + $0xd0] sm:$0xff]  }
 0x732   :  { %8227 = vmatprep.subr.mxu0 %v6739_v14  ;;  %8238 = vmatprep.subr.mxu1 %v6827_v3  ;;  %v6819_v14 = vunpack.c.h.bf16 %v7790_v50  ;;  %v7780_v3 = vld [vmem:[%s13215_s8 + $0x90] sm:$0xff]  }
 0x733   :  { %8228 = vmatpush3.msra.mxu0 %v6707_v61  ;;  %8239 = vmatpush3.msra.mxu1 %v6795_v31  ;;  %v6787_v61 = vunpack.c.h.bf16 %v7782_v18  ;;  %v6783_v31 = vunpack.c.h.bf16 %v7781_v45  ;;  %v7786_v18 = vld [vmem:[%s13215_s8 + $0xc0] sm:$0xff]  }
 0x734   :  { %8229 = vmatprep.subr.mxu0 %v6738_v25  ;;  %8240 = vmatprep.subr.mxu1 %v6826_v51  ;;  %v6811_v25 = vunpack.c.h.bf16 %v7788_v38  ;;  %v6779_v51 = vunpack.c.h.bf16 %v7780_v3 }
 0x735   :  { %8230 = vmatpush3.msra.mxu0 %v6706_v57  ;;  %8241 = vmatpush3.msra.mxu1 %v6794_v26  ;;  %v6810_v57 = vunpack.c.l.bf16 %v7788_v38  ;;  %v7779_v26 = vld [vmem:[%s13215_s8 + $0x88] sm:$0xff]  }
 0x736   :  { %8242 = vmatprep.subr.mxu1 %v6823_v53  ;;  %v6778_v53 = vunpack.c.l.bf16 %v7780_v3  ;;  %v6775_v50 = vunpack.c.h.bf16 %v7779_v26 }
 0x737   :  { %8243 = vmatpush3.msra.mxu1 %v6791_v6  ;;  %v6807_v6 = vunpack.c.h.bf16 %v7787_v60 }
 0x738   :  { %8244 = vmatprep.subr.mxu1 %v6822_v48  ;;  %v6806_v48 = vunpack.c.l.bf16 %v7787_v60 }
 0x739   :  { %8245 = vmatpush3.msra.mxu1 %v6790_v11  ;;  %v7778_v11 = vld [vmem:[%s13215_s8 + $0x80] sm:$0xff]  }
 0x73a   :  { %8246 = vmatprep.subr.mxu1 %v6819_v14  ;;  %v7809_v14 = vld [vmem:[%s13215_s8 + $0x178] sm:$0xff]   ;;  %v6771_v56 = vunpack.c.h.bf16 %v7778_v11  ;;  %v6770_v45 = vunpack.c.l.bf16 %v7778_v11 }
 0x73b   :  { %8247 = vmatpush3.msra.mxu1 %v6787_v61  ;;  %v6774_v61 = vunpack.c.l.bf16 %v7779_v26 }
 0x73c   :  { %8248 = vmatprep.subr.mxu1 %v6818_v10  ;;  %v6803_v10 = vunpack.c.h.bf16 %v7786_v18 }
 0x73d   :  { %8249 = vmatpush3.msra.mxu1 %v6786_v30  ;;  %v6895_v30 = vunpack.c.h.bf16 %v7809_v14 }
 0x73e   :  { %8250 = vmatprep.subr.mxu1 %v6815_v55  ;;  %v6802_v55 = vunpack.c.l.bf16 %v7786_v18 }
 0x73f   :  { %8251 = vmatpush3.msra.mxu1 %v6783_v31  ;;  %8269 = vmatprep.subr.mxu0 %v6895_v30 }
 0x740   :  { %8252 = vmatprep.subr.mxu1 %v6814_v12 }
 0x741   :  { %8253 = vmatpush3.msra.mxu1 %v6782_v20 }
 0x742   :  { %8254 = vmatprep.subr.mxu1 %v6811_v25 }
 0x743   :  { %8255 = vmatpush3.msra.mxu1 %v6779_v51 }
 0x744   :  { %8256 = vmatprep.subr.mxu1 %v6810_v57 }
 0x745   :  { %8257 = vmatpush3.msra.mxu1 %v6778_v53  ;;  %v2983_v53 = vld [vmem:[%s13209_s1 + $0x12] ss:$0 sm:$0xff] }
 0x746   :  { %8258 = vmatprep.subr.mxu1 %v6807_v6 }
 0x747   :  { %8259 = vmatpush3.msra.mxu1 %v6775_v50  ;;  %v2985_v50 = vld [vmem:[%s13209_s1 + $0x13] ss:$0 sm:$0xff] }
 0x748   :  { %8260 = vmatprep.subr.mxu1 %v6806_v48 }
 0x749   :  { %8261 = vmatpush3.msra.mxu1 %v6774_v61  ;;  %v7801_v61 = vld [vmem:[%s13215_s8 + $0x138] sm:$0xff]  }
 0x74a   :  { %8262 = vmatprep.subr.mxu1 %v6803_v10 }
 0x74b   :  { %8263 = vmatpush3.msra.mxu1 %v6771_v56  ;;  %v6863_v56 = vunpack.c.h.bf16 %v7801_v61 }
 0x74c   :  { %8264 = vmatprep.subr.mxu1 %v6802_v55  ;;  %v7808_v55 = vld [vmem:[%s13215_s8 + $0x170] sm:$0xff]  }
 0x74d   :  { %8265 = vmatpush3.msra.mxu1 %v6770_v45 }
 0x7ae   :  { %v8126_v12 = vpop.f32.mrf.mxu1 }
 0x7b0   :  { %v8127_v38 = vpop.f32.mrf.mxu1 }
 0x7b1   :  { %v8128_v51 = vadd.f32 %v8127_v38, %v8126_v12  ;;  %v6894_v38 = vunpack.c.l.bf16 %v7809_v14  ;;  %v7799_v14 = vld [vmem:[%s13215_s8 + $0x128] sm:$0xff]  }
 0x7ce   :  { %v8161_v3 = vpop.f32.mrf.mxu1 }
 0x7d0   :  { %v8162_v31 = vpop.f32.mrf.mxu1 }
 0x7d1   :  { %v8163_v20 = vadd.f32 %v8162_v31, %v8161_v3  ;;  %v7800_v3 = vld [vmem:[%s13215_s8 + $0x130] sm:$0xff]   ;;  %v6862_v31 = vunpack.c.l.bf16 %v7801_v61  ;;  %v7805_v61 = vld [vmem:[%s13215_s8 + $0x158] sm:$0xff]  }
 0x7d3   :  { %v2910_v57 = vadd.f32 %v8163_v20, %v8128_v51  ;;  %v6891_v20 = vunpack.c.h.bf16 %v7808_v55  ;;  %v7807_v51 = vld [vmem:[%s13215_s8 + $0x168] sm:$0xff]  }
 0x7ee   :  { %v8196_v25 = vpop.f32.mrf.mxu1 }
 0x7f0   :  { %v8197_v60 = vpop.f32.mrf.mxu1 }
 0x7f1   :  { %v8198_v26 = vadd.f32 %v8197_v60, %v8196_v25  ;;  %v6859_v25 = vunpack.c.h.bf16 %v7800_v3  ;;  %v6890_v60 = vunpack.c.l.bf16 %v7808_v55  ;;  %v6879_v55 = vunpack.c.h.bf16 %v7805_v61 }
 0x7f3   :  { %v2980_v6 = vadd.f32 %v8198_v26, %v2910_v57  ;;  %v6858_v57 = vunpack.c.l.bf16 %v7800_v3  ;;  %v6887_v26 = vunpack.c.h.bf16 %v7807_v51  ;;  %v7796_v3 = vld [vmem:[%s13215_s8 + $0x110] sm:$0xff]  }
 0x7f5   :  { %v2984_v48 = vmul.f32 %v2983_v53, %v2980_v6  ;;  %v6855_v53 = vunpack.c.h.bf16 %v7799_v14  ;;  %v6886_v6 = vunpack.c.l.bf16 %v7807_v51  ;;  %v7803_v51 = vld [vmem:[%s13215_s8 + $0x148] sm:$0xff]  }
 0x7f7   :  { %v2986_v18 = vadd.f32 %v2985_v50, %v2984_v48  ;;  %v7798_v50 = vld [vmem:[%s13215_s8 + $0x120] sm:$0xff]   ;;  %v6854_v48 = vunpack.c.l.bf16 %v7799_v14  ;;  %v7795_v14 = vld [vmem:[%s13215_s8 + $0x108] sm:$0xff]  }
 0x7f9   :  { %v2987_v11 = vmax.f32 %v2986_v18, 0.0 }
 0x7fb   :  { %v2989_v10 = vrot.slane %v2987_v11, 7  ;;  %v2993_v30 = vrot.slane %v2987_v11, 1  ;;  %3253 = vmatprep.mubr.f32.mxu0 %v2987_v11  ;;  %v6851_v11 = vunpack.c.h.bf16 %v7798_v50 }
 0x7fd   :  { %v2992_v45 = vmul.f32 %v2989_v10, %v11009_v41  ;;  %v2996_v12 = vmul.f32 %v2993_v30, %v11002_v9  ;;  %v7797_v30 = vld [vmem:[%s13215_s8 + $0x118] sm:$0xff]  }
 0x7ff   :  { %3254 = vmatmul.mubr.f32.vlgmr.msra.gmra.mxu0 %v2992_v45  ;;  %3324 = vmatmul.mubr.f32.vlgmr.msra.gmra.mxu1 %v2996_v12  ;;  %v6847_v45 = vunpack.c.h.bf16 %v7797_v30  ;;  %v7804_v12 = vld [vmem:[%s13215_s8 + $0x150] sm:$0xff]  }
 0x800   :  { %8270 = vmatpush3.msra.mxu0 %v6863_v56  ;;  %3393 = vmatprep.mubr.f32.mxu0 %v11253_v33  ;;  %v7806_v33 = vld [vmem:[%s13215_s8 + $0x160] sm:$0xff]   ;;  %v6850_v56 = vunpack.c.l.bf16 %v7798_v50 }
 0x801   :  { %8271 = vmatprep.subr.mxu0 %v6894_v38  ;;  %v6883_v18 = vunpack.c.h.bf16 %v7806_v33  ;;  %v6882_v10 = vunpack.c.l.bf16 %v7806_v33  ;;  %v6878_v38 = vunpack.c.l.bf16 %v7805_v61  ;;  %v7802_v33 = vld [vmem:[%s13215_s8 + $0x140] sm:$0xff]  }
 0x802   :  { %8272 = vmatpush3.msra.mxu0 %v6862_v31  ;;  %v6846_v31 = vunpack.c.l.bf16 %v7797_v30  ;;  %v7794_v50 = vld [vmem:[%s13215_s8 + $0x100] sm:$0xff]   ;;  %v6866_v61 = vunpack.c.l.bf16 %v7802_v33  ;;  %v7824_v30 = vld [vmem:[%s13216_s9 + $0x78] sm:$0xff]  }
 0x803   :  { %8273 = vmatprep.subr.mxu0 %v6891_v20  ;;  %v6875_v20 = vunpack.c.h.bf16 %v7804_v12 }
 0x804   :  { %8274 = vmatpush3.msra.mxu0 %v6859_v25  ;;  %v6843_v25 = vunpack.c.h.bf16 %v7796_v3 }
 0x805   :  { %8275 = vmatprep.subr.mxu0 %v6890_v60  ;;  %v6874_v60 = vunpack.c.l.bf16 %v7804_v12 }
 0x806   :  { %8276 = vmatpush3.msra.mxu0 %v6858_v57  ;;  %v6842_v57 = vunpack.c.l.bf16 %v7796_v3  ;;  %v7823_v3 = vld [vmem:[%s13216_s9 + $0x70] sm:$0xff]  }
 0x807   :  { %8277 = vmatprep.subr.mxu0 %v6887_v26  ;;  %v6871_v26 = vunpack.c.h.bf16 %v7803_v51 }
 0x808   :  { %8278 = vmatpush3.msra.mxu0 %v6855_v53  ;;  %v6839_v53 = vunpack.c.h.bf16 %v7795_v14 }
 0x809   :  { %8279 = vmatprep.subr.mxu0 %v6886_v6  ;;  %v6870_v6 = vunpack.c.l.bf16 %v7803_v51 }
 0x80a   :  { %8280 = vmatpush3.msra.mxu0 %v6854_v48  ;;  %v6838_v48 = vunpack.c.l.bf16 %v7795_v14 }
 0x80b   :  { %8281 = vmatprep.subr.mxu0 %v6883_v18  ;;  %v6867_v18 = vunpack.c.h.bf16 %v7802_v33  ;;  %v6954_v33 = vunpack.c.l.bf16 %v7823_v3 }
 0x80c   :  { %8282 = vmatpush3.msra.mxu0 %v6851_v11  ;;  %v6835_v11 = vunpack.c.h.bf16 %v7794_v50 }
 0x80d   :  { %8283 = vmatprep.subr.mxu0 %v6882_v10  ;;  %v6834_v10 = vunpack.c.l.bf16 %v7794_v50  ;;  %v7814_v50 = vld [vmem:[%s13216_s9 + $0x28] sm:$0xff]  }
 0x80e   :  { %8284 = vmatpush3.msra.mxu0 %v6850_v56  ;;  %v7832_v56 = vld [vmem:[%s13216_s9 + $0xb8] sm:$0xff]  }
 0x80f   :  { %8285 = vmatprep.subr.mxu0 %v6879_v55  ;;  %v7816_v55 = vld [vmem:[%s13216_s9 + $0x38] sm:$0xff]   ;;  %v6991_v12 = vunpack.c.h.bf16 %v7832_v56 }
 0x810   :  { %8286 = vmatpush3.msra.mxu0 %v6847_v45  ;;  %v6959_v45 = vunpack.c.h.bf16 %v7824_v30  ;;  %v6926_v51 = vunpack.c.l.bf16 %v7816_v55 }
 0x811   :  { %8287 = vmatprep.subr.mxu0 %v6878_v38  ;;  %v6958_v38 = vunpack.c.l.bf16 %v7824_v30  ;;  %v7829_v30 = vld [vmem:[%s13216_s9 + $0xa0] sm:$0xff]  }
 0x812   :  { %8288 = vmatpush3.msra.mxu0 %v6846_v31  ;;  %v7831_v31 = vld [vmem:[%s13216_s9 + $0xb0] sm:$0xff]   ;;  %8304 = vmatprep.subr.mxu1 %v6959_v45  ;;  %v7813_v45 = vld [vmem:[%s13216_s9 + $0x20] sm:$0xff]  }
 0x813   :  { %8289 = vmatprep.subr.mxu0 %v6875_v20  ;;  %v7815_v20 = vld [vmem:[%s13216_s9 + $0x30] sm:$0xff]   ;;  %v6987_v14 = vunpack.c.h.bf16 %v7831_v31 }
 0x814   :  { %8290 = vmatpush3.msra.mxu0 %v6843_v25  ;;  %v6990_v25 = vunpack.c.l.bf16 %v7832_v56 }
 0x815   :  { %8291 = vmatprep.subr.mxu0 %v6874_v60  ;;  %v6955_v60 = vunpack.c.h.bf16 %v7823_v3  ;;  %v6915_v3 = vunpack.c.h.bf16 %v7813_v45 }
 0x816   :  { %8292 = vmatpush3.msra.mxu0 %v6842_v57  ;;  %v6923_v57 = vunpack.c.h.bf16 %v7815_v20 }
 0x817   :  { %8293 = vmatprep.subr.mxu0 %v6871_v26  ;;  %v7822_v26 = vld [vmem:[%s13216_s9 + $0x68] sm:$0xff]  }
 0x818   :  { %8294 = vmatpush3.msra.mxu0 %v6839_v53  ;;  %v7830_v53 = vld [vmem:[%s13216_s9 + $0xa8] sm:$0xff]   ;;  %v6950_v56 = vunpack.c.l.bf16 %v7822_v26 }
 0x819   :  { %8295 = vmatprep.subr.mxu0 %v6870_v6  ;;  %v6986_v6 = vunpack.c.l.bf16 %v7831_v31  ;;  %v7820_v31 = vld [vmem:[%s13216_s9 + $0x58] sm:$0xff]  }
 0x81a   :  { %8296 = vmatpush3.msra.mxu0 %v6838_v48  ;;  %v6922_v48 = vunpack.c.l.bf16 %v7815_v20  ;;  %v7828_v20 = vld [vmem:[%s13216_s9 + $0x98] sm:$0xff]  }
 0x81b   :  { %8297 = vmatprep.subr.mxu0 %v6867_v18  ;;  %v6951_v18 = vunpack.c.h.bf16 %v7822_v26  ;;  %v6975_v26 = vunpack.c.h.bf16 %v7828_v20 }
 0x81c   :  { %8298 = vmatpush3.msra.mxu0 %v6835_v11  ;;  %v6983_v11 = vunpack.c.h.bf16 %v7830_v53 }
 0x81d   :  { %8299 = vmatprep.subr.mxu0 %v6866_v61  ;;  %v6919_v61 = vunpack.c.h.bf16 %v7814_v50 }
 0x81e   :  { %8300 = vmatpush3.msra.mxu0 %v6834_v10  ;;  %v7821_v10 = vld [vmem:[%s13216_s9 + $0x60] sm:$0xff]  }
 0x81f   :  { %3394 = vmatmul.mubr.f32.vlgmr.msra.gmra.mxu0 %v11197_v7  ;;  %9094 = vmatprep.subr.mxu0 %v13389_v62  ;;  %v6927_v7 = vunpack.c.h.bf16 %v7816_v55  ;;  %v6982_v55 = vunpack.c.l.bf16 %v7830_v53 }
 0x820   :  { %9126 = vmatprep.mubr.msk.f32.mxu0 %vm9285_vm1, %v13389_v62  ;;  %9095 = vmatpush3.msra.mxu0 %v6991_v12  ;;  %v6918_v12 = vunpack.c.l.bf16 %v7814_v50  ;;  %v6942_v50 = vunpack.c.l.bf16 %v7820_v31 }
 0x821   :  { %8305 = vmatpush3.msra.mxu1 %v6927_v7  ;;  %9096 = vmatprep.subr.mxu0 %v13389_v62  ;;  %v6947_v7 = vunpack.c.h.bf16 %v7821_v10 }
 0x822   :  { %8306 = vmatprep.subr.mxu1 %v6958_v38  ;;  %9097 = vmatpush3.msra.mxu0 %v6990_v25  ;;  %v6979_v38 = vunpack.c.h.bf16 %v7829_v30  ;;  %v6946_v25 = vunpack.c.l.bf16 %v7821_v10 }
 0x823   :  { %8307 = vmatpush3.msra.mxu1 %v6926_v51  ;;  %9098 = vmatprep.subr.mxu0 %v13389_v62  ;;  %v6978_v51 = vunpack.c.l.bf16 %v7829_v30 }
 0x824   :  { %8308 = vmatprep.subr.mxu1 %v6955_v60  ;;  %9099 = vmatpush3.msra.mxu0 %v6987_v14  ;;  %v7812_v60 = vld [vmem:[%s13216_s9 + $0x18] sm:$0xff]   ;;  %v6914_v14 = vunpack.c.l.bf16 %v7813_v45 }
 0x825   :  { %8309 = vmatpush3.msra.mxu1 %v6923_v57  ;;  %9100 = vmatprep.subr.mxu0 %v13389_v62  ;;  %v6943_v57 = vunpack.c.h.bf16 %v7820_v31  ;;  %v6911_v53 = vunpack.c.h.bf16 %v7812_v60 }
 0x826   :  { %8310 = vmatprep.subr.mxu1 %v6954_v33  ;;  %9101 = vmatpush3.msra.mxu0 %v6986_v6  ;;  %v7819_v33 = vld [vmem:[%s13216_s9 + $0x50] sm:$0xff]  }
 0x827   :  { %8311 = vmatpush3.msra.mxu1 %v6922_v48  ;;  %9102 = vmatprep.subr.mxu0 %v13389_v62  ;;  %v7827_v6 = vld [vmem:[%s13216_s9 + $0x90] sm:$0xff]   ;;  %v6974_v48 = vunpack.c.l.bf16 %v7828_v20  ;;  %v6938_v45 = vunpack.c.l.bf16 %v7819_v33 }
 0x828   :  { %8312 = vmatprep.subr.mxu1 %v6951_v18  ;;  %9103 = vmatpush3.msra.mxu0 %v6983_v11  ;;  %v7811_v18 = vld [vmem:[%s13216_s9 + $0x10] sm:$0xff]   ;;  %v6910_v11 = vunpack.c.l.bf16 %v7812_v60  ;;  %v6971_v10 = vunpack.c.h.bf16 %v7827_v6 }
 0x829   :  { %8313 = vmatpush3.msra.mxu1 %v6919_v61  ;;  %9104 = vmatprep.subr.mxu0 %v13389_v62  ;;  %v6939_v61 = vunpack.c.h.bf16 %v7819_v33  ;;  %v6907_v30 = vunpack.c.h.bf16 %v7811_v18 }
 0x82a   :  { %8314 = vmatprep.subr.mxu1 %v6950_v56  ;;  %9105 = vmatpush3.msra.mxu0 %v6982_v55  ;;  %v7818_v56 = vld [vmem:[%s13216_s9 + $0x48] sm:$0xff]  }
 0x82b   :  { %8315 = vmatpush3.msra.mxu1 %v6918_v12  ;;  %9106 = vmatprep.subr.mxu0 %v13389_v62  ;;  %v7826_v55 = vld [vmem:[%s13216_s9 + $0x88] sm:$0xff]   ;;  %v6970_v12 = vunpack.c.l.bf16 %v7827_v6 }
 0x82c   :  { %8316 = vmatprep.subr.mxu1 %v6947_v7  ;;  %9107 = vmatpush3.msra.mxu0 %v6979_v38  ;;  %v7810_v7 = vld [vmem:[%s13216_s9 + $0x8] sm:$0xff]   ;;  %v6906_v38 = vunpack.c.l.bf16 %v7811_v18  ;;  %v6967_v31 = vunpack.c.h.bf16 %v7826_v55 }
 0x82d   :  { %8317 = vmatpush3.msra.mxu1 %v6915_v3  ;;  %9108 = vmatprep.subr.mxu0 %v13389_v62  ;;  %v6935_v3 = vunpack.c.h.bf16 %v7818_v56  ;;  %v6903_v20 = vunpack.c.h.bf16 %v7810_v7  ;;  %v6902_v60 = vunpack.c.l.bf16 %v7810_v7 }
 0x82e   :  { %8318 = vmatprep.subr.mxu1 %v6946_v25  ;;  %9109 = vmatpush3.msra.mxu0 %v6978_v51  ;;  %v6934_v25 = vunpack.c.l.bf16 %v7818_v56  ;;  %v6966_v51 = vunpack.c.l.bf16 %v7826_v55 }
 0x82f   :  { %8319 = vmatpush3.msra.mxu1 %v6914_v14  ;;  %9110 = vmatprep.subr.mxu0 %v13389_v62 }
 0x830   :  { %8320 = vmatprep.subr.mxu1 %v6943_v57  ;;  %9111 = vmatpush3.msra.mxu0 %v6975_v26 }
 0x831   :  { %8321 = vmatpush3.msra.mxu1 %v6911_v53  ;;  %9112 = vmatprep.subr.mxu0 %v13389_v62 }
 0x832   :  { %8322 = vmatprep.subr.mxu1 %v6942_v50  ;;  %9113 = vmatpush3.msra.mxu0 %v6974_v48 }
 0x833   :  { %8323 = vmatpush3.msra.mxu1 %v6910_v11  ;;  %9114 = vmatprep.subr.mxu0 %v13389_v62  ;;  %v7817_v11 = vld [vmem:[%s13216_s9 + $0x40] sm:$0xff]  }
 0x834   :  { %8324 = vmatprep.subr.mxu1 %v6939_v61  ;;  %9115 = vmatpush3.msra.mxu0 %v6971_v10  ;;  %v7825_v61 = vld [vmem:[%s13216_s9 + $0x80] sm:$0xff]   ;;  %v6931_v56 = vunpack.c.h.bf16 %v7817_v11  ;;  %v6930_v7 = vunpack.c.l.bf16 %v7817_v11 }
 0x835   :  { %8325 = vmatpush3.msra.mxu1 %v6907_v30  ;;  %9116 = vmatprep.subr.mxu0 %v13389_v62  ;;  %v6897_v10 = vld [vmem:[%s13216_s9] sm:$0xff]   ;;  %v6963_v55 = vunpack.c.h.bf16 %v7825_v61 }
 0x836   :  { %8326 = vmatprep.subr.mxu1 %v6938_v45  ;;  %9117 = vmatpush3.msra.mxu0 %v6970_v12  ;;  %v6899_v45 = vunpack.c.h.bf16 %v6897_v10  ;;  %v3399_v12 = vld [vmem:[%s13209_s1 + $0x14] ss:$0 sm:$0xff] }
 0x837   :  { %8327 = vmatpush3.msra.mxu1 %v6906_v38  ;;  %9118 = vmatprep.subr.mxu0 %v13389_v62  ;;  %v6962_v38 = vunpack.c.l.bf16 %v7825_v61 }
 0x838   :  { %8328 = vmatprep.subr.mxu1 %v6935_v3  ;;  %9119 = vmatpush3.msra.mxu0 %v6967_v31  ;;  %v6898_v3 = vunpack.c.l.bf16 %v6897_v10 }
 0x839   :  { %8329 = vmatpush3.msra.mxu1 %v6903_v20  ;;  %9120 = vmatprep.subr.mxu0 %v13389_v62  ;;  %v3401_v20 = vld [vmem:[%s13209_s1 + $0x15] ss:$0 sm:$0xff] }
 0x83a   :  { %8330 = vmatprep.subr.mxu1 %v6934_v25  ;;  %9121 = vmatpush3.msra.mxu0 %v6966_v51 }
 0x83b   :  { %8331 = vmatpush3.msra.mxu1 %v6902_v60  ;;  %9122 = vmatprep.subr.mxu0 %v13389_v62 }
 0x83c   :  { %8332 = vmatprep.subr.mxu1 %v6931_v56  ;;  %9123 = vmatpush3.msra.mxu0 %v6963_v55 }
 0x83d   :  { %8333 = vmatpush3.msra.mxu1 %v6899_v45  ;;  %9124 = vmatprep.subr.mxu0 %v13389_v62 }
 0x83e   :  { %8334 = vmatprep.subr.mxu1 %v6930_v7  ;;  %9125 = vmatpush3.msra.mxu0 %v6962_v38 }
 0x83f   :  { %8335 = vmatpush3.msra.mxu1 %v6898_v3  ;;  %9129 = vmatprep.subr.mxu0 %v13389_v62  ;;  %v7836_v3 = vld [vmem:[%s13217_s10 + $0x20] sm:$0xff]  }
 0x840   :  { %3739 = vmatprep.subr.mxu1 %v13389_v62 }
 0x8bf   :  { %v8231_v14 = vpop.f32.mrf.mxu0  ;;  %v8266_v57 = vpop.f32.mrf.mxu1 }
 0x8c1   :  { %v8232_v26 = vpop.f32.mrf.mxu0  ;;  %v8267_v53 = vpop.f32.mrf.mxu1 }
 0x8c2   :  { %v8233_v33 = vadd.f32 %v8232_v26, %v8231_v14  ;;  %v8268_v6 = vadd.f32 %v8267_v53, %v8266_v57 }
 0x8c4   :  { %v3326_v48 = vadd.f32 %v8268_v6, %v8233_v33 }
 0x8df   :  { %v8301_v50 = vpop.f32.mrf.mxu0 }
 0x8e1   :  { %v8302_v18 = vpop.f32.mrf.mxu0 }
 0x8e2   :  { %v8303_v30 = vadd.f32 %v8302_v18, %v8301_v50  ;;  %v3421_v18 = vpop.permute.xlu0 %3420 }
 0x8e4   :  { %v3396_v31 = vadd.f32 %v8303_v30, %v3326_v48  ;;  %v7838_v30 = vld [vmem:[%s13217_s10 + $0x30] sm:$0xff]  }
 0x8e5   :  { %v7019_v45 = vunpack.c.h.bf16 %v7838_v30  ;;  %v7018_v7 = vunpack.c.l.bf16 %v7838_v30 }
 0x8e6   :  { %v3400_v25 = vmul.f32 %v3399_v12, %v3396_v31  ;;  %v7837_v12 = vld [vmem:[%s13217_s10 + $0x28] sm:$0xff]  }
 0x8e7   :  { %v7015_v38 = vunpack.c.h.bf16 %v7837_v12  ;;  %v7014_v31 = vunpack.c.l.bf16 %v7837_v12 }
 0x8e8   :  { %v3402_v51 = vadd.f32 %v3401_v20, %v3400_v25  ;;  %v7011_v20 = vunpack.c.h.bf16 %v7836_v3  ;;  %v7835_v25 = vld [vmem:[%s13217_s10 + $0x18] sm:$0xff]  }
 0x8ea   :  { %v3403_v60 = vmax.f32 %v3402_v51, 0.0  ;;  %v7010_v51 = vunpack.c.l.bf16 %v7836_v3 }
 0x8ec   :  { %v9206_v14 = vpack.i.bf16 %v3403_v60, %v11098_v22  ;;  %v3409_v57 = vrot.slane %v3403_v60, 1  ;;  %v3405_v26 = vrot.slane %v3403_v60, 7  ;;  %v7839_v22 = vld [vmem:[%s13217_s10 + $0x38] sm:$0xff]   ;;  %v7007_v60 = vunpack.c.h.bf16 %v7835_v25 }
 0x8ed   :  { %v7023_v56 = vunpack.c.h.bf16 %v7839_v22  ;;  %v7022_v55 = vunpack.c.l.bf16 %v7839_v22  ;;  %v7842_v22 = vld [vmem:[%s13217_s10 + $0x50] sm:$0xff]  }
 0x8ee   :  { %9207 = vrot.lane.b32.xlu1 %v9206_v14, %s9293_s20  ;;  %v3412_v50 = vmul.f32 %v3409_v57, %v11002_v9  ;;  %v3408_v48 = vmul.f32 %v3405_v26, %v11009_v41  ;;  %v7834_v14 = vld [vmem:[%s13217_s10 + $0x10] sm:$0xff]   ;;  %v7006_v57 = vunpack.c.l.bf16 %v7835_v25 }
 0x8ef   :  { %v7003_v26 = vunpack.c.h.bf16 %v7834_v14 }
 0x960   :  { %v9208_v53 = vpop.permute.xlu1 %9207 }
 0x961   :  { %v9210_v33 = vunpack.i.h.bf16 %v9208_v53  ;;  %v9209_v6 = vunpack.i.l.bf16 %v9208_v53  ;;  %v7833_v53 = vld [vmem:[%s13217_s10 + $0x8] sm:$0xff]  }
 0x963   :  { %v3425_v11 = vsel %vm1753_vm10, %v3412_v50, %v9209_v6  ;;  %v3422_v61 = vsel %vm1753_vm10, %v9209_v6, %v3421_v18  ;;  %v3416_v10 = vsel %vm1753_vm10, %v3408_v48, %v9210_v33  ;;  %v7002_v33 = vunpack.c.l.bf16 %v7834_v14  ;;  %v6993_v50 = vld [vmem:[%s13217_s10] sm:$0xff]   ;;  %v3662_v14 = vld [vmem:[%s13209_s1 + $0x16] ss:$0 sm:$0xff] }
 0x964   :  { %3586 = vmatprep.mubr.f32.mxu1 %v3425_v11  ;;  %9127 = vmatmul.mubr.f32.vlgmr.msra.gmra.mxu0 %v3422_v61  ;;  %v6999_v6 = vunpack.c.h.bf16 %v7833_v53  ;;  %v6998_v48 = vunpack.c.l.bf16 %v7833_v53  ;;  %v6995_v18 = vunpack.c.h.bf16 %v6993_v50  ;;  %v7843_v11 = vld [vmem:[%s13217_s10 + $0x58] sm:$0xff]   ;;  %v6994_v61 = vunpack.c.l.bf16 %v6993_v50  ;;  %v3664_v53 = vld [vmem:[%s13209_s1 + $0x17] ss:$0 sm:$0xff] }
 0x965   :  { %3587 = vmatmul.mubr.f32.vlgmr.msra.gmra.mxu1 %v3416_v10  ;;  %9133 = vmatprep.mubr.msk.f32.mxu0 %vm9285_vm1, %v13389_v62  ;;  %v7039_v10 = vunpack.c.h.bf16 %v7843_v11  ;;  %v7038_v30 = vunpack.c.l.bf16 %v7843_v11 }
 0x966   :  { %3740 = vmatpush1.msra.mxu1 %v7023_v56  ;;  %v7035_v56 = vunpack.c.h.bf16 %v7842_v22 }
 0x967   :  { %3741 = vmatprep.subr.mxu1 %v13389_v62 }
 0x968   :  { %3742 = vmatpush1.msra.mxu1 %v7022_v55  ;;  %v7841_v55 = vld [vmem:[%s13217_s10 + $0x48] sm:$0xff]  }
 0x969   :  { %3743 = vmatprep.subr.mxu1 %v13389_v62  ;;  %v7031_v12 = vunpack.c.h.bf16 %v7841_v55  ;;  %v7030_v3 = vunpack.c.l.bf16 %v7841_v55 }
 0x96a   :  { %3744 = vmatpush1.msra.mxu1 %v7019_v45  ;;  %v7034_v45 = vunpack.c.l.bf16 %v7842_v22 }
 0x96b   :  { %3745 = vmatprep.subr.mxu1 %v13389_v62 }
 0x96c   :  { %3746 = vmatpush1.msra.mxu1 %v7018_v7 }
 0x96d   :  { %3747 = vmatprep.subr.mxu1 %v13389_v62 }
 0x96e   :  { %3748 = vmatpush1.msra.mxu1 %v7015_v38 }
 0x96f   :  { %3749 = vmatprep.subr.mxu1 %v13389_v62 }
 0x970   :  { %3750 = vmatpush1.msra.mxu1 %v7014_v31  ;;  %v7840_v31 = vld [vmem:[%s13217_s10 + $0x40] sm:$0xff]  }
 0x971   :  { %3751 = vmatprep.subr.mxu1 %v13389_v62  ;;  %v7027_v25 = vunpack.c.h.bf16 %v7840_v31 }
 0x972   :  { %3752 = vmatpush1.msra.mxu1 %v7011_v20 }
 0x973   :  { %3753 = vmatprep.subr.mxu1 %v13389_v62 }
 0x974   :  { %3754 = vmatpush1.msra.mxu1 %v7010_v51 }
 0x975   :  { %3755 = vmatprep.subr.mxu1 %v13389_v62 }
 0x976   :  { %3756 = vmatpush1.msra.mxu1 %v7007_v60 }
 0x977   :  { %3757 = vmatprep.subr.mxu1 %v13389_v62 }
 0x978   :  { %3758 = vmatpush1.msra.mxu1 %v7006_v57  ;;  %v7026_v57 = vunpack.c.l.bf16 %v7840_v31 }
 0x979   :  { %3759 = vmatprep.subr.mxu1 %v13389_v62 }
 0x97a   :  { %3760 = vmatpush1.msra.mxu1 %v7003_v26 }
 0x97b   :  { %3761 = vmatprep.subr.mxu1 %v13389_v62 }
 0x97c   :  { %3762 = vmatpush1.msra.mxu1 %v7002_v33 }
 0x97d   :  { %3763 = vmatprep.subr.mxu1 %v13389_v62 }
 0x97e   :  { %3764 = vmatpush1.msra.mxu1 %v6999_v6 }
 0x97f   :  { %3765 = vmatprep.subr.mxu1 %v13389_v62 }
 0x980   :  { %3766 = vmatpush1.msra.mxu1 %v6998_v48 }
 0x981   :  { %3767 = vmatprep.subr.mxu1 %v13389_v62 }
 0x982   :  { %3768 = vmatpush1.msra.mxu1 %v6995_v18 }
 0x983   :  { %3769 = vmatprep.subr.mxu1 %v13389_v62 }
 0x984   :  { %3770 = vmatpush1.msra.mxu1 %v6994_v61 }
 0x985   :  { %3787 = vmatprep.subr.mxu1 %v13389_v62 }
 0x986   :  { %3788 = vmatpush2.msra.mxu1 %v7039_v10 }
 0x987   :  { %3789 = vmatprep.subr.mxu1 %v13389_v62 }
 0x988   :  { %3790 = vmatpush2.msra.mxu1 %v7038_v30 }
 0x989   :  { %3791 = vmatprep.subr.mxu1 %v13389_v62 }
 0x98a   :  { %3792 = vmatpush2.msra.mxu1 %v7035_v56 }
 0x98b   :  { %3793 = vmatprep.subr.mxu1 %v13389_v62 }
 0x98c   :  { %3794 = vmatpush2.msra.mxu1 %v7034_v45 }
 0x98d   :  { %3795 = vmatprep.subr.mxu1 %v13389_v62 }
 0x98e   :  { %3796 = vmatpush2.msra.mxu1 %v7031_v12 }
 0x98f   :  { %3797 = vmatprep.subr.mxu1 %v13389_v62 }
 0x990   :  { %3798 = vmatpush2.msra.mxu1 %v7030_v3 }
 0x991   :  { %3799 = vmatprep.subr.mxu1 %v13389_v62 }
 0x992   :  { %3800 = vmatpush2.msra.mxu1 %v7027_v25 }
 0x993   :  { %3801 = vmatprep.subr.mxu1 %v13389_v62 }
 0x994   :  { %3802 = vmatpush2.msra.mxu1 %v7026_v57  ;;  %v7858_v57 = vld [vmem:[%s13219_s12 + $0x78] sm:$0xff]  }
 0xa24   :  { %v3658_v7 = vpop.f32.mrf.mxu0 }
 0xa25   :  { %v8336_v38 = vpop.f32.mrf.mxu1 }
 0xa26   :  { %v9128_v20 = vpop.f32.mrf.mxu0 }
 0xa27   :  { %v8337_v51 = vpop.f32.mrf.mxu1 }
 0xa28   :  { %v8338_v60 = vadd.f32 %v8337_v51, %v8336_v38  ;;  %v3811_v38 = vld [vmem:[%s13209_s1 + $0x21] ss:$0 sm:$0xff] }
 0xa2a   :  { %v3659_v26 = vadd.f32 %v8338_v60, %v3658_v7 }
 0xa2c   :  { %v3663_v33 = vmul.f32 %v3662_v14, %v3659_v26  ;;  %v7850_v26 = vld [vmem:[%s13219_s12 + $0x38] sm:$0xff]  }
 0xa2e   :  { %v3665_v6 = vadd.f32 %v3664_v53, %v3663_v33  ;;  %v7107_v53 = vunpack.c.h.bf16 %v7858_v57  ;;  %v7106_v33 = vunpack.c.l.bf16 %v7858_v57 }
 0xa30   :  { %v3666_v50 = vmax.f32 %v3665_v6, 0.0 }
 0xa32   :  { %3676 = vrot.lane.b32.xlu1 %v3666_v50, %s9295_s21  ;;  %v3672_v48 = vrot.slane %v3666_v50, 1  ;;  %v3668_v11 = vrot.slane %v3666_v50, 7 }
 0xa34   :  { %v3675_v18 = vmul.f32 %v3672_v48, %v11002_v9  ;;  %v3671_v10 = vmul.f32 %v3668_v11, %v11009_v41  ;;  %v7041_v9 = vld [vmem:[%s13218_s11] sm:$0xff]   ;;  %v7856_v48 = vld [vmem:[%s13219_s12 + $0x68] sm:$0xff]  }
 0xa35   :  { %v7042_v12 = vunpack.c.l.bf16 %v7041_v9  ;;  %v3809_v41 = vld [vmem:[%s13209_s1 + $0x20] ss:$0 sm:$0xff]  ;;  %v7848_v11 = vld [vmem:[%s13219_s12 + $0x28] sm:$0xff]  }
 0xa36   :  { %3685 = vrot.lane.b32.xlu1 %v11014_v63, %s9297_s23  ;;  %3680 = vrot.lane.b32.xlu0 %v3675_v18, %s9293_s20  ;;  %v7043_v63 = vunpack.c.h.bf16 %v7041_v9  ;;  %v7847_v9 = vld [vmem:[%s13219_s12 + $0x20] sm:$0xff]  }
 0xa38   :  { %9130 = vmatpush3.msra.mxu0 %v7043_v63 }
 0xa39   :  { %9131 = vmatprep.subr.mxu0 %v13389_v62 }
 0xa3a   :  { %9132 = vmatpush3.msra.mxu0 %v7042_v12  ;;  %v7854_v12 = vld [vmem:[%s13219_s12 + $0x58] sm:$0xff]  }
 0xa3b   :  { %8359 = vmatprep.subr.mxu0 %v7107_v53 }
 0xaa4   :  { %v3677_v61 = vpop.permute.xlu1 %3676 }
 0xaa5   :  { %v3683_v22 = vsel %vm1741_vm8, %v3671_v10, %v3677_v61  ;;  %v7099_v10 = vunpack.c.h.bf16 %v7856_v48 }
 0xaa8   :  { %v3686_v30 = vpop.permute.xlu1 %3685  ;;  %v3681_v56 = vpop.permute.xlu0 %3680 }
 0xaa9   :  { %v3684_v55 = vsel %vm1753_vm10, %v3683_v22, %v3681_v56  ;;  %6391 = vmatprep.mubr.msk.f32.mxu1 %vm1753_vm10, %v3686_v30  ;;  %v7067_v22 = vunpack.c.h.bf16 %v7848_v11  ;;  %v7098_v56 = vunpack.c.l.bf16 %v7856_v48 }
 0xaaa   :  { %v3688_v45 = vsel %vm1765_vm12, %v3684_v55, %v3686_v30  ;;  %v7855_v30 = vld [vmem:[%s13219_s12 + $0x60] sm:$0xff]   ;;  %v7066_v55 = vunpack.c.l.bf16 %v7848_v11 }
 0xaab   :  { %3804 = vmatmul.mubr.f32.vlgmr.msra.gmra.mxu1 %v3688_v45  ;;  %v7095_v45 = vunpack.c.h.bf16 %v7855_v30  ;;  %v7094_v63 = vunpack.c.l.bf16 %v7855_v30 }
 0xb6b   :  { %v3805_v7 = vpop.f32.mrf.mxu1 }
 0xb6c   :  { %v3810_v3 = vmul.f32 %v3809_v41, %v3805_v7  ;;  %v7063_v41 = vunpack.c.h.bf16 %v7847_v9  ;;  %v7062_v7 = vunpack.c.l.bf16 %v7847_v9 }
 0xb6d   :  { %v3807_v31 = vpop.f32.mrf.mxu1 }
 0xb6e   :  { %v3812_v20 = vadd.f32 %v3811_v38, %v3810_v3  ;;  %v3910_v38 = vld [vmem:[%s13209_s1 + $0x22] ss:$0 sm:$0xff]  ;;  %v7091_v3 = vunpack.c.h.bf16 %v7854_v12 }
 0xb70   :  { %v3813_v25 = vmax.f32 %v3812_v20, 0.0 }
 0xb72   :  { %9134 = vmatmul.mubr.msk.f32.vlgmr.msra.gmra.mxu0 %vm1735_vm6, %v3813_v25  ;;  %v7846_v25 = vld [vmem:[%s13219_s12 + $0x18] sm:$0xff]  }
 0xc32   :  { %v11780_v51 = vpop.f32.mrf.mxu0 }
 0xc33   :  { %v3892_v60 = vrot.slane %v11780_v51, 4 }
 0xc34   :  { %v9135_v14 = vpop.f32.mrf.mxu0 }
 0xc35   :  { %3899 = vrot.lane.b32.xlu1 %v3892_v60, %s9296_s22  ;;  %3893 = vrot.lane.b32.xlu0 %v3892_v60, %s9299_s26  ;;  %v7059_v14 = vunpack.c.h.bf16 %v7846_v25 }
 0xc39   :  { %3896 = vrot.lane.b32.xlu1 %v11780_v51, %s9297_s23  ;;  %3902 = vrot.lane.b32.xlu0 %v11780_v51, %s9293_s20 }
 0xc3d   :  { %4224 = vrot.lane.b32.xlu1 %v10925_v13, %s9294_s17  ;;  %4216 = vrot.lane.b32.xlu0 %v10882_v24, %s9294_s17  ;;  %v7857_v13 = vld [vmem:[%s13219_s12 + $0x70] sm:$0xff]   ;;  %v7075_v24 = vunpack.c.h.bf16 %v7850_v26 }
 0xc3e   :  { %v7103_v6 = vunpack.c.h.bf16 %v7857_v13  ;;  %v7102_v18 = vunpack.c.l.bf16 %v7857_v13 }
 0xc3f   :  { %8360 = vmatpush3.msra.mxu0 %v7075_v24 }
 0xc40   :  { %8361 = vmatprep.subr.mxu0 %v7106_v33 }
 0xc41   :  { %4228 = vrot.lane.b32.xlu1 %v10947_v34, %s9294_s17  ;;  %4220 = vrot.lane.b32.xlu0 %v10905_v16, %s9294_s17  ;;  %v7849_v34 = vld [vmem:[%s13219_s12 + $0x30] sm:$0xff]   ;;  %v7074_v16 = vunpack.c.l.bf16 %v7850_v26 }
 0xc42   :  { %v7071_v50 = vunpack.c.h.bf16 %v7849_v34  ;;  %v7070_v61 = vunpack.c.l.bf16 %v7849_v34 }
 0xc43   :  { %8362 = vmatpush3.msra.mxu0 %v7074_v16 }
 0xc44   :  { %8363 = vmatprep.subr.mxu0 %v7103_v6 }
 0xc45   :  { %8364 = vmatpush3.msra.mxu0 %v7071_v50 }
 0xc46   :  { %8365 = vmatprep.subr.mxu0 %v7102_v18  ;;  %v11846_v18 = vld [vmem:[%s13219_s12 + $0x50] sm:$0xff]  }
 0xc47   :  { %8366 = vmatpush3.msra.mxu0 %v7070_v61 }
 0xc48   :  { %8367 = vmatprep.subr.mxu0 %v7099_v10 }
 0xc49   :  { %8368 = vmatpush3.msra.mxu0 %v7067_v22 }
 0xc4a   :  { %8369 = vmatprep.subr.mxu0 %v7098_v56  ;;  %v7090_v56 = vunpack.c.l.bf16 %v7854_v12 }
 0xc4b   :  { %8370 = vmatpush3.msra.mxu0 %v7066_v55  ;;  %v7058_v55 = vunpack.c.l.bf16 %v7846_v25 }
 0xc4c   :  { %8371 = vmatprep.subr.mxu0 %v7095_v45 }
 0xc4d   :  { %8372 = vmatpush3.msra.mxu0 %v7063_v41 }
 0xc4e   :  { %8373 = vmatprep.subr.mxu0 %v7094_v63 }
 0xc4f   :  { %8374 = vmatpush3.msra.mxu0 %v7062_v7 }
 0xc50   :  { %8375 = vmatprep.subr.mxu0 %v7091_v3 }
 0xc51   :  { %8376 = vmatpush3.msra.mxu0 %v7059_v14 }
 0xc52   :  { %8377 = vmatprep.subr.mxu0 %v7090_v56 }
 0xc53   :  { %8378 = vmatpush3.msra.mxu0 %v7058_v55 }
 0xca7   :  { %v3900_v31 = vpop.permute.xlu1 %3899  ;;  %v3894_v20 = vpop.permute.xlu0 %3893 }
 0xca8   :  { %v3905_v60 = vsel %vm1202_vm4, %v11780_v51, %v3894_v20 }
 0xca9   :  { %v11832_v57 = vadd.f32 %v3910_v38, %v3905_v60 }
 0xcab   :  { %v3897_v26 = vpop.permute.xlu1 %3896  ;;  %v3903_v13 = vpop.permute.xlu0 %3902  ;;  %v3965_v53 = vrot.slane %v11832_v57, 5  ;;  %v3944_v24 = vrot.slane %v11832_v57, 4  ;;  %v3986_v33 = vrot.slane %v11832_v57, 7  ;;  %v13283_v34 = vrot.slane %v11832_v57, 3 }
 0xcac   :  { %v3906_v16 = vsel %vm1202_vm4, %v3897_v26, %v3900_v31  ;;  %v3908_v6 = vsel %vm1202_vm4, %v3894_v20, %v3897_v26  ;;  %v3907_v50 = vsel %vm1202_vm4, %v3903_v13, %v11780_v51  ;;  %v3909_v48 = vsel %vm1202_vm4, %v3900_v31, %v3903_v13 }
 0xcad   :  { %v11848_v11 = vadd.f32 %v3910_v38, %v3906_v16  ;;  %v11850_v61 = vadd.f32 %v3910_v38, %v3908_v6  ;;  %v11852_v10 = vadd.f32 %v3910_v38, %v3907_v50  ;;  %v11854_v22 = vadd.f32 %v3910_v38, %v3909_v48 }
 0xcae   :  { %v13286_v30 = vrot.slane %v11832_v57, 1  ;;  %v7087_v51 = vunpack.c.h.bf16 %v11846_v18 }
 0xcaf   :  { %v9211_v45 = vpack.i.bf16 %v11848_v11, %v11832_v57  ;;  %v9216_v9 = vpack.i.bf16 %v11850_v61, %v11852_v10  ;;  %v3966_v63 = vrot.slane %v11848_v11, 5  ;;  %v13285_v41 = vrot.slane %v11854_v22, 4  ;;  %v11883_v6 = vpop.permute.xlu0 %4216 }
 0xcb0   :  { %v3945_v7 = vrot.slane %v11848_v11, 4  ;;  %v13284_v38 = vrot.slane %v11854_v22, 5  ;;  %v13282_v3 = vrot.slane %v11854_v22, 7  ;;  %v13287_v12 = vrot.slane %v11848_v11, 7  ;;  %8379 = vmatprep.subr.mxu0 %v7087_v51 }
 0xcb1   :  { %9212 = vrot.lane.b32.xlu1 %v9211_v45, %s9293_s20  ;;  %9217 = vrot.lane.b32.xlu0 %v9216_v9, %s9293_s20  ;;  %v3967_v31 = vsel %vm1258_vm3, %v3965_v53, %v3966_v63  ;;  %v11874_v20 = vsel %vm1202_vm4, %v13285_v41, %v3944_v24  ;;  %v3924_v25 = vrot.slane %v11848_v11, 3  ;;  %v3926_v60 = vrot.slane %v11852_v10, 3 }
 0xcb2   :  { %v3980_v14 = vmul.f32 %v3967_v31, %v10370_v39  ;;  %v4036_v26 = vmul.f32 %v3967_v31, %v10381_v4  ;;  %v3946_v13 = vsel %vm1202_vm4, %v3944_v24, %v3945_v7  ;;  %v3958_v16 = vmul.f32 %v11874_v20, %v10683_v0 }
 0xcb3   :  { %v3959_v50 = vmul.f32 %v3946_v13, %v10324_v8  ;;  %v11889_v48 = vsel %vm1258_vm3, %v13284_v38, %v3965_v53  ;;  %v3988_v56 = vsel %vm362_vm0, %v3986_v33, %v13287_v12  ;;  %v3999_v24 = vsel %vm362_vm0, %v13282_v3, %v3986_v33 }
 0xcb4   :  { %v4246_v55 = vsel %vm1735_vm6, %v4036_v26, %v11883_v6  ;;  %v3979_v45 = vmul.f32 %v11889_v48, %v10751_v5  ;;  %v4000_v9 = vmul.f32 %v3999_v24, %v10771_v28  ;;  %v4001_v53 = vmul.f32 %v3988_v56, %v10505_v54 }
 0xcb5   :  { %4109 = vrot.lane.b32.xlu1 %v11854_v22, %s9293_s20  ;;  %4397 = vmatprep.mubr.f32.mxu0 %v4246_v55  ;;  %v9221_v31 = vpack.i.bf16 %v3959_v50, %v3958_v16  ;;  %v11908_v33 = vsel %vm1110_vm7, %v13283_v34, %v3924_v25  ;;  %v11911_v51 = vsel %vm1110_vm7, %v3924_v25, %v3926_v60  ;;  %v4006_v26 = vrot.slane %v11848_v11, 1 }
 0xcb6   :  { %v9226_v3 = vpack.i.bf16 %v3980_v14, %v3979_v45  ;;  %v4026_v24 = vmul.f32 %v11908_v33, %v10493_v43  ;;  %v4027_v56 = vmul.f32 %v11911_v51, %v10649_v49  ;;  %v4008_v50 = vrot.slane %v11852_v10, 1 }
 0xcb7   :  { %9222 = vrot.lane.b32.xlu0 %v9221_v31, %s9294_s17  ;;  %v4007_v16 = vsel %vm1397_vm5, %v13286_v30, %v4006_v26  ;;  %v3947_v25 = vrot.slane %v11852_v10, 4  ;;  %v9231_v55 = vpack.i.bf16 %v4001_v53, %v4000_v9  ;;  %v3949_v34 = vrot.slane %v11850_v61, 4 }
 0xcb8   :  { %v3968_v14 = vrot.slane %v11852_v10, 5  ;;  %v4009_v45 = vsel %vm1397_vm5, %v4006_v26, %v4008_v50  ;;  %v4021_v31 = vmul.f32 %v4007_v16, %v10360_v1  ;;  %v13290_v41 = vrot.slane %v11850_v61, 5  ;;  %v13452_v1 = vld [vmem:[#allocation2_spill] sm:$0xff] }
 0xcb9   :  { %9227 = vrot.lane.b32.xlu1 %v9226_v3, %s9295_s21  ;;  %v3948_v38 = vsel %vm1202_vm4, %v3945_v7, %v3947_v25  ;;  %v4022_v30 = vmul.f32 %v4009_v45, %v10626_v42  ;;  %v3950_v12 = vsel %vm1202_vm4, %v3947_v25, %v3949_v34  ;;  %v13291_v9 = vrot.slane %v11854_v22, 3  ;;  %v7852_v42 = vld [vmem:[%s13219_s12 + $0x48] sm:$0xff]  }
 0xcba   :  { %v9241_v53 = vpack.i.bf16 %v4027_v56, %v4026_v24  ;;  %v4031_v4 = vmul.f32 %v3946_v13, %v10573_v19  ;;  %v4032_v3 = vmul.f32 %v3948_v38, %v10674_v27  ;;  %v3928_v26 = vrot.slane %v11850_v61, 3  ;;  %v13445_v27 = vld [vmem:[#allocation11_spill] sm:$0xff] }
 0xcbb   :  { %9232 = vrot.lane.b32.xlu0 %v9231_v55, %s9298_s2  ;;  %v11939_v16 = vsel %vm1258_vm3, %v3966_v63, %v3968_v14  ;;  %v11944_v7 = vsel %vm1258_vm3, %v3968_v14, %v13290_v41  ;;  %v9236_v25 = vpack.i.bf16 %v4022_v30, %v4021_v31  ;;  %v3960_v55 = vmul.f32 %v3948_v38, %v10470_v36  ;;  %v13442_v30 = vld [vmem:[#allocation31_spill] sm:$0xff] }
 0xcbc   :  { %v3961_v24 = vmul.f32 %v3950_v12, %v10602_v47  ;;  %v3989_v13 = vrot.slane %v11852_v10, 7  ;;  %v11951_v56 = vsel %vm1110_vm7, %v3926_v60, %v3928_v26  ;;  %v11956_v63 = vsel %vm1110_vm7, %v3928_v26, %v13291_v9  ;;  %v13443_v31 = vld [vmem:[#allocation35_spill] sm:$0xff] }
 0xcbd   :  { %9242 = vrot.lane.b32.xlu1 %v9241_v53, %s9297_s23  ;;  %v3991_v14 = vrot.slane %v11850_v61, 7  ;;  %v9246_v45 = vpack.i.bf16 %v4032_v3, %v4031_v4  ;;  %v3981_v38 = vmul.f32 %v11939_v16, %v13442_v30  ;;  %v3982_v53 = vmul.f32 %v11944_v7, %v13443_v31  ;;  %v13446_v3 = vld [vmem:[#allocation13_spill] sm:$0xff] }
 0xcbe   :  { %v4010_v10 = vrot.slane %v11850_v61, 1  ;;  %v13444_v60 = vrot.slane %v11848_v11, 7  ;;  %v9251_v9 = vpack.i.bf16 %v3961_v24, %v3960_v55  ;;  %v4028_v4 = vmul.f32 %v11951_v56, %v13445_v27  ;;  %v7845_v11 = vld [vmem:[%s13219_s12 + $0x10] sm:$0xff]  }
 0xcbf   :  { %9237 = vrot.lane.b32.xlu0 %v9236_v25, %s9296_s22  ;;  %v3992_v26 = vsel %vm362_vm0, %v3989_v13, %v3991_v14  ;;  %v4029_v25 = vmul.f32 %v11956_v63, %v13446_v3  ;;  %v4012_v49 = vrot.slane %v11854_v22, 1  ;;  %v13447_v19 = vrot.slane %v11854_v22, 4  ;;  %v13448_v55 = vld [vmem:[#allocation32_spill] sm:$0xff] }
 0xcc0   :  { %v3990_v41 = vsel %vm362_vm0, %v13444_v60, %v3989_v13  ;;  %v9256_v13 = vpack.i.bf16 %v3982_v53, %v3981_v38  ;;  %v4011_v27 = vsel %vm1397_vm5, %v4008_v50, %v4010_v10  ;;  %v7083_v54 = vunpack.c.h.bf16 %v7852_v42 }
 0xcc1   :  { %9247 = vrot.lane.b32.xlu1 %v9246_v45, %s9299_s26  ;;  %v3951_v43 = vsel %vm1202_vm4, %v3949_v34, %v13447_v19  ;;  %v4002_v24 = vmul.f32 %v3990_v41, %v13448_v55  ;;  %v13449_v45 = vld [vmem:[#allocation37_spill] sm:$0xff]  ;;  %v4013_v3 = vsel %vm1397_vm5, %v4010_v10, %v4012_v49  ;;  %v7844_v19 = vld [vmem:[%s13219_s12 + $0x8] sm:$0xff]   ;;  %v9271_v34 = vpack.i.bf16 %v4029_v25, %v4028_v4  ;;  %v13451_v41 = vld [vmem:[#allocation8_spill] sm:$0xff] }
 0xcc2   :  { %v4003_v60 = vmul.f32 %v3992_v26, %v13449_v45  ;;  %v4034_v53 = vmul.f32 %v3951_v43, %v13451_v41  ;;  %v7055_v26 = vunpack.c.h.bf16 %v7845_v11  ;;  %v4023_v50 = vmul.f32 %v4011_v27, %v13452_v1  ;;  %v13453_v55 = vld [vmem:[#allocation6_spill] sm:$0xff] }
 0xcc3   :  { %9252 = vrot.lane.b32.xlu0 %v9251_v9, %s9294_s17  ;;  %v13450_v9 = vld [vmem:[#allocation9_spill] sm:$0xff]  ;;  %v7086_v10 = vunpack.c.l.bf16 %v11846_v18  ;;  %v7054_v45 = vunpack.c.l.bf16 %v7845_v11  ;;  %v4024_v30 = vmul.f32 %v4013_v3, %v13453_v55  ;;  %v7051_v39 = vunpack.c.h.bf16 %v7844_v19  ;;  %v7045_v27 = vld [vmem:[%s13219_s12] sm:$0xff]  }
 0xcc4   :  { %v4033_v38 = vmul.f32 %v3950_v12, %v13450_v9  ;;  %v9261_v31 = vpack.i.bf16 %v4003_v60, %v4002_v24  ;;  %8380 = vmatpush3.msra.mxu0 %v7055_v26  ;;  %v7851_v12 = vld [vmem:[%s13219_s12 + $0x40] sm:$0xff]   ;;  %v7082_v4 = vunpack.c.l.bf16 %v7852_v42  ;;  %v7050_v25 = vunpack.c.l.bf16 %v7844_v19 }
 0xcc5   :  { %9257 = vrot.lane.b32.xlu1 %v9256_v13, %s9295_s21  ;;  %8381 = vmatprep.subr.mxu0 %v7086_v10  ;;  %v13454_v3 = vrot.slane %v11854_v22, 5  ;;  %v13455_v11 = vrot.slane %v11850_v61, 5  ;;  %v7079_v24 = vunpack.c.h.bf16 %v7851_v12  ;;  %v9266_v42 = vpack.i.bf16 %v4024_v30, %v4023_v50  ;;  %v13461_v50 = vld [vmem:[#allocation17_spill] sm:$0xff] }
 0xcc6   :  { %v9276_v18 = vpack.i.bf16 %v4034_v53, %v4033_v38  ;;  %8382 = vmatpush3.msra.mxu0 %v7054_v45  ;;  %v7047_v60 = vunpack.c.h.bf16 %v7045_v27  ;;  %v7046_v19 = vunpack.c.l.bf16 %v7045_v27  ;;  %v13457_v61 = vrot.slane %v11854_v22, 7 }
 0xcc7   :  { %9272 = vrot.lane.b32.xlu0 %v9271_v34, %s9297_s23  ;;  %v12011_v13 = vsel %vm1258_vm3, %v13455_v11, %v13454_v3  ;;  %8383 = vmatprep.subr.mxu0 %v7083_v54  ;;  %v7078_v34 = vunpack.c.l.bf16 %v7851_v12  ;;  %v13458_v54 = vld [vmem:[#allocation12_spill] sm:$0xff]  ;;  %v13460_v53 = vrot.slane %v11854_v22, 3  ;;  %v13464_v22 = vld [vmem:[#allocation10_spill] sm:$0xff] }
 0xcc8   :  { %8384 = vmatpush3.msra.mxu0 %v7051_v39  ;;  %v3993_v38 = vsel %vm362_vm0, %v3991_v14, %v13457_v61  ;;  %v3962_v30 = vmul.f32 %v3951_v43, %v13458_v54  ;;  %v13459_v39 = vrot.slane %v11832_v57, 3  ;;  %v13462_v14 = vrot.slane %v11832_v57, 1  ;;  %v13463_v43 = vld [vmem:[#allocation5_spill] sm:$0xff]  ;;  %v12053_v57 = vpop.permute.xlu1 %4224 }
 0xcc9   :  { %9262 = vrot.lane.b32.xlu1 %v9261_v31, %s9298_s2  ;;  %8385 = vmatprep.subr.mxu0 %v7082_v4  ;;  %v13456_v31 = vld [vmem:[#allocation14_spill] sm:$0xff]  ;;  %v4004_v10 = vmul.f32 %v3993_v38, %v13461_v50 }
 0xcca   :  { %v3983_v45 = vmul.f32 %v12011_v13, %v13456_v31  ;;  %8386 = vmatpush3.msra.mxu0 %v7050_v25  ;;  %v3936_v26 = vsel %vm1110_vm7, %v13460_v53, %v13459_v39  ;;  %v4020_v12 = vsel %vm1397_vm5, %v4012_v49, %v13462_v14  ;;  %v13466_v49 = vld [vmem:[#allocation28_spill] sm:$0xff] }
 0xccb   :  { %9277 = vrot.lane.b32.xlu0 %v9276_v18, %s9299_s26  ;;  %8387 = vmatprep.subr.mxu0 %v7079_v24  ;;  %v4030_v4 = vmul.f32 %v3936_v26, %v13463_v43  ;;  %v4025_v27 = vmul.f32 %v4020_v12, %v13464_v22  ;;  %v13465_v18 = vld [vmem:[#allocation3_spill] sm:$0xff] }
 0xccc   :  { %8388 = vmatpush3.msra.mxu0 %v7047_v60  ;;  %v4035_v25 = vmul.f32 %v11874_v20, %v13465_v18  ;;  %v12055_v20 = vpop.permute.xlu1 %4228  ;;  %v3937_v60 = vmul.f32 %v3936_v26, %v10853_v52 }
 0xccd   :  { %9267 = vrot.lane.b32.xlu1 %v9266_v42, %s9296_s22  ;;  %8389 = vmatprep.subr.mxu0 %v7078_v34 }
 0xcce   :  { %8390 = vmatpush3.msra.mxu0 %v7046_v19 }
 0xccf   :  { %4074 = vrot.lane.b32.xlu0 %v3983_v45, %s9295_s21  ;;  %9136 = vmatprep.subr.mxu0 %v13389_v62 }
 0xcd1   :  { %4054 = vrot.lane.b32.xlu1 %v3962_v30, %s9294_s17 }
 0xcd3   :  { %4094 = vrot.lane.b32.xlu0 %v4004_v10, %s9298_s2 }
 0xcd5   :  { %4149 = vrot.lane.b32.xlu1 %v4030_v4, %s9297_s23 }
 0xcd7   :  { %4129 = vrot.lane.b32.xlu0 %v4025_v27, %s9296_s22 }
 0xcd9   :  { %4169 = vrot.lane.b32.xlu1 %v4035_v25, %s9299_s26 }
 0xcdb   :  { %4232 = vrot.lane.b32.xlu0 %v10960_v44, %s9294_s17  ;;  %v12057_v44 = vpop.permute.xlu0 %4220 }
 0xcdd   :  { %4222 = vrot.lane.b32.xlu1 %v10878_v37, %s9294_s17 }
 0xcdf   :  { %4218 = vrot.lane.b32.xlu0 %v13466_v49, %s9294_s17  ;;  %v7860_v49 = vld [vmem:[%s13219_s12 + $0x88] sm:$0xff]  }
 0xce1   :  { %4230 = vrot.lane.b32.xlu1 %v10929_v17, %s9294_s17 }
 0xce3   :  { %4226 = vrot.lane.b32.xlu0 %v10900_v40, %s9294_s17  ;;  %v13467_v40 = vld [vmem:[#allocation7_spill] sm:$0xff] }
 0xce4   :  { %v3938_v34 = vmul.f32 %v11908_v33, %v13467_v40 }
 0xce7   :  { %4234 = vrot.lane.b32.xlu0 %v10951_v29, %s9294_s17 }
 0xd23   :  { %v9213_v3 = vpop.permute.xlu1 %9212  ;;  %v12059_v37 = vpop.permute.xlu0 %9217 }
 0xd24   :  { %v9215_v33 = vunpack.i.h.bf16 %v9213_v3  ;;  %v9214_v27 = vunpack.i.l.bf16 %v9213_v3 }
 0xd27   :  { %v12061_v11 = vpop.permute.xlu1 %4109 }
 0xd29   :  { %v9223_v24 = vpop.permute.xlu0 %9222 }
 0xd2a   :  { %v9225_v42 = vunpack.i.h.bf16 %v9223_v24  ;;  %v9224_v17 = vunpack.i.l.bf16 %v9223_v24 }
 0xd2b   :  { %v9228_v29 = vpop.permute.xlu1 %9227 }
 0xd2c   :  { %v9230_v45 = vunpack.i.h.bf16 %v9228_v29  ;;  %v9229_v19 = vunpack.i.l.bf16 %v9228_v29  ;;  %v4177_v61 = vsel %vm1735_vm6, %v3938_v34, %v9225_v42  ;;  %v4176_v38 = vsel %vm1735_vm6, %v3937_v60, %v9224_v17 }
 0xd2d   :  { %v9233_v30 = vpop.permute.xlu0 %9232 }
 0xd2e   :  { %v4181_v39 = vsel %vm1741_vm8, %v4176_v38, %v9229_v19  ;;  %v4182_v53 = vsel %vm1741_vm8, %v4177_v61, %v9230_v45  ;;  %v9235_v10 = vunpack.i.h.bf16 %v9233_v30  ;;  %v9234_v14 = vunpack.i.l.bf16 %v9233_v30 }
 0xd2f   :  { %v9243_v12 = vpop.permute.xlu1 %9242  ;;  %v4037_v45 = vmul.f32 %v11939_v16, %v13434_v59  ;;  %v7115_v38 = vunpack.c.h.bf16 %v7860_v49 }
 0xd30   :  { %v4186_v26 = vsel %vm1747_vm9, %v4181_v39, %v9234_v14  ;;  %v4187_v4 = vsel %vm1747_vm9, %v4182_v53, %v9235_v10  ;;  %v9244_v17 = vunpack.i.l.bf16 %v9243_v12  ;;  %v9245_v30 = vunpack.i.h.bf16 %v9243_v12  ;;  %v7859_v10 = vld [vmem:[%s13219_s12 + $0x80] sm:$0xff]  }
 0xd31   :  { %v9238_v25 = vpop.permute.xlu0 %9237  ;;  %v4191_v60 = vsel %vm1753_vm10, %v4186_v26, %v9214_v27  ;;  %v4192_v34 = vsel %vm1753_vm10, %v4187_v4, %v9215_v33  ;;  %v7114_v4 = vunpack.c.l.bf16 %v7860_v49  ;;  %v4247_v16 = vsel %vm1735_vm6, %v4037_v45, %v12057_v44 }
 0xd32   :  { %v9240_v24 = vunpack.i.h.bf16 %v9238_v25  ;;  %v9239_v42 = vunpack.i.l.bf16 %v9238_v25  ;;  %v4038_v12 = vmul.f32 %v11944_v7, %v13437_v23  ;;  %v3939_v49 = vmul.f32 %v11911_v51, %v13433_v46 }
 0xd33   :  { %v9248_v29 = vpop.permute.xlu1 %9247  ;;  %v7110_v7 = vunpack.c.l.bf16 %v7859_v10 }
 0xd34   :  { %v4196_v19 = vsel %vm1759_vm11, %v4191_v60, %v9239_v42  ;;  %v4197_v3 = vsel %vm1759_vm11, %v4192_v34, %v9240_v24  ;;  %v9249_v61 = vunpack.i.l.bf16 %v9248_v29  ;;  %v9250_v14 = vunpack.i.h.bf16 %v9248_v29 }
 0xd35   :  { %v9253_v39 = vpop.permute.xlu0 %9252  ;;  %v4201_v53 = vsel %vm1765_vm12, %v4196_v19, %v9244_v17  ;;  %v4202_v27 = vsel %vm1765_vm12, %v4197_v3, %v9245_v30  ;;  %v7111_v42 = vunpack.c.h.bf16 %v7859_v10  ;;  %v3940_v29 = vmul.f32 %v11951_v56, %v10887_v32 }
 0xd36   :  { %v4206_v26 = vsel %vm1771_vm13, %v4201_v53, %v9249_v61  ;;  %v9255_v25 = vunpack.i.h.bf16 %v9253_v39  ;;  %v9254_v24 = vunpack.i.l.bf16 %v9253_v39  ;;  %v4207_v45 = vsel %vm1771_vm13, %v4202_v27, %v9250_v14 }
 0xd37   :  { %v9258_v33 = vpop.permute.xlu1 %9257  ;;  %4398 = vmatmul.mubr.f32.vlgmr.msra.gmra.mxu0 %v4206_v26  ;;  %v4248_v3 = vsel %vm1735_vm6, %v4038_v12, %v12053_v57  ;;  %v9220_v26 = vunpack.i.h.bf16 %v12059_v37 }
 0xd38   :  { %4402 = vmatprep.mubr.f32.mxu0 %v4247_v16  ;;  %9137 = vmatpush3.msra.mxu0 %v7115_v38  ;;  %v9260_v17 = vunpack.i.h.bf16 %v9258_v33  ;;  %v9259_v60 = vunpack.i.l.bf16 %v9258_v33  ;;  %v4179_v61 = vsel %vm1735_vm6, %v3940_v29, %v9255_v25  ;;  %v4178_v38 = vsel %vm1735_vm6, %v3939_v49, %v9254_v24 }
 0xd39   :  { %v9273_v34 = vpop.permute.xlu0 %9272  ;;  %9138 = vmatprep.subr.mxu0 %v13389_v62 }
 0xd3a   :  { %9139 = vmatpush3.msra.mxu0 %v7114_v4  ;;  %v4183_v56 = vsel %vm1741_vm8, %v4178_v38, %v9259_v60  ;;  %v4184_v39 = vsel %vm1741_vm8, %v4179_v61, %v9260_v17  ;;  %v9219_v4 = vunpack.i.l.bf16 %v12059_v37  ;;  %v9274_v12 = vunpack.i.l.bf16 %v9273_v34 }
 0xd3b   :  { %v9263_v19 = vpop.permute.xlu1 %9262  ;;  %4403 = vmatmul.mubr.f32.gmra.mxu0 %v4207_v45  ;;  %9140 = vmatprep.subr.mxu0 %v13389_v62  ;;  %v4039_v17 = vmul.f32 %v12011_v13, %v13438_v58  ;;  %v3941_v37 = vmul.f32 %v11956_v63, %v10909_v15  ;;  %v9275_v45 = vunpack.i.h.bf16 %v9273_v34 }
 0xd3c   :  { %v9265_v30 = vunpack.i.h.bf16 %v9263_v19  ;;  %v9264_v51 = vunpack.i.l.bf16 %v9263_v19  ;;  %4407 = vmatprep.mubr.f32.mxu0 %v4248_v3  ;;  %9141 = vmatpush3.msra.mxu0 %v7111_v42 }
 0xd3d   :  { %v9278_v53 = vpop.permute.xlu0 %9277  ;;  %9142 = vmatprep.subr.mxu0 %v13389_v62  ;;  %v4249_v13 = vsel %vm1735_vm6, %v4039_v17, %v12055_v20 }
 0xd3e   :  { %v4188_v10 = vsel %vm1747_vm9, %v4183_v56, %v9264_v51  ;;  %v4189_v14 = vsel %vm1747_vm9, %v4184_v39, %v9265_v30  ;;  %9143 = vmatpush3.msra.mxu0 %v7110_v7  ;;  %v9279_v60 = vunpack.i.l.bf16 %v9278_v53  ;;  %v9280_v56 = vunpack.i.h.bf16 %v9278_v53 }
 0xd3f   :  { %v9268_v33 = vpop.permute.xlu1 %9267  ;;  %v4193_v25 = vsel %vm1753_vm10, %v4188_v10, %v9219_v4  ;;  %v4194_v24 = vsel %vm1753_vm10, %v4189_v14, %v9220_v26 }
 0xd40   :  { %v9270_v16 = vunpack.i.h.bf16 %v9268_v33  ;;  %v9269_v27 = vunpack.i.l.bf16 %v9268_v33 }
 0xd41   :  { %v4075_v42 = vpop.permute.xlu0 %4074 }
 0xd42   :  { %v4198_v49 = vsel %vm1759_vm11, %v4193_v25, %v9269_v27  ;;  %v4199_v29 = vsel %vm1759_vm11, %v4194_v24, %v9270_v16  ;;  %v4040_v16 = vmul.f32 %v11889_v48, %v10934_v21 }
 0xd43   :  { %v4055_v7 = vpop.permute.xlu1 %4054  ;;  %v4203_v19 = vsel %vm1765_vm12, %v4198_v49, %v9274_v12  ;;  %v4204_v51 = vsel %vm1765_vm12, %v4199_v29, %v9275_v45 }
 0xd44   :  { %v4180_v3 = vsel %vm1735_vm6, %v3941_v37, %v4055_v7  ;;  %v4208_v61 = vsel %vm1771_vm13, %v4203_v19, %v9279_v60  ;;  %v4209_v10 = vsel %vm1771_vm13, %v4204_v51, %v9280_v56  ;;  %v7875_v19 = vld [vmem:[%s13221_s14 + $0x78] sm:$0xff]   ;;  %v12177_v56 = vld [vmem:[%s13221_s14 + $0x70] sm:$0xff]  }
 0xd45   :  { %v4185_v38 = vsel %vm1741_vm8, %v4180_v3, %v4075_v42  ;;  %v4095_v30 = vpop.permute.xlu0 %4094  ;;  %4408 = vmatmul.mubr.f32.gmra.mxu0 %v4208_v61  ;;  %v7891_v3 = vld [vmem:[%s13221_s14 + $0xf8] sm:$0xff]   ;;  %v7178_v51 = vunpack.c.l.bf16 %v7875_v19 }
 0xd46   :  { %v4190_v63 = vsel %vm1747_vm9, %v4185_v38, %v4095_v30  ;;  %4412 = vmatprep.mubr.f32.mxu0 %v4249_v13  ;;  %v7867_v61 = vld [vmem:[%s13221_s14 + $0x38] sm:$0xff]   ;;  %v7179_v38 = vunpack.c.h.bf16 %v7875_v19  ;;  %v7243_v30 = vunpack.c.h.bf16 %v7891_v3  ;;  %v7890_v19 = vld [vmem:[%s13221_s14 + $0xf0] sm:$0xff]  }
 0xd47   :  { %v4150_v34 = vpop.permute.xlu1 %4149  ;;  %v4195_v39 = vsel %vm1753_vm10, %v4190_v63, %v12061_v11  ;;  %v7147_v13 = vunpack.c.h.bf16 %v7867_v61  ;;  %v7146_v63 = vunpack.c.l.bf16 %v7867_v61 }
 0xd48   :  { %8415 = vmatprep.subr.mxu1 %v7179_v38 }
 0xd49   :  { %v4130_v14 = vpop.permute.xlu0 %4129  ;;  %4413 = vmatmul.mubr.f32.gmra.mxu0 %v4209_v10  ;;  %8416 = vmatpush3.msra.mxu1 %v7147_v13  ;;  %v7242_v13 = vunpack.c.l.bf16 %v7891_v3 }
 0xd4a   :  { %v4200_v26 = vsel %vm1759_vm11, %v4195_v39, %v4130_v14  ;;  %v7175_v39 = vunpack.c.h.bf16 %v12177_v56  ;;  %8417 = vmatprep.subr.mxu1 %v7178_v51  ;;  %v7882_v51 = vld [vmem:[%s13221_s14 + $0xb0] sm:$0xff]  }
 0xd4b   :  { %v4170_v4 = vpop.permute.xlu1 %4169  ;;  %v4205_v33 = vsel %vm1765_vm12, %v4200_v26, %v4150_v34  ;;  %v12182_v34 = vld [vmem:[%s13221_s14 + $0x30] sm:$0xff]   ;;  %8418 = vmatpush3.msra.mxu1 %v7146_v63 }
 0xd4c   :  { %v4210_v12 = vsel %vm1771_vm13, %v4205_v33, %v4170_v4  ;;  %v7143_v10 = vunpack.c.h.bf16 %v12182_v34  ;;  %8419 = vmatprep.subr.mxu1 %v7175_v39 }
 0xd4d   :  { %v4233_v53 = vpop.permute.xlu0 %4232 }
 0xd4e   :  { %v4250_v27 = vsel %vm1735_vm6, %v4040_v16, %v4233_v53  ;;  %8420 = vmatpush3.msra.mxu1 %v7143_v10 }
 0xd4f   :  { %4417 = vmatprep.mubr.f32.mxu0 %v4250_v27  ;;  %v4223_v24 = vpop.permute.xlu1 %4222 }
 0xd50   :  { %4418 = vmatmul.mubr.f32.gmra.mxu0 %v4210_v12  ;;  %v4237_v48 = vsel %vm1735_vm6, %v12057_v44, %v4223_v24 }
 0xd51   :  { %v4219_v11 = vpop.permute.xlu0 %4218  ;;  %9144 = vmatprep.mubr.msk.f32.mxu0 %vm9285_vm1, %v13389_v62 }
 0xd52   :  { %v4236_v25 = vsel %vm1735_vm6, %v11883_v6, %v4219_v11 }
 0xd53   :  { %v4231_v60 = vpop.permute.xlu1 %4230 }
 0xd54   :  { %9145 = vmatmul.mubr.msk.f32.vlgmr.msra.gmra.mxu0 %vm1741_vm8, %v4236_v25  ;;  %v4239_v6 = vsel %vm1735_vm6, %v12055_v20, %v4231_v60  ;;  %v4530_v20 = vld [vmem:[%s13220_s13] sm:$0xff] }
 0xd55   :  { %9147 = vmatprep.mubr.msk.f32.mxu0 %vm9285_vm1, %v13389_v62  ;;  %v4227_v42 = vpop.permute.xlu0 %4226  ;;  %v4532_v45 = vunpack.c.l.bf16 %v4530_v20  ;;  %v4533_v7 = vunpack.c.h.bf16 %v4530_v20  ;;  %v4519_v60 = vld [vmem:[%s13209_s1 + $0x24] ss:$0 sm:$0xff] }
 0xd56   :  { %v4238_v17 = vsel %vm1735_vm6, %v12053_v57, %v4227_v42  ;;  %v4531_v57 = vld [vmem:[%s13220_s13 + $0x8] sm:$0xff]  ;;  %v4513_v42 = vld [vmem:[%s13209_s1 + $0x23] ss:$0 sm:$0xff] }
 0xd57   :  { %v4534_v29 = vunpack.c.l.bf16 %v4531_v57  ;;  %v4535_v37 = vunpack.c.h.bf16 %v4531_v57  ;;  %v7883_v57 = vld [vmem:[%s13221_s14 + $0xb8] sm:$0xff]  }
 0xd58   :  { %9148 = vmatmul.mubr.msk.f32.gmra.mxu0 %vm1741_vm8, %v4237_v48  ;;  %v7210_v39 = vunpack.c.l.bf16 %v7883_v57 }
 0xd59   :  { %9150 = vmatprep.mubr.msk.f32.mxu0 %vm9285_vm1, %v13389_v62  ;;  %v4235_v49 = vpop.permute.xlu0 %4234  ;;  %4592 = vmatprep.subr.mxu0 %v4535_v37 }
 0xd5a   :  { %v4240_v44 = vsel %vm1735_vm6, %v4233_v53, %v4235_v49  ;;  %4593 = vmatpush1.msra.mxu0 %v4534_v29 }
 0xd5b   :  { %4594 = vmatprep.subr.mxu0 %v4533_v7  ;;  %v7211_v7 = vunpack.c.h.bf16 %v7883_v57 }
 0xd5c   :  { %9151 = vmatmul.mubr.msk.f32.gmra.mxu0 %vm1741_vm8, %v4238_v17 }
 0xd5d   :  { %9153 = vmatprep.mubr.msk.f32.mxu0 %vm9285_vm1, %v13389_v62  ;;  %4595 = vmatpush1.msra.mxu0 %v4532_v45 }
 0xd5e   :  { %8462 = vmatprep.subr.mxu0 %v7243_v30 }
 0xd60   :  { %9154 = vmatmul.mubr.msk.f32.gmra.mxu0 %vm1741_vm8, %v4239_v6 }
 0xd61   :  { %9156 = vmatprep.mubr.msk.f32.mxu0 %vm9285_vm1, %v13389_v62 }
 0xd64   :  { %9157 = vmatmul.mubr.msk.f32.gmra.mxu0 %vm1741_vm8, %v4240_v44 }
 0xd65   :  { %4628 = vmatprep.mubr.f32.mxu0 %v13389_v62 }
 0xdf7   :  { %v8391_v14 = vpop.f32.mrf.mxu0 }
 0xdf9   :  { %v8392_v26 = vpop.f32.mrf.mxu0 }
 0xdfa   :  { %v8393_v24 = vadd.f32 %v8392_v26, %v8391_v14  ;;  %v7239_v26 = vunpack.c.h.bf16 %v7890_v19 }
 0xdfb   :  { %v8394_v4 = vpop.f32.mrf.mxu0 }
 0xdfd   :  { %v8395_v33 = vpop.f32.mrf.mxu0 }
 0xdfe   :  { %v8396_v49 = vadd.f32 %v8395_v33, %v8394_v4  ;;  %v7207_v33 = vunpack.c.h.bf16 %v7882_v51 }
 0xe05   :  { %v8397_v16 = vpop.f32.mrf.mxu0 }
 0xe07   :  { %v8398_v53 = vpop.f32.mrf.mxu0 }
 0xe08   :  { %v8399_v61 = vadd.f32 %v8398_v53, %v8397_v16 }
 0xe09   :  { %v8400_v27 = vpop.f32.mrf.mxu0 }
 0xe0b   :  { %v8401_v12 = vpop.f32.mrf.mxu0 }
 0xe0c   :  { %v8402_v16 = vadd.f32 %v8401_v12, %v8400_v27 }
 0xe10   :  { %v8403_v11 = vpop.f32.mrf.mxu0 }
 0xe12   :  { %v8404_v25 = vpop.f32.mrf.mxu0 }
 0xe14   :  { %v4489_v48 = vpop.f32.mrf.mxu0 }
 0xe15   :  { %v4490_v17 = vadd.f32 %v8393_v24, %v4489_v48 }
 0xe16   :  { %v9146_v6 = vpop.f32.mrf.mxu0 }
 0xe17   :  { %v4514_v44 = vmul.f32 %v4513_v42, %v4490_v17 }
 0xe18   :  { %v4494_v29 = vpop.f32.mrf.mxu0 }
 0xe19   :  { %v4520_v37 = vadd.f32 %v4519_v60, %v4514_v44  ;;  %v4495_v20 = vadd.f32 %v8396_v49, %v4494_v29  ;;  %v8405_v49 = vadd.f32 %v8404_v25, %v8403_v11  ;;  %v7174_v11 = vunpack.c.l.bf16 %v12177_v56  ;;  %v7881_v56 = vld [vmem:[%s13221_s14 + $0xa8] sm:$0xff]  }
 0xe1a   :  { %v9149_v45 = vpop.f32.mrf.mxu0  ;;  %v7238_v25 = vunpack.c.l.bf16 %v7890_v19 }
 0xe1b   :  { %v4525_v38 = vmax.f32 %v4520_v37, 0.0  ;;  %v4515_v30 = vmul.f32 %v4513_v42, %v4495_v20  ;;  %8421 = vmatprep.subr.mxu1 %v7174_v11 }
 0xe1c   :  { %v4499_v63 = vpop.f32.mrf.mxu0 }
 0xe1d   :  { %v4521_v10 = vadd.f32 %v4519_v60, %v4515_v30  ;;  %v4500_v14 = vadd.f32 %v8399_v61, %v4499_v63  ;;  %6399 = vmatmul.mubr.msk.f32.vlgmr.msra.gmra.mxu0 %vm1735_vm6, %v4525_v38  ;;  %v7142_v38 = vunpack.c.l.bf16 %v12182_v34  ;;  %v7206_v30 = vunpack.c.l.bf16 %v7882_v51 }
 0xe1e   :  { %v9152_v4 = vpop.f32.mrf.mxu0  ;;  %4634 = vmatprep.mubr.f32.mxu0 %v13389_v62  ;;  %8463 = vmatpush3.msra.mxu0 %v7211_v7  ;;  %v7203_v34 = vunpack.c.h.bf16 %v7881_v56 }
 0xe1f   :  { %v4526_v53 = vmax.f32 %v4521_v10, 0.0  ;;  %v4516_v24 = vmul.f32 %v4513_v42, %v4500_v14  ;;  %8464 = vmatprep.subr.mxu0 %v7242_v13  ;;  %v7873_v13 = vld [vmem:[%s13221_s14 + $0x68] sm:$0xff]   ;;  %8422 = vmatpush3.msra.mxu1 %v7142_v38  ;;  %v7202_v14 = vunpack.c.l.bf16 %v7881_v56  ;;  %v7888_v4 = vld [vmem:[%s13221_s14 + $0xe0] sm:$0xff]  }
 0xe20   :  { %v4504_v3 = vpop.f32.mrf.mxu0  ;;  %8465 = vmatpush3.msra.mxu0 %v7210_v39  ;;  %v7170_v19 = vunpack.c.l.bf16 %v7873_v13 }
 0xe21   :  { %v4522_v48 = vadd.f32 %v4519_v60, %v4516_v24  ;;  %v4505_v17 = vadd.f32 %v8402_v16, %v4504_v3  ;;  %6400 = vmatmul.mubr.msk.f32.gmra.mxu0 %vm1735_vm6, %v4526_v53  ;;  %8466 = vmatprep.subr.mxu0 %v7239_v26  ;;  %v7872_v26 = vld [vmem:[%s13221_s14 + $0x60] sm:$0xff]   ;;  %v7231_v53 = vunpack.c.h.bf16 %v7888_v4 }
 0xe22   :  { %v9155_v6 = vpop.f32.mrf.mxu0  ;;  %4640 = vmatprep.mubr.f32.mxu0 %v13389_v62  ;;  %8467 = vmatpush3.msra.mxu0 %v7207_v33  ;;  %v7864_v33 = vld [vmem:[%s13221_s14 + $0x20] sm:$0xff]   ;;  %v7167_v16 = vunpack.c.h.bf16 %v7872_v26 }
 0xe23   :  { %v4527_v44 = vmax.f32 %v4522_v48, 0.0  ;;  %v4517_v57 = vmul.f32 %v4513_v42, %v4505_v17  ;;  %8468 = vmatprep.subr.mxu0 %v7238_v25  ;;  %v7135_v24 = vunpack.c.h.bf16 %v7864_v33  ;;  %v7880_v3 = vld [vmem:[%s13221_s14 + $0xa0] sm:$0xff]   ;;  %v7166_v17 = vunpack.c.l.bf16 %v7872_v26  ;;  %v7885_v26 = vld [vmem:[%s13221_s14 + $0xc8] sm:$0xff]  }
 0xe24   :  { %v4509_v29 = vpop.f32.mrf.mxu0  ;;  %8469 = vmatpush3.msra.mxu0 %v7206_v30  ;;  %v7199_v48 = vunpack.c.h.bf16 %v7880_v3  ;;  %v7230_v6 = vunpack.c.l.bf16 %v7888_v4  ;;  %v7870_v30 = vld [vmem:[%s13221_s14 + $0x50] sm:$0xff]   ;;  %v7861_v4 = vld [vmem:[%s13221_s14 + $0x8] sm:$0xff]  }
 0xe25   :  { %v4523_v37 = vadd.f32 %v4519_v60, %v4517_v57  ;;  %v4510_v27 = vadd.f32 %v8405_v49, %v4509_v29  ;;  %6401 = vmatmul.mubr.msk.f32.gmra.mxu0 %vm1735_vm6, %v4527_v44  ;;  %v7134_v49 = vunpack.c.l.bf16 %v7864_v33  ;;  %v7198_v44 = vunpack.c.l.bf16 %v7880_v3  ;;  %v7871_v57 = vld [vmem:[%s13221_s14 + $0x58] sm:$0xff]   ;;  %v7868_v3 = vld [vmem:[%s13221_s14 + $0x40] sm:$0xff]  }
 0xe26   :  { %v9158_v12 = vpop.f32.mrf.mxu0  ;;  %4646 = vmatprep.mubr.f32.mxu0 %v13389_v62  ;;  %v7887_v29 = vld [vmem:[%s13221_s14 + $0xd8] sm:$0xff]  }
 0xe27   :  { %v4528_v20 = vmax.f32 %v4523_v37, 0.0  ;;  %v4518_v45 = vmul.f32 %v4513_v42, %v4510_v27  ;;  %v7889_v42 = vld [vmem:[%s13221_s14 + $0xe8] sm:$0xff]   ;;  %v7863_v37 = vld [vmem:[%s13221_s14 + $0x18] sm:$0xff]   ;;  %v7163_v27 = vunpack.c.h.bf16 %v7871_v57  ;;  %v7227_v12 = vunpack.c.h.bf16 %v7887_v29 }
 0xe28   :  { %v7235_v63 = vunpack.c.h.bf16 %v7889_v42  ;;  %v7234_v51 = vunpack.c.l.bf16 %v7889_v42  ;;  %v7226_v11 = vunpack.c.l.bf16 %v7887_v29  ;;  %v7130_v25 = vunpack.c.l.bf16 %v7863_v37  ;;  %v7862_v42 = vld [vmem:[%s13221_s14 + $0x10] sm:$0xff]  }
 0xe29   :  { %v4524_v7 = vadd.f32 %v4519_v60, %v4518_v45  ;;  %6402 = vmatmul.mubr.msk.f32.gmra.mxu0 %vm1735_vm6, %v4528_v20  ;;  %v7171_v60 = vunpack.c.h.bf16 %v7873_v13  ;;  %v7131_v20 = vunpack.c.h.bf16 %v7863_v37  ;;  %v7879_v45 = vld [vmem:[%s13221_s14 + $0x98] sm:$0xff]   ;;  %v7886_v13 = vld [vmem:[%s13221_s14 + $0xd0] sm:$0xff]   ;;  %v7122_v29 = vunpack.c.l.bf16 %v7861_v4 }
 0xe2a   :  { %4652 = vmatprep.mubr.f32.mxu0 %v13389_v62  ;;  %v7865_v62 = vld [vmem:[%s13221_s14 + $0x28] sm:$0xff]   ;;  %8470 = vmatprep.subr.mxu0 %v7235_v63  ;;  %v7194_v38 = vunpack.c.l.bf16 %v7879_v45  ;;  %v7127_v63 = vunpack.c.h.bf16 %v7862_v42 }
 0xe2b   :  { %v4529_v61 = vmax.f32 %v4524_v7, 0.0  ;;  %v7139_v39 = vunpack.c.h.bf16 %v7865_v62  ;;  %8423 = vmatprep.subr.mxu1 %v7171_v60  ;;  %v7138_v10 = vunpack.c.l.bf16 %v7865_v62  ;;  %8471 = vmatpush3.msra.mxu0 %v7203_v34  ;;  %v7195_v7 = vunpack.c.h.bf16 %v7879_v45 }
 0xe2c   :  { %8472 = vmatprep.subr.mxu0 %v7234_v51  ;;  %v7159_v62 = vunpack.c.h.bf16 %v7870_v30  ;;  %v7223_v60 = vunpack.c.h.bf16 %v7886_v13  ;;  %v7158_v34 = vunpack.c.l.bf16 %v7870_v30  ;;  %v7126_v51 = vunpack.c.l.bf16 %v7862_v42  ;;  %v12292_v30 = vld [vmem:[%s13221_s14 + $0x1f8] sm:$0xff]  }
 0xe2d   :  { %6403 = vmatmul.mubr.msk.f32.gmra.mxu0 %vm1735_vm6, %v4529_v61  ;;  %8424 = vmatpush3.msra.mxu1 %v7139_v39  ;;  %v7162_v61 = vunpack.c.l.bf16 %v7871_v57  ;;  %v7878_v39 = vld [vmem:[%s13221_s14 + $0x90] sm:$0xff]   ;;  %v7876_v57 = vld [vmem:[%s13221_s14 + $0x80] sm:$0xff]   ;;  %v7371_v42 = vunpack.c.h.bf16 %v12292_v30 }
 0xe2e   :  { %8425 = vmatprep.subr.mxu1 %v7170_v19  ;;  %8473 = vmatpush3.msra.mxu0 %v7202_v14  ;;  %v7191_v56 = vunpack.c.h.bf16 %v7878_v39  ;;  %v7222_v19 = vunpack.c.l.bf16 %v7886_v13  ;;  %v7869_v14 = vld [vmem:[%s13221_s14 + $0x48] sm:$0xff]   ;;  %v7183_v45 = vunpack.c.h.bf16 %v7876_v57 }
 0xe2f   :  { %8426 = vmatpush3.msra.mxu1 %v7138_v10  ;;  %8474 = vmatprep.subr.mxu0 %v7231_v53  ;;  %v7190_v10 = vunpack.c.l.bf16 %v7878_v39  ;;  %v7155_v33 = vunpack.c.h.bf16 %v7869_v14  ;;  %v7123_v53 = vunpack.c.h.bf16 %v7861_v4  ;;  %v12308_v4 = vld [vmem:[%s13221_s14 + $0x138] sm:$0xff]  }
 0xe30   :  { %8427 = vmatprep.subr.mxu1 %v7167_v16  ;;  %8475 = vmatpush3.msra.mxu0 %v7199_v48  ;;  %v7219_v16 = vunpack.c.h.bf16 %v7885_v26  ;;  %v7884_v48 = vld [vmem:[%s13221_s14 + $0xc0] sm:$0xff]  }
 0xe31   :  { %8428 = vmatpush3.msra.mxu1 %v7135_v24  ;;  %8476 = vmatprep.subr.mxu0 %v7230_v6  ;;  %v7877_v24 = vld [vmem:[%s13221_s14 + $0x88] sm:$0xff]   ;;  %v7154_v6 = vunpack.c.l.bf16 %v7869_v14 }
 0xe32   :  { %8429 = vmatprep.subr.mxu1 %v7166_v17  ;;  %8477 = vmatpush3.msra.mxu0 %v7198_v44  ;;  %v7187_v17 = vunpack.c.h.bf16 %v7877_v24  ;;  %v7117_v44 = vld [vmem:[%s13221_s14] sm:$0xff]   ;;  %v7186_v37 = vunpack.c.l.bf16 %v7877_v24 }
 0xe33   :  { %8430 = vmatpush3.msra.mxu1 %v7134_v49  ;;  %8478 = vmatprep.subr.mxu0 %v7227_v12  ;;  %v7218_v49 = vunpack.c.l.bf16 %v7885_v26  ;;  %v7215_v12 = vunpack.c.h.bf16 %v7884_v48 }
 0xe34   :  { %8431 = vmatprep.subr.mxu1 %v7163_v27  ;;  %8479 = vmatpush3.msra.mxu0 %v7195_v7  ;;  %v7151_v27 = vunpack.c.h.bf16 %v7868_v3  ;;  %v7150_v7 = vunpack.c.l.bf16 %v7868_v3 }
 0xe35   :  { %8432 = vmatpush3.msra.mxu1 %v7131_v20  ;;  %8480 = vmatprep.subr.mxu0 %v7226_v11  ;;  %v7119_v20 = vunpack.c.h.bf16 %v7117_v44  ;;  %v7118_v11 = vunpack.c.l.bf16 %v7117_v44  ;;  %v7915_v44 = vld [vmem:[%s13221_s14 + $0x1b8] sm:$0xff]  }
 0xe36   :  { %8433 = vmatprep.subr.mxu1 %v7162_v61  ;;  %8481 = vmatpush3.msra.mxu0 %v7194_v38  ;;  %v7214_v61 = vunpack.c.l.bf16 %v7884_v48  ;;  %v12287_v38 = vld [vmem:[%s13221_s14 + $0x178] sm:$0xff]  }
 0xe37   :  { %8434 = vmatpush3.msra.mxu1 %v7130_v25  ;;  %8482 = vmatprep.subr.mxu0 %v7223_v60  ;;  %v7182_v25 = vunpack.c.l.bf16 %v7876_v57  ;;  %v7307_v13 = vunpack.c.h.bf16 %v12287_v38 }
 0xe38   :  { %8435 = vmatprep.subr.mxu1 %v7159_v62  ;;  %8483 = vmatpush3.msra.mxu0 %v7191_v56 }
 0xe39   :  { %8436 = vmatpush3.msra.mxu1 %v7127_v63  ;;  %8484 = vmatprep.subr.mxu0 %v7222_v19 }
 0xe3a   :  { %8437 = vmatprep.subr.mxu1 %v7158_v34  ;;  %8485 = vmatpush3.msra.mxu0 %v7190_v10  ;;  %v6398_v34 = vld [vmem:[%s13209_s1 + $0x25] ss:$8 sm:$0x3] }
 0xe3b   :  { %8438 = vmatpush3.msra.mxu1 %v7126_v51  ;;  %8486 = vmatprep.subr.mxu0 %v7219_v16  ;;  %v12300_v51 = vrot.slane %v6398_v34, %v11346_v35  ;;  %v4546_v14 = vrot.slane %v6398_v34, %v11351_v2  ;;  %v7275_v2 = vunpack.c.h.bf16 %v12308_v4 }
 0xe3c   :  { %8439 = vmatprep.subr.mxu1 %v7155_v33  ;;  %8487 = vmatpush3.msra.mxu0 %v7187_v17 }
 0xe3d   :  { %8440 = vmatpush3.msra.mxu1 %v7123_v53  ;;  %8488 = vmatprep.subr.mxu0 %v7218_v49 }
 0xe3e   :  { %8441 = vmatprep.subr.mxu1 %v7154_v6  ;;  %8489 = vmatpush3.msra.mxu0 %v7186_v37 }
 0xe3f   :  { %8442 = vmatpush3.msra.mxu1 %v7122_v29  ;;  %8490 = vmatprep.subr.mxu0 %v7215_v12 }
 0xe40   :  { %8443 = vmatprep.subr.mxu1 %v7151_v27  ;;  %8491 = vmatpush3.msra.mxu0 %v7183_v45 }
 0xe41   :  { %8444 = vmatpush3.msra.mxu1 %v7119_v20  ;;  %8492 = vmatprep.subr.mxu0 %v7214_v61 }
 0xe42   :  { %8445 = vmatprep.subr.mxu1 %v7150_v7  ;;  %8493 = vmatpush3.msra.mxu0 %v7182_v25 }
 0xe43   :  { %8446 = vmatpush3.msra.mxu1 %v7118_v11  ;;  %8556 = vmatprep.subr.mxu0 %v7371_v42 }
 0xe44   :  { %8509 = vmatprep.subr.mxu1 %v7307_v13  ;;  %v7339_v13 = vunpack.c.h.bf16 %v7915_v44 }
 0xedd   :  { %v4630_v62 = vpop.f32.mrf.mxu0 }
 0xede   :  { %v12311_v33 = vadd.f32 %v4630_v62, %v12300_v51 }
 0xedf   :  { %v4632_v60 = vpop.f32.mrf.mxu0 }
 0xee0   :  { %v12315_v24 = vadd.f32 %v4632_v60, %v4546_v14  ;;  %v4715_v57 = vrot.slane %v12311_v33, 4  ;;  %v4673_v29 = vrot.slane %v12311_v33, 3  ;;  %v4799_v43 = vrot.slane %v12311_v33, 7 }
 0xee1   :  { %v4636_v63 = vpop.f32.mrf.mxu0 }
 0xee2   :  { %v12322_v48 = vadd.f32 %v4636_v63, %v12300_v51  ;;  %v4674_v20 = vrot.slane %v12315_v24, 3  ;;  %v4716_v7 = vrot.slane %v12315_v24, 4  ;;  %v7274_v63 = vunpack.c.l.bf16 %v12308_v4 }
 0xee3   :  { %v4638_v39 = vpop.f32.mrf.mxu0 }
 0xee4   :  { %v12313_v16 = vadd.f32 %v4638_v39, %v4546_v14  ;;  %v13472_v58 = vrot.slane %v12322_v48, 3 }
 0xee5   :  { %v4642_v56 = vpop.f32.mrf.mxu0 }
 0xee6   :  { %v4677_v37 = vrot.slane %v12313_v16, 3  ;;  %v4719_v27 = vrot.slane %v12313_v16, 4 }
 0xee7   :  { %v4644_v19 = vpop.f32.mrf.mxu0 }
 0xee8   :  { %v12339_v61 = vadd.f32 %v4644_v19, %v4546_v14  ;;  %v12368_v19 = vsel %vm1110_vm7, %v4674_v20, %v4677_v37 }
 0xee9   :  { %v12302_v10 = vpop.f32.mrf.mxu0 }
 0xeeb   :  { %v4650_v26 = vpop.f32.mrf.mxu0 }
 0xeec   :  { %v12410_v60 = vadd.f32 %v4650_v26, %v4546_v14 }
 0xeed   :  { %v4654_v53 = vpop.f32.mrf.mxu0 }
 0xeee   :  { %v12318_v35 = vadd.f32 %v4654_v53, %v12300_v51  ;;  %v12371_v53 = vsel %vm1202_vm4, %v4716_v7, %v4719_v27 }
 0xeef   :  { %v4656_v3 = vpop.f32.mrf.mxu0  ;;  %v4746_v4 = vmul.f32 %v12371_v53, %v10324_v8 }
 0xef0   :  { %v13308_v17 = vrot.slane %v12318_v35, 4  ;;  %v12325_v6 = vadd.f32 %v4656_v3, %v4546_v14  ;;  %v13309_v49 = vrot.slane %v12318_v35, 3  ;;  %v12376_v3 = vld [vmem:[%s13221_s14 + $0x170] sm:$0xff]  }
 0xef2   :  { %v13311_v12 = vrot.slane %v12325_v6, 3  ;;  %v13310_v45 = vrot.slane %v12325_v6, 4  ;;  %v12344_v11 = vsel %vm1110_vm7, %v13309_v49, %v4673_v29  ;;  %v12349_v25 = vsel %vm1202_vm4, %v13308_v17, %v4715_v57 }
 0xef3   :  { %13468 = vst [vmem:[#allocation16_spill] sm:$0xff] %v12344_v11  ;;  %13469 = vst [vmem:[#allocation18_spill] sm:$0xff] %v12349_v25  ;;  %v4701_v17 = vmul.f32 %v12344_v11, %v10853_v52  ;;  %v4743_v49 = vmul.f32 %v12349_v25, %v10683_v0 }
 0xef4   :  { %v12354_v42 = vsel %vm1110_vm7, %v13311_v12, %v4674_v20  ;;  %v12359_v62 = vsel %vm1202_vm4, %v13310_v45, %v4716_v7  ;;  %v7306_v45 = vunpack.c.l.bf16 %v12287_v38  ;;  %v7370_v12 = vunpack.c.l.bf16 %v12292_v30  ;;  %v12387_v20 = vld [vmem:[%s13221_s14 + $0x1f0] sm:$0xff]  }
 0xef5   :  { %13470 = vst [vmem:[#allocation21_spill] sm:$0xff] %v12354_v42  ;;  %13471 = vst [vmem:[#allocation19_spill] sm:$0xff] %v12359_v62  ;;  %v4702_v39 = vmul.f32 %v12354_v42, %v10853_v52  ;;  %v4744_v34 = vmul.f32 %v12359_v62, %v10683_v0  ;;  %v12390_v7 = vadd.f32 %v4642_v56, %v12300_v51  ;;  %v12396_v0 = vld [vmem:[%s13221_s14 + $0x130] sm:$0xff]   ;;  %v4681_v38 = vrot.slane %v12339_v61, 3 }
 0xef6   :  { %v12401_v52 = vld [vmem:[%s13221_s14 + $0x1b0] sm:$0xff]   ;;  %v4723_v30 = vrot.slane %v12339_v61, 4  ;;  %v4704_v56 = vmul.f32 %v12368_v19, %v13467_v40  ;;  %v7367_v21 = vunpack.c.h.bf16 %v12387_v20 }
 0xef7   :  { %5550 = vmatprep.mubr.f32.mxu1 %v4702_v39  ;;  %5640 = vmatprep.mubr.f32.mxu0 %v4744_v34  ;;  %v7338_v39 = vunpack.c.l.bf16 %v7915_v44  ;;  %v7303_v34 = vunpack.c.h.bf16 %v12376_v3  ;;  %v7271_v44 = vunpack.c.h.bf16 %v12396_v0  ;;  %v7335_v14 = vunpack.c.h.bf16 %v12401_v52 }
 0xef8   :  { %5551 = vmatmul.mubr.f32.vlgmr.msra.gmra.mxu1 %v4701_v17  ;;  %5641 = vmatmul.mubr.f32.vlgmr.msra.gmra.mxu0 %v4743_v49  ;;  %v12416_v17 = vsel %vm1110_vm7, %v4673_v29, %v13472_v58  ;;  %v13473_v49 = vrot.slane %v12322_v48, 4  ;;  %v12426_v26 = vsel %vm1110_vm7, %v4677_v37, %v4681_v38  ;;  %v4679_v58 = vrot.slane %v12390_v7, 3  ;;  %v7905_v37 = vld [vmem:[%s13221_s14 + $0x168] sm:$0xff]  }
 0xef9   :  { %8510 = vmatpush3.msra.mxu1 %v7275_v2  ;;  %8557 = vmatpush3.msra.mxu0 %v7339_v13  ;;  %v12429_v2 = vsel %vm1202_vm4, %v4719_v27, %v4723_v30  ;;  %v4721_v29 = vrot.slane %v12390_v7, 4  ;;  %v7921_v27 = vld [vmem:[%s13221_s14 + $0x1e8] sm:$0xff]  }
 0xefa   :  { %v12421_v23 = vsel %vm1202_vm4, %v4715_v57, %v13473_v49  ;;  %5555 = vmatprep.mubr.f32.mxu1 %v4704_v56  ;;  %5645 = vmatprep.mubr.f32.mxu0 %v4746_v4  ;;  %v4703_v57 = vmul.f32 %v12416_v17, %v13467_v40  ;;  %v7366_v40 = vunpack.c.l.bf16 %v12387_v20  ;;  %v4727_v56 = vrot.slane %v12410_v60, 4 }
 0xefb   :  { %8511 = vmatprep.subr.mxu1 %v7306_v45  ;;  %8558 = vmatprep.subr.mxu0 %v7370_v12  ;;  %v4745_v13 = vmul.f32 %v12421_v23, %v10324_v8  ;;  %v7302_v12 = vunpack.c.l.bf16 %v12376_v3  ;;  %v12446_v45 = vadd.f32 %v12302_v10, %v12300_v51  ;;  %v7897_v8 = vld [vmem:[%s13221_s14 + $0x128] sm:$0xff]   ;;  %v4685_v3 = vrot.slane %v12410_v60, 3 }
 0xefc   :  { %8512 = vmatpush3.msra.mxu1 %v7274_v63  ;;  %8559 = vmatpush3.msra.mxu0 %v7338_v39  ;;  %v7913_v63 = vld [vmem:[%s13221_s14 + $0x1a8] sm:$0xff]   ;;  %v4706_v51 = vmul.f32 %v12426_v26, %v13433_v46  ;;  %v7270_v10 = vunpack.c.l.bf16 %v12396_v0  ;;  %v7334_v20 = vunpack.c.l.bf16 %v12401_v52  ;;  %v7299_v4 = vunpack.c.h.bf16 %v7905_v37 }
 0xefd   :  { %8513 = vmatprep.subr.mxu1 %v7303_v34  ;;  %8560 = vmatprep.subr.mxu0 %v7367_v21  ;;  %v4748_v21 = vmul.f32 %v12429_v2, %v10470_v36  ;;  %v7363_v39 = vunpack.c.h.bf16 %v7921_v27  ;;  %v13474_v34 = vrot.slane %v12322_v48, 3  ;;  %v7267_v59 = vunpack.c.h.bf16 %v7897_v8 }
 0xefe   :  { %5556 = vmatmul.mubr.f32.gmra.mxu1 %v4703_v57  ;;  %5646 = vmatmul.mubr.f32.gmra.mxu0 %v4745_v13  ;;  %v13475_v57 = vrot.slane %v12322_v48, 4  ;;  %v7331_v0 = vunpack.c.h.bf16 %v7913_v63  ;;  %v12474_v52 = vsel %vm1110_vm7, %v4681_v38, %v4685_v3  ;;  %v7904_v38 = vld [vmem:[%s13221_s14 + $0x160] sm:$0xff]  }
 0xeff   :  { %8514 = vmatpush3.msra.mxu1 %v7271_v44  ;;  %8561 = vmatpush3.msra.mxu0 %v7335_v14  ;;  %v12466_v49 = vsel %vm1110_vm7, %v13474_v34, %v4679_v58  ;;  %v12477_v44 = vsel %vm1202_vm4, %v4723_v30, %v4727_v56  ;;  %v4683_v14 = vrot.slane %v12446_v45, 3  ;;  %v4725_v34 = vrot.slane %v12446_v45, 4  ;;  %v7920_v30 = vld [vmem:[%s13221_s14 + $0x1e0] sm:$0xff]  }
 0xf00   :  { %v12471_v13 = vsel %vm1202_vm4, %v13475_v57, %v4721_v29  ;;  %5560 = vmatprep.mubr.f32.mxu1 %v4706_v51  ;;  %5650 = vmatprep.mubr.f32.mxu0 %v4748_v21  ;;  %v4705_v51 = vmul.f32 %v12466_v49, %v13433_v46  ;;  %v4708_v46 = vmul.f32 %v12474_v52, %v10887_v32  ;;  %v7896_v57 = vld [vmem:[%s13221_s14 + $0x120] sm:$0xff]  }
 0xf01   :  { %8515 = vmatprep.subr.mxu1 %v7302_v12  ;;  %8562 = vmatprep.subr.mxu0 %v7366_v40  ;;  %v4747_v21 = vmul.f32 %v12471_v13, %v10470_v36  ;;  %v7298_v12 = vunpack.c.l.bf16 %v7905_v37  ;;  %v7362_v40 = vunpack.c.l.bf16 %v7921_v27  ;;  %v4750_v36 = vmul.f32 %v12477_v44, %v10602_v47 }
 0xf02   :  { %8516 = vmatpush3.msra.mxu1 %v7270_v10  ;;  %8563 = vmatpush3.msra.mxu0 %v7334_v20  ;;  %v7266_v10 = vunpack.c.l.bf16 %v7897_v8  ;;  %v7330_v20 = vunpack.c.l.bf16 %v7913_v63  ;;  %v7295_v37 = vunpack.c.h.bf16 %v7904_v38  ;;  %v7359_v27 = vunpack.c.h.bf16 %v7920_v30 }
 0xf03   :  { %8517 = vmatprep.subr.mxu1 %v7299_v4  ;;  %8564 = vmatprep.subr.mxu0 %v7363_v39  ;;  %v7912_v4 = vld [vmem:[%s13221_s14 + $0x1a0] sm:$0xff]   ;;  %v12502_v39 = vsel %vm1110_vm7, %v4679_v58, %v4683_v14  ;;  %v7263_v8 = vunpack.c.h.bf16 %v7896_v57  ;;  %v7903_v58 = vld [vmem:[%s13221_s14 + $0x158] sm:$0xff]  }
 0xf04   :  { %5561 = vmatmul.mubr.f32.gmra.mxu1 %v4705_v51  ;;  %5651 = vmatmul.mubr.f32.gmra.mxu0 %v4747_v21  ;;  %v12505_v51 = vsel %vm1202_vm4, %v4721_v29, %v4725_v34  ;;  %v7327_v63 = vunpack.c.h.bf16 %v7912_v4  ;;  %v13476_v21 = vrot.slane %v12325_v6, 3  ;;  %v4707_v29 = vmul.f32 %v12502_v39, %v10887_v32 }
 0xf05   :  { %8518 = vmatpush3.msra.mxu1 %v7267_v59  ;;  %8565 = vmatpush3.msra.mxu0 %v7331_v0  ;;  %v13477_v59 = vrot.slane %v12325_v6, 4 }
 0xf06   :  { %5565 = vmatprep.mubr.f32.mxu1 %v4708_v46  ;;  %5655 = vmatprep.mubr.f32.mxu0 %v4750_v36  ;;  %v12510_v11 = vsel %vm1110_vm7, %v4685_v3, %v13476_v21  ;;  %v7919_v3 = vld [vmem:[%s13221_s14 + $0x1d8] sm:$0xff]   ;;  %v7262_v46 = vunpack.c.l.bf16 %v7896_v57  ;;  %v7326_v36 = vunpack.c.l.bf16 %v7912_v4  ;;  %v13319_v21 = vrot.slane %v12325_v6, 5 }
 0xf07   :  { %8519 = vmatprep.subr.mxu1 %v7298_v12  ;;  %8566 = vmatprep.subr.mxu0 %v7362_v40  ;;  %v12515_v0 = vsel %vm1202_vm4, %v4727_v56, %v13477_v59  ;;  %v4749_v12 = vmul.f32 %v12505_v51, %v10602_v47  ;;  %v7294_v40 = vunpack.c.l.bf16 %v7904_v38  ;;  %v7358_v56 = vunpack.c.l.bf16 %v7920_v30  ;;  %v7911_v30 = vld [vmem:[%s13221_s14 + $0x198] sm:$0xff]  }
 0xf08   :  { %8520 = vmatpush3.msra.mxu1 %v7266_v10  ;;  %8567 = vmatpush3.msra.mxu0 %v7330_v20  ;;  %v4710_v32 = vmul.f32 %v12510_v11, %v10909_v15  ;;  %v4752_v47 = vmul.f32 %v12515_v0, %v13458_v54  ;;  %v7291_v38 = vunpack.c.h.bf16 %v7903_v58  ;;  %v7895_v10 = vld [vmem:[%s13221_s14 + $0x118] sm:$0xff]   ;;  %v13318_v20 = vrot.slane %v12325_v6, 7 }
 0xf09   :  { %8521 = vmatprep.subr.mxu1 %v7295_v37  ;;  %8568 = vmatprep.subr.mxu0 %v7359_v27  ;;  %v7355_v57 = vunpack.c.h.bf16 %v7919_v3  ;;  %v13478_v4 = vrot.slane %v12318_v35, 3  ;;  %v13480_v27 = vrot.slane %v12318_v35, 4 }
 0xf0a   :  { %5566 = vmatmul.mubr.f32.gmra.mxu1 %v4707_v29  ;;  %5656 = vmatmul.mubr.f32.gmra.mxu0 %v4749_v12  ;;  %v13321_v29 = vrot.slane %v12315_v24, 5  ;;  %v13320_v12 = vrot.slane %v12315_v24, 7 }
 0xf0b   :  { %8522 = vmatpush3.msra.mxu1 %v7263_v8  ;;  %8569 = vmatpush3.msra.mxu0 %v7327_v63  ;;  %v12542_v37 = vsel %vm1110_vm7, %v4683_v14, %v13478_v4  ;;  %v12547_v59 = vsel %vm1202_vm4, %v4725_v34, %v13480_v27  ;;  %v7259_v8 = vunpack.c.h.bf16 %v7895_v10  ;;  %v7323_v63 = vunpack.c.h.bf16 %v7911_v30 }
 0xf0c   :  { %13479 = vst [vmem:[#allocation23_spill] sm:$0xff] %v12542_v37  ;;  %5570 = vmatprep.mubr.f32.mxu1 %v4710_v32  ;;  %5660 = vmatprep.mubr.f32.mxu0 %v4752_v47  ;;  %v12556_v14 = vsel %vm1258_vm3, %v13319_v21, %v13321_v29  ;;  %v4709_v34 = vmul.f32 %v12542_v37, %v10909_v15  ;;  %v7290_v47 = vunpack.c.l.bf16 %v7903_v58  ;;  %v7354_v15 = vunpack.c.l.bf16 %v7919_v3  ;;  %v7910_v58 = vld [vmem:[%s13221_s14 + $0x190] sm:$0xff]  }
 0xf0d   :  { %8523 = vmatprep.subr.mxu1 %v7294_v40  ;;  %8570 = vmatprep.subr.mxu0 %v7358_v56  ;;  %13481 = vst [vmem:[#allocation9_spill] sm:$0xff] %v12556_v14  ;;  %v4751_v32 = vmul.f32 %v12547_v59, %v13458_v54  ;;  %v4826_v40 = vsel %vm362_vm0, %v13318_v20, %v13320_v12  ;;  %v7902_v56 = vld [vmem:[%s13221_s14 + $0x150] sm:$0xff]   ;;  %v7258_v4 = vunpack.c.l.bf16 %v7895_v10  ;;  %v7322_v27 = vunpack.c.l.bf16 %v7911_v30 }
 0xf0e   :  { %8524 = vmatpush3.msra.mxu1 %v7262_v46  ;;  %8571 = vmatpush3.msra.mxu0 %v7326_v36  ;;  %v7918_v46 = vld [vmem:[%s13221_s14 + $0x1d0] sm:$0xff]   ;;  %v4786_v36 = vmul.f32 %v12556_v14, %v10751_v5  ;;  %v7287_v3 = vunpack.c.h.bf16 %v7902_v56  ;;  %v7319_v21 = vunpack.c.h.bf16 %v7910_v58  ;;  %v7286_v10 = vunpack.c.l.bf16 %v7902_v56  ;;  %v7900_v56 = vld [vmem:[%s13221_s14 + $0x140] sm:$0xff]  }
 0xf0f   :  { %8525 = vmatprep.subr.mxu1 %v7291_v38  ;;  %8572 = vmatprep.subr.mxu0 %v7355_v57  ;;  %v7894_v54 = vld [vmem:[%s13221_s14 + $0x110] sm:$0xff]   ;;  %v4828_v38 = vmul.f32 %v4826_v40, %v10771_v28  ;;  %v7351_v57 = vunpack.c.h.bf16 %v7918_v46  ;;  %v7350_v30 = vunpack.c.l.bf16 %v7918_v46  ;;  %v7318_v40 = vunpack.c.l.bf16 %v7910_v58  ;;  %v7908_v58 = vld [vmem:[%s13221_s14 + $0x180] sm:$0xff]  }
 0xf10   :  { %5571 = vmatmul.mubr.f32.gmra.mxu1 %v4709_v34  ;;  %5661 = vmatmul.mubr.f32.gmra.mxu0 %v4751_v32  ;;  %v7255_v20 = vunpack.c.h.bf16 %v7894_v54  ;;  %v7901_v34 = vld [vmem:[%s13221_s14 + $0x148] sm:$0xff]   ;;  %v7279_v29 = vunpack.c.h.bf16 %v7900_v56  ;;  %v7311_v42 = vunpack.c.h.bf16 %v7908_v58 }
 0xf11   :  { %8526 = vmatpush3.msra.mxu1 %v7259_v8  ;;  %8573 = vmatpush3.msra.mxu0 %v7323_v63  ;;  %v7917_v32 = vld [vmem:[%s13221_s14 + $0x1c8] sm:$0xff]  }
 0xf12   :  { %8527 = vmatprep.subr.mxu1 %v7290_v47  ;;  %5730 = vmatprep.mubr.f32.mxu1 %v4786_v36  ;;  %v7893_v8 = vld [vmem:[%s13221_s14 + $0x108] sm:$0xff]   ;;  %v7254_v47 = vunpack.c.l.bf16 %v7894_v54  ;;  %v7283_v36 = vunpack.c.h.bf16 %v7901_v34  ;;  %v7347_v12 = vunpack.c.h.bf16 %v7917_v32  ;;  %v7892_v54 = vld [vmem:[%s13221_s14 + $0x100] sm:$0xff]  }
 0xf13   :  { %8574 = vmatprep.subr.mxu0 %v7354_v15  ;;  %5820 = vmatprep.mubr.f32.mxu0 %v4828_v38  ;;  %v7909_v63 = vld [vmem:[%s13221_s14 + $0x188] sm:$0xff]   ;;  %v7251_v46 = vunpack.c.h.bf16 %v7893_v8  ;;  %v7916_v38 = vld [vmem:[%s13221_s14 + $0x1c0] sm:$0xff]   ;;  %v7247_v25 = vunpack.c.h.bf16 %v7892_v54 }
 0xf14   :  { %8528 = vmatpush3.msra.mxu1 %v7258_v4  ;;  %8575 = vmatpush3.msra.mxu0 %v7322_v27  ;;  %v7315_v15 = vunpack.c.h.bf16 %v7909_v63  ;;  %v7282_v4 = vunpack.c.l.bf16 %v7901_v34  ;;  %v7346_v27 = vunpack.c.l.bf16 %v7917_v32  ;;  %v7343_v14 = vunpack.c.h.bf16 %v7916_v38  ;;  %v7939_v32 = vld [vmem:[%s13221_s14 + $0x278] sm:$0xff]  }
 0xf15   :  { %8529 = vmatprep.subr.mxu1 %v7287_v3  ;;  %8576 = vmatprep.subr.mxu0 %v7351_v57  ;;  %v7314_v3 = vunpack.c.l.bf16 %v7909_v63  ;;  %v13326_v57 = vrot.slane %v12318_v35, 5  ;;  %v4757_v34 = vrot.slane %v12311_v33, 5  ;;  %v7342_v63 = vunpack.c.l.bf16 %v7916_v38  ;;  %v7947_v38 = vld [vmem:[%s13221_s14 + $0x2b8] sm:$0xff]  }
 0xf16   :  { %8530 = vmatpush3.msra.mxu1 %v7255_v20  ;;  %8577 = vmatpush3.msra.mxu0 %v7319_v21  ;;  %v13325_v21 = vrot.slane %v12318_v35, 7  ;;  %v7250_v20 = vunpack.c.l.bf16 %v7893_v8  ;;  %v7278_v8 = vunpack.c.l.bf16 %v7900_v56  ;;  %v7931_v56 = vld [vmem:[%s13221_s14 + $0x238] sm:$0xff]   ;;  %v7466_v37 = vunpack.c.l.bf16 %v7947_v38 }
 0xf17   :  { %8531 = vmatprep.subr.mxu1 %v7286_v10  ;;  %8578 = vmatprep.subr.mxu0 %v7350_v30  ;;  %v7955_v10 = vld [vmem:[%s13221_s14 + $0x2f8] sm:$0xff]   ;;  %v4803_v30 = vrot.slane %v12313_v16, 7 }
 0xf18   :  { %8532 = vmatpush3.msra.mxu1 %v7254_v47  ;;  %8579 = vmatpush3.msra.mxu0 %v7318_v40  ;;  %v7246_v47 = vunpack.c.l.bf16 %v7892_v54  ;;  %v7310_v40 = vunpack.c.l.bf16 %v7908_v58  ;;  %v13483_v54 = vrot.slane %v12315_v24, 5 }
 0xf19   :  { %8533 = vmatprep.subr.mxu1 %v7283_v36  ;;  %8580 = vmatprep.subr.mxu0 %v7347_v12  ;;  %v4761_v12 = vrot.slane %v12313_v16, 5  ;;  %v12621_v36 = vsel %vm1258_vm3, %v13326_v57, %v4757_v34  ;;  %v7498_v57 = vunpack.c.l.bf16 %v7955_v10 }
 0xf1a   :  { %8534 = vmatpush3.msra.mxu1 %v7251_v46  ;;  %8581 = vmatpush3.msra.mxu0 %v7315_v15  ;;  %13482 = vst [vmem:[#allocation8_spill] sm:$0xff] %v12621_v36  ;;  %v4825_v46 = vsel %vm362_vm0, %v13325_v21, %v4799_v43  ;;  %v7435_v15 = vunpack.c.h.bf16 %v7939_v32  ;;  %v12648_v21 = vld [vmem:[%s13221_s14 + $0x270] sm:$0xff]  }
 0xf1b   :  { %8535 = vmatprep.subr.mxu1 %v7282_v4  ;;  %8582 = vmatprep.subr.mxu0 %v7346_v27  ;;  %v7499_v4 = vunpack.c.h.bf16 %v7955_v10  ;;  %v12635_v58 = vsel %vm1258_vm3, %v13483_v54, %v4761_v12  ;;  %v4759_v27 = vrot.slane %v12322_v48, 5  ;;  %v7467_v54 = vunpack.c.h.bf16 %v7947_v38  ;;  %v7946_v10 = vld [vmem:[%s13221_s14 + $0x2b0] sm:$0xff]  }
 0xf1c   :  { %8536 = vmatpush3.msra.mxu1 %v7250_v20  ;;  %8583 = vmatpush3.msra.mxu0 %v7314_v3  ;;  %13484 = vst [vmem:[#allocation2_spill] sm:$0xff] %v12635_v58  ;;  %v4801_v20 = vrot.slane %v12322_v48, 7  ;;  %v4785_v3 = vmul.f32 %v12621_v36, %v10751_v5  ;;  %v4807_v5 = vrot.slane %v12339_v61, 7  ;;  %v7402_v36 = vunpack.c.l.bf16 %v7931_v56 }
 0xf1d   :  { %8537 = vmatprep.subr.mxu1 %v7279_v29  ;;  %8584 = vmatprep.subr.mxu0 %v7343_v14  ;;  %v13485_v29 = vrot.slane %v12315_v24, 7  ;;  %v12661_v62 = vsel %vm1258_vm3, %v4757_v34, %v4759_v27 }
 0xf1e   :  { %8538 = vmatpush3.msra.mxu1 %v7247_v25  ;;  %8585 = vmatpush3.msra.mxu0 %v7311_v42  ;;  %v4827_v25 = vmul.f32 %v4825_v46, %v10771_v28  ;;  %v7403_v42 = vunpack.c.h.bf16 %v7931_v56  ;;  %v13486_v28 = vld [vmem:[#allocation26_spill] sm:$0xff]  ;;  %v7434_v46 = vunpack.c.l.bf16 %v7939_v32  ;;  %13488 = vst [vmem:[#allocation6_spill] sm:$0xff] %v12661_v62  ;;  %v4802_v18 = vsel %vm362_vm0, %v4799_v43, %v4801_v20  ;;  %v7930_v32 = vld [vmem:[%s13221_s14 + $0x230] sm:$0xff]  }
 0xf1f   :  { %v4804_v14 = vsel %vm362_vm0, %v13485_v29, %v4803_v30  ;;  %8539 = vmatprep.subr.mxu1 %v7278_v8  ;;  %8586 = vmatprep.subr.mxu0 %v7342_v63  ;;  %v12653_v29 = vld [vmem:[%s13221_s14 + $0x2f0] sm:$0xff]   ;;  %v4765_v8 = vrot.slane %v12339_v61, 5  ;;  %v4788_v63 = vmul.f32 %v12635_v58, %v13486_v28  ;;  %v4808_v43 = vsel %vm362_vm0, %v4803_v30, %v4807_v5  ;;  %v7953_v30 = vld [vmem:[%s13221_s14 + $0x2e8] sm:$0xff]  }
 0xf20   :  { %8540 = vmatpush3.msra.mxu1 %v7246_v47  ;;  %8587 = vmatpush3.msra.mxu0 %v7310_v40  ;;  %v13487_v47 = vld [vmem:[#allocation30_spill] sm:$0xff]  ;;  %v4787_v56 = vmul.f32 %v12661_v62, %v13486_v28  ;;  %v13490_v28 = vld [vmem:[#allocation31_spill] sm:$0xff] }
 0xf21   :  { %5731 = vmatmul.mubr.f32.vlgmr.msra.gmra.mxu1 %v4785_v3  ;;  %5821 = vmatmul.mubr.f32.vlgmr.msra.gmra.mxu0 %v4827_v25  ;;  %v4830_v40 = vmul.f32 %v4804_v14, %v13487_v47  ;;  %v7431_v3 = vunpack.c.h.bf16 %v12648_v21  ;;  %v7495_v25 = vunpack.c.h.bf16 %v12653_v29  ;;  %v12673_v34 = vsel %vm1258_vm3, %v4761_v12, %v4765_v8  ;;  %v7937_v12 = vld [vmem:[%s13221_s14 + $0x268] sm:$0xff]  }
 0xf22   :  { %8603 = vmatprep.subr.mxu1 %v7435_v15  ;;  %8650 = vmatprep.subr.mxu0 %v7499_v4  ;;  %13489 = vst [vmem:[#allocation14_spill] sm:$0xff] %v12673_v34  ;;  %v4763_v15 = vrot.slane %v12390_v7, 5  ;;  %v4805_v4 = vrot.slane %v12390_v7, 7  ;;  %v4829_v38 = vmul.f32 %v4802_v18, %v13487_v47  ;;  %v7399_v14 = vunpack.c.h.bf16 %v7930_v32 }
 0xf23   :  { %5735 = vmatprep.mubr.f32.mxu1 %v4788_v63  ;;  %5825 = vmatprep.mubr.f32.mxu0 %v4830_v40  ;;  %v4790_v18 = vmul.f32 %v12673_v34, %v13490_v28  ;;  %v7430_v63 = vunpack.c.l.bf16 %v12648_v21  ;;  %v7494_v47 = vunpack.c.l.bf16 %v12653_v29  ;;  %v7398_v40 = vunpack.c.l.bf16 %v7930_v32  ;;  %v7945_v21 = vld [vmem:[%s13221_s14 + $0x2a8] sm:$0xff]  }
 0xf24   :  { %8604 = vmatpush3.msra.mxu1 %v7403_v42  ;;  %8651 = vmatpush3.msra.mxu0 %v7467_v54  ;;  %v7463_v42 = vunpack.c.h.bf16 %v7946_v10  ;;  %v4769_v54 = vrot.slane %v12410_v60, 5  ;;  %v12695_v62 = vsel %vm1258_vm3, %v4759_v27, %v4763_v15  ;;  %v4806_v58 = vsel %vm362_vm0, %v4801_v20, %v4805_v4 }
 0xf25   :  { %8605 = vmatprep.subr.mxu1 %v7434_v46  ;;  %8652 = vmatprep.subr.mxu0 %v7498_v57  ;;  %v4811_v57 = vrot.slane %v12410_v60, 7  ;;  %v7462_v46 = vunpack.c.l.bf16 %v7946_v10  ;;  %v4767_v20 = vrot.slane %v12446_v45, 5  ;;  %v7490_v34 = vunpack.c.l.bf16 %v7953_v30 }
 0xf26   :  { %8606 = vmatpush3.msra.mxu1 %v7402_v36  ;;  %8653 = vmatpush3.msra.mxu0 %v7466_v37  ;;  %v13491_v37 = vld [vmem:[#allocation32_spill] sm:$0xff]  ;;  %v12705_v29 = vsel %vm1258_vm3, %v4765_v8, %v4769_v54  ;;  %v13492_v8 = vld [vmem:[#allocation35_spill] sm:$0xff] }
 0xf27   :  { %5736 = vmatmul.mubr.f32.gmra.mxu1 %v4787_v56  ;;  %5826 = vmatmul.mubr.f32.gmra.mxu0 %v4829_v38  ;;  %v4832_v36 = vmul.f32 %v4808_v43, %v13491_v37  ;;  %v7427_v56 = vunpack.c.h.bf16 %v7937_v12  ;;  %v7491_v38 = vunpack.c.h.bf16 %v7953_v30  ;;  %v7929_v43 = vld [vmem:[%s13221_s14 + $0x228] sm:$0xff]   ;;  %v4812_v27 = vsel %vm362_vm0, %v4807_v5, %v4811_v57  ;;  %v7944_v30 = vld [vmem:[%s13221_s14 + $0x2a0] sm:$0xff]  }
 0xf28   :  { %8607 = vmatprep.subr.mxu1 %v7431_v3  ;;  %8654 = vmatprep.subr.mxu0 %v7495_v25  ;;  %v4809_v3 = vrot.slane %v12446_v45, 7  ;;  %v4789_v25 = vmul.f32 %v12695_v62, %v13490_v28  ;;  %v4831_v32 = vmul.f32 %v4806_v58, %v13491_v37  ;;  %v7395_v10 = vunpack.c.h.bf16 %v7929_v43  ;;  %v7952_v58 = vld [vmem:[%s13221_s14 + $0x2e0] sm:$0xff]  }
 0xf29   :  { %5740 = vmatprep.mubr.f32.mxu1 %v4790_v18  ;;  %5830 = vmatprep.mubr.f32.mxu0 %v4832_v36  ;;  %v4792_v5 = vmul.f32 %v12705_v29, %v13492_v8  ;;  %v7426_v36 = vunpack.c.l.bf16 %v7937_v12  ;;  %v7394_v28 = vunpack.c.l.bf16 %v7929_v43  ;;  %v7458_v37 = vunpack.c.l.bf16 %v7945_v21  ;;  %v7928_v12 = vld [vmem:[%s13221_s14 + $0x220] sm:$0xff]  }
 0xf2a   :  { %8608 = vmatpush3.msra.mxu1 %v7399_v14  ;;  %8655 = vmatpush3.msra.mxu0 %v7463_v42  ;;  %v7459_v14 = vunpack.c.h.bf16 %v7945_v21  ;;  %v13493_v42 = vld [vmem:[#allocation37_spill] sm:$0xff] }
 0xf2b   :  { %8609 = vmatprep.subr.mxu1 %v7430_v63  ;;  %8656 = vmatprep.subr.mxu0 %v7494_v47  ;;  %v4834_v18 = vmul.f32 %v4812_v27, %v13493_v42  ;;  %v7936_v63 = vld [vmem:[%s13221_s14 + $0x260] sm:$0xff]   ;;  %v12723_v47 = vsel %vm1258_vm3, %v4763_v15, %v4767_v20 }
 0xf2c   :  { %8610 = vmatpush3.msra.mxu1 %v7398_v40  ;;  %8657 = vmatpush3.msra.mxu0 %v7462_v46  ;;  %v4810_v40 = vsel %vm362_vm0, %v4805_v4, %v4809_v3  ;;  %v7423_v46 = vunpack.c.h.bf16 %v7936_v63  ;;  %v13495_v4 = vrot.slane %v12325_v6, 7  ;;  %v4791_v21 = vmul.f32 %v12723_v47, %v13492_v8  ;;  %v7951_v8 = vld [vmem:[%s13221_s14 + $0x2d8] sm:$0xff]  }
 0xf2d   :  { %5741 = vmatmul.mubr.f32.gmra.mxu1 %v4789_v25  ;;  %5831 = vmatmul.mubr.f32.gmra.mxu0 %v4831_v32  ;;  %v4833_v27 = vmul.f32 %v4810_v40, %v13493_v42  ;;  %v7391_v25 = vunpack.c.h.bf16 %v7928_v12  ;;  %v7455_v32 = vunpack.c.h.bf16 %v7944_v30  ;;  %v7390_v42 = vunpack.c.l.bf16 %v7928_v12  ;;  %v7943_v40 = vld [vmem:[%s13221_s14 + $0x298] sm:$0xff]  }
 0xf2e   :  { %8611 = vmatprep.subr.mxu1 %v7427_v56  ;;  %8658 = vmatprep.subr.mxu0 %v7491_v38  ;;  %v7487_v56 = vunpack.c.h.bf16 %v7952_v58  ;;  %v13494_v38 = vrot.slane %v12325_v6, 5  ;;  %v4814_v43 = vsel %vm362_vm0, %v4811_v57, %v13495_v4  ;;  %v7486_v57 = vunpack.c.l.bf16 %v7952_v58 }
 0xf2f   :  { %5745 = vmatprep.mubr.f32.mxu1 %v4792_v5  ;;  %5835 = vmatprep.mubr.f32.mxu0 %v4834_v18  ;;  %v4841_v5 = vrot.slane %v12313_v16, 1  ;;  %v7454_v18 = vunpack.c.l.bf16 %v7944_v30  ;;  %v13497_v58 = vrot.slane %v12318_v35, 7  ;;  %v4840_v12 = vrot.slane %v12315_v24, 1 }
 0xf30   :  { %8612 = vmatpush3.msra.mxu1 %v7395_v10  ;;  %8659 = vmatpush3.msra.mxu0 %v7459_v14  ;;  %v12735_v15 = vsel %vm1258_vm3, %v4769_v54, %v13494_v38  ;;  %v7422_v10 = vunpack.c.l.bf16 %v7936_v63  ;;  %v4836_v14 = vmul.f32 %v4814_v43, %v13461_v50  ;;  %v7483_v30 = vunpack.c.h.bf16 %v7951_v8  ;;  %v7934_v43 = vld [vmem:[%s13221_s14 + $0x250] sm:$0xff]  }
 0xf31   :  { %8613 = vmatprep.subr.mxu1 %v7426_v36  ;;  %8660 = vmatprep.subr.mxu0 %v7490_v34  ;;  %v4794_v54 = vmul.f32 %v12735_v15, %v13456_v31  ;;  %v7935_v34 = vld [vmem:[%s13221_s14 + $0x258] sm:$0xff]   ;;  %v13496_v36 = vrot.slane %v12318_v35, 5  ;;  %v4842_v38 = vsel %vm1397_vm5, %v4840_v12, %v4841_v5  ;;  %v7451_v4 = vunpack.c.h.bf16 %v7943_v40 }
 0xf32   :  { %8614 = vmatpush3.msra.mxu1 %v7394_v28  ;;  %8661 = vmatpush3.msra.mxu0 %v7458_v37  ;;  %v4813_v28 = vsel %vm362_vm0, %v4809_v3, %v13497_v58  ;;  %v7927_v37 = vld [vmem:[%s13221_s14 + $0x218] sm:$0xff]   ;;  %v7414_v58 = vunpack.c.l.bf16 %v7934_v43 }
 0xf33   :  { %5746 = vmatmul.mubr.f32.gmra.mxu1 %v4791_v21  ;;  %5836 = vmatmul.mubr.f32.gmra.mxu0 %v4833_v27  ;;  %v12756_v63 = vsel %vm1258_vm3, %v4767_v20, %v13496_v36  ;;  %v7419_v20 = vunpack.c.h.bf16 %v7935_v34  ;;  %v7482_v21 = vunpack.c.l.bf16 %v7951_v8  ;;  %v7926_v27 = vld [vmem:[%s13221_s14 + $0x210] sm:$0xff]   ;;  %v7949_v36 = vld [vmem:[%s13221_s14 + $0x2c8] sm:$0xff]  }
 0xf34   :  { %8615 = vmatprep.subr.mxu1 %v7423_v46  ;;  %8662 = vmatprep.subr.mxu0 %v7487_v56  ;;  %v4793_v3 = vmul.f32 %v12756_v63, %v13456_v31  ;;  %v4835_v46 = vmul.f32 %v4813_v28, %v13461_v50  ;;  %v7387_v56 = vunpack.c.h.bf16 %v7927_v37  ;;  %v7950_v31 = vld [vmem:[%s13221_s14 + $0x2d0] sm:$0xff]   ;;  %v7418_v50 = vunpack.c.l.bf16 %v7935_v34 }
 0xf35   :  { %5750 = vmatprep.mubr.f32.mxu1 %v4794_v54  ;;  %5840 = vmatprep.mubr.f32.mxu0 %v4836_v14  ;;  %v7386_v54 = vunpack.c.l.bf16 %v7927_v37  ;;  %v7450_v14 = vunpack.c.l.bf16 %v7943_v40  ;;  %v7479_v34 = vunpack.c.h.bf16 %v7950_v31  ;;  %v7383_v8 = vunpack.c.h.bf16 %v7926_v27  ;;  %v7925_v37 = vld [vmem:[%s13221_s14 + $0x208] sm:$0xff]  }
 0xf36   :  { %8616 = vmatpush3.msra.mxu1 %v7391_v25  ;;  %8663 = vmatpush3.msra.mxu0 %v7455_v32  ;;  %v7942_v25 = vld [vmem:[%s13221_s14 + $0x290] sm:$0xff]   ;;  %v13498_v32 = vld [vmem:[#allocation25_spill] sm:$0xff]  ;;  %v7478_v28 = vunpack.c.l.bf16 %v7950_v31  ;;  %v7941_v40 = vld [vmem:[%s13221_s14 + $0x288] sm:$0xff]  }
 0xf37   :  { %8617 = vmatprep.subr.mxu1 %v7422_v10  ;;  %8664 = vmatprep.subr.mxu0 %v7486_v57  ;;  %v4870_v10 = vmul.f32 %v4842_v38, %v13498_v32  ;;  %v7415_v57 = vunpack.c.h.bf16 %v7934_v43  ;;  %v7443_v38 = vunpack.c.h.bf16 %v7941_v40  ;;  %v7948_v43 = vld [vmem:[%s13221_s14 + $0x2c0] sm:$0xff]  }
 0xf38   :  { %8618 = vmatpush3.msra.mxu1 %v7390_v42  ;;  %8665 = vmatpush3.msra.mxu0 %v7454_v18  ;;  %v7447_v42 = vunpack.c.h.bf16 %v7942_v25  ;;  %v7933_v18 = vld [vmem:[%s13221_s14 + $0x248] sm:$0xff]  }
 0xf39   :  { %5751 = vmatmul.mubr.f32.gmra.mxu1 %v4793_v3  ;;  %5841 = vmatmul.mubr.f32.gmra.mxu0 %v4835_v46  ;;  %v7411_v3 = vunpack.c.h.bf16 %v7933_v18  ;;  %v7475_v46 = vunpack.c.h.bf16 %v7949_v36  ;;  %v7410_v31 = vunpack.c.l.bf16 %v7933_v18  ;;  %v4845_v18 = vrot.slane %v12339_v61, 1 }
 0xf3a   :  { %8619 = vmatprep.subr.mxu1 %v7419_v20  ;;  %8666 = vmatprep.subr.mxu0 %v7483_v30  ;;  %v7382_v20 = vunpack.c.l.bf16 %v7926_v27  ;;  %v7446_v30 = vunpack.c.l.bf16 %v7942_v25  ;;  %v7940_v27 = vld [vmem:[%s13221_s14 + $0x280] sm:$0xff]   ;;  %v4838_v25 = vrot.slane %v12322_v48, 1 }
 0xf3b   :  { %8620 = vmatpush3.msra.mxu1 %v7387_v56  ;;  %5910 = vmatprep.mubr.f32.mxu1 %v12315_v24  ;;  %v7379_v56 = vunpack.c.h.bf16 %v7925_v37  ;;  %v7967_v24 = vld [vmem:[%s13221_s14 + $0x358] sm:$0xff]  }
 0xf3c   :  { %8667 = vmatpush3.msra.mxu0 %v7451_v4  ;;  %6000 = vmatprep.mubr.f32.mxu0 %v4870_v10  ;;  %v7932_v4 = vld [vmem:[%s13221_s14 + $0x240] sm:$0xff]   ;;  %v7378_v10 = vunpack.c.l.bf16 %v7925_v37  ;;  %v7987_v37 = vld [vmem:[%s13221_s14 + $0x3f8] sm:$0xff]  }
 0xf3d   :  { %8621 = vmatprep.subr.mxu1 %v7418_v50  ;;  %8668 = vmatprep.subr.mxu0 %v7482_v21  ;;  %v7474_v50 = vunpack.c.l.bf16 %v7949_v36  ;;  %v7924_v21 = vld [vmem:[%s13221_s14 + $0x200] sm:$0xff]   ;;  %v7406_v36 = vunpack.c.l.bf16 %v7932_v4 }
 0xf3e   :  { %8622 = vmatpush3.msra.mxu1 %v7386_v54  ;;  %8669 = vmatpush3.msra.mxu0 %v7450_v14  ;;  %v7442_v54 = vunpack.c.l.bf16 %v7941_v40  ;;  %v7407_v14 = vunpack.c.h.bf16 %v7932_v4  ;;  %v7374_v40 = vunpack.c.l.bf16 %v7924_v21  ;;  %v4846_v4 = vsel %vm1397_vm5, %v4841_v5, %v4845_v18  ;;  %v7970_v5 = vld [vmem:[%s13221_s14 + $0x370] sm:$0xff]  }
 0xf3f   :  { %8623 = vmatprep.subr.mxu1 %v7415_v57  ;;  %8670 = vmatprep.subr.mxu0 %v7479_v34  ;;  %v7471_v57 = vunpack.c.h.bf16 %v7948_v43  ;;  %v4837_v34 = vrot.slane %v12311_v33, 1 }
 0xf40   :  { %8624 = vmatpush3.msra.mxu1 %v7383_v8  ;;  %8671 = vmatpush3.msra.mxu0 %v7447_v42  ;;  %v7375_v8 = vunpack.c.h.bf16 %v7924_v21  ;;  %v7439_v42 = vunpack.c.h.bf16 %v7940_v27 }
 0xf41   :  { %8625 = vmatprep.subr.mxu1 %v7414_v58  ;;  %8672 = vmatprep.subr.mxu0 %v7478_v28  ;;  %v7470_v58 = vunpack.c.l.bf16 %v7948_v43  ;;  %v7971_v28 = vld [vmem:[%s13221_s14 + $0x378] sm:$0xff]   ;;  %v4843_v43 = vrot.slane %v12390_v7, 1 }
 0xf42   :  { %8626 = vmatpush3.msra.mxu1 %v7382_v20  ;;  %8673 = vmatpush3.msra.mxu0 %v7446_v30  ;;  %v7438_v20 = vunpack.c.l.bf16 %v7940_v27  ;;  %v4839_v30 = vsel %vm1397_vm5, %v4837_v34, %v4838_v25  ;;  %v4849_v27 = vrot.slane %v12410_v60, 1 }
 0xf43   :  { %8627 = vmatprep.subr.mxu1 %v7411_v3  ;;  %8674 = vmatprep.subr.mxu0 %v7475_v46  ;;  %v7963_v3 = vld [vmem:[%s13221_s14 + $0x338] sm:$0xff]  }
 0xf44   :  { %8628 = vmatpush3.msra.mxu1 %v7379_v56  ;;  %8675 = vmatpush3.msra.mxu0 %v7443_v38  ;;  %v7979_v46 = vld [vmem:[%s13221_s14 + $0x3b8] sm:$0xff]   ;;  %v7563_v56 = vunpack.c.h.bf16 %v7971_v28  ;;  %v7627_v38 = vunpack.c.h.bf16 %v7987_v37 }
 0xf45   :  { %8629 = vmatprep.subr.mxu1 %v7410_v31  ;;  %8676 = vmatprep.subr.mxu0 %v7474_v50  ;;  %v4869_v31 = vmul.f32 %v4839_v30, %v13498_v32  ;;  %v7531_v50 = vunpack.c.h.bf16 %v7963_v3  ;;  %v7595_v21 = vunpack.c.h.bf16 %v7979_v46  ;;  %v7986_v32 = vld [vmem:[%s13221_s14 + $0x3f0] sm:$0xff]   ;;  %v4847_v30 = vrot.slane %v12446_v45, 1 }
 0xf46   :  { %8630 = vmatpush3.msra.mxu1 %v7378_v10  ;;  %8677 = vmatpush3.msra.mxu0 %v7442_v54  ;;  %v13499_v10 = vld [vmem:[#allocation34_spill] sm:$0xff] }
 0xf47   :  { %8631 = vmatprep.subr.mxu1 %v7407_v14  ;;  %8678 = vmatprep.subr.mxu0 %v7471_v57  ;;  %v4872_v54 = vmul.f32 %v4846_v4, %v13499_v10  ;;  %v7562_v14 = vunpack.c.l.bf16 %v7971_v28  ;;  %v7626_v57 = vunpack.c.l.bf16 %v7987_v37  ;;  %v7978_v28 = vld [vmem:[%s13221_s14 + $0x3b0] sm:$0xff]   ;;  %v7559_v37 = vunpack.c.h.bf16 %v7970_v5 }
 0xf48   :  { %8632 = vmatpush3.msra.mxu1 %v7375_v8  ;;  %8679 = vmatpush3.msra.mxu0 %v7439_v42  ;;  %v7530_v8 = vunpack.c.l.bf16 %v7963_v3  ;;  %v7594_v42 = vunpack.c.l.bf16 %v7979_v46  ;;  %v7591_v3 = vunpack.c.h.bf16 %v7978_v28  ;;  %v4853_v46 = vrot.slane %v12325_v6, 1 }
 0xf49   :  { %8633 = vmatprep.subr.mxu1 %v7406_v36  ;;  %8680 = vmatprep.subr.mxu0 %v7470_v58  ;;  %v4844_v36 = vsel %vm1397_vm5, %v4838_v25, %v4843_v43  ;;  %v7962_v58 = vld [vmem:[%s13221_s14 + $0x330] sm:$0xff]   ;;  %v7622_v4 = vunpack.c.l.bf16 %v7986_v32 }
 0xf4a   :  { %8634 = vmatpush3.msra.mxu1 %v7374_v40  ;;  %8681 = vmatpush3.msra.mxu0 %v7438_v20  ;;  %v7623_v40 = vunpack.c.h.bf16 %v7986_v32  ;;  %v4850_v20 = vsel %vm1397_vm5, %v4845_v18, %v4849_v27  ;;  %v7527_v25 = vunpack.c.h.bf16 %v7962_v58  ;;  %v7969_v18 = vld [vmem:[%s13221_s14 + $0x368] sm:$0xff]   ;;  %v4851_v32 = vrot.slane %v12318_v35, 1 }
 0xf4b   :  { %5911 = vmatmul.mubr.f32.vlgmr.msra.gmra.mxu1 %v12311_v33  ;;  %6001 = vmatmul.mubr.f32.vlgmr.msra.gmra.mxu0 %v4869_v31  ;;  %v7985_v31 = vld [vmem:[%s13221_s14 + $0x3e8] sm:$0xff]  }
 0xf4c   :  { %8697 = vmatprep.subr.mxu1 %v7563_v56  ;;  %8744 = vmatprep.subr.mxu0 %v7627_v38  ;;  %v4874_v56 = vmul.f32 %v4850_v20, %v13452_v1  ;;  %v7558_v38 = vunpack.c.l.bf16 %v7970_v5  ;;  %v4854_v5 = vsel %vm1397_vm5, %v4849_v27, %v4853_v46  ;;  %v7968_v27 = vld [vmem:[%s13221_s14 + $0x360] sm:$0xff]  }
 0xf4d   :  { %5915 = vmatprep.mubr.f32.mxu1 %v12313_v16  ;;  %6005 = vmatprep.mubr.f32.mxu0 %v4872_v54  ;;  %v4871_v16 = vmul.f32 %v4844_v36, %v13499_v10  ;;  %v4848_v10 = vsel %vm1397_vm5, %v4843_v43, %v4847_v30  ;;  %v7977_v54 = vld [vmem:[%s13221_s14 + $0x3a8] sm:$0xff]   ;;  %v7554_v36 = vunpack.c.l.bf16 %v7969_v18  ;;  %v7976_v20 = vld [vmem:[%s13221_s14 + $0x3a0] sm:$0xff]  }
 0xf4e   :  { %8698 = vmatpush3.msra.mxu1 %v7531_v50  ;;  %8745 = vmatpush3.msra.mxu0 %v7595_v21  ;;  %v7526_v50 = vunpack.c.l.bf16 %v7962_v58  ;;  %v7590_v21 = vunpack.c.l.bf16 %v7978_v28  ;;  %v7618_v58 = vunpack.c.l.bf16 %v7985_v31  ;;  %v7984_v28 = vld [vmem:[%s13221_s14 + $0x3e0] sm:$0xff]  }
 0xf4f   :  { %8699 = vmatprep.subr.mxu1 %v7562_v14  ;;  %8746 = vmatprep.subr.mxu0 %v7626_v57  ;;  %v7555_v14 = vunpack.c.h.bf16 %v7969_v18  ;;  %v7619_v57 = vunpack.c.h.bf16 %v7985_v31  ;;  %v7614_v18 = vunpack.c.l.bf16 %v7984_v28  ;;  %v7959_v31 = vld [vmem:[%s13221_s14 + $0x318] sm:$0xff]  }
 0xf50   :  { %8700 = vmatpush3.msra.mxu1 %v7530_v8  ;;  %8747 = vmatpush3.msra.mxu0 %v7594_v42  ;;  %v7587_v8 = vunpack.c.h.bf16 %v7977_v54  ;;  %v4876_v42 = vmul.f32 %v4854_v5, %v13453_v55  ;;  %v7546_v5 = vunpack.c.l.bf16 %v7967_v24 }
 0xf51   :  { %5916 = vmatmul.mubr.f32.gmra.mxu1 %v12322_v48  ;;  %6006 = vmatmul.mubr.f32.gmra.mxu0 %v4871_v16  ;;  %v7961_v48 = vld [vmem:[%s13221_s14 + $0x328] sm:$0xff]   ;;  %v7551_v16 = vunpack.c.h.bf16 %v7968_v27 }
 0xf52   :  { %8701 = vmatprep.subr.mxu1 %v7559_v37  ;;  %8748 = vmatprep.subr.mxu0 %v7623_v40  ;;  %v7523_v43 = vunpack.c.h.bf16 %v7961_v48  ;;  %v7586_v37 = vunpack.c.l.bf16 %v7977_v54  ;;  %v4852_v40 = vsel %vm1397_vm5, %v4847_v30, %v4851_v32  ;;  %v7982_v54 = vld [vmem:[%s13221_s14 + $0x3d0] sm:$0xff]  }
 0xf53   :  { %5920 = vmatprep.mubr.f32.mxu1 %v12339_v61  ;;  %6010 = vmatprep.mubr.f32.mxu0 %v4874_v56  ;;  %v4873_v61 = vmul.f32 %v4848_v10, %v13452_v1  ;;  %v7522_v1 = vunpack.c.l.bf16 %v7961_v48  ;;  %v7583_v56 = vunpack.c.h.bf16 %v7976_v20 }
 0xf54   :  { %8702 = vmatpush3.msra.mxu1 %v7527_v25  ;;  %8749 = vmatpush3.msra.mxu0 %v7591_v3  ;;  %v7615_v25 = vunpack.c.h.bf16 %v7984_v28  ;;  %v4868_v3 = vsel %vm1397_vm5, %v4853_v46, %v4840_v12  ;;  %v7983_v12 = vld [vmem:[%s13221_s14 + $0x3d8] sm:$0xff]   ;;  %v7582_v46 = vunpack.c.l.bf16 %v7976_v20  ;;  %v7965_v28 = vld [vmem:[%s13221_s14 + $0x348] sm:$0xff]  }
 0xf55   :  { %8703 = vmatprep.subr.mxu1 %v7558_v38  ;;  %8750 = vmatprep.subr.mxu0 %v7622_v4  ;;  %v4878_v38 = vmul.f32 %v4868_v3, %v13464_v22  ;;  %v7550_v4 = vunpack.c.l.bf16 %v7968_v27  ;;  %v7611_v10 = vunpack.c.h.bf16 %v7983_v12 }
 0xf56   :  { %8704 = vmatpush3.msra.mxu1 %v7526_v50  ;;  %8751 = vmatpush3.msra.mxu0 %v7590_v21  ;;  %v7975_v50 = vld [vmem:[%s13221_s14 + $0x398] sm:$0xff]   ;;  %v7547_v21 = vunpack.c.h.bf16 %v7967_v24  ;;  %v7956_v24 = vld [vmem:[%s13221_s14 + $0x300] sm:$0xff]  }
 0xf57   :  { %5921 = vmatmul.mubr.f32.gmra.mxu1 %v12390_v7  ;;  %6011 = vmatmul.mubr.f32.gmra.mxu0 %v4873_v61  ;;  %v7960_v7 = vld [vmem:[%s13221_s14 + $0x320] sm:$0xff]   ;;  %v7579_v48 = vunpack.c.h.bf16 %v7975_v50  ;;  %v7974_v61 = vld [vmem:[%s13221_s14 + $0x390] sm:$0xff]  }
 0xf58   :  { %8705 = vmatprep.subr.mxu1 %v7555_v14  ;;  %8752 = vmatprep.subr.mxu0 %v7619_v57  ;;  %v7519_v30 = vunpack.c.h.bf16 %v7960_v7  ;;  %v13500_v14 = vld [vmem:[#allocation29_spill] sm:$0xff]  ;;  %v7575_v27 = vunpack.c.h.bf16 %v7974_v61 }
 0xf59   :  { %5925 = vmatprep.mubr.f32.mxu1 %v12410_v60  ;;  %6015 = vmatprep.mubr.f32.mxu0 %v4876_v42  ;;  %v4875_v60 = vmul.f32 %v4852_v40, %v13453_v55  ;;  %v7518_v55 = vunpack.c.l.bf16 %v7960_v7  ;;  %v4880_v57 = vmul.f32 %v12368_v19, %v13500_v14  ;;  %v7578_v42 = vunpack.c.l.bf16 %v7975_v50  ;;  %v7957_v40 = vld [vmem:[%s13221_s14 + $0x308] sm:$0xff]  }
 0xf5a   :  { %8706 = vmatpush3.msra.mxu1 %v7523_v43  ;;  %8753 = vmatpush3.msra.mxu0 %v7587_v8  ;;  %v13501_v43 = vld [vmem:[#allocation33_spill] sm:$0xff]  ;;  %v7973_v7 = vld [vmem:[%s13221_s14 + $0x388] sm:$0xff]   ;;  %v7503_v50 = vunpack.c.h.bf16 %v7956_v24 }
 0xf5b   :  { %8707 = vmatprep.subr.mxu1 %v7554_v36  ;;  %8754 = vmatprep.subr.mxu0 %v7618_v58  ;;  %v4890_v8 = vmul.f32 %v12371_v53, %v13501_v43  ;;  %v7607_v36 = vunpack.c.h.bf16 %v7982_v54 }
 0xf5c   :  { %8708 = vmatpush3.msra.mxu1 %v7522_v1  ;;  %8755 = vmatpush3.msra.mxu0 %v7586_v37  ;;  %v7981_v1 = vld [vmem:[%s13221_s14 + $0x3c8] sm:$0xff]   ;;  %v7606_v37 = vunpack.c.l.bf16 %v7982_v54  ;;  %v7995_v54 = vld [vmem:[%s13221_s14 + $0x438] sm:$0xff]  }
 0xf5d   :  { %5926 = vmatmul.mubr.f32.gmra.mxu1 %v12446_v45  ;;  %6016 = vmatmul.mubr.f32.gmra.mxu0 %v4875_v60  ;;  %v4867_v45 = vsel %vm1397_vm5, %v4851_v32, %v4837_v34  ;;  %v7515_v34 = vunpack.c.h.bf16 %v7959_v31  ;;  %v7958_v32 = vld [vmem:[%s13221_s14 + $0x310] sm:$0xff]   ;;  %v7603_v3 = vunpack.c.h.bf16 %v7981_v1  ;;  %v7507_v60 = vunpack.c.h.bf16 %v7957_v40 }
 0xf5e   :  { %8709 = vmatprep.subr.mxu1 %v7551_v16  ;;  %8756 = vmatprep.subr.mxu0 %v7615_v25  ;;  %v4877_v33 = vmul.f32 %v4867_v45, %v13464_v22  ;;  %v7610_v22 = vunpack.c.l.bf16 %v7983_v12  ;;  %v7511_v58 = vunpack.c.h.bf16 %v7958_v32  ;;  %v7510_v20 = vunpack.c.l.bf16 %v7958_v32  ;;  %v7972_v12 = vld [vmem:[%s13221_s14 + $0x380] sm:$0xff]  }
 0xf5f   :  { %5930 = vmatprep.mubr.f32.mxu1 %v12325_v6  ;;  %6020 = vmatprep.mubr.f32.mxu0 %v4878_v38  ;;  %v7966_v6 = vld [vmem:[%s13221_s14 + $0x350] sm:$0xff]   ;;  %v7574_v16 = vunpack.c.l.bf16 %v7974_v61  ;;  %v7539_v25 = vunpack.c.h.bf16 %v7965_v28  ;;  %v7980_v38 = vld [vmem:[%s13221_s14 + $0x3c0] sm:$0xff]   ;;  %v7659_v32 = vunpack.c.h.bf16 %v7995_v54 }
 0xf60   :  { %8710 = vmatpush3.msra.mxu1 %v7519_v30  ;;  %8757 = vmatpush3.msra.mxu0 %v7583_v56  ;;  %v7543_v19 = vunpack.c.h.bf16 %v7966_v6  ;;  %v7542_v53 = vunpack.c.l.bf16 %v7966_v6  ;;  %v7571_v30 = vunpack.c.h.bf16 %v7973_v7  ;;  %v7964_v56 = vld [vmem:[%s13221_s14 + $0x340] sm:$0xff]   ;;  %v7566_v6 = vunpack.c.l.bf16 %v7972_v12  ;;  %v8002_v61 = vld [vmem:[%s13221_s14 + $0x470] sm:$0xff]  }
 0xf61   :  { %8711 = vmatprep.subr.mxu1 %v7550_v4  ;;  %8758 = vmatprep.subr.mxu0 %v7614_v18  ;;  %v7538_v4 = vunpack.c.l.bf16 %v7965_v28  ;;  %v7602_v18 = vunpack.c.l.bf16 %v7981_v1  ;;  %v7535_v45 = vunpack.c.h.bf16 %v7964_v56  ;;  %v4894_v1 = vmul.f32 %v12477_v44, %v13450_v9  ;;  %v8000_v44 = vld [vmem:[%s13221_s14 + $0x460] sm:$0xff]  }
 0xf62   :  { %8712 = vmatpush3.msra.mxu1 %v7518_v55  ;;  %8759 = vmatpush3.msra.mxu0 %v7582_v46  ;;  %v7506_v55 = vunpack.c.l.bf16 %v7957_v40  ;;  %v7570_v46 = vunpack.c.l.bf16 %v7973_v7 }
 0xf63   :  { %5931 = vmatmul.mubr.f32.gmra.mxu1 %v12318_v35  ;;  %6021 = vmatmul.mubr.f32.gmra.mxu0 %v4877_v33  ;;  %v7514_v35 = vunpack.c.l.bf16 %v7959_v31  ;;  %v7599_v31 = vunpack.c.h.bf16 %v7980_v38  ;;  %v7598_v33 = vunpack.c.l.bf16 %v7980_v38 }
 0xf64   :  { %8713 = vmatprep.subr.mxu1 %v7547_v21  ;;  %8760 = vmatprep.subr.mxu0 %v7611_v10  ;;  %v7567_v21 = vunpack.c.h.bf16 %v7972_v12  ;;  %v7534_v10 = vunpack.c.l.bf16 %v7964_v56  ;;  %v13510_v12 = vld [vmem:[#allocation21_spill] sm:$0xff] }
 0xf65   :  { %8714 = vmatpush3.msra.mxu1 %v7515_v34  ;;  %6090 = vmatprep.mubr.f32.mxu1 %v4880_v57  ;;  %v8003_v34 = vld [vmem:[%s13221_s14 + $0x478] sm:$0xff]  }
 0xf66   :  { %8761 = vmatpush3.msra.mxu0 %v7579_v48  ;;  %6180 = vmatprep.mubr.f32.mxu0 %v4890_v8  ;;  %v7502_v48 = vunpack.c.l.bf16 %v7956_v24  ;;  %v7691_v57 = vunpack.c.h.bf16 %v8003_v34  ;;  %v13502_v8 = vld [vmem:[#allocation36_spill] sm:$0xff]  ;;  %v7678_v24 = vunpack.c.l.bf16 %v8000_v44 }
 0xf67   :  { %8715 = vmatprep.subr.mxu1 %v7546_v5  ;;  %8762 = vmatprep.subr.mxu0 %v7610_v22  ;;  %v4879_v5 = vmul.f32 %v12416_v17, %v13500_v14  ;;  %v4889_v22 = vmul.f32 %v12421_v23, %v13501_v43  ;;  %v7658_v14 = vunpack.c.l.bf16 %v7995_v54  ;;  %v7994_v23 = vld [vmem:[%s13221_s14 + $0x430] sm:$0xff]   ;;  %v7687_v43 = vunpack.c.h.bf16 %v8002_v61  ;;  %v13513_v54 = vld [vmem:[#allocation27_spill] sm:$0xff] }
 0xf68   :  { %8716 = vmatpush3.msra.mxu1 %v7514_v35  ;;  %8763 = vmatpush3.msra.mxu0 %v7578_v42  ;;  %v4882_v35 = vmul.f32 %v12426_v26, %v13502_v8  ;;  %v7690_v42 = vunpack.c.l.bf16 %v8003_v34  ;;  %v4881_v26 = vmul.f32 %v12466_v49, %v13502_v8  ;;  %v7654_v49 = vunpack.c.l.bf16 %v7994_v23  ;;  %v7997_v8 = vld [vmem:[%s13221_s14 + $0x448] sm:$0xff]  }
 0xf69   :  { %8717 = vmatprep.subr.mxu1 %v7543_v19  ;;  %8764 = vmatprep.subr.mxu0 %v7607_v36  ;;  %v13503_v19 = vld [vmem:[#allocation4_spill] sm:$0xff] }
 0xf6a   :  { %8718 = vmatpush3.msra.mxu1 %v7511_v58  ;;  %8765 = vmatpush3.msra.mxu0 %v7575_v27  ;;  %v4892_v17 = vmul.f32 %v12429_v2, %v13503_v19  ;;  %v4891_v36 = vmul.f32 %v12471_v13, %v13503_v19  ;;  %v7655_v58 = vunpack.c.h.bf16 %v7994_v23  ;;  %v8001_v2 = vld [vmem:[%s13221_s14 + $0x468] sm:$0xff]   ;;  %v7996_v23 = vld [vmem:[%s13221_s14 + $0x440] sm:$0xff]  }
 0xf6b   :  { %8719 = vmatprep.subr.mxu1 %v7542_v53  ;;  %8766 = vmatprep.subr.mxu0 %v7606_v37  ;;  %v13504_v27 = vld [vmem:[#allocation11_spill] sm:$0xff]  ;;  %v7686_v53 = vunpack.c.l.bf16 %v8002_v61  ;;  %v4893_v37 = vmul.f32 %v12505_v51, %v13450_v9  ;;  %v7683_v40 = vunpack.c.h.bf16 %v8001_v2  ;;  %v7992_v9 = vld [vmem:[%s13221_s14 + $0x420] sm:$0xff]   ;;  %v13505_v51 = vld [vmem:[#allocation13_spill] sm:$0xff] }
 0xf6c   :  { %8720 = vmatpush3.msra.mxu1 %v7510_v20  ;;  %8767 = vmatpush3.msra.mxu0 %v7574_v16  ;;  %v4884_v28 = vmul.f32 %v12474_v52, %v13504_v27  ;;  %v7993_v13 = vld [vmem:[%s13221_s14 + $0x428] sm:$0xff]   ;;  %v4896_v52 = vmul.f32 %v12515_v0, %v13451_v41  ;;  %v4883_v20 = vmul.f32 %v12502_v39, %v13504_v27  ;;  %v7682_v16 = vunpack.c.l.bf16 %v8001_v2 }
 0xf6d   :  { %8721 = vmatprep.subr.mxu1 %v7539_v25  ;;  %8768 = vmatprep.subr.mxu0 %v7603_v3  ;;  %v7651_v7 = vunpack.c.h.bf16 %v7993_v13  ;;  %v4886_v25 = vmul.f32 %v12510_v11, %v13505_v51  ;;  %v7650_v0 = vunpack.c.l.bf16 %v7993_v13  ;;  %v4895_v3 = vmul.f32 %v12547_v59, %v13451_v41  ;;  %v13506_v39 = vld [vmem:[#allocation3_spill] sm:$0xff]  ;;  %v7991_v41 = vld [vmem:[%s13221_s14 + $0x418] sm:$0xff]   ;;  %v13516_v13 = vld [vmem:[#allocation20_spill] sm:$0xff] }
 0xf6e   :  { %8722 = vmatpush3.msra.mxu1 %v7507_v60  ;;  %8769 = vmatpush3.msra.mxu0 %v7571_v30  ;;  %v7679_v60 = vunpack.c.h.bf16 %v8000_v44  ;;  %v13507_v30 = vld [vmem:[#allocation19_spill] sm:$0xff]  ;;  %v7647_v38 = vunpack.c.h.bf16 %v7992_v9  ;;  %v13509_v59 = vld [vmem:[#allocation5_spill] sm:$0xff]  ;;  %v7662_v27 = vunpack.c.l.bf16 %v7996_v23 }
 0xf6f   :  { %8723 = vmatprep.subr.mxu1 %v7538_v4  ;;  %8770 = vmatprep.subr.mxu0 %v7602_v18  ;;  %v4898_v56 = vmul.f32 %v13507_v30, %v13506_v39  ;;  %v7999_v4 = vld [vmem:[%s13221_s14 + $0x458] sm:$0xff]   ;;  %v13508_v11 = vld [vmem:[#allocation23_spill] sm:$0xff] }
 0xf70   :  { %8724 = vmatpush3.msra.mxu1 %v7506_v55  ;;  %8771 = vmatpush3.msra.mxu0 %v7570_v46  ;;  %v4885_v18 = vmul.f32 %v13508_v11, %v13505_v51  ;;  %v4888_v55 = vmul.f32 %v13510_v12, %v13509_v59  ;;  %v7646_v46 = vunpack.c.l.bf16 %v7992_v9  ;;  %v13520_v51 = vld [vmem:[#allocation15_spill] sm:$0xff] }
 0xf71   :  { %8725 = vmatprep.subr.mxu1 %v7535_v45  ;;  %8772 = vmatprep.subr.mxu0 %v7599_v31  ;;  %v13511_v45 = vld [vmem:[#allocation18_spill] sm:$0xff] }
 0xf72   :  { %8726 = vmatpush3.msra.mxu1 %v7503_v50  ;;  %8773 = vmatpush3.msra.mxu0 %v7567_v21  ;;  %v4897_v31 = vmul.f32 %v13511_v45, %v13506_v39  ;;  %v7675_v50 = vunpack.c.h.bf16 %v7999_v4  ;;  %v7643_v21 = vunpack.c.h.bf16 %v7991_v41 }
 0xf73   :  { %8727 = vmatprep.subr.mxu1 %v7534_v10  ;;  %8774 = vmatprep.subr.mxu0 %v7598_v33  ;;  %v7998_v10 = vld [vmem:[%s13221_s14 + $0x450] sm:$0xff]  }
 0xf74   :  { %8728 = vmatpush3.msra.mxu1 %v7502_v48  ;;  %8775 = vmatpush3.msra.mxu0 %v7566_v6  ;;  %v13512_v33 = vld [vmem:[#allocation16_spill] sm:$0xff]  ;;  %v7674_v48 = vunpack.c.l.bf16 %v7999_v4 }
 0xf75   :  { %6091 = vmatmul.mubr.f32.vlgmr.msra.gmra.mxu1 %v4879_v5  ;;  %6181 = vmatmul.mubr.f32.vlgmr.msra.gmra.mxu0 %v4889_v22  ;;  %v4887_v34 = vmul.f32 %v13512_v33, %v13509_v59  ;;  %v7990_v6 = vld [vmem:[%s13221_s14 + $0x410] sm:$0xff]   ;;  %v7642_v22 = vunpack.c.l.bf16 %v7991_v41 }
 0xf76   :  { %8791 = vmatprep.subr.mxu1 %v7691_v57  ;;  %6095 = vmatprep.mubr.f32.mxu1 %v4882_v35  ;;  %v13514_v57 = vld [vmem:[#allocation2_spill] sm:$0xff]  ;;  %v7639_v61 = vunpack.c.h.bf16 %v7990_v6  ;;  %v7670_v35 = vunpack.c.l.bf16 %v7998_v10  ;;  %v7638_v19 = vunpack.c.l.bf16 %v7990_v6 }
 0xf77   :  { %6185 = vmatprep.mubr.f32.mxu0 %v4892_v17  ;;  %8792 = vmatpush3.msra.mxu1 %v7659_v32  ;;  %v4900_v5 = vmul.f32 %v13514_v57, %v13513_v54  ;;  %v7671_v32 = vunpack.c.h.bf16 %v7998_v10  ;;  %v7667_v17 = vunpack.c.h.bf16 %v7997_v8 }
 0xf78   :  { %8793 = vmatprep.subr.mxu1 %v7690_v42  ;;  %v7989_v42 = vld [vmem:[%s13221_s14 + $0x408] sm:$0xff]  }
 0xf79   :  { %8794 = vmatpush3.msra.mxu1 %v7658_v14  ;;  %6186 = vmatmul.mubr.f32.gmra.mxu0 %v4891_v36  ;;  %v7635_v14 = vunpack.c.h.bf16 %v7989_v42  ;;  %v7988_v36 = vld [vmem:[%s13221_s14 + $0x400] sm:$0xff]  }
 0xf7a   :  { %6096 = vmatmul.mubr.f32.gmra.mxu1 %v4881_v26  ;;  %8795 = vmatprep.subr.mxu1 %v7687_v43  ;;  %v7666_v43 = vunpack.c.l.bf16 %v7997_v8  ;;  %v7634_v26 = vunpack.c.l.bf16 %v7989_v42  ;;  %v7631_v2 = vunpack.c.h.bf16 %v7988_v36 }
 0xf7b   :  { %6100 = vmatprep.mubr.f32.mxu1 %v4884_v28  ;;  %6190 = vmatprep.mubr.f32.mxu0 %v4894_v1  ;;  %v7630_v28 = vunpack.c.l.bf16 %v7988_v36  ;;  %v13515_v1 = vld [vmem:[#allocation6_spill] sm:$0xff] }
 0xf7c   :  { %8796 = vmatpush3.msra.mxu1 %v7655_v58  ;;  %v7663_v58 = vunpack.c.h.bf16 %v7996_v23 }
 0xf7d   :  { %8797 = vmatprep.subr.mxu1 %v7686_v53  ;;  %6191 = vmatmul.mubr.f32.gmra.mxu0 %v4893_v37  ;;  %v4899_v53 = vmul.f32 %v13515_v1, %v13513_v54 }
 0xf7e   :  { %8798 = vmatpush3.msra.mxu1 %v7654_v49  ;;  %6195 = vmatprep.mubr.f32.mxu0 %v4896_v52  ;;  %v13517_v49 = vld [vmem:[#allocation14_spill] sm:$0xff] }
 0xf7f   :  { %6101 = vmatmul.mubr.f32.gmra.mxu1 %v4883_v20  ;;  %8799 = vmatprep.subr.mxu1 %v7683_v40  ;;  %v4902_v37 = vmul.f32 %v13517_v49, %v13516_v13  ;;  %v4901_v40 = vmul.f32 %v12695_v62, %v13516_v13  ;;  %v13518_v52 = vld [vmem:[#allocation22_spill] sm:$0xff]  ;;  %v13519_v20 = vld [vmem:[#allocation24_spill] sm:$0xff] }
 0xf80   :  { %6105 = vmatprep.mubr.f32.mxu1 %v4886_v25  ;;  %8800 = vmatpush3.msra.mxu1 %v7651_v7  ;;  %v4904_v7 = vmul.f32 %v12705_v29, %v13518_v52  ;;  %v4903_v44 = vmul.f32 %v12723_v47, %v13518_v52  ;;  %v4905_v9 = vmul.f32 %v12756_v63, %v13519_v20  ;;  %v13521_v25 = vld [vmem:[#allocation9_spill] sm:$0xff]  ;;  %v13522_v62 = vld [vmem:[#allocation8_spill] sm:$0xff] }
 0xf81   :  { %8801 = vmatprep.subr.mxu1 %v7682_v16  ;;  %6196 = vmatmul.mubr.f32.gmra.mxu0 %v4895_v3  ;;  %v4906_v16 = vmul.f32 %v12735_v15, %v13519_v20  ;;  %v4907_v29 = vmul.f32 %v13522_v62, %v13520_v51 }
 0xf82   :  { %8802 = vmatpush3.msra.mxu1 %v7650_v0  ;;  %6200 = vmatprep.mubr.f32.mxu0 %v4898_v56  ;;  %v4908_v0 = vmul.f32 %v13521_v25, %v13520_v51 }
 0xf83   :  { %6106 = vmatmul.mubr.f32.gmra.mxu1 %v4885_v18  ;;  %8803 = vmatprep.subr.mxu1 %v7679_v60 }
 0xf84   :  { %6110 = vmatprep.mubr.f32.mxu1 %v4888_v55  ;;  %8804 = vmatpush3.msra.mxu1 %v7647_v38 }
 0xf85   :  { %8805 = vmatprep.subr.mxu1 %v7678_v24  ;;  %6201 = vmatmul.mubr.f32.gmra.mxu0 %v4897_v31 }
 0xf86   :  { %8806 = vmatpush3.msra.mxu1 %v7646_v46 }
 0xf87   :  { %6111 = vmatmul.mubr.f32.gmra.mxu1 %v4887_v34  ;;  %8807 = vmatprep.subr.mxu1 %v7675_v50 }
 0xf88   :  { %8808 = vmatpush3.msra.mxu1 %v7643_v21  ;;  %6270 = vmatprep.mubr.f32.mxu1 %v4900_v5 }
 0xf89   :  { %8809 = vmatprep.subr.mxu1 %v7674_v48 }
 0xf8a   :  { %8810 = vmatpush3.msra.mxu1 %v7642_v22 }
 0xf8b   :  { %8811 = vmatprep.subr.mxu1 %v7671_v32 }
 0xf8c   :  { %8812 = vmatpush3.msra.mxu1 %v7639_v61 }
 0xf8d   :  { %8813 = vmatprep.subr.mxu1 %v7670_v35 }
 0xf8e   :  { %8814 = vmatpush3.msra.mxu1 %v7638_v19 }
 0xf8f   :  { %8815 = vmatprep.subr.mxu1 %v7667_v17 }
 0xf90   :  { %8816 = vmatpush3.msra.mxu1 %v7635_v14 }
 0xf91   :  { %8817 = vmatprep.subr.mxu1 %v7666_v43 }
 0xf92   :  { %8818 = vmatpush3.msra.mxu1 %v7634_v26 }
 0xf93   :  { %8819 = vmatprep.subr.mxu1 %v7663_v58 }
 0xf94   :  { %8820 = vmatpush3.msra.mxu1 %v7631_v2 }
 0xf95   :  { %8821 = vmatprep.subr.mxu1 %v7662_v27 }
 0xf96   :  { %8822 = vmatpush3.msra.mxu1 %v7630_v28 }
 0xf97   :  { %6271 = vmatmul.mubr.f32.vlgmr.msra.gmra.mxu1 %v4899_v53 }
 0xf98   :  { %6275 = vmatprep.mubr.f32.mxu1 %v4902_v37 }
 0xf9b   :  { %6276 = vmatmul.mubr.f32.gmra.mxu1 %v4901_v40 }
 0xf9c   :  { %6280 = vmatprep.mubr.f32.mxu1 %v4904_v7 }
 0xf9f   :  { %6281 = vmatmul.mubr.f32.gmra.mxu1 %v4903_v44 }
 0xfa0   :  { %6285 = vmatprep.mubr.f32.mxu1 %v4906_v16 }
 0xfa3   :  { %6286 = vmatmul.mubr.f32.gmra.mxu1 %v4905_v9 }
 0xfa4   :  { %6290 = vmatprep.mubr.f32.mxu1 %v4908_v0 }
 0xfa7   :  { %6291 = vmatmul.mubr.f32.gmra.mxu1 %v4907_v29 }
 0xfb8   :  { %v8447_v3 = vpop.f32.mrf.mxu1  ;;  %v13069_v24 = vpop.f32.mrf.mxu0 }
 0xfba   :  { %v8448_v60 = vpop.f32.mrf.mxu1  ;;  %v8495_v12 = vpop.f32.mrf.mxu0 }
 0xfbb   :  { %v13061_v47 = vadd.f32 %v8448_v60, %v8447_v3 }
 0xfbe   :  { %v8450_v39 = vpop.f32.mrf.mxu1  ;;  %v13073_v46 = vpop.f32.mrf.mxu0 }
 0xfc0   :  { %v8451_v15 = vpop.f32.mrf.mxu1  ;;  %v13075_v45 = vpop.f32.mrf.mxu0 }
 0xfc1   :  { %v13063_v30 = vadd.f32 %v8451_v15, %v8450_v39 }
 0xfc4   :  { %v8453_v56 = vpop.f32.mrf.mxu1  ;;  %v13077_v31 = vpop.f32.mrf.mxu0 }
 0xfc6   :  { %v8454_v38 = vpop.f32.mrf.mxu1  ;;  %v13079_v50 = vpop.f32.mrf.mxu0 }
 0xfc7   :  { %v13065_v63 = vadd.f32 %v8454_v38, %v8453_v56  ;;  %v5485_v38 = vld [vmem:[%s13209_s1 + $0x26] ss:$0 sm:$0xff] }
 0xfca   :  { %v8456_v4 = vpop.f32.mrf.mxu1  ;;  %v13081_v21 = vpop.f32.mrf.mxu0 }
 0xfcc   :  { %v8457_v11 = vpop.f32.mrf.mxu1  ;;  %v13083_v33 = vpop.f32.mrf.mxu0 }
 0xfcd   :  { %v13067_v18 = vadd.f32 %v8457_v11, %v8456_v4 }
 0xfd0   :  { %v8459_v41 = vpop.f32.mrf.mxu1  ;;  %v13085_v48 = vpop.f32.mrf.mxu0 }
 0xfd2   :  { %v8460_v59 = vpop.f32.mrf.mxu1  ;;  %v13087_v54 = vpop.f32.mrf.mxu0 }
 0xfd3   :  { %v13071_v55 = vadd.f32 %v8460_v59, %v8459_v41  ;;  %v5553_v41 = vadd.f32 %v13061_v47, %v5485_v38 }
 0xfe1   :  { %v8541_v10 = vpop.f32.mrf.mxu1  ;;  %v8588_v57 = vpop.f32.mrf.mxu0 }
 0xfe3   :  { %v8542_v34 = vpop.f32.mrf.mxu1  ;;  %v8589_v22 = vpop.f32.mrf.mxu0 }
 0xfe7   :  { %v8544_v6 = vpop.f32.mrf.mxu1  ;;  %v13089_v61 = vpop.f32.mrf.mxu0 }
 0xfe9   :  { %v8545_v5 = vpop.f32.mrf.mxu1  ;;  %v8592_v35 = vpop.f32.mrf.mxu0 }
 0xfed   :  { %v8547_v32 = vpop.f32.mrf.mxu1  ;;  %v13093_v19 = vpop.f32.mrf.mxu0 }
 0xfef   :  { %v8548_v8 = vpop.f32.mrf.mxu1  ;;  %v13097_v14 = vpop.f32.mrf.mxu0 }
 0xff3   :  { %v13091_v42 = vpop.f32.mrf.mxu1  ;;  %v13101_v43 = vpop.f32.mrf.mxu0 }
 0xff5   :  { %v13095_v17 = vpop.f32.mrf.mxu1  ;;  %v13105_v58 = vpop.f32.mrf.mxu0 }
 0xff9   :  { %v13099_v23 = vpop.f32.mrf.mxu1  ;;  %v13107_v27 = vpop.f32.mrf.mxu0 }
 0xffa   :  { %13523 = vst [vmem:[#allocation12_spill] sm:$0xff] %v13107_v27  ;;  %v8499_v27 = vadd.f32 %v13075_v45, %v13073_v46  ;;  %v8593_v46 = vadd.f32 %v8592_v35, %v13089_v61  ;;  %v8596_v61 = vadd.f32 %v13097_v14, %v13093_v19  ;;  %v8599_v19 = vadd.f32 %v13105_v58, %v13101_v43 }
 0xffb   :  { %v13103_v36 = vpop.f32.mrf.mxu1  ;;  %v13109_v1 = vpop.f32.mrf.mxu0 }
 0xffc   :  { %13524 = vst [vmem:[#allocation17_spill] sm:$0xff] %v13109_v1 }
0x1001   :  { %v13542_v43 = vld [vmem:[#allocation12_spill] sm:$0xff] }
0x1003   :  { %v13543_v58 = vld [vmem:[#allocation17_spill] sm:$0xff] }
0x100b   :  { %v8635_v26 = vpop.f32.mrf.mxu1  ;;  %v8682_v53 = vpop.f32.mrf.mxu0 }
0x100d   :  { %v8636_v2 = vpop.f32.mrf.mxu1  ;;  %v8683_v49 = vpop.f32.mrf.mxu0 }
0x1011   :  { %v8638_v28 = vpop.f32.mrf.mxu1  ;;  %v13111_v40 = vpop.f32.mrf.mxu0 }
0x1013   :  { %v8639_v13 = vpop.f32.mrf.mxu1  ;;  %v13113_v7 = vpop.f32.mrf.mxu0 }
0x1017   :  { %v8641_v37 = vpop.f32.mrf.mxu1  ;;  %v13117_v20 = vpop.f32.mrf.mxu0 }
0x1018   :  { %13526 = vst [vmem:[#allocation28_spill] sm:$0xff] %v13117_v20  ;;  %v8546_v20 = vadd.f32 %v8545_v5, %v8544_v6  ;;  %v8640_v6 = vadd.f32 %v8639_v13, %v8638_v28  ;;  %v8552_v5 = vadd.f32 %v13095_v17, %v13091_v42  ;;  %v8555_v17 = vadd.f32 %v13103_v36, %v13099_v23 }
0x1019   :  { %v8642_v52 = vpop.f32.mrf.mxu1  ;;  %v13121_v9 = vpop.f32.mrf.mxu0  ;;  %v8687_v13 = vadd.f32 %v13113_v7, %v13111_v40 }
0x101a   :  { %13528 = vst [vmem:[#allocation26_spill] sm:$0xff] %v13121_v9  ;;  %v8643_v35 = vadd.f32 %v8642_v52, %v8641_v37 }
0x101d   :  { %v13115_v44 = vpop.f32.mrf.mxu1  ;;  %v13125_v25 = vpop.f32.mrf.mxu0 }
0x101e   :  { %13525 = vst [vmem:[#allocation10_spill] sm:$0xff] %v13115_v44  ;;  %13530 = vst [vmem:[#allocation31_spill] sm:$0xff] %v13125_v25  ;;  %v8637_v44 = vadd.f32 %v8636_v2, %v8635_v26 }
0x101f   :  { %v13119_v16 = vpop.f32.mrf.mxu1  ;;  %v13129_v29 = vpop.f32.mrf.mxu0  ;;  %v13539_v36 = vld [vmem:[#allocation28_spill] sm:$0xff] }
0x1020   :  { %13527 = vst [vmem:[#allocation7_spill] sm:$0xff] %v13119_v16  ;;  %13532 = vst [vmem:[#allocation35_spill] sm:$0xff] %v13129_v29  ;;  %v8496_v29 = vadd.f32 %v8495_v12, %v13069_v24  ;;  %v8590_v16 = vadd.f32 %v8589_v22, %v8588_v57  ;;  %v8502_v24 = vadd.f32 %v13079_v50, %v13077_v31 }
0x1021   :  { %v8549_v12 = vadd.f32 %v8548_v8, %v8547_v32  ;;  %v8684_v32 = vadd.f32 %v8683_v49, %v8682_v53 }
0x1023   :  { %v13123_v51 = vpop.f32.mrf.mxu1  ;;  %v13131_v39 = vpop.f32.mrf.mxu0 }
0x1024   :  { %13529 = vst [vmem:[#allocation30_spill] sm:$0xff] %v13123_v51  ;;  %13533 = vst [vmem:[#allocation37_spill] sm:$0xff] %v13131_v39  ;;  %v5643_v51 = vadd.f32 %v8496_v29, %v5553_v41  ;;  %v5558_v39 = vadd.f32 %v13063_v30, %v5485_v38 }
0x1025   :  { %v13127_v0 = vpop.f32.mrf.mxu1  ;;  %v13133_v56 = vpop.f32.mrf.mxu0 }
0x1026   :  { %13531 = vst [vmem:[#allocation32_spill] sm:$0xff] %v13127_v0  ;;  %13534 = vst [vmem:[#allocation25_spill] sm:$0xff] %v13133_v56  ;;  %v8543_v0 = vadd.f32 %v8542_v34, %v8541_v10  ;;  %v5648_v47 = vadd.f32 %v8499_v27, %v5558_v39 }
0x1028   :  { %v5733_v9 = vadd.f32 %v8543_v0, %v5643_v51  ;;  %v5738_v29 = vadd.f32 %v8546_v20, %v5648_v47  ;;  %v13540_v51 = vld [vmem:[#allocation26_spill] sm:$0xff] }
0x1029   :  { %v8690_v0 = vadd.f32 %v13540_v51, %v13539_v36 }
0x102a   :  { %v5823_v34 = vadd.f32 %v8590_v16, %v5733_v9  ;;  %v5828_v22 = vadd.f32 %v8593_v46, %v5738_v29  ;;  %v13547_v46 = vld [vmem:[#allocation35_spill] sm:$0xff] }
0x102c   :  { %v5913_v45 = vadd.f32 %v8637_v44, %v5823_v34  ;;  %v5918_v27 = vadd.f32 %v8640_v6, %v5828_v22 }
0x102e   :  { %v6003_v2 = vadd.f32 %v8684_v32, %v5913_v45  ;;  %v6008_v52 = vadd.f32 %v8687_v13, %v5918_v27 }
0x1035   :  { %v8729_v62 = vpop.f32.mrf.mxu1  ;;  %v8776_v4 = vpop.f32.mrf.mxu0 }
0x1037   :  { %v8730_v3 = vpop.f32.mrf.mxu1  ;;  %v8777_v59 = vpop.f32.mrf.mxu0 }
0x1038   :  { %v8731_v8 = vadd.f32 %v8730_v3, %v8729_v62  ;;  %v8778_v16 = vadd.f32 %v8777_v59, %v8776_v4  ;;  %v13544_v4 = vld [vmem:[#allocation30_spill] sm:$0xff]  ;;  %v13545_v59 = vld [vmem:[#allocation32_spill] sm:$0xff] }
0x1039   :  { %v13143_v1 = vpop.f32.mrf.mxu0 }
0x103a   :  { %v8732_v60 = vpop.f32.mrf.mxu1 }
0x103b   :  { %v8780_v10 = vpop.f32.mrf.mxu0 }
0x103c   :  { %v8733_v15 = vpop.f32.mrf.mxu1 }
0x103d   :  { %v8782_v31 = vpop.f32.mrf.mxu0  ;;  %v8734_v49 = vadd.f32 %v8733_v15, %v8732_v60 }
0x103f   :  { %v13138_v11 = vpop.f32.mrf.mxu1  ;;  %v8783_v28 = vpop.f32.mrf.mxu0  ;;  %v6098_v3 = vadd.f32 %v8734_v49, %v6008_v52 }
0x1040   :  { %13535 = vst [vmem:[#allocation34_spill] sm:$0xff] %v13138_v11  ;;  %v5563_v11 = vadd.f32 %v13065_v63, %v5485_v38  ;;  %v8505_v63 = vadd.f32 %v13083_v33, %v13081_v21  ;;  %v8508_v21 = vadd.f32 %v13087_v54, %v13085_v48  ;;  %v13537_v48 = vld [vmem:[#allocation10_spill] sm:$0xff]  ;;  %v13538_v54 = vld [vmem:[#allocation7_spill] sm:$0xff] }
0x1041   :  { %v8736_v25 = vpop.f32.mrf.mxu1  ;;  %v8646_v20 = vadd.f32 %v13538_v54, %v13537_v48  ;;  %v8785_v62 = vpop.f32.mrf.mxu0 }
0x1042   :  { %v5653_v41 = vadd.f32 %v8502_v24, %v5563_v11  ;;  %v8649_v24 = vadd.f32 %v13545_v59, %v13544_v4 }
0x1043   :  { %v13145_v56 = vpop.f32.mrf.mxu1  ;;  %v8786_v6 = vpop.f32.mrf.mxu0 }
0x1044   :  { %13536 = vst [vmem:[#allocation29_spill] sm:$0xff] %v13145_v56  ;;  %v5568_v56 = vadd.f32 %v13067_v18, %v5485_v38  ;;  %v5743_v57 = vadd.f32 %v8549_v12, %v5653_v41  ;;  %v5573_v18 = vadd.f32 %v13071_v55, %v5485_v38  ;;  %v6093_v55 = vadd.f32 %v8731_v8, %v6003_v2  ;;  %v13546_v41 = vld [vmem:[#allocation31_spill] sm:$0xff] }
0x1045   :  { %v8739_v30 = vpop.f32.mrf.mxu1  ;;  %v8781_v12 = vadd.f32 %v8780_v10, %v13143_v1  ;;  %v8693_v45 = vadd.f32 %v13547_v46, %v13546_v41  ;;  %v8784_v10 = vadd.f32 %v8783_v28, %v8782_v31  ;;  %v8788_v27 = vpop.f32.mrf.mxu0  ;;  %v8787_v49 = vadd.f32 %v8786_v6, %v8785_v62 }
0x1046   :  { %v5658_v26 = vadd.f32 %v8505_v63, %v5568_v56  ;;  %v5833_v33 = vadd.f32 %v8596_v61, %v5743_v57  ;;  %v5663_v44 = vadd.f32 %v8508_v21, %v5573_v18  ;;  %v6183_v7 = vadd.f32 %v8778_v16, %v6093_v55  ;;  %v13549_v61 = vld [vmem:[#allocation37_spill] sm:$0xff] }
0x1047   :  { %v13158_v50 = vpop.f32.mrf.mxu1  ;;  %v13541_v60 = vld [vmem:[#allocation34_spill] sm:$0xff]  ;;  %v8602_v56 = vadd.f32 %v13543_v58, %v13542_v43  ;;  %v6188_v63 = vadd.f32 %v8781_v12, %v6098_v3  ;;  %v8789_v28 = vpop.f32.mrf.mxu0 }
0x1048   :  { %v5748_v42 = vadd.f32 %v8552_v5, %v5658_v26  ;;  %v5923_v14 = vadd.f32 %v8643_v35, %v5833_v33  ;;  %v5753_v23 = vadd.f32 %v8555_v17, %v5663_v44  ;;  %v8737_v39 = vadd.f32 %v8736_v25, %v13541_v60  ;;  %v13550_v35 = vld [vmem:[#allocation25_spill] sm:$0xff] }
0x1049   :  { %v8742_v53 = vpop.f32.mrf.mxu1  ;;  %v8696_v2 = vadd.f32 %v13550_v35, %v13549_v61 }
0x104a   :  { %v5838_v9 = vadd.f32 %v8599_v19, %v5748_v42  ;;  %v6013_v38 = vadd.f32 %v8690_v0, %v5923_v14  ;;  %v5843_v29 = vadd.f32 %v8602_v56, %v5753_v23 }
0x104b   :  { %v13548_v5 = vld [vmem:[#allocation29_spill] sm:$0xff] }
0x104c   :  { %v5928_v47 = vadd.f32 %v8646_v20, %v5838_v9  ;;  %v6103_v57 = vadd.f32 %v8737_v39, %v6013_v38  ;;  %v8740_v22 = vadd.f32 %v8739_v30, %v13548_v5  ;;  %v5933_v1 = vadd.f32 %v8649_v24, %v5843_v29 }
0x104d   :  { %v8743_v30 = vadd.f32 %v8742_v53, %v13158_v50 }
0x104e   :  { %v6018_v26 = vadd.f32 %v8693_v45, %v5928_v47  ;;  %v6193_v33 = vadd.f32 %v8784_v10, %v6103_v57  ;;  %v6023_v55 = vadd.f32 %v8696_v2, %v5933_v1 }
0x1050   :  { %v6108_v42 = vadd.f32 %v8740_v22, %v6018_v26  ;;  %v6113_v14 = vadd.f32 %v8743_v30, %v6023_v55 }
0x1052   :  { %v6198_v19 = vadd.f32 %v8787_v49, %v6108_v42 }
0x1057   :  { %v8823_v37 = vpop.f32.mrf.mxu1 }
0x1059   :  { %v8824_v40 = vpop.f32.mrf.mxu1 }
0x105a   :  { %v8825_v15 = vadd.f32 %v8824_v40, %v8823_v37  ;;  %v8790_v37 = vadd.f32 %v8789_v28, %v8788_v27 }
0x105b   :  { %v8826_v11 = vpop.f32.mrf.mxu1 }
0x105c   :  { %v6273_v34 = vadd.f32 %v8825_v15, %v6183_v7  ;;  %v6203_v54 = vadd.f32 %v8790_v37, %v6113_v14 }
0x105d   :  { %v8827_v25 = vpop.f32.mrf.mxu1 }
0x105e   :  { %6297 = vst.msk [vmem:[%s13222_s15] sm:$0xff] %vm6296_vm14, %v6273_v34  ;;  %v8828_v32 = vadd.f32 %v8827_v25, %v8826_v11 }
0x105f   :  { %v8829_v8 = vpop.f32.mrf.mxu1 }
0x1060   :  { %v6278_v18 = vadd.f32 %v8828_v32, %v6188_v63 }
0x1061   :  { %v8830_v21 = vpop.f32.mrf.mxu1 }
0x1062   :  { %6298 = vst.msk [vmem:[%s13222_s15 + $0x8] sm:$0xff] %vm6296_vm14, %v6278_v18  ;;  %v8831_v17 = vadd.f32 %v8830_v21, %v8829_v8 }
0x1063   :  { %v8832_v13 = vpop.f32.mrf.mxu1 }
0x1064   :  { %v6283_v31 = vadd.f32 %v8831_v17, %v6193_v33 }
0x1065   :  { %v8833_v44 = vpop.f32.mrf.mxu1 }
0x1066   :  { %6299 = vst.msk [vmem:[%s13222_s15 + $0x10] sm:$0xff] %vm6296_vm14, %v6283_v31  ;;  %v8834_v50 = vadd.f32 %v8833_v44, %v8832_v13 }
0x1067   :  { %v8835_v53 = vpop.f32.mrf.mxu1 }
0x1068   :  { %v6288_v52 = vadd.f32 %v8834_v50, %v6198_v19 }
0x1069   :  { %v8836_v48 = vpop.f32.mrf.mxu1 }
0x106a   :  { %6300 = vst.msk [vmem:[%s13222_s15 + $0x18] sm:$0xff] %vm6296_vm14, %v6288_v52  ;;  %v8837_v20 = vadd.f32 %v8836_v48, %v8835_v53 }
0x106c   :  { %v6293_v16 = vadd.f32 %v8837_v20, %v6203_v54 }
0x106e   :  { %6301 = vst.msk [vmem:[%s13222_s15 + $0x20] sm:$0xff] %vm6296_vm14, %v6293_v16 }

</bundles_post_ra>
